<compile_context>
chip_gen: v6e
topology: v6e:2x2x1
jax: 0.10.0
libtpu: 0.0.40
codegen_flags: <defaults>
</compile_context>

<pallas_src>
from functools import partial

import numpy as np
import jax
import jax.numpy as jnp
from jax.experimental import pallas as pl
from jax.experimental.pallas import tpu as pltpu


# ----------------------------------------------------------------------------
# Fused LiteMLA kernel: one grid step == one batch element.
#   channel layout of qkv / dw / agg tiles : [q heads (td) | k heads (td) | v heads (td) | 0-pad]
#   attention output layout (lanes)        : [scale0 heads | scale1 heads] x dim  (width 2*td)
# ----------------------------------------------------------------------------
def _lite_mla_kernel(x_ref, wqkv_ref, wdw_ref, wpw_ref, mask_ref, wproj_ref,
                     scale_ref, shift_ref, o_ref, *, H, W, Wp, td, eps):
    f32, bf16 = jnp.float32, jnp.bfloat16
    N = H * W
    Cp = wqkv_ref.shape[1]
    Dh = 2 * td

    # ---- qkv 1x1 conv (bf16 MXU, f32 accumulate) --------------------------------
    qkv = jnp.dot(x_ref[...], wqkv_ref[...],
                  preferred_element_type=f32).astype(bf16)              # (N, Cp)

    # ---- 5x5 depthwise conv, "same" padding, on the resident tile ---------------
    # bf16 padded value (no scratch, no full-buffer zeroing); f32 accumulator.
    img = qkv.reshape(H, W, Cp)                                          # W is sublane dim
    zl = jnp.zeros((H, 2, Cp), bf16)
    zr = jnp.zeros((H, Wp - W - 2, Cp), bf16)
    zt = jnp.zeros((2, Wp, Cp), bf16)
    imgp = jnp.concatenate(
        [zt, jnp.concatenate([zl, img, zr], axis=1), zt], axis=0)        # (H+4, Wp, Cp)

    acc = jnp.zeros((H, W, Cp), f32)
    for j in range(5):                         # column (W-axis) taps: one shifted copy each,
        cs = imgp[:, j:j + W, :]               # reused across the 5 row offsets below.
        for dh in range(5):                    # row (H-axis) taps: leading-dim slices (cheap).
            t = dh * 5 + j
            acc = acc + cs[dh:dh + H].astype(f32) * wdw_ref[t:t + 1, :]
    # TODO(synk): replace the 5 strided column slices with pltpu.roll along the sublane
    #             axis and row-tile (grid=(B, H//th) with a 2-row halo) for large H*W so
    #             the working set stays inside v7x's 64 MiB VMEM.
    dw = acc.reshape(N, Cp).astype(bf16)

    # ---- aggreg grouped 1x1 conv (block-diagonal dense weight, MXU) -------------
    agg = jnp.dot(dw, wpw_ref[...], preferred_element_type=f32).astype(bf16)   # (N, Cp)

    # ---- multi-scale linear attention, both scales lane-packed (width 2*td) -----
    # (cross-array scale packing; these concats act on VMEM-resident values only)
    q = jnp.concatenate([qkv[:, :td],           agg[:, :td]],           axis=-1)
    k = jnp.concatenate([qkv[:, td:2 * td],     agg[:, td:2 * td]],     axis=-1)
    v = jnp.concatenate([qkv[:, 2 * td:3 * td], agg[:, 2 * td:3 * td]], axis=-1)
    q = jnp.maximum(q, 0)
    k = jnp.maximum(k, 0)

    # lane-packed ones trick: one (N,Dh)^T x (N,2Dh) matmul yields per-head kv and k-sums
    v2 = jnp.concatenate([v, jnp.ones_like(v)], axis=-1)                 # (N, 2*Dh)
    kv2 = jax.lax.dot_general(k, v2, (((0,), (0,)), ((), ())),
                              preferred_element_type=f32)                # (Dh, 2*Dh)
    kv2 = (kv2 * mask_ref[...]).astype(bf16)        # precomputed same-head (block-diag) mask
    out2 = jnp.dot(q, kv2, preferred_element_type=f32)                   # (N, 2*Dh)
    att = out2[:, :Dh] * pl.reciprocal(out2[:, Dh:] + eps, approx=True)  # (N, Dh)
    # TODO(synk): for large N on v7x, add an N-chunk reduction grid axis with an f32 kv2
    #             accumulator (init/finalize via pl.when) instead of whole-image tiles.

    # ---- proj 1x1 + folded BatchNorm epilogue (lane-dense 128-wide store) -------
    proj = jnp.dot(att.astype(bf16), wproj_ref[...], preferred_element_type=f32)  # (N, Coutp)
    o_ref[...] = (proj * scale_ref[...] + shift_ref[...]).astype(o_ref.dtype)


# ----------------------------------------------------------------------------
# Full LiteMLA forward: one pallas_call; NCHW only at the boundaries.
# ----------------------------------------------------------------------------
def lite_mla_forward(x_nchw, params, *, eps=1e-5):
    B, Cin, H, W = x_nchw.shape
    N = H * W
    Cp = params["c_pad"]
    td = params["total_dim"]
    Cout = params["out_channels"]
    Coutp = params["w_proj"].shape[1]
    Dh = 2 * td
    Wp = ((W + 4 + 15) // 16) * 16            # padded image width (>= W+4, bf16-tile aligned)

    # only layout shuffle on the input side; x goes to bf16 here (halves the HBM read)
    x2d = jnp.transpose(x_nchw, (0, 2, 3, 1)).reshape(B * N, Cin).astype(jnp.bfloat16)

    kern = partial(_lite_mla_kernel, H=H, W=W, Wp=Wp, td=td, eps=eps)
    out2d = pl.pallas_call(
        kern,
        out_shape=jax.ShapeDtypeStruct((B * N, Coutp), jnp.float32),
        grid=(B,),
        in_specs=[
            pl.BlockSpec((N, Cin), lambda b: (b, 0)),          # per-image token tile
            pl.BlockSpec((Cin, Cp), lambda b: (0, 0)),         # qkv 1x1 weight   (resident)
            pl.BlockSpec((25, Cp), lambda b: (0, 0)),          # 5x5 depthwise taps
            pl.BlockSpec((Cp, Cp), lambda b: (0, 0)),          # grouped 1x1 (block-diag dense)
            pl.BlockSpec((Dh, 2 * Dh), lambda b: (0, 0)),      # kv block-diagonal mask
            pl.BlockSpec((Dh, Coutp), lambda b: (0, 0)),       # proj 1x1 weight
            pl.BlockSpec((1, Coutp), lambda b: (0, 0)),        # folded BN scale
            pl.BlockSpec((1, Coutp), lambda b: (0, 0)),        # folded BN shift
        ],
        out_specs=pl.BlockSpec((N, Coutp), lambda b: (b, 0)),
        compiler_params=pltpu.CompilerParams(dimension_semantics=("parallel",)),
    )(x2d, params["w_qkv"], params["w_dw"], params["w_pw"], params["kv_mask"],
      params["w_proj"], params["bn_scale"], params["bn_shift"])

    out = out2d[:, :Cout].reshape(B, H, W, Cout)
    # TODO(synk): NHWC consumers can take `out` directly; the NCHW transpose below is one
    #             extra XLA pass kept only for layout parity with the PyTorch module.
    return jnp.transpose(out, (0, 3, 1, 2))


# ----------------------------------------------------------------------------
# Parameters: PyTorch-layout weights + conversion to kernel layout
# (channel permutation [q|k|v heads], zero-pad to 128 lanes, BN folding, kv mask).
# ----------------------------------------------------------------------------
def make_params(key, in_channels, out_channels, dim=8):
    heads = in_channels // dim
    total_dim = heads * dim
    td3 = 3 * total_dim
    ks = jax.random.split(key, 8)
    return dict(
        w_qkv=0.1 * jax.random.normal(ks[0], (td3, in_channels), jnp.float32),
        w_dw=0.1 * jax.random.normal(ks[1], (td3, 5, 5), jnp.float32),
        w_pw=0.1 * jax.random.normal(ks[2], (td3, dim), jnp.float32),
        w_proj=0.1 * jax.random.normal(ks[3], (out_channels, 2 * total_dim), jnp.float32),
        gamma=jax.random.normal(ks[4], (out_channels,), jnp.float32) * 0.2 + 1.0,
        beta=jax.random.normal(ks[5], (out_channels,), jnp.float32) * 0.1,
        run_mean=jax.random.normal(ks[6], (out_channels,), jnp.float32) * 0.1,
        run_var=jax.random.uniform(ks[7], (out_channels,), jnp.float32,
                                   minval=0.5, maxval=1.5),
    )


def prepare_params(raw, in_channels, out_channels, dim=8, bn_eps=1e-5, lane=128):
    heads = in_channels // dim
    total_dim = heads * dim
    td3 = 3 * total_dim
    Dh = 2 * total_dim
    c_pad = ((td3 + lane - 1) // lane) * lane
    cout_pad = ((out_channels + lane - 1) // lane) * lane

    # torch channel t = h*3*dim + comp*dim + d  ->  kernel channel comp*total_dim + h*dim + d
    t = np.arange(td3)
    h, comp, d = t // (3 * dim), (t // dim) % 3, t % dim
    k_of_t = comp * total_dim + h * dim + d

    w_qkv = np.zeros((in_channels, c_pad), np.float32)
    w_qkv[:, k_of_t] = np.asarray(raw["w_qkv"]).T

    # 5x5 depthwise taps flattened to (25, c_pad): row = dh*5 + dw
    w_dw = np.zeros((25, c_pad), np.float32)
    w_dw[:, k_of_t] = np.asarray(raw["w_dw"]).transpose(1, 2, 0).reshape(25, td3)

    # grouped 1x1 as block-diagonal dense weight in kernel channel order
    w_pw = np.zeros((c_pad, c_pad), np.float32)
    wpt = np.asarray(raw["w_pw"])
    for co in range(td3):
        g = co // dim
        for di in range(dim):
            w_pw[k_of_t[g * dim + di], k_of_t[co]] = wpt[co, di]

    # block-diagonal (same-head) mask for the lane-packed [v | 1] kv trick
    ri = np.arange(Dh)[:, None]
    cj = np.arange(2 * Dh)[None, :] % Dh
    kv_mask = (ri // dim == cj // dim).astype(np.float32)

    w_proj = np.zeros((Dh, cout_pad), np.float32)
    w_proj[:, :out_channels] = np.asarray(raw["w_proj"]).T

    scale = np.zeros((1, cout_pad), np.float32)
    shift = np.zeros((1, cout_pad), np.float32)
    s = np.asarray(raw["gamma"]) / np.sqrt(np.asarray(raw["run_var"]) + bn_eps)
    scale[0, :out_channels] = s
    shift[0, :out_channels] = np.asarray(raw["beta"]) - np.asarray(raw["run_mean"]) * s

    return dict(
        w_qkv=jnp.asarray(w_qkv, jnp.bfloat16),
        w_dw=jnp.asarray(w_dw, jnp.float32),
        w_pw=jnp.asarray(w_pw, jnp.bfloat16),
        kv_mask=jnp.asarray(kv_mask, jnp.float32),
        w_proj=jnp.asarray(w_proj, jnp.bfloat16),
        bn_scale=jnp.asarray(scale, jnp.float32),
        bn_shift=jnp.asarray(shift, jnp.float32),
        c_pad=c_pad, total_dim=total_dim, out_channels=out_channels,
    )


# ----------------------------------------------------------------------------
# Pure-JAX reference (f32) of the PyTorch forward, for a loose self-check.
# ----------------------------------------------------------------------------
def lite_mla_reference(x, raw, *, dim=8, eps=1e-5, bn_eps=1e-5):
    B, Cin, H, W = x.shape
    heads = Cin // dim
    total_dim = heads * dim
    td3 = 3 * total_dim
    dn = ("NCHW", "OIHW", "NCHW")
    qkv = jax.lax.conv_general_dilated(
        x, raw["w_qkv"].reshape(td3, Cin, 1, 1), (1, 1), "VALID", dimension_numbers=dn)
    dw = jax.lax.conv_general_dilated(
        qkv, raw["w_dw"].reshape(td3, 1, 5, 5), (1, 1), [(2, 2), (2, 2)],
        dimension_numbers=dn, feature_group_count=td3)
    agg = jax.lax.conv_general_dilated(
        dw, raw["w_pw"].reshape(td3, dim, 1, 1), (1, 1), "VALID",
        dimension_numbers=dn, feature_group_count=3 * heads)
    ms = jnp.concatenate([qkv, agg], axis=1)
    xr = jnp.swapaxes(ms.reshape(B, -1, 3 * dim, H * W), -1, -2)   # (B, NH, N, 3*dim)
    q = jax.nn.relu(xr[..., :dim])
    k = jax.nn.relu(xr[..., dim:2 * dim])
    v = xr[..., 2 * dim:]
    v1 = jnp.concatenate([v, jnp.ones_like(v[..., :1])], axis=-1)
    kv = jnp.einsum("bhnd,bhne->bhde", k, v1)
    o = jnp.einsum("bhnd,bhde->bhne", q, kv)
    o = o[..., :dim] / (o[..., dim:] + eps)
    o = jnp.swapaxes(o, -1, -2).reshape(B, -1, H, W)
    p = jax.lax.conv_general_dilated(
        o, raw["w_proj"].reshape(-1, 2 * total_dim, 1, 1), (1, 1), "VALID",
        dimension_numbers=dn)
    scale = raw["gamma"] / jnp.sqrt(raw["run_var"] + bn_eps)
    shift = raw["beta"] - raw["run_mean"] * scale
    return p * scale[None, :, None, None] + shift[None, :, None, None]


if __name__ == "__main__":
    key = jax.random.PRNGKey(0)
    k_x, k_p = jax.random.split(key)

    B, Cin, H, W = 2, 32, 16, 16
    dim, Cout = 8, 32

    x = jax.random.normal(k_x, (B, Cin, H, W), jnp.float32)
    raw = make_params(k_p, Cin, Cout, dim=dim)
    params = prepare_params(raw, Cin, Cout, dim=dim)

    out = jax.block_until_ready(lite_mla_forward(x, params, eps=1e-5))

    assert out.shape == (B, Cout, H, W), out.shape
    assert bool(jnp.all(jnp.isfinite(out)))

    ref = lite_mla_reference(x, raw, dim=dim, eps=1e-5)
    assert bool(jnp.allclose(out, ref, rtol=0.1, atol=0.05)), \
        float(jnp.max(jnp.abs(out - ref)))

    print("KERNEL_OK")
</pallas_src>

<mosaic_0001>
module attributes {stable_mosaic.version = 11 : i64} {
  func.func @_lite_mla_kernel(%arg0: i32, %arg1: memref<256x32xbf16, #tpu.memory_space<vmem>>, %arg2: memref<32x128xbf16, #tpu.memory_space<vmem>>, %arg3: memref<25x128xf32, #tpu.memory_space<vmem>>, %arg4: memref<128x128xbf16, #tpu.memory_space<vmem>>, %arg5: memref<64x128xf32, #tpu.memory_space<vmem>>, %arg6: memref<64x128xbf16, #tpu.memory_space<vmem>>, %arg7: memref<1x128xf32, #tpu.memory_space<vmem>>, %arg8: memref<1x128xf32, #tpu.memory_space<vmem>>, %arg9: memref<256x128xf32, #tpu.memory_space<vmem>>) attributes {dimension_semantics = [#tpu.dimension_semantics<parallel>], iteration_bounds = array<i64: 2>, scalar_prefetch = 0 : i64, scratch_operands = 0 : i64, tpu.core_type = #tpu.core_type<tc>, window_params = [{transform_indices = @transform_0, window_bounds = array<i64: 256, 32>}, {pipeline_mode = #tpu.pipeline_mode<synchronous>, transform_indices = @transform_1, window_bounds = array<i64: 32, 128>}, {pipeline_mode = #tpu.pipeline_mode<synchronous>, transform_indices = @transform_2, window_bounds = array<i64: 25, 128>}, {pipeline_mode = #tpu.pipeline_mode<synchronous>, transform_indices = @transform_3, window_bounds = array<i64: 128, 128>}, {pipeline_mode = #tpu.pipeline_mode<synchronous>, transform_indices = @transform_4, window_bounds = array<i64: 64, 128>}, {pipeline_mode = #tpu.pipeline_mode<synchronous>, transform_indices = @transform_5, window_bounds = array<i64: 64, 128>}, {pipeline_mode = #tpu.pipeline_mode<synchronous>, transform_indices = @transform_6, window_bounds = array<i64: 1, 128>}, {pipeline_mode = #tpu.pipeline_mode<synchronous>, transform_indices = @transform_7, window_bounds = array<i64: 1, 128>}, {transform_indices = @transform_8, window_bounds = array<i64: 256, 128>}]} {
    %c0 = arith.constant 0 : index
    %c0_0 = arith.constant 0 : index
    %0 = vector.load %arg1[%c0, %c0_0] : memref<256x32xbf16, #tpu.memory_space<vmem>>, vector<256x32xbf16>
    %c0_1 = arith.constant 0 : index
    %c0_2 = arith.constant 0 : index
    %1 = vector.load %arg2[%c0_1, %c0_2] : memref<32x128xbf16, #tpu.memory_space<vmem>>, vector<32x128xbf16>
    %cst = arith.constant dense<0.000000e+00> : vector<256x128xf32>
    %2 = tpu.matmul %0, %1, %cst {dimension_numbers = #tpu.dot_dimension_numbers<[1], [0], [0], [1], [0, 0, 1, 1], [], []>} : vector<256x32xbf16>, vector<32x128xbf16>, vector<256x128xf32> -> vector<256x128xf32>
    %3 = arith.truncf %2 : vector<256x128xf32> to vector<256x128xbf16>
    %4 = vector.shape_cast %3 : vector<256x128xbf16> to vector<16x16x128xbf16>
    %cst_3 = arith.constant 0.000000e+00 : bf16
    %5 = vector.broadcast %cst_3 : bf16 to vector<16x2x128xbf16>
    %cst_4 = arith.constant 0.000000e+00 : bf16
    %6 = vector.broadcast %cst_4 : bf16 to vector<16x14x128xbf16>
    %cst_5 = arith.constant 0.000000e+00 : bf16
    %7 = vector.broadcast %cst_5 : bf16 to vector<2x32x128xbf16>
    %8 = tpu.concatenate %5, %4, %6 in 1 : vector<16x2x128xbf16>, vector<16x16x128xbf16>, vector<16x14x128xbf16> -> vector<16x32x128xbf16>
    %9 = tpu.concatenate %7, %8, %7 in 0 : vector<2x32x128xbf16>, vector<16x32x128xbf16>, vector<2x32x128xbf16> -> vector<20x32x128xbf16>
    %cst_6 = arith.constant 0.000000e+00 : f32
    %10 = vector.broadcast %cst_6 : f32 to vector<16x16x128xf32>
    %11 = vector.extract_strided_slice %9 {offsets = [0, 0, 0], sizes = [20, 16, 128], strides = [1, 1, 1]} : vector<20x32x128xbf16> to vector<20x16x128xbf16>
    %12 = vector.extract_strided_slice %11 {offsets = [0, 0, 0], sizes = [16, 16, 128], strides = [1, 1, 1]} : vector<20x16x128xbf16> to vector<16x16x128xbf16>
    %13 = arith.extf %12 : vector<16x16x128xbf16> to vector<16x16x128xf32>
    %c0_7 = arith.constant 0 : index
    %c0_8 = arith.constant 0 : index
    %14 = vector.load %arg3[%c0_7, %c0_8] : memref<25x128xf32, #tpu.memory_space<vmem>>, vector<1x128xf32>
    %15 = vector.shape_cast %14 : vector<1x128xf32> to vector<1x1x128xf32>
    %16 = vector.broadcast %15 : vector<1x1x128xf32> to vector<16x16x128xf32>
    %17 = arith.mulf %13, %16 : vector<16x16x128xf32>
    %18 = arith.addf %10, %17 : vector<16x16x128xf32>
    %19 = vector.extract_strided_slice %11 {offsets = [1, 0, 0], sizes = [16, 16, 128], strides = [1, 1, 1]} : vector<20x16x128xbf16> to vector<16x16x128xbf16>
    %20 = arith.extf %19 : vector<16x16x128xbf16> to vector<16x16x128xf32>
    %c5 = arith.constant 5 : index
    %c0_9 = arith.constant 0 : index
    %21 = vector.load %arg3[%c5, %c0_9] : memref<25x128xf32, #tpu.memory_space<vmem>>, vector<1x128xf32>
    %22 = vector.shape_cast %21 : vector<1x128xf32> to vector<1x1x128xf32>
    %23 = vector.broadcast %22 : vector<1x1x128xf32> to vector<16x16x128xf32>
    %24 = arith.mulf %20, %23 : vector<16x16x128xf32>
    %25 = arith.addf %18, %24 : vector<16x16x128xf32>
    %26 = vector.extract_strided_slice %11 {offsets = [2, 0, 0], sizes = [16, 16, 128], strides = [1, 1, 1]} : vector<20x16x128xbf16> to vector<16x16x128xbf16>
    %27 = arith.extf %26 : vector<16x16x128xbf16> to vector<16x16x128xf32>
    %c10 = arith.constant 10 : index
    %c0_10 = arith.constant 0 : index
    %28 = vector.load %arg3[%c10, %c0_10] : memref<25x128xf32, #tpu.memory_space<vmem>>, vector<1x128xf32>
    %29 = vector.shape_cast %28 : vector<1x128xf32> to vector<1x1x128xf32>
    %30 = vector.broadcast %29 : vector<1x1x128xf32> to vector<16x16x128xf32>
    %31 = arith.mulf %27, %30 : vector<16x16x128xf32>
    %32 = arith.addf %25, %31 : vector<16x16x128xf32>
    %33 = vector.extract_strided_slice %11 {offsets = [3, 0, 0], sizes = [16, 16, 128], strides = [1, 1, 1]} : vector<20x16x128xbf16> to vector<16x16x128xbf16>
    %34 = arith.extf %33 : vector<16x16x128xbf16> to vector<16x16x128xf32>
    %c15 = arith.constant 15 : index
    %c0_11 = arith.constant 0 : index
    %35 = vector.load %arg3[%c15, %c0_11] : memref<25x128xf32, #tpu.memory_space<vmem>>, vector<1x128xf32>
    %36 = vector.shape_cast %35 : vector<1x128xf32> to vector<1x1x128xf32>
    %37 = vector.broadcast %36 : vector<1x1x128xf32> to vector<16x16x128xf32>
    %38 = arith.mulf %34, %37 : vector<16x16x128xf32>
    %39 = arith.addf %32, %38 : vector<16x16x128xf32>
    %40 = vector.extract_strided_slice %11 {offsets = [4, 0, 0], sizes = [16, 16, 128], strides = [1, 1, 1]} : vector<20x16x128xbf16> to vector<16x16x128xbf16>
    %41 = arith.extf %40 : vector<16x16x128xbf16> to vector<16x16x128xf32>
    %c20 = arith.constant 20 : index
    %c0_12 = arith.constant 0 : index
    %42 = vector.load %arg3[%c20, %c0_12] : memref<25x128xf32, #tpu.memory_space<vmem>>, vector<1x128xf32>
    %43 = vector.shape_cast %42 : vector<1x128xf32> to vector<1x1x128xf32>
    %44 = vector.broadcast %43 : vector<1x1x128xf32> to vector<16x16x128xf32>
    %45 = arith.mulf %41, %44 : vector<16x16x128xf32>
    %46 = arith.addf %39, %45 : vector<16x16x128xf32>
    %47 = vector.extract_strided_slice %9 {offsets = [0, 1, 0], sizes = [20, 16, 128], strides = [1, 1, 1]} : vector<20x32x128xbf16> to vector<20x16x128xbf16>
    %48 = vector.extract_strided_slice %47 {offsets = [0, 0, 0], sizes = [16, 16, 128], strides = [1, 1, 1]} : vector<20x16x128xbf16> to vector<16x16x128xbf16>
    %49 = arith.extf %48 : vector<16x16x128xbf16> to vector<16x16x128xf32>
    %c1 = arith.constant 1 : index
    %c0_13 = arith.constant 0 : index
    %50 = vector.load %arg3[%c1, %c0_13] : memref<25x128xf32, #tpu.memory_space<vmem>>, vector<1x128xf32>
    %51 = vector.shape_cast %50 : vector<1x128xf32> to vector<1x1x128xf32>
    %52 = vector.broadcast %51 : vector<1x1x128xf32> to vector<16x16x128xf32>
    %53 = arith.mulf %49, %52 : vector<16x16x128xf32>
    %54 = arith.addf %46, %53 : vector<16x16x128xf32>
    %55 = vector.extract_strided_slice %47 {offsets = [1, 0, 0], sizes = [16, 16, 128], strides = [1, 1, 1]} : vector<20x16x128xbf16> to vector<16x16x128xbf16>
    %56 = arith.extf %55 : vector<16x16x128xbf16> to vector<16x16x128xf32>
    %c6 = arith.constant 6 : index
    %c0_14 = arith.constant 0 : index
    %57 = vector.load %arg3[%c6, %c0_14] : memref<25x128xf32, #tpu.memory_space<vmem>>, vector<1x128xf32>
    %58 = vector.shape_cast %57 : vector<1x128xf32> to vector<1x1x128xf32>
    %59 = vector.broadcast %58 : vector<1x1x128xf32> to vector<16x16x128xf32>
    %60 = arith.mulf %56, %59 : vector<16x16x128xf32>
    %61 = arith.addf %54, %60 : vector<16x16x128xf32>
    %62 = vector.extract_strided_slice %47 {offsets = [2, 0, 0], sizes = [16, 16, 128], strides = [1, 1, 1]} : vector<20x16x128xbf16> to vector<16x16x128xbf16>
    %63 = arith.extf %62 : vector<16x16x128xbf16> to vector<16x16x128xf32>
    %c11 = arith.constant 11 : index
    %c0_15 = arith.constant 0 : index
    %64 = vector.load %arg3[%c11, %c0_15] : memref<25x128xf32, #tpu.memory_space<vmem>>, vector<1x128xf32>
    %65 = vector.shape_cast %64 : vector<1x128xf32> to vector<1x1x128xf32>
    %66 = vector.broadcast %65 : vector<1x1x128xf32> to vector<16x16x128xf32>
    %67 = arith.mulf %63, %66 : vector<16x16x128xf32>
    %68 = arith.addf %61, %67 : vector<16x16x128xf32>
    %69 = vector.extract_strided_slice %47 {offsets = [3, 0, 0], sizes = [16, 16, 128], strides = [1, 1, 1]} : vector<20x16x128xbf16> to vector<16x16x128xbf16>
    %70 = arith.extf %69 : vector<16x16x128xbf16> to vector<16x16x128xf32>
    %c16 = arith.constant 16 : index
    %c0_16 = arith.constant 0 : index
    %71 = vector.load %arg3[%c16, %c0_16] : memref<25x128xf32, #tpu.memory_space<vmem>>, vector<1x128xf32>
    %72 = vector.shape_cast %71 : vector<1x128xf32> to vector<1x1x128xf32>
    %73 = vector.broadcast %72 : vector<1x1x128xf32> to vector<16x16x128xf32>
    %74 = arith.mulf %70, %73 : vector<16x16x128xf32>
    %75 = arith.addf %68, %74 : vector<16x16x128xf32>
    %76 = vector.extract_strided_slice %47 {offsets = [4, 0, 0], sizes = [16, 16, 128], strides = [1, 1, 1]} : vector<20x16x128xbf16> to vector<16x16x128xbf16>
    %77 = arith.extf %76 : vector<16x16x128xbf16> to vector<16x16x128xf32>
    %c21 = arith.constant 21 : index
    %c0_17 = arith.constant 0 : index
    %78 = vector.load %arg3[%c21, %c0_17] : memref<25x128xf32, #tpu.memory_space<vmem>>, vector<1x128xf32>
    %79 = vector.shape_cast %78 : vector<1x128xf32> to vector<1x1x128xf32>
    %80 = vector.broadcast %79 : vector<1x1x128xf32> to vector<16x16x128xf32>
    %81 = arith.mulf %77, %80 : vector<16x16x128xf32>
    %82 = arith.addf %75, %81 : vector<16x16x128xf32>
    %83 = vector.extract_strided_slice %9 {offsets = [0, 2, 0], sizes = [20, 16, 128], strides = [1, 1, 1]} : vector<20x32x128xbf16> to vector<20x16x128xbf16>
    %84 = vector.extract_strided_slice %83 {offsets = [0, 0, 0], sizes = [16, 16, 128], strides = [1, 1, 1]} : vector<20x16x128xbf16> to vector<16x16x128xbf16>
    %85 = arith.extf %84 : vector<16x16x128xbf16> to vector<16x16x128xf32>
    %c2 = arith.constant 2 : index
    %c0_18 = arith.constant 0 : index
    %86 = vector.load %arg3[%c2, %c0_18] : memref<25x128xf32, #tpu.memory_space<vmem>>, vector<1x128xf32>
    %87 = vector.shape_cast %86 : vector<1x128xf32> to vector<1x1x128xf32>
    %88 = vector.broadcast %87 : vector<1x1x128xf32> to vector<16x16x128xf32>
    %89 = arith.mulf %85, %88 : vector<16x16x128xf32>
    %90 = arith.addf %82, %89 : vector<16x16x128xf32>
    %91 = vector.extract_strided_slice %83 {offsets = [1, 0, 0], sizes = [16, 16, 128], strides = [1, 1, 1]} : vector<20x16x128xbf16> to vector<16x16x128xbf16>
    %92 = arith.extf %91 : vector<16x16x128xbf16> to vector<16x16x128xf32>
    %c7 = arith.constant 7 : index
    %c0_19 = arith.constant 0 : index
    %93 = vector.load %arg3[%c7, %c0_19] : memref<25x128xf32, #tpu.memory_space<vmem>>, vector<1x128xf32>
    %94 = vector.shape_cast %93 : vector<1x128xf32> to vector<1x1x128xf32>
    %95 = vector.broadcast %94 : vector<1x1x128xf32> to vector<16x16x128xf32>
    %96 = arith.mulf %92, %95 : vector<16x16x128xf32>
    %97 = arith.addf %90, %96 : vector<16x16x128xf32>
    %98 = vector.extract_strided_slice %83 {offsets = [2, 0, 0], sizes = [16, 16, 128], strides = [1, 1, 1]} : vector<20x16x128xbf16> to vector<16x16x128xbf16>
    %99 = arith.extf %98 : vector<16x16x128xbf16> to vector<16x16x128xf32>
    %c12 = arith.constant 12 : index
    %c0_20 = arith.constant 0 : index
    %100 = vector.load %arg3[%c12, %c0_20] : memref<25x128xf32, #tpu.memory_space<vmem>>, vector<1x128xf32>
    %101 = vector.shape_cast %100 : vector<1x128xf32> to vector<1x1x128xf32>
    %102 = vector.broadcast %101 : vector<1x1x128xf32> to vector<16x16x128xf32>
    %103 = arith.mulf %99, %102 : vector<16x16x128xf32>
    %104 = arith.addf %97, %103 : vector<16x16x128xf32>
    %105 = vector.extract_strided_slice %83 {offsets = [3, 0, 0], sizes = [16, 16, 128], strides = [1, 1, 1]} : vector<20x16x128xbf16> to vector<16x16x128xbf16>
    %106 = arith.extf %105 : vector<16x16x128xbf16> to vector<16x16x128xf32>
    %c17 = arith.constant 17 : index
    %c0_21 = arith.constant 0 : index
    %107 = vector.load %arg3[%c17, %c0_21] : memref<25x128xf32, #tpu.memory_space<vmem>>, vector<1x128xf32>
    %108 = vector.shape_cast %107 : vector<1x128xf32> to vector<1x1x128xf32>
    %109 = vector.broadcast %108 : vector<1x1x128xf32> to vector<16x16x128xf32>
    %110 = arith.mulf %106, %109 : vector<16x16x128xf32>
    %111 = arith.addf %104, %110 : vector<16x16x128xf32>
    %112 = vector.extract_strided_slice %83 {offsets = [4, 0, 0], sizes = [16, 16, 128], strides = [1, 1, 1]} : vector<20x16x128xbf16> to vector<16x16x128xbf16>
    %113 = arith.extf %112 : vector<16x16x128xbf16> to vector<16x16x128xf32>
    %c22 = arith.constant 22 : index
    %c0_22 = arith.constant 0 : index
    %114 = vector.load %arg3[%c22, %c0_22] : memref<25x128xf32, #tpu.memory_space<vmem>>, vector<1x128xf32>
    %115 = vector.shape_cast %114 : vector<1x128xf32> to vector<1x1x128xf32>
    %116 = vector.broadcast %115 : vector<1x1x128xf32> to vector<16x16x128xf32>
    %117 = arith.mulf %113, %116 : vector<16x16x128xf32>
    %118 = arith.addf %111, %117 : vector<16x16x128xf32>
    %119 = vector.extract_strided_slice %9 {offsets = [0, 3, 0], sizes = [20, 16, 128], strides = [1, 1, 1]} : vector<20x32x128xbf16> to vector<20x16x128xbf16>
    %120 = vector.extract_strided_slice %119 {offsets = [0, 0, 0], sizes = [16, 16, 128], strides = [1, 1, 1]} : vector<20x16x128xbf16> to vector<16x16x128xbf16>
    %121 = arith.extf %120 : vector<16x16x128xbf16> to vector<16x16x128xf32>
    %c3 = arith.constant 3 : index
    %c0_23 = arith.constant 0 : index
    %122 = vector.load %arg3[%c3, %c0_23] : memref<25x128xf32, #tpu.memory_space<vmem>>, vector<1x128xf32>
    %123 = vector.shape_cast %122 : vector<1x128xf32> to vector<1x1x128xf32>
    %124 = vector.broadcast %123 : vector<1x1x128xf32> to vector<16x16x128xf32>
    %125 = arith.mulf %121, %124 : vector<16x16x128xf32>
    %126 = arith.addf %118, %125 : vector<16x16x128xf32>
    %127 = vector.extract_strided_slice %119 {offsets = [1, 0, 0], sizes = [16, 16, 128], strides = [1, 1, 1]} : vector<20x16x128xbf16> to vector<16x16x128xbf16>
    %128 = arith.extf %127 : vector<16x16x128xbf16> to vector<16x16x128xf32>
    %c8 = arith.constant 8 : index
    %c0_24 = arith.constant 0 : index
    %129 = vector.load %arg3[%c8, %c0_24] : memref<25x128xf32, #tpu.memory_space<vmem>>, vector<1x128xf32>
    %130 = vector.shape_cast %129 : vector<1x128xf32> to vector<1x1x128xf32>
    %131 = vector.broadcast %130 : vector<1x1x128xf32> to vector<16x16x128xf32>
    %132 = arith.mulf %128, %131 : vector<16x16x128xf32>
    %133 = arith.addf %126, %132 : vector<16x16x128xf32>
    %134 = vector.extract_strided_slice %119 {offsets = [2, 0, 0], sizes = [16, 16, 128], strides = [1, 1, 1]} : vector<20x16x128xbf16> to vector<16x16x128xbf16>
    %135 = arith.extf %134 : vector<16x16x128xbf16> to vector<16x16x128xf32>
    %c13 = arith.constant 13 : index
    %c0_25 = arith.constant 0 : index
    %136 = vector.load %arg3[%c13, %c0_25] : memref<25x128xf32, #tpu.memory_space<vmem>>, vector<1x128xf32>
    %137 = vector.shape_cast %136 : vector<1x128xf32> to vector<1x1x128xf32>
    %138 = vector.broadcast %137 : vector<1x1x128xf32> to vector<16x16x128xf32>
    %139 = arith.mulf %135, %138 : vector<16x16x128xf32>
    %140 = arith.addf %133, %139 : vector<16x16x128xf32>
    %141 = vector.extract_strided_slice %119 {offsets = [3, 0, 0], sizes = [16, 16, 128], strides = [1, 1, 1]} : vector<20x16x128xbf16> to vector<16x16x128xbf16>
    %142 = arith.extf %141 : vector<16x16x128xbf16> to vector<16x16x128xf32>
    %c18 = arith.constant 18 : index
    %c0_26 = arith.constant 0 : index
    %143 = vector.load %arg3[%c18, %c0_26] : memref<25x128xf32, #tpu.memory_space<vmem>>, vector<1x128xf32>
    %144 = vector.shape_cast %143 : vector<1x128xf32> to vector<1x1x128xf32>
    %145 = vector.broadcast %144 : vector<1x1x128xf32> to vector<16x16x128xf32>
    %146 = arith.mulf %142, %145 : vector<16x16x128xf32>
    %147 = arith.addf %140, %146 : vector<16x16x128xf32>
    %148 = vector.extract_strided_slice %119 {offsets = [4, 0, 0], sizes = [16, 16, 128], strides = [1, 1, 1]} : vector<20x16x128xbf16> to vector<16x16x128xbf16>
    %149 = arith.extf %148 : vector<16x16x128xbf16> to vector<16x16x128xf32>
    %c23 = arith.constant 23 : index
    %c0_27 = arith.constant 0 : index
    %150 = vector.load %arg3[%c23, %c0_27] : memref<25x128xf32, #tpu.memory_space<vmem>>, vector<1x128xf32>
    %151 = vector.shape_cast %150 : vector<1x128xf32> to vector<1x1x128xf32>
    %152 = vector.broadcast %151 : vector<1x1x128xf32> to vector<16x16x128xf32>
    %153 = arith.mulf %149, %152 : vector<16x16x128xf32>
    %154 = arith.addf %147, %153 : vector<16x16x128xf32>
    %155 = vector.extract_strided_slice %9 {offsets = [0, 4, 0], sizes = [20, 16, 128], strides = [1, 1, 1]} : vector<20x32x128xbf16> to vector<20x16x128xbf16>
    %156 = vector.extract_strided_slice %155 {offsets = [0, 0, 0], sizes = [16, 16, 128], strides = [1, 1, 1]} : vector<20x16x128xbf16> to vector<16x16x128xbf16>
    %157 = arith.extf %156 : vector<16x16x128xbf16> to vector<16x16x128xf32>
    %c4 = arith.constant 4 : index
    %c0_28 = arith.constant 0 : index
    %158 = vector.load %arg3[%c4, %c0_28] : memref<25x128xf32, #tpu.memory_space<vmem>>, vector<1x128xf32>
    %159 = vector.shape_cast %158 : vector<1x128xf32> to vector<1x1x128xf32>
    %160 = vector.broadcast %159 : vector<1x1x128xf32> to vector<16x16x128xf32>
    %161 = arith.mulf %157, %160 : vector<16x16x128xf32>
    %162 = arith.addf %154, %161 : vector<16x16x128xf32>
    %163 = vector.extract_strided_slice %155 {offsets = [1, 0, 0], sizes = [16, 16, 128], strides = [1, 1, 1]} : vector<20x16x128xbf16> to vector<16x16x128xbf16>
    %164 = arith.extf %163 : vector<16x16x128xbf16> to vector<16x16x128xf32>
    %c9 = arith.constant 9 : index
    %c0_29 = arith.constant 0 : index
    %165 = vector.load %arg3[%c9, %c0_29] : memref<25x128xf32, #tpu.memory_space<vmem>>, vector<1x128xf32>
    %166 = vector.shape_cast %165 : vector<1x128xf32> to vector<1x1x128xf32>
    %167 = vector.broadcast %166 : vector<1x1x128xf32> to vector<16x16x128xf32>
    %168 = arith.mulf %164, %167 : vector<16x16x128xf32>
    %169 = arith.addf %162, %168 : vector<16x16x128xf32>
    %170 = vector.extract_strided_slice %155 {offsets = [2, 0, 0], sizes = [16, 16, 128], strides = [1, 1, 1]} : vector<20x16x128xbf16> to vector<16x16x128xbf16>
    %171 = arith.extf %170 : vector<16x16x128xbf16> to vector<16x16x128xf32>
    %c14 = arith.constant 14 : index
    %c0_30 = arith.constant 0 : index
    %172 = vector.load %arg3[%c14, %c0_30] : memref<25x128xf32, #tpu.memory_space<vmem>>, vector<1x128xf32>
    %173 = vector.shape_cast %172 : vector<1x128xf32> to vector<1x1x128xf32>
    %174 = vector.broadcast %173 : vector<1x1x128xf32> to vector<16x16x128xf32>
    %175 = arith.mulf %171, %174 : vector<16x16x128xf32>
    %176 = arith.addf %169, %175 : vector<16x16x128xf32>
    %177 = vector.extract_strided_slice %155 {offsets = [3, 0, 0], sizes = [16, 16, 128], strides = [1, 1, 1]} : vector<20x16x128xbf16> to vector<16x16x128xbf16>
    %178 = arith.extf %177 : vector<16x16x128xbf16> to vector<16x16x128xf32>
    %c19 = arith.constant 19 : index
    %c0_31 = arith.constant 0 : index
    %179 = vector.load %arg3[%c19, %c0_31] : memref<25x128xf32, #tpu.memory_space<vmem>>, vector<1x128xf32>
    %180 = vector.shape_cast %179 : vector<1x128xf32> to vector<1x1x128xf32>
    %181 = vector.broadcast %180 : vector<1x1x128xf32> to vector<16x16x128xf32>
    %182 = arith.mulf %178, %181 : vector<16x16x128xf32>
    %183 = arith.addf %176, %182 : vector<16x16x128xf32>
    %184 = vector.extract_strided_slice %155 {offsets = [4, 0, 0], sizes = [16, 16, 128], strides = [1, 1, 1]} : vector<20x16x128xbf16> to vector<16x16x128xbf16>
    %185 = arith.extf %184 : vector<16x16x128xbf16> to vector<16x16x128xf32>
    %c24 = arith.constant 24 : index
    %c0_32 = arith.constant 0 : index
    %186 = vector.load %arg3[%c24, %c0_32] : memref<25x128xf32, #tpu.memory_space<vmem>>, vector<1x128xf32>
    %187 = vector.shape_cast %186 : vector<1x128xf32> to vector<1x1x128xf32>
    %188 = vector.broadcast %187 : vector<1x1x128xf32> to vector<16x16x128xf32>
    %189 = arith.mulf %185, %188 : vector<16x16x128xf32>
    %190 = arith.addf %183, %189 : vector<16x16x128xf32>
    %191 = vector.shape_cast %190 : vector<16x16x128xf32> to vector<256x128xf32>
    %192 = arith.truncf %191 : vector<256x128xf32> to vector<256x128xbf16>
    %c0_33 = arith.constant 0 : index
    %c0_34 = arith.constant 0 : index
    %193 = vector.load %arg4[%c0_33, %c0_34] : memref<128x128xbf16, #tpu.memory_space<vmem>>, vector<128x128xbf16>
    %cst_35 = arith.constant dense<0.000000e+00> : vector<256x128xf32>
    %194 = tpu.matmul %192, %193, %cst_35 {dimension_numbers = #tpu.dot_dimension_numbers<[1], [0], [0], [1], [0, 0, 1, 1], [], []>} : vector<256x128xbf16>, vector<128x128xbf16>, vector<256x128xf32> -> vector<256x128xf32>
    %195 = arith.truncf %194 : vector<256x128xf32> to vector<256x128xbf16>
    %196 = vector.extract_strided_slice %3 {offsets = [0, 0], sizes = [256, 32], strides = [1, 1]} : vector<256x128xbf16> to vector<256x32xbf16>
    %197 = vector.extract_strided_slice %195 {offsets = [0, 0], sizes = [256, 32], strides = [1, 1]} : vector<256x128xbf16> to vector<256x32xbf16>
    %198 = tpu.concatenate %196, %197 in 1 : vector<256x32xbf16>, vector<256x32xbf16> -> vector<256x64xbf16>
    %199 = vector.extract_strided_slice %3 {offsets = [0, 32], sizes = [256, 32], strides = [1, 1]} : vector<256x128xbf16> to vector<256x32xbf16>
    %200 = vector.extract_strided_slice %195 {offsets = [0, 32], sizes = [256, 32], strides = [1, 1]} : vector<256x128xbf16> to vector<256x32xbf16>
    %201 = tpu.concatenate %199, %200 in 1 : vector<256x32xbf16>, vector<256x32xbf16> -> vector<256x64xbf16>
    %202 = vector.extract_strided_slice %3 {offsets = [0, 64], sizes = [256, 32], strides = [1, 1]} : vector<256x128xbf16> to vector<256x32xbf16>
    %203 = vector.extract_strided_slice %195 {offsets = [0, 64], sizes = [256, 32], strides = [1, 1]} : vector<256x128xbf16> to vector<256x32xbf16>
    %204 = tpu.concatenate %202, %203 in 1 : vector<256x32xbf16>, vector<256x32xbf16> -> vector<256x64xbf16>
    %cst_36 = arith.constant 0.000000e+00 : bf16
    %205 = vector.broadcast %cst_36 : bf16 to vector<256x64xbf16>
    %206 = arith.maximumf %198, %205 : vector<256x64xbf16>
    %cst_37 = arith.constant 0.000000e+00 : bf16
    %207 = vector.broadcast %cst_37 : bf16 to vector<256x64xbf16>
    %208 = arith.maximumf %201, %207 : vector<256x64xbf16>
    %cst_38 = arith.constant 1.000000e+00 : bf16
    %209 = vector.broadcast %cst_38 : bf16 to vector<256x64xbf16>
    %210 = tpu.concatenate %204, %209 in 1 : vector<256x64xbf16>, vector<256x64xbf16> -> vector<256x128xbf16>
    %cst_39 = arith.constant dense<0.000000e+00> : vector<64x128xf32>
    %211 = tpu.matmul %208, %210, %cst_39 {dimension_numbers = #tpu.dot_dimension_numbers<[0], [0], [1], [1], [0, 1, 1, 1], [], []>} : vector<256x64xbf16>, vector<256x128xbf16>, vector<64x128xf32> -> vector<64x128xf32>
    %c0_40 = arith.constant 0 : index
    %c0_41 = arith.constant 0 : index
    %212 = vector.load %arg5[%c0_40, %c0_41] : memref<64x128xf32, #tpu.memory_space<vmem>>, vector<64x128xf32>
    %213 = arith.mulf %211, %212 : vector<64x128xf32>
    %214 = arith.truncf %213 : vector<64x128xf32> to vector<64x128xbf16>
    %cst_42 = arith.constant dense<0.000000e+00> : vector<256x128xf32>
    %215 = tpu.matmul %206, %214, %cst_42 {dimension_numbers = #tpu.dot_dimension_numbers<[1], [0], [0], [1], [0, 0, 1, 1], [], []>} : vector<256x64xbf16>, vector<64x128xbf16>, vector<256x128xf32> -> vector<256x128xf32>
    %216 = vector.extract_strided_slice %215 {offsets = [0, 0], sizes = [256, 64], strides = [1, 1]} : vector<256x128xf32> to vector<256x64xf32>
    %217 = vector.extract_strided_slice %215 {offsets = [0, 64], sizes = [256, 64], strides = [1, 1]} : vector<256x128xf32> to vector<256x64xf32>
    %cst_43 = arith.constant 9.99999974E-6 : f32
    %218 = vector.broadcast %cst_43 : f32 to vector<256x64xf32>
    %219 = arith.addf %217, %218 : vector<256x64xf32>
    %220 = tpu.reciprocal %219 {approx = true} : vector<256x64xf32> -> vector<256x64xf32>
    %221 = arith.mulf %216, %220 : vector<256x64xf32>
    %222 = arith.truncf %221 : vector<256x64xf32> to vector<256x64xbf16>
    %c0_44 = arith.constant 0 : index
    %c0_45 = arith.constant 0 : index
    %223 = vector.load %arg6[%c0_44, %c0_45] : memref<64x128xbf16, #tpu.memory_space<vmem>>, vector<64x128xbf16>
    %cst_46 = arith.constant dense<0.000000e+00> : vector<256x128xf32>
    %224 = tpu.matmul %222, %223, %cst_46 {dimension_numbers = #tpu.dot_dimension_numbers<[1], [0], [0], [1], [0, 0, 1, 1], [], []>} : vector<256x64xbf16>, vector<64x128xbf16>, vector<256x128xf32> -> vector<256x128xf32>
    %c0_47 = arith.constant 0 : index
    %c0_48 = arith.constant 0 : index
    %225 = vector.load %arg7[%c0_47, %c0_48] : memref<1x128xf32, #tpu.memory_space<vmem>>, vector<1x128xf32>
    %226 = vector.broadcast %225 : vector<1x128xf32> to vector<256x128xf32>
    %227 = arith.mulf %224, %226 : vector<256x128xf32>
    %c0_49 = arith.constant 0 : index
    %c0_50 = arith.constant 0 : index
    %228 = vector.load %arg8[%c0_49, %c0_50] : memref<1x128xf32, #tpu.memory_space<vmem>>, vector<1x128xf32>
    %229 = vector.broadcast %228 : vector<1x128xf32> to vector<256x128xf32>
    %230 = arith.addf %227, %229 : vector<256x128xf32>
    %c0_51 = arith.constant 0 : index
    %c0_52 = arith.constant 0 : index
    %231 = vector.load %arg9[%c0_51, %c0_52] : memref<256x128xf32, #tpu.memory_space<vmem>>, vector<256x128xf32>
    tpu.vector_store %arg9[%c0_51, %c0_52], %230 {strides = array<i32>} : memref<256x128xf32, #tpu.memory_space<vmem>>, vector<256x128xf32>,
    return
  }
  func.func @transform_0(%arg0: i32) -> (i32, i32) {
    %c0_i32 = arith.constant 0 : i32
    %c0_i32_0 = arith.constant 0 : i32
    return %arg0, %c0_i32 : i32, i32
  }
  func.func @transform_1(%arg0: i32) -> (i32, i32) {
    %c0_i32 = arith.constant 0 : i32
    %c0_i32_0 = arith.constant 0 : i32
    %c0_i32_1 = arith.constant 0 : i32
    return %c0_i32, %c0_i32_0 : i32, i32
  }
  func.func @transform_2(%arg0: i32) -> (i32, i32) {
    %c0_i32 = arith.constant 0 : i32
    %c0_i32_0 = arith.constant 0 : i32
    %c0_i32_1 = arith.constant 0 : i32
    return %c0_i32, %c0_i32_0 : i32, i32
  }
  func.func @transform_3(%arg0: i32) -> (i32, i32) {
    %c0_i32 = arith.constant 0 : i32
    %c0_i32_0 = arith.constant 0 : i32
    %c0_i32_1 = arith.constant 0 : i32
    return %c0_i32, %c0_i32_0 : i32, i32
  }
  func.func @transform_4(%arg0: i32) -> (i32, i32) {
    %c0_i32 = arith.constant 0 : i32
    %c0_i32_0 = arith.constant 0 : i32
    %c0_i32_1 = arith.constant 0 : i32
    return %c0_i32, %c0_i32_0 : i32, i32
  }
  func.func @transform_5(%arg0: i32) -> (i32, i32) {
    %c0_i32 = arith.constant 0 : i32
    %c0_i32_0 = arith.constant 0 : i32
    %c0_i32_1 = arith.constant 0 : i32
    return %c0_i32, %c0_i32_0 : i32, i32
  }
  func.func @transform_6(%arg0: i32) -> (i32, i32) {
    %c0_i32 = arith.constant 0 : i32
    %c0_i32_0 = arith.constant 0 : i32
    %c0_i32_1 = arith.constant 0 : i32
    return %c0_i32, %c0_i32_0 : i32, i32
  }
  func.func @transform_7(%arg0: i32) -> (i32, i32) {
    %c0_i32 = arith.constant 0 : i32
    %c0_i32_0 = arith.constant 0 : i32
    %c0_i32_1 = arith.constant 0 : i32
    return %c0_i32, %c0_i32_0 : i32, i32
  }
  func.func @transform_8(%arg0: i32) -> (i32, i32) {
    %c0_i32 = arith.constant 0 : i32
    %c0_i32_0 = arith.constant 0 : i32
    return %arg0, %c0_i32 : i32, i32
  }
}

</mosaic_0001>

<bundles_post_ra>
// kernel: tpu_custom_call.1
= control target key start
LH: loop header
LB: loop body
LE: loop exit
PB: predicated region body
PF: predicated region fallthrough
CT: control target
= control target key end

     0   :  { %13 = vsyncpa [#allocation3], 0  ;;  %s12987_s0 = inlined_call_operand.vmem [shape: bf16[512,32], index: 0, kind: input, shape index: {}]   ;;  %s12988_s1 = inlined_call_operand.vmem [shape: bf16[32,128], index: 1, kind: input, shape index: {}]   ;;  %s12989_s2 = inlined_call_operand.vmem [shape: f32[25,128], index: 2, kind: input, shape index: {}]   ;;  %s12990_s3 = inlined_call_operand.vmem [shape: bf16[128,128], index: 3, kind: input, shape index: {}]   ;;  %s12991_s4 = inlined_call_operand.vmem [shape: f32[64,128], index: 4, kind: input, shape index: {}]   ;;  %s12992_s5 = inlined_call_operand.vmem [shape: bf16[64,128], index: 5, kind: input, shape index: {}]   ;;  %s12993_s6 = inlined_call_operand.vmem [shape: f32[1,128], index: 6, kind: input, shape index: {}]   ;;  %s12994_s7 = inlined_call_operand.vmem [shape: f32[1,128], index: 7, kind: input, shape index: {}]   ;;  %s12995_s8 = inlined_call_operand.hbm [shape: f32[512,128], index: 8, kind: output, shape index: {}]  }
   0x1   :  { %15 = vsyncpa [#allocation3 + $0x1], 0  ;;  %s8329_s27 = smov 0   ;;  %s8331_s28 = smov 0  }
   0x2   :  { %s8333_s29 = smov 0   ;;  %s8335_s30 = smov 0  }
   0x3 LB: > { %s8350_s9 = sadd.s32 4294967295, %s8275_s30   ;;  %s7554_s10 = sadd.s32 4294967294, %s8275_s30   ;;  %s8275_s30 = sphi %s8335_s30, %s13178_s30   ;;  %s8271_s29 = sphi %s8333_s29, %s13177_s29   ;;  %s8267_s28 = sphi %s8331_s28, %s13176_s28   ;;  %s8263_s27 = sphi %s8329_s27, %s13175_s27  }
   0x4   : > { %s8354_s11 = sadd.s32 1, %s8275_s30   ;;  %s201_s12 = sadd.s32 1, %s8271_s29 }
   0x5   : > { %s198_s13 = ssub.s32 %s8275_s30, %s8354_s11  ;;  %p211_p0 = scmp.ne.s32.totalorder %s8271_s29, %s8267_s28 }
   0x6   : > { %p199_p1 = scmp.eq.s32.totalorder %s198_s13, 0  ;;  %p212_p2 = scmp.eq.s32.totalorder %s8350_s9, 1 }
   0x7   : > { %p217_p3 = scmp.ne.s32.totalorder %s8267_s28, %s8263_s27  ;;  %p218_p4 = scmp.eq.s32.totalorder %s7554_s10, 1 }
   0x8   : > { %s8365_s14 = scalar_select %p199_p1, %s8271_s29, %s201_s12  }
   0x9   : > { %p8367_p5 = por %p212_p2, %p211_p0  ;;  %p8371_p6 = por %p218_p4, %p217_p3 }
   0xa   : > { %p7557_p7 = scmp.ge.s32.totalorder %s8275_s30, 1  ;;  %p266_p8 = scmp.lt.s32.totalorder %s8275_s30, 3 }
   0xc   : > { %p267_p9 = pnand %p7557_p7, %p266_p8 }
   0xe   : > { %270 = sbr.rel (%p267_p9) target bundleno = 2307 (0x903), region = 52 }
  0x13   : > { %v8003_v0 = vld [vmem:[%s12988_s1 + $0x8] sm:$0xff]   ;;  %s7559_s19 = sshll.u32 %s8350_s9, 5  ;;  %v8004_v1 = vld [vmem:[%s12988_s1] sm:$0xff]   ;;  %vm437_vm0 = vcmask 261120   ;;  %v8021_v18 = vld [vmem:[%s12990_s3 + $0x38] sm:$0xff]   ;;  %v12996_v26 = vmov 0  }
  0x14   : > { %p301_p10 = scmp.lt.s32.totalorder %s7559_s19, 63  ;;  %7794 = vmatprep.subr.bf16.mxu0 %v8003_v0  ;;  %7830 = vmatprep.subr.bf16.mxu1 %v8021_v18  ;;  %v8022_v19 = vld [vmem:[%s12990_s3 + $0x30] sm:$0xff]   ;;  %v8023_v20 = vld [vmem:[%s12990_s3 + $0x28] sm:$0xff]   ;;  %v8024_v21 = vld [vmem:[%s12990_s3 + $0x20] sm:$0xff]   ;;  %v8446_v27 = vunpack.c.l.bf16 %v12996_v26  ;;  %v8449_v28 = vunpack.c.h.bf16 %v12996_v26  ;;  %vm695_vm1 = vcmask 1040384   ;;  %vm1257_vm2 = vcmask 1046528  }
  0x15   : > { %7795 = vmatpush3.bf16.msra.mxu0 %v8003_v0  ;;  %7831 = vmatpush3.bf16.msra.mxu1 %v8021_v18  ;;  %v8025_v22 = vld [vmem:[%s12990_s3 + $0x18] sm:$0xff]   ;;  %v8026_v23 = vld [vmem:[%s12990_s3 + $0x10] sm:$0xff]   ;;  %v8027_v24 = vld [vmem:[%s12990_s3 + $0x8] sm:$0xff]   ;;  %vm2447_vm3 = vcmask 1045504   ;;  %vm3635_vm4 = vcmask 1044480   ;;  %s8278_s23 = smov 64  }
  0x16   : > { %s13180_s19 = smov (!%p301_p10, %s7559_s19), 63  ;;  %7796 = vmatprep.subr.bf16.mxu0 %v8004_v1  ;;  %7832 = vmatprep.subr.bf16.mxu1 %v8022_v19  ;;  %v8028_v25 = vld [vmem:[%s12990_s3] sm:$0xff]   ;;  %13052 = vst [vmem:[#allocation5_spill] sm:$0xff] %v8446_v27  ;;  %13053 = vst [vmem:[#allocation6_spill] sm:$0xff] %v8449_v28  ;;  %v8511_v56 = vld [vmem:[%s12989_s2 + $0x8] ss:$0 sm:$0xff] }
  0x17   : > { %s7560_s22 = sshll.u32 %s13180_s19, 2  ;;  %v7595_v29 = vld [vmem:[%s12989_s2] ss:$0 sm:$0xff]  ;;  %v8457_v30 = vld [vmem:[%s12989_s2 + $0x5] ss:$0 sm:$0xff]  ;;  %v3777_v60 = vmul.f32 %v8511_v56, %v8446_v27  ;;  %v3778_v61 = vmul.f32 %v8511_v56, %v8449_v28  ;;  %s8279_s24 = smov 96  }
  0x18   : > { %s8387_s25 = scalar_lea.vmem %s12987_s0, %s7560_s22  ;;  %v7600_v31 = vld [vmem:[%s12989_s2 + $0x1] ss:$0 sm:$0xff]  ;;  %v8463_v32 = vmul.f32 %v7595_v29, %v8446_v27  ;;  %v879_v33 = vmul.f32 %v8457_v30, %v8446_v27  ;;  %v8470_v36 = vmul.f32 %v7595_v29, %v8449_v28  ;;  %v880_v37 = vmul.f32 %v8457_v30, %v8449_v28  ;;  %v8477_v38 = vld [vmem:[%s12989_s2 + $0x6] ss:$0 sm:$0xff]  ;;  %v7605_v41 = vld [vmem:[%s12989_s2 + $0x2] ss:$0 sm:$0xff] }
  0x19   : > { %7797 = vmatpush3.bf16.msra.mxu0 %v8004_v1  ;;  %v8005_v2 = vld [vmem:[%s8387_s25] sm:$0xff]   ;;  %v8006_v3 = vld [vmem:[%s8387_s25 + $0x8] sm:$0xff]   ;;  %v8007_v4 = vld [vmem:[%s8387_s25 + $0x10] sm:$0xff]   ;;  %7833 = vmatpush3.bf16.msra.mxu1 %v8022_v19  ;;  %v1169_v34 = vmul.f32 %v7600_v31, %v8446_v27  ;;  %v1170_v35 = vmul.f32 %v7600_v31, %v8449_v28  ;;  %v1400_v39 = vmul.f32 %v8477_v38, %v8446_v27  ;;  %vm4823_vm5 = vcmask 1043456   ;;  %s8280_s10 = smov 32   ;;  %s7671_s20 = sshll.u32 %s8350_s9, 12 }
  0x1a   : > { %7798 = vmatprep.mubr.msk.bf16.mxu0 %vm437_vm0, %v8005_v2  ;;  %v8008_v5 = vld [vmem:[%s8387_s25 + $0x18] sm:$0xff]   ;;  %v8009_v6 = vld [vmem:[%s8387_s25 + $0x20] sm:$0xff]   ;;  %v8010_v7 = vld [vmem:[%s8387_s25 + $0x28] sm:$0xff]   ;;  %7834 = vmatprep.subr.bf16.mxu1 %v8023_v20  ;;  %v1401_v40 = vmul.f32 %v8477_v38, %v8449_v28  ;;  %v2359_v42 = vmul.f32 %v7605_v41, %v8446_v27  ;;  %v2360_v43 = vmul.f32 %v7605_v41, %v8449_v28  ;;  %vm6527_vm6 = vcmask 523264   ;;  %s12938_s26 = scalar_lea.hbm %s12995_s8, %s7671_s20 }
  0x1b   : > { %v8011_v8 = vld [vmem:[%s8387_s25 + $0x30] sm:$0xff]   ;;  %v8012_v9 = vld [vmem:[%s8387_s25 + $0x38] sm:$0xff]   ;;  %v8013_v10 = vld [vmem:[%s8387_s25 + $0x40] sm:$0xff]   ;;  %v8489_v44 = vadd.f32 %v879_v33, %v8463_v32  ;;  %v1258_v45 = vrot.slane %v1169_v34, 1  ;;  %v1259_v46 = vrot.slane %v1170_v35, 1  ;;  %v8497_v48 = vadd.f32 %v880_v37, %v8470_v36 }
  0x1c   : > { %7799 = vmatmul.mubr.msk.bf16.vlgmr.msra.gmra.mxu0 %vm437_vm0, %v8006_v3  ;;  %v8014_v11 = vld [vmem:[%s8387_s25 + $0x48] sm:$0xff]   ;;  %v8015_v12 = vld [vmem:[%s8387_s25 + $0x50] sm:$0xff]   ;;  %v8016_v13 = vld [vmem:[%s8387_s25 + $0x58] sm:$0xff]   ;;  %v1494_v52 = vrot.slane %v1400_v39, 1  ;;  %v1495_v53 = vrot.slane %v1401_v40, 1  ;;  %v2448_v58 = vrot.slane %v2359_v42, 2 }
  0x1d   : > { %7802 = vmatprep.mubr.msk.bf16.mxu0 %vm437_vm0, %v8007_v4  ;;  %v8017_v14 = vld [vmem:[%s8387_s25 + $0x60] sm:$0xff]   ;;  %v8018_v15 = vld [vmem:[%s8387_s25 + $0x68] sm:$0xff]   ;;  %v8019_v16 = vld [vmem:[%s8387_s25 + $0x70] sm:$0xff]   ;;  %7835 = vmatpush3.bf16.msra.mxu1 %v8023_v20  ;;  %v2449_v59 = vrot.slane %v2360_v43, 2  ;;  %v8521_v63 = vsel %vm1257_vm2, %v1258_v45, %v1259_v46  ;;  %v8524_v0 = vsel %vm1257_vm2, %v1259_v46, %v1258_v45 }
  0x1e   : > { %v8020_v17 = vld [vmem:[%s8387_s25 + $0x78] sm:$0xff]   ;;  %7836 = vmatprep.subr.bf16.mxu1 %v8024_v21  ;;  %v8494_v47 = vld [vmem:[%s12989_s2 + $0x7] ss:$0 sm:$0xff]  ;;  %v7610_v51 = vld [vmem:[%s12989_s2 + $0x3] ss:$0 sm:$0xff] }
  0x1f   : > { %v2589_v49 = vmul.f32 %v8494_v47, %v8446_v27  ;;  %v2590_v50 = vmul.f32 %v8494_v47, %v8449_v28  ;;  %v3547_v54 = vmul.f32 %v7610_v51, %v8446_v27  ;;  %v3548_v55 = vmul.f32 %v7610_v51, %v8449_v28  ;;  %v7615_v62 = vld [vmem:[%s12989_s2 + $0x4] ss:$0 sm:$0xff]  ;;  %v8531_v3 = vld [vmem:[%s12989_s2 + $0x9] ss:$0 sm:$0xff]  ;;  %v7597_v43 = vld [vmem:[%s12989_s2 + $0xa] ss:$0 sm:$0xff] }
  0x20   : > { %v4735_v1 = vmul.f32 %v7615_v62, %v8446_v27  ;;  %v4736_v2 = vmul.f32 %v7615_v62, %v8449_v28  ;;  %v8549_v18 = vsel %vm2447_vm3, %v2449_v59, %v2448_v58  ;;  %v7598_v51 = vld [vmem:[%s12989_s2 + $0xf] ss:$0 sm:$0xff] }
  0x21   : > { %7837 = vmatpush3.bf16.msra.mxu1 %v8024_v21 }
  0x22   : > { %7838 = vmatprep.subr.bf16.mxu1 %v8025_v22  ;;  %v4824_v19 = vrot.slane %v4735_v1, 4  ;;  %v4825_v20 = vrot.slane %v4736_v2, 4 }
  0x24   : > { %7803 = vmatmul.mubr.msk.bf16.gmra.mxu0 %vm437_vm0, %v8008_v5  ;;  %v2683_v5 = vrot.slane %v2589_v49, 2  ;;  %v8583_v45 = vsel %vm4823_vm5, %v4824_v19, %v4825_v20 }
  0x25   : > { %7806 = vmatprep.mubr.msk.bf16.mxu0 %vm437_vm0, %v8009_v6  ;;  %7839 = vmatpush3.bf16.msra.mxu1 %v8025_v22  ;;  %v2684_v6 = vrot.slane %v2590_v50, 2 }
  0x26   : > { %7840 = vmatprep.subr.bf16.mxu1 %v8026_v23 }
  0x27   : > { %v8552_v22 = vsel %vm2447_vm3, %v2683_v5, %v2684_v6  ;;  %v8562_v31 = vsel %vm2447_vm3, %v2684_v6, %v2683_v5 }
  0x29   : > { %7841 = vmatpush3.bf16.msra.mxu1 %v8026_v23 }
  0x2a   : > { %7842 = vmatprep.subr.bf16.mxu1 %v8027_v24 }
  0x2c   : > { %7807 = vmatmul.mubr.msk.bf16.gmra.mxu0 %vm437_vm0, %v8010_v7  ;;  %v4965_v7 = vmul.f32 %v8531_v3, %v8446_v27 }
  0x2d   : > { %7810 = vmatprep.mubr.msk.bf16.mxu0 %vm437_vm0, %v8011_v8  ;;  %7843 = vmatpush3.bf16.msra.mxu1 %v8027_v24  ;;  %v4966_v8 = vmul.f32 %v8531_v3, %v8449_v28 }
  0x2e   : > { %7844 = vmatprep.subr.bf16.mxu1 %v8028_v25  ;;  %v5059_v23 = vrot.slane %v4965_v7, 4 }
  0x2f   : > { %v5060_v24 = vrot.slane %v4966_v8, 4 }
  0x31   : > { %7845 = vmatpush3.bf16.msra.mxu1 %v8028_v25 }
  0x34   : > { %7811 = vmatmul.mubr.msk.bf16.gmra.mxu0 %vm437_vm0, %v8012_v9  ;;  %v8538_v9 = vsel %vm1257_vm2, %v1494_v52, %v1495_v53 }
  0x35   : > { %7814 = vmatprep.mubr.msk.bf16.mxu0 %vm437_vm0, %v8013_v10  ;;  %v3636_v10 = vrot.slane %v3547_v54, 3 }
  0x3c   : > { %7815 = vmatmul.mubr.msk.bf16.gmra.mxu0 %vm437_vm0, %v8014_v11  ;;  %v3637_v11 = vrot.slane %v3548_v55, 3 }
  0x3d   : > { %7818 = vmatprep.mubr.msk.bf16.mxu0 %vm437_vm0, %v8015_v12 }
  0x3e   : > { %v8565_v33 = vsel %vm3635_vm4, %v3636_v10, %v3637_v11  ;;  %v8568_v35 = vsel %vm3635_vm4, %v3637_v11, %v3636_v10 }
  0x44   : > { %7819 = vmatmul.mubr.msk.bf16.gmra.mxu0 %vm437_vm0, %v8016_v13  ;;  %v8541_v13 = vsel %vm1257_vm2, %v1495_v53, %v1494_v52  ;;  %v8593_v52 = vsel %vm4823_vm5, %v4825_v20, %v4824_v19  ;;  %v8596_v53 = vsel %vm4823_vm5, %v5059_v23, %v5060_v24 }
  0x45   : > { %7822 = vmatprep.mubr.msk.bf16.mxu0 %vm437_vm0, %v8017_v14  ;;  %v8544_v14 = vsel %vm2447_vm3, %v2448_v58, %v2449_v59  ;;  %v8605_v58 = vsel %vm4823_vm5, %v5060_v24, %v5059_v23 }
  0x4c   : > { %7823 = vmatmul.mubr.msk.bf16.gmra.mxu0 %vm437_vm0, %v8018_v15  ;;  %v3871_v15 = vrot.slane %v3777_v60, 3 }
  0x4d   : > { %7826 = vmatprep.mubr.msk.bf16.mxu0 %vm437_vm0, %v8019_v16  ;;  %v3872_v16 = vrot.slane %v3778_v61, 3 }
  0x4f   : > { %v8571_v37 = vsel %vm3635_vm4, %v3871_v15, %v3872_v16  ;;  %v8574_v39 = vsel %vm3635_vm4, %v3872_v16, %v3871_v15 }
  0x54   : > { %7827 = vmatmul.mubr.msk.bf16.gmra.mxu0 %vm437_vm0, %v8020_v17 }
  0xdc   : > { %v7800_v57 = vpop.f32.mrf.mxu0 }
  0xde   : > { %v520_v4 = vpop.f32.mrf.mxu0 }
  0xe0   : > { %v7801_v12 = vpop.f32.mrf.mxu0 }
  0xe1   : > { %v8546_v17 = vpack.c.bf16 %v7801_v12, %v7800_v57 }
  0xe2   : > { %v523_v21 = vpop.f32.mrf.mxu0 }
  0xe3   : > { %13054 = vst [vmem:[#allocation7_spill] sm:$0xff] %v8546_v17  ;;  %v680_v25 = vrot.slane %v8546_v17, 7  ;;  %v8555_v29 = vpack.c.bf16 %v523_v21, %v520_v4  ;;  %6385 = vrot.lane.b32.xlu0 %v8546_v17, %s8278_s23  ;;  %6289 = vrot.lane.b32.xlu1 %v8546_v17, %s8279_s24 }
  0xe4   : > { %v7804_v34 = vpop.f32.mrf.mxu0 }
  0xe5   : > { %13055 = vst [vmem:[#allocation8_spill] sm:$0xff] %v8555_v29  ;;  %v701_v40 = vsel %vm695_vm1, 0, %v680_v25  ;;  %v747_v41 = vsel %vm695_vm1, %v680_v25, 0  ;;  %v679_v42 = vrot.slane %v8555_v29, 7 }
  0xe6   : > { %v8585_v46 = vunpack.c.l.bf16 %v701_v40  ;;  %v8587_v49 = vunpack.c.h.bf16 %v701_v40  ;;  %v536_v50 = vpop.f32.mrf.mxu0  ;;  %v8598_v54 = vunpack.c.l.bf16 %v747_v41 }
  0xe7   : > { %v698_v55 = vsel %vm695_vm1, 0, %v679_v42  ;;  %v745_v57 = vsel %vm695_vm1, %v679_v42, 0  ;;  %6287 = vrot.lane.b32.xlu0 %v8555_v29, %s8279_s24 }
  0xe8   : > { %v8607_v59 = vunpack.c.l.bf16 %v698_v55  ;;  %v8609_v60 = vunpack.c.h.bf16 %v698_v55  ;;  %v8611_v61 = vunpack.c.l.bf16 %v745_v57  ;;  %v7805_v62 = vpop.f32.mrf.mxu0  ;;  %v952_v1 = vmul.f32 %v7597_v43, %v8585_v46 }
  0xe9   : > { %v8614_v2 = vpack.c.bf16 %v7805_v62, %v7804_v34  ;;  %v953_v4 = vmul.f32 %v7597_v43, %v8587_v49  ;;  %v1019_v5 = vmul.f32 %v7598_v51, %v8585_v46  ;;  %v1020_v6 = vmul.f32 %v7598_v51, %v8587_v49 }
  0xea   : > { %v539_v7 = vpop.f32.mrf.mxu0  ;;  %v881_v8 = vmul.f32 %v8457_v30, %v8607_v59  ;;  %v882_v10 = vmul.f32 %v8457_v30, %v8609_v60  ;;  %v950_v11 = vmul.f32 %v7597_v43, %v8607_v59  ;;  %v951_v12 = vmul.f32 %v7597_v43, %v8609_v60 }
  0xeb   : > { %13056 = vst [vmem:[#allocation9_spill] sm:$0xff] %v8614_v2  ;;  %v682_v15 = vrot.slane %v8614_v2, 7  ;;  %v8626_v16 = vpack.c.bf16 %v539_v7, %v536_v50  ;;  %6389 = vrot.lane.b32.xlu0 %v8614_v2, %s8278_s23  ;;  %6293 = vrot.lane.b32.xlu1 %v8614_v2, %s8279_s24  ;;  %v1402_v19 = vmul.f32 %v8477_v38, %v8607_v59 }
  0xec   : > { %v8636_v30 = vmul.f32 %v8477_v38, %v8609_v60  ;;  %v7808_v20 = vpop.f32.mrf.mxu0  ;;  %v913_v21 = vadd.f32 %v881_v8, %v8463_v32  ;;  %v914_v23 = vadd.f32 %v882_v10, %v8470_v36  ;;  %v982_v24 = vadd.f32 %v950_v11, %v8489_v44 }
  0xed   : > { %13057 = vst [vmem:[#allocation10_spill] sm:$0xff] %v8626_v16  ;;  %v983_v25 = vadd.f32 %v951_v12, %v8497_v48  ;;  %v707_v34 = vsel %vm695_vm1, 0, %v682_v15  ;;  %v751_v40 = vsel %vm695_vm1, %v682_v15, 0  ;;  %v681_v41 = vrot.slane %v8626_v16, 7  ;;  %v8658_v48 = vld [vmem:[%s12989_s2 + $0x14] ss:$0 sm:$0xff] }
  0xee   : > { %v8647_v42 = vmul.f32 %v8477_v38, %v8611_v61  ;;  %v8649_v43 = vunpack.c.l.bf16 %v707_v34  ;;  %v8651_v50 = vunpack.c.h.bf16 %v707_v34  ;;  %v8653_v32 = vunpack.c.l.bf16 %v751_v40  ;;  %v552_v36 = vpop.f32.mrf.mxu0 }
  0xef   : > { %v984_v44 = vadd.f32 %v952_v1, %v913_v21  ;;  %v704_v55 = vsel %vm695_vm1, 0, %v681_v41  ;;  %v749_v57 = vsel %vm695_vm1, %v681_v41, 0  ;;  %6387 = vrot.lane.b32.xlu0 %v8626_v16, %s8278_s23  ;;  %6291 = vrot.lane.b32.xlu1 %v8626_v16, %s8279_s24  ;;  %v985_v38 = vadd.f32 %v953_v4, %v914_v23 }
  0xf0   : > { %v1051_v62 = vadd.f32 %v1019_v5, %v982_v24  ;;  %v8666_v7 = vunpack.c.l.bf16 %v704_v55  ;;  %v8668_v1 = vunpack.c.h.bf16 %v704_v55  ;;  %v8670_v8 = vunpack.c.l.bf16 %v749_v57  ;;  %v7809_v10 = vpop.f32.mrf.mxu0 }
  0xf1   : > { %v1052_v11 = vadd.f32 %v1020_v6, %v983_v25  ;;  %v8672_v12 = vpack.c.bf16 %v7809_v10, %v7808_v20  ;;  %v1090_v15 = vmul.f32 %v8658_v48, %v8649_v43  ;;  %v1091_v21 = vmul.f32 %v8658_v48, %v8651_v50 }
  0xf2   : > { %v1498_v34 = vrot.slane %v1402_v19, 1  ;;  %v555_v40 = vpop.f32.mrf.mxu0  ;;  %v1021_v4 = vmul.f32 %v7598_v51, %v8666_v7  ;;  %v1022_v5 = vmul.f32 %v7598_v51, %v8668_v1  ;;  %v1088_v23 = vmul.f32 %v8658_v48, %v8666_v7 }
  0xf3   : > { %13058 = vst [vmem:[#allocation11_spill] sm:$0xff] %v8672_v12  ;;  %v1089_v6 = vmul.f32 %v8658_v48, %v8668_v1  ;;  %v684_v20 = vrot.slane %v8672_v12, 7  ;;  %v8685_v24 = vpack.c.bf16 %v555_v40, %v552_v36  ;;  %6393 = vrot.lane.b32.xlu0 %v8672_v12, %s8278_s23  ;;  %6297 = vrot.lane.b32.xlu1 %v8672_v12, %s8279_s24  ;;  %v1499_v19 = vrot.slane %v8636_v30, 1 }
  0xf4   : > { %v1501_v51 = vrot.slane %v8647_v42, 1  ;;  %v7812_v25 = vpop.f32.mrf.mxu0  ;;  %v1053_v41 = vadd.f32 %v1021_v4, %v984_v44  ;;  %v1054_v55 = vadd.f32 %v1022_v5, %v985_v38  ;;  %v1118_v57 = vadd.f32 %v1088_v23, %v1051_v62 }
  0xf5   : > { %13059 = vst [vmem:[#allocation12_spill] sm:$0xff] %v8685_v24  ;;  %v1119_v10 = vadd.f32 %v1089_v6, %v1052_v11  ;;  %v713_v26 = vsel %vm695_vm1, 0, %v684_v20  ;;  %v755_v36 = vsel %vm695_vm1, %v684_v20, 0  ;;  %v683_v40 = vrot.slane %v8685_v24, 7 }
  0xf6   : > { %v1500_v2 = vsel %vm1257_vm2, %v1498_v34, %v1499_v19  ;;  %v8697_v16 = vunpack.c.l.bf16 %v713_v26  ;;  %v8699_v12 = vunpack.c.h.bf16 %v713_v26  ;;  %v8701_v30 = vunpack.c.l.bf16 %v755_v36  ;;  %v568_v42 = vpop.f32.mrf.mxu0 }
  0xf7   : > { %v1120_v17 = vadd.f32 %v1090_v15, %v1053_v41  ;;  %v710_v44 = vsel %vm695_vm1, 0, %v683_v40  ;;  %v753_v38 = vsel %vm695_vm1, %v683_v40, 0  ;;  %6391 = vrot.lane.b32.xlu0 %v8685_v24, %s8278_s23  ;;  %6295 = vrot.lane.b32.xlu1 %v8685_v24, %s8279_s24  ;;  %v1121_v62 = vadd.f32 %v1091_v21, %v1054_v55  ;;  %v8725_v21 = vld [vmem:[%s12989_s2 + $0xb] ss:$0 sm:$0xff] }
  0xf8   : > { %13060 = vst [vmem:[#allocation13_spill] sm:$0xff] %v8697_v16  ;;  %13061 = vst [vmem:[#allocation14_spill] sm:$0xff] %v8699_v12  ;;  %v1362_v11 = vadd.f32 %v8521_v63, %v1118_v57  ;;  %v8710_v34 = vunpack.c.l.bf16 %v710_v44  ;;  %v8712_v26 = vunpack.c.h.bf16 %v710_v44  ;;  %v8714_v4 = vunpack.c.l.bf16 %v753_v38  ;;  %v7813_v15 = vpop.f32.mrf.mxu0 }
  0xf9   : > { %13062 = vst [vmem:[#allocation15_spill] sm:$0xff] %v8701_v30  ;;  %v1363_v5 = vadd.f32 %v8524_v0, %v1119_v10  ;;  %v8717_v23 = vpack.c.bf16 %v7813_v15, %v7812_v25  ;;  %v1364_v6 = vadd.f32 %v8521_v63, %v1120_v17  ;;  %v1365_v20 = vadd.f32 %v8524_v0, %v1121_v62 }
  0xfa   : > { %v1502_v41 = vsel %vm1257_vm2, %v1499_v19, %v1501_v51  ;;  %v571_v55 = vpop.f32.mrf.mxu0  ;;  %v1605_v57 = vadd.f32 %v8538_v9, %v1362_v11  ;;  %v1643_v25 = vmul.f32 %v8725_v21, %v8607_v59  ;;  %v1644_v63 = vmul.f32 %v8725_v21, %v8609_v60 }
  0xfb   : > { %13063 = vst [vmem:[#allocation16_spill] sm:$0xff] %v8717_v23  ;;  %v1606_v36 = vadd.f32 %v8541_v13, %v1363_v5  ;;  %v686_v0 = vrot.slane %v8717_v23, 7  ;;  %v8734_v17 = vpack.c.bf16 %v571_v55, %v568_v42  ;;  %6397 = vrot.lane.b32.xlu0 %v8717_v23, %s8278_s23  ;;  %6301 = vrot.lane.b32.xlu1 %v8717_v23, %s8279_s24 }
  0xfc   : > { %v1607_v19 = vadd.f32 %v1500_v2, %v1364_v6  ;;  %v1608_v9 = vadd.f32 %v1502_v41, %v1365_v20  ;;  %v7816_v51 = vpop.f32.mrf.mxu0  ;;  %v1645_v13 = vmul.f32 %v8725_v21, %v8611_v61  ;;  %v1646_v10 = vmul.f32 %v8725_v21, %v8585_v46 }
  0xfd   : > { %13064 = vst [vmem:[#allocation17_spill] sm:$0xff] %v8734_v17  ;;  %v1647_v40 = vmul.f32 %v8725_v21, %v8587_v49  ;;  %v1648_v42 = vmul.f32 %v8725_v21, %v8598_v54  ;;  %v719_v44 = vsel %vm695_vm1, 0, %v686_v0  ;;  %v759_v38 = vsel %vm695_vm1, %v686_v0, 0 }
  0xfe   : > { %v685_v2 = vrot.slane %v8734_v17, 7  ;;  %v1739_v62 = vrot.slane %v1643_v25, 1  ;;  %v8751_v11 = vunpack.c.l.bf16 %v719_v44  ;;  %v8753_v15 = vunpack.c.h.bf16 %v719_v44  ;;  %v584_v6 = vpop.f32.mrf.mxu0  ;;  %v8766_v44 = vld [vmem:[%s12989_s2 + $0x10] ss:$0 sm:$0xff] }
  0xff   : > { %v8755_v5 = vunpack.c.l.bf16 %v759_v38  ;;  %v1740_v20 = vrot.slane %v1644_v63, 1  ;;  %6395 = vrot.lane.b32.xlu0 %v8734_v17, %s8278_s23  ;;  %6299 = vrot.lane.b32.xlu1 %v8734_v17, %s8279_s24  ;;  %v1742_v0 = vrot.slane %v1645_v13, 1  ;;  %v1744_v25 = vrot.slane %v1646_v10, 1 }
 0x100   : > { %13065 = vst [vmem:[#allocation18_spill] sm:$0xff] %v8751_v11  ;;  %13066 = vst [vmem:[#allocation19_spill] sm:$0xff] %v8753_v15  ;;  %v716_v41 = vsel %vm695_vm1, 0, %v685_v2  ;;  %v757_v55 = vsel %vm695_vm1, %v685_v2, 0  ;;  %v7817_v2 = vpop.f32.mrf.mxu0  ;;  %v1745_v13 = vrot.slane %v1647_v40, 1  ;;  %v1747_v10 = vrot.slane %v1648_v42, 1 }
 0x101   : > { %13067 = vst [vmem:[#allocation20_spill] sm:$0xff] %v8755_v5  ;;  %v8768_v38 = vunpack.c.l.bf16 %v716_v41  ;;  %v8770_v63 = vunpack.c.h.bf16 %v716_v41  ;;  %v8772_v23 = vunpack.c.l.bf16 %v757_v55  ;;  %v1741_v24 = vsel %vm1257_vm2, %v1739_v62, %v1740_v20 }
 0x102   : > { %v8775_v28 = vpack.c.bf16 %v7817_v2, %v7816_v51  ;;  %v1743_v17 = vsel %vm1257_vm2, %v1740_v20, %v1742_v0  ;;  %v587_v27 = vpop.f32.mrf.mxu0  ;;  %v1851_v5 = vadd.f32 %v1741_v24, %v1605_v57  ;;  %v1888_v11 = vmul.f32 %v8766_v44, %v8585_v46 }
 0x103   : > { %13068 = vst [vmem:[#allocation21_spill] sm:$0xff] %v8768_v38  ;;  %13069 = vst [vmem:[#allocation22_spill] sm:$0xff] %v8770_v63  ;;  %v1852_v15 = vadd.f32 %v1743_v17, %v1606_v36  ;;  %v1889_v41 = vmul.f32 %v8766_v44, %v8587_v49  ;;  %v1746_v51 = vsel %vm1257_vm2, %v1744_v25, %v1745_v13 }
 0x104   : > { %13070 = vst [vmem:[#allocation23_spill] sm:$0xff] %v8772_v23  ;;  %13071 = vst [vmem:[#allocation24_spill] sm:$0xff] %v8775_v28  ;;  %v688_v55 = vrot.slane %v8775_v28, 7  ;;  %v8783_v23 = vpack.c.bf16 %v587_v27, %v584_v6  ;;  %6401 = vrot.lane.b32.xlu0 %v8775_v28, %s8278_s23  ;;  %6305 = vrot.lane.b32.xlu1 %v8775_v28, %s8279_s24  ;;  %v1748_v24 = vsel %vm1257_vm2, %v1745_v13, %v1747_v10  ;;  %v7820_v57 = vpop.f32.mrf.mxu0 }
 0x105   : > { %v1853_v36 = vadd.f32 %v1746_v51, %v1607_v19  ;;  %v1854_v17 = vadd.f32 %v1748_v24, %v1608_v9  ;;  %v1890_v40 = vmul.f32 %v8766_v44, %v8598_v54  ;;  %v1891_v27 = vmul.f32 %v8766_v44, %v8666_v7 }
 0x106   : > { %13072 = vst [vmem:[#allocation25_spill] sm:$0xff] %v8783_v23  ;;  %v725_v42 = vsel %vm695_vm1, 0, %v688_v55  ;;  %v763_v62 = vsel %vm695_vm1, %v688_v55, 0  ;;  %v687_v6 = vrot.slane %v8783_v23, 7  ;;  %v1892_v20 = vmul.f32 %v8766_v44, %v8668_v1  ;;  %v600_v9 = vpop.f32.mrf.mxu0 }
 0x107   : > { %v8800_v0 = vunpack.c.l.bf16 %v725_v42  ;;  %v8802_v25 = vunpack.c.h.bf16 %v725_v42  ;;  %v8804_v19 = vunpack.c.l.bf16 %v763_v62  ;;  %v1893_v2 = vmul.f32 %v8766_v44, %v8670_v8 }
 0x108   : > { %v722_v13 = vsel %vm695_vm1, 0, %v687_v6  ;;  %v761_v10 = vsel %vm695_vm1, %v687_v6, 0  ;;  %6303 = vrot.lane.b32.xlu0 %v8783_v23, %s8279_s24  ;;  %v1982_v55 = vrot.slane %v1888_v11, 1  ;;  %v1983_v51 = vrot.slane %v1889_v41, 1  ;;  %v7821_v62 = vpop.f32.mrf.mxu0  ;;  %v8824_v6 = vld [vmem:[%s12989_s2 + $0x15] ss:$0 sm:$0xff] }
 0x109   : > { %13073 = vst [vmem:[#allocation26_spill] sm:$0xff] %v8800_v0  ;;  %13074 = vst [vmem:[#allocation27_spill] sm:$0xff] %v8802_v25  ;;  %v8812_v24 = vunpack.c.l.bf16 %v722_v13  ;;  %v8814_v28 = vunpack.c.h.bf16 %v722_v13  ;;  %v8816_v42 = vunpack.c.l.bf16 %v761_v10  ;;  %v8818_v25 = vpack.c.bf16 %v7821_v62, %v7820_v57 }
 0x10a   : > { %13075 = vst [vmem:[#allocation28_spill] sm:$0xff] %v8804_v19  ;;  %v1985_v19 = vrot.slane %v1890_v40, 1  ;;  %v1984_v0 = vsel %vm1257_vm2, %v1982_v55, %v1983_v51  ;;  %v1987_v63 = vrot.slane %v1891_v27, 1  ;;  %v1988_v38 = vrot.slane %v1892_v20, 1  ;;  %v603_v11 = vpop.f32.mrf.mxu0 }
 0x10b   : > { %13076 = vst [vmem:[#allocation29_spill] sm:$0xff] %v8812_v24  ;;  %13077 = vst [vmem:[#allocation30_spill] sm:$0xff] %v8814_v28  ;;  %v1990_v13 = vrot.slane %v1893_v2, 1  ;;  %v2093_v28 = vadd.f32 %v1984_v0, %v1851_v5  ;;  %v2130_v10 = vmul.f32 %v8824_v6, %v8666_v7  ;;  %v690_v57 = vrot.slane %v8818_v25, 7 }
 0x10c   : > { %13078 = vst [vmem:[#allocation31_spill] sm:$0xff] %v8816_v42  ;;  %13079 = vst [vmem:[#allocation32_spill] sm:$0xff] %v8818_v25  ;;  %v1986_v41 = vsel %vm1257_vm2, %v1983_v51, %v1985_v19  ;;  %v8830_v40 = vpack.c.bf16 %v603_v11, %v600_v9  ;;  %6399 = vrot.lane.b32.xlu0 %v8783_v23, %s8278_s23  ;;  %v1989_v27 = vsel %vm1257_vm2, %v1987_v63, %v1988_v38  ;;  %v7824_v55 = vpop.f32.mrf.mxu0 }
 0x10d   : > { %v2094_v20 = vadd.f32 %v1986_v41, %v1852_v15  ;;  %v1991_v62 = vsel %vm1257_vm2, %v1988_v38, %v1990_v13  ;;  %v2095_v42 = vadd.f32 %v1989_v27, %v1853_v36  ;;  %v2131_v5 = vmul.f32 %v8824_v6, %v8668_v1 }
 0x10e   : > { %13080 = vst [vmem:[#allocation33_spill] sm:$0xff] %v8830_v40  ;;  %v2132_v0 = vmul.f32 %v8824_v6, %v8670_v8  ;;  %v731_v19 = vsel %vm695_vm1, 0, %v690_v57  ;;  %v767_v9 = vsel %vm695_vm1, %v690_v57, 0  ;;  %v689_v2 = vrot.slane %v8830_v40, 7  ;;  %v616_v38 = vpop.f32.mrf.mxu0 }
 0x10f   : > { %v2096_v51 = vadd.f32 %v1991_v62, %v1854_v17  ;;  %v8843_v11 = vunpack.c.l.bf16 %v731_v19  ;;  %v8845_v15 = vunpack.c.h.bf16 %v731_v19  ;;  %v8847_v63 = vunpack.c.l.bf16 %v767_v9 }
 0x110   : > { %v2133_v36 = vmul.f32 %v8824_v6, %v8649_v43  ;;  %v728_v41 = vsel %vm695_vm1, 0, %v689_v2  ;;  %v765_v13 = vsel %vm695_vm1, %v689_v2, 0  ;;  %6309 = vrot.lane.b32.xlu0 %v8818_v25, %s8279_s24  ;;  %v2134_v17 = vmul.f32 %v8824_v6, %v8651_v50  ;;  %v7825_v9 = vpop.f32.mrf.mxu0 }
 0x111   : > { %13081 = vst [vmem:[#allocation34_spill] sm:$0xff] %v8843_v11  ;;  %13082 = vst [vmem:[#allocation35_spill] sm:$0xff] %v8845_v15  ;;  %v2135_v57 = vmul.f32 %v8824_v6, %v8653_v32  ;;  %v8859_v27 = vunpack.c.l.bf16 %v728_v41  ;;  %v8861_v62 = vunpack.c.h.bf16 %v728_v41  ;;  %v8863_v19 = vunpack.c.l.bf16 %v765_v13 }
 0x112   : > { %13083 = vst [vmem:[#allocation36_spill] sm:$0xff] %v8847_v63  ;;  %v2218_v23 = vrot.slane %v2130_v10, 1  ;;  %v8865_v63 = vpack.c.bf16 %v7825_v9, %v7824_v55  ;;  %v2219_v2 = vrot.slane %v2131_v5, 1  ;;  %v2221_v15 = vrot.slane %v2132_v0, 1  ;;  %v619_v24 = vpop.f32.mrf.mxu0 }
 0x113   : > { %13084 = vst [vmem:[#allocation37_spill] sm:$0xff] %v8859_v27  ;;  %13085 = vst [vmem:[#allocation38_spill] sm:$0xff] %v8861_v62  ;;  %v2223_v11 = vrot.slane %v2133_v36, 1  ;;  %v2224_v30 = vrot.slane %v2134_v17, 1  ;;  %v2226_v12 = vrot.slane %v2135_v57, 1  ;;  %v2591_v16 = vmul.f32 %v8494_v47, %v8607_v59 }
 0x114   : > { %13086 = vst [vmem:[#allocation39_spill] sm:$0xff] %v8863_v19  ;;  %13087 = vst [vmem:[#allocation40_spill] sm:$0xff] %v8865_v63  ;;  %v2592_v27 = vmul.f32 %v8494_v47, %v8609_v60  ;;  %v692_v41 = vrot.slane %v8865_v63, 7  ;;  %v8872_v13 = vpack.c.bf16 %v619_v24, %v616_v38  ;;  %6405 = vrot.lane.b32.xlu0 %v8818_v25, %s8278_s23  ;;  %v7828_v5 = vpop.f32.mrf.mxu0 }
 0x115   : > { %v2220_v10 = vsel %vm1257_vm2, %v2218_v23, %v2219_v2  ;;  %v2222_v55 = vsel %vm1257_vm2, %v2219_v2, %v2221_v15  ;;  %v2225_v0 = vsel %vm1257_vm2, %v2223_v11, %v2224_v30  ;;  %v2227_v36 = vsel %vm1257_vm2, %v2224_v30, %v2226_v12 }
 0x116   : > { %13088 = vst [vmem:[#allocation41_spill] sm:$0xff] %v8872_v13  ;;  %v2322_v17 = vadd.f32 %v2220_v10, %v2093_v28  ;;  %v2323_v57 = vadd.f32 %v2222_v55, %v2094_v20  ;;  %v737_v9 = vsel %vm695_vm1, 0, %v692_v41  ;;  %v771_v19 = vsel %vm695_vm1, %v692_v41, 0  ;;  %v632_v15 = vpop.f32.mrf.mxu0 }
 0x117   : > { %v691_v24 = vrot.slane %v8872_v13, 7  ;;  %v2324_v38 = vadd.f32 %v2225_v0, %v2095_v42  ;;  %v8883_v62 = vunpack.c.l.bf16 %v737_v9  ;;  %v8885_v25 = vunpack.c.h.bf16 %v737_v9 }
 0x118   : > { %v8887_v23 = vunpack.c.l.bf16 %v771_v19  ;;  %v2325_v2 = vadd.f32 %v2227_v36, %v2096_v51  ;;  %6307 = vrot.lane.b32.xlu0 %v8830_v40, %s8279_s24  ;;  %v2552_v12 = vadd.f32 %v8544_v14, %v2322_v17  ;;  %v2553_v30 = vadd.f32 %v8549_v18, %v2323_v57  ;;  %v7829_v19 = vpop.f32.mrf.mxu0  ;;  %v8910_v17 = vld [vmem:[%s12989_s2 + $0xc] ss:$0 sm:$0xff] }
 0x119   : > { %13089 = vst [vmem:[#allocation42_spill] sm:$0xff] %v8883_v62  ;;  %13090 = vst [vmem:[#allocation43_spill] sm:$0xff] %v8885_v25  ;;  %v734_v11 = vsel %vm695_vm1, 0, %v691_v24  ;;  %v769_v28 = vsel %vm695_vm1, %v691_v24, 0  ;;  %v2554_v51 = vadd.f32 %v8544_v14, %v2324_v38  ;;  %v8902_v10 = vpack.c.bf16 %v7829_v19, %v7828_v5 }
 0x11a   : > { %13091 = vst [vmem:[#allocation44_spill] sm:$0xff] %v8887_v23  ;;  %v8895_v42 = vunpack.c.l.bf16 %v734_v11  ;;  %v8897_v20 = vunpack.c.h.bf16 %v734_v11  ;;  %v8899_v41 = vunpack.c.l.bf16 %v769_v28  ;;  %v2555_v55 = vadd.f32 %v8549_v18, %v2325_v2  ;;  %v635_v57 = vpop.f32.mrf.mxu0 }
 0x11b   : > { %13094 = vst [vmem:[#allocation47_spill] sm:$0xff] %v8902_v10  ;;  %v2593_v0 = vmul.f32 %v8494_v47, %v8611_v61  ;;  %v2687_v36 = vrot.slane %v2591_v16, 2  ;;  %v2688_v9 = vrot.slane %v2592_v27, 2  ;;  %v2794_v24 = vadd.f32 %v8552_v22, %v2552_v12 }
 0x11c   : > { %13092 = vst [vmem:[#allocation45_spill] sm:$0xff] %v8897_v20  ;;  %13093 = vst [vmem:[#allocation46_spill] sm:$0xff] %v8899_v41  ;;  %v2795_v11 = vadd.f32 %v8562_v31, %v2553_v30  ;;  %v2831_v14 = vmul.f32 %v8910_v17, %v8607_v59  ;;  %v694_v18 = vrot.slane %v8902_v10, 7  ;;  %v8917_v5 = vpack.c.bf16 %v635_v57, %v632_v15 }
 0x11d   : > { %6403 = vrot.lane.b32.xlu0 %v8830_v40, %s8278_s23  ;;  %v2690_v47 = vrot.slane %v2593_v0, 2  ;;  %v2832_v16 = vmul.f32 %v8910_v17, %v8609_v60  ;;  %v2689_v27 = vsel %vm2447_vm3, %v2687_v36, %v2688_v9  ;;  %v2833_v22 = vmul.f32 %v8910_v17, %v8611_v61 }
 0x11e   : > { %13095 = vst [vmem:[#allocation48_spill] sm:$0xff] %v8917_v5  ;;  %v2834_v31 = vmul.f32 %v8910_v17, %v8585_v46  ;;  %v2835_v38 = vmul.f32 %v8910_v17, %v8587_v49  ;;  %v743_v15 = vsel %vm695_vm1, 0, %v694_v18  ;;  %v775_v2 = vsel %vm695_vm1, %v694_v18, 0 }
 0x11f   : > { %v693_v28 = vrot.slane %v8917_v5, 7  ;;  %v2691_v12 = vsel %vm2447_vm3, %v2688_v9, %v2690_v47  ;;  %v8934_v30 = vunpack.c.l.bf16 %v743_v15  ;;  %v8936_v19 = vunpack.c.h.bf16 %v743_v15  ;;  %v8949_v9 = vld [vmem:[%s12989_s2 + $0x11] ss:$0 sm:$0xff] }
 0x120   : > { %v8938_v0 = vunpack.c.l.bf16 %v775_v2  ;;  %v2796_v36 = vadd.f32 %v2689_v27, %v2554_v51  ;;  %v2797_v23 = vadd.f32 %v2691_v12, %v2555_v55  ;;  %v2836_v18 = vmul.f32 %v8910_v17, %v8598_v54 }
 0x121   : > { %13096 = vst [vmem:[#allocation49_spill] sm:$0xff] %v8934_v30  ;;  %13097 = vst [vmem:[#allocation50_spill] sm:$0xff] %v8936_v19  ;;  %v740_v57 = vsel %vm695_vm1, 0, %v693_v28  ;;  %v773_v40 = vsel %vm695_vm1, %v693_v28, 0  ;;  %6313 = vrot.lane.b32.xlu0 %v8865_v63, %s8279_s24  ;;  %v2927_v27 = vrot.slane %v2831_v14, 2  ;;  %v2928_v2 = vrot.slane %v2832_v16, 2 }
 0x122   : > { %13098 = vst [vmem:[#allocation51_spill] sm:$0xff] %v8938_v0  ;;  %v8951_v47 = vunpack.c.l.bf16 %v740_v57  ;;  %v8953_v15 = vunpack.c.h.bf16 %v740_v57  ;;  %v8955_v51 = vunpack.c.l.bf16 %v773_v40  ;;  %v2930_v28 = vrot.slane %v2833_v22, 2 }
 0x123   : > { %v2932_v0 = vrot.slane %v2834_v31, 2  ;;  %v2933_v19 = vrot.slane %v2835_v38, 2  ;;  %v2935_v55 = vrot.slane %v2836_v18, 2  ;;  %v3076_v12 = vmul.f32 %v8949_v9, %v8585_v46 }
 0x124   : > { %13099 = vst [vmem:[#allocation52_spill] sm:$0xff] %v8951_v47  ;;  %13100 = vst [vmem:[#allocation53_spill] sm:$0xff] %v8953_v15  ;;  %v3077_v30 = vmul.f32 %v8949_v9, %v8587_v49  ;;  %v3078_v25 = vmul.f32 %v8949_v9, %v8598_v54  ;;  %v2929_v57 = vsel %vm2447_vm3, %v2927_v27, %v2928_v2 }
 0x125   : > { %13101 = vst [vmem:[#allocation54_spill] sm:$0xff] %v8955_v51  ;;  %v2931_v40 = vsel %vm2447_vm3, %v2928_v2, %v2930_v28  ;;  %v2934_v14 = vsel %vm2447_vm3, %v2932_v0, %v2933_v19  ;;  %v3079_v16 = vmul.f32 %v8949_v9, %v8666_v7  ;;  %6409 = vrot.lane.b32.xlu0 %v8865_v63, %s8278_s23  ;;  %v3170_v2 = vrot.slane %v3076_v12, 2  ;;  %v8978_v0 = vld [vmem:[%s12989_s2 + $0x16] ss:$0 sm:$0xff] }
 0x126   : > { %v2936_v22 = vsel %vm2447_vm3, %v2933_v19, %v2935_v55  ;;  %v3039_v31 = vadd.f32 %v2929_v57, %v2794_v24  ;;  %v3040_v38 = vadd.f32 %v2931_v40, %v2795_v11  ;;  %v3041_v18 = vadd.f32 %v2934_v14, %v2796_v36 }
 0x127   : > { %v3042_v51 = vadd.f32 %v2936_v22, %v2797_v23  ;;  %v3080_v15 = vmul.f32 %v8949_v9, %v8668_v1  ;;  %v3081_v27 = vmul.f32 %v8949_v9, %v8670_v8  ;;  %v3171_v28 = vrot.slane %v3077_v30, 2 }
 0x128   : > { %v3173_v63 = vrot.slane %v3078_v25, 2  ;;  %v3175_v47 = vrot.slane %v3079_v16, 2  ;;  %v3318_v24 = vmul.f32 %v8978_v0, %v8666_v7  ;;  %v3319_v19 = vmul.f32 %v8978_v0, %v8668_v1 }
 0x129   : > { %v3176_v11 = vrot.slane %v3080_v15, 2  ;;  %v3178_v23 = vrot.slane %v3081_v27, 2  ;;  %v3320_v36 = vmul.f32 %v8978_v0, %v8670_v8  ;;  %6311 = vrot.lane.b32.xlu0 %v8872_v13, %s8279_s24  ;;  %v3172_v55 = vsel %vm2447_vm3, %v3170_v2, %v3171_v28 }
 0x12a   : > { %v3174_v30 = vsel %vm2447_vm3, %v3171_v28, %v3173_v63  ;;  %v3321_v25 = vmul.f32 %v8978_v0, %v8649_v43  ;;  %v3322_v15 = vmul.f32 %v8978_v0, %v8651_v50  ;;  %v3281_v40 = vadd.f32 %v3172_v55, %v3039_v31 }
 0x12b   : > { %v3177_v12 = vsel %vm2447_vm3, %v3175_v47, %v3176_v11  ;;  %v3179_v57 = vsel %vm2447_vm3, %v3176_v11, %v3178_v23  ;;  %v3282_v14 = vadd.f32 %v3174_v30, %v3040_v38  ;;  %v3323_v27 = vmul.f32 %v8978_v0, %v8653_v32  ;;  %v9009_v38 = vld [vmem:[%s12989_s2 + $0xd] ss:$0 sm:$0xff] }
 0x12c   : > { %v3283_v16 = vadd.f32 %v3177_v12, %v3041_v18  ;;  %v3284_v22 = vadd.f32 %v3179_v57, %v3042_v51  ;;  %v3406_v2 = vrot.slane %v3318_v24, 2  ;;  %v3407_v62 = vrot.slane %v3319_v19, 2 }
 0x12d   : > { %v3409_v63 = vrot.slane %v3320_v36, 2  ;;  %v3411_v28 = vrot.slane %v3321_v25, 2  ;;  %v3412_v41 = vrot.slane %v3322_v15, 2  ;;  %6407 = vrot.lane.b32.xlu0 %v8872_v13, %s8278_s23  ;;  %v3414_v20 = vrot.slane %v3323_v27, 2 }
 0x12e   : > { %v3779_v47 = vmul.f32 %v8511_v56, %v8607_v59  ;;  %v3780_v31 = vmul.f32 %v8511_v56, %v8609_v60  ;;  %v3781_v51 = vmul.f32 %v8511_v56, %v8611_v61  ;;  %v3408_v18 = vsel %vm2447_vm3, %v3406_v2, %v3407_v62 }
 0x12f   : > { %v3410_v24 = vsel %vm2447_vm3, %v3407_v62, %v3409_v63  ;;  %v3413_v11 = vsel %vm2447_vm3, %v3411_v28, %v3412_v41  ;;  %v4019_v23 = vmul.f32 %v9009_v38, %v8607_v59  ;;  %v3415_v19 = vsel %vm2447_vm3, %v3412_v41, %v3414_v20 }
 0x130   : > { %v3510_v36 = vadd.f32 %v3408_v18, %v3281_v40  ;;  %v3511_v55 = vadd.f32 %v3410_v24, %v3282_v14  ;;  %v3512_v30 = vadd.f32 %v3413_v11, %v3283_v16  ;;  %v3513_v56 = vadd.f32 %v3415_v19, %v3284_v22  ;;  %v9032_v16 = vld [vmem:[%s12989_s2 + $0x12] ss:$0 sm:$0xff] }
 0x131   : > { %v3875_v25 = vrot.slane %v3779_v47, 3  ;;  %v3876_v15 = vrot.slane %v3780_v31, 3  ;;  %v3878_v12 = vrot.slane %v3781_v51, 3  ;;  %6317 = vrot.lane.b32.xlu0 %v8902_v10, %s8279_s24  ;;  %v4020_v2 = vmul.f32 %v9009_v38, %v8609_v60 }
 0x132   : > { %v3740_v57 = vadd.f32 %v8565_v33, %v3510_v36  ;;  %v3741_v62 = vadd.f32 %v8568_v35, %v3511_v55  ;;  %v3742_v27 = vadd.f32 %v8565_v33, %v3512_v30  ;;  %v3743_v20 = vadd.f32 %v8568_v35, %v3513_v56 }
 0x133   : > { %v3877_v41 = vsel %vm3635_vm4, %v3875_v25, %v3876_v15  ;;  %v3879_v40 = vsel %vm3635_vm4, %v3876_v15, %v3878_v12  ;;  %v4021_v14 = vmul.f32 %v9009_v38, %v8611_v61  ;;  %v4022_v35 = vmul.f32 %v9009_v38, %v8585_v46 }
 0x134   : > { %v3982_v22 = vadd.f32 %v8571_v37, %v3740_v57  ;;  %v3983_v33 = vadd.f32 %v8574_v39, %v3741_v62  ;;  %v3984_v63 = vadd.f32 %v3877_v41, %v3742_v27  ;;  %v3985_v28 = vadd.f32 %v3879_v40, %v3743_v20  ;;  %v9065_v40 = vld [vmem:[%s12989_s2 + $0x17] ss:$0 sm:$0xff] }
 0x135   : > { %v4023_v47 = vmul.f32 %v9009_v38, %v8587_v49  ;;  %v4024_v31 = vmul.f32 %v9009_v38, %v8598_v54  ;;  %v4115_v51 = vrot.slane %v4019_v23, 3  ;;  %6413 = vrot.lane.b32.xlu0 %v8902_v10, %s8278_s23  ;;  %v4116_v18 = vrot.slane %v4020_v2, 3 }
 0x136   : > { %v4118_v24 = vrot.slane %v4021_v14, 3  ;;  %v4120_v37 = vrot.slane %v4022_v35, 3  ;;  %v4264_v39 = vmul.f32 %v9032_v16, %v8585_v46  ;;  %v4265_v36 = vmul.f32 %v9032_v16, %v8587_v49 }
 0x137   : > { %v4121_v11 = vrot.slane %v4023_v47, 3  ;;  %v4123_v19 = vrot.slane %v4024_v31, 3  ;;  %v4266_v55 = vmul.f32 %v9032_v16, %v8598_v54  ;;  %v4117_v30 = vsel %vm3635_vm4, %v4115_v51, %v4116_v18 }
 0x138   : > { %v4119_v23 = vsel %vm3635_vm4, %v4116_v18, %v4118_v24  ;;  %v4267_v56 = vmul.f32 %v9032_v16, %v8666_v7  ;;  %v4268_v25 = vmul.f32 %v9032_v16, %v8668_v1  ;;  %v4227_v57 = vadd.f32 %v4117_v30, %v3982_v22 }
 0x139   : > { %v4122_v15 = vsel %vm3635_vm4, %v4120_v37, %v4121_v11  ;;  %v4124_v12 = vsel %vm3635_vm4, %v4121_v11, %v4123_v19  ;;  %v4228_v62 = vadd.f32 %v4119_v23, %v3983_v33  ;;  %6315 = vrot.lane.b32.xlu0 %v8917_v5, %s8279_s24  ;;  %v4269_v20 = vmul.f32 %v9032_v16, %v8670_v8 }
 0x13a   : > { %v4229_v27 = vadd.f32 %v4122_v15, %v3984_v63  ;;  %v4230_v2 = vadd.f32 %v4124_v12, %v3985_v28  ;;  %v4358_v41 = vrot.slane %v4264_v39, 3  ;;  %v4359_v14 = vrot.slane %v4265_v36, 3  ;;  %v9093_v15 = vld [vmem:[%s12989_s2 + $0x13] ss:$0 sm:$0xff] }
 0x13b   : > { %v4361_v35 = vrot.slane %v4266_v55, 3  ;;  %v4363_v47 = vrot.slane %v4267_v56, 3  ;;  %v4364_v31 = vrot.slane %v4268_v25, 3  ;;  %v4366_v22 = vrot.slane %v4269_v20, 3  ;;  %v9088_v25 = vld [vmem:[%s12989_s2 + $0xe] ss:$0 sm:$0xff] }
 0x13c   : > { %v4506_v33 = vmul.f32 %v9065_v40, %v8666_v7  ;;  %v4507_v63 = vmul.f32 %v9065_v40, %v8668_v1  ;;  %v4508_v28 = vmul.f32 %v9065_v40, %v8670_v8  ;;  %v4360_v51 = vsel %vm3635_vm4, %v4358_v41, %v4359_v14 }
 0x13d   : > { %v4362_v18 = vsel %vm3635_vm4, %v4359_v14, %v4361_v35  ;;  %v4365_v24 = vsel %vm3635_vm4, %v4363_v47, %v4364_v31  ;;  %v4509_v37 = vmul.f32 %v9065_v40, %v8649_v43  ;;  %6383 = vrot.lane.b32.xlu0 %v8555_v29, %s8278_s23  ;;  %v4367_v39 = vsel %vm3635_vm4, %v4364_v31, %v4366_v22 }
 0x13e   : > { %v4469_v11 = vadd.f32 %v4360_v51, %v4227_v57  ;;  %v4470_v19 = vadd.f32 %v4362_v18, %v4228_v62  ;;  %v4471_v36 = vadd.f32 %v4365_v24, %v4229_v27  ;;  %v4472_v55 = vadd.f32 %v4367_v39, %v4230_v2 }
 0x13f   : > { %v4510_v30 = vmul.f32 %v9065_v40, %v8651_v50  ;;  %v4511_v23 = vmul.f32 %v9065_v40, %v8653_v32  ;;  %v4594_v56 = vrot.slane %v4506_v33, 3  ;;  %v4595_v12 = vrot.slane %v4507_v63, 3 }
 0x140   : > { %v4597_v57 = vrot.slane %v4508_v28, 3  ;;  %v4599_v62 = vrot.slane %v4509_v37, 3  ;;  %v5207_v27 = vmul.f32 %v9088_v25, %v8607_v59  ;;  %v5208_v41 = vmul.f32 %v9088_v25, %v8609_v60 }
 0x141   : > { %v4600_v2 = vrot.slane %v4510_v30, 3  ;;  %v4602_v20 = vrot.slane %v4511_v23, 3  ;;  %v5209_v14 = vmul.f32 %v9088_v25, %v8611_v61  ;;  %6411 = vrot.lane.b32.xlu0 %v8917_v5, %s8278_s23  ;;  %v4596_v35 = vsel %vm3635_vm4, %v4594_v56, %v4595_v12 }
 0x142   : > { %v4598_v47 = vsel %vm3635_vm4, %v4595_v12, %v4597_v57  ;;  %v5303_v31 = vrot.slane %v5207_v27, 4  ;;  %v5452_v22 = vmul.f32 %v9093_v15, %v8585_v46  ;;  %v4698_v28 = vadd.f32 %v4596_v35, %v4469_v11 }
 0x143   : > { %v4601_v33 = vsel %vm3635_vm4, %v4599_v62, %v4600_v2  ;;  %v4603_v63 = vsel %vm3635_vm4, %v4600_v2, %v4602_v20  ;;  %v4699_v51 = vadd.f32 %v4598_v47, %v4470_v19  ;;  %v5304_v37 = vrot.slane %v5208_v41, 4  ;;  %v9124_v20 = vld [vmem:[%s12989_s2 + $0x18] ss:$0 sm:$0xff] }
 0x144   : > { %v4700_v18 = vadd.f32 %v4601_v33, %v4471_v36  ;;  %v4701_v24 = vadd.f32 %v4603_v63, %v4472_v55  ;;  %v5306_v39 = vrot.slane %v5209_v14, 4  ;;  %v4928_v30 = vadd.f32 %v8583_v45, %v4698_v28 }
 0x145   : > { %v4929_v23 = vadd.f32 %v8593_v52, %v4699_v51  ;;  %v5453_v56 = vmul.f32 %v9093_v15, %v8587_v49  ;;  %v5454_v12 = vmul.f32 %v9093_v15, %v8598_v54  ;;  %v5305_v11 = vsel %vm4823_vm5, %v5303_v31, %v5304_v37 }
 0x146   : > { %v4930_v57 = vadd.f32 %v8583_v45, %v4700_v18  ;;  %v4931_v62 = vadd.f32 %v8593_v52, %v4701_v24  ;;  %v5307_v19 = vsel %vm4823_vm5, %v5304_v37, %v5306_v39  ;;  %v5170_v36 = vadd.f32 %v8596_v53, %v4928_v30  ;;  %v9141_v24 = vld [vmem:[%s12989_s2 + $0x9] ss:$0 sm:$0xff] }
 0x147   : > { %v5171_v55 = vadd.f32 %v8605_v58, %v4929_v23  ;;  %v5546_v27 = vrot.slane %v5452_v22, 4  ;;  %v5547_v2 = vrot.slane %v5453_v56, 4  ;;  %v5549_v41 = vrot.slane %v5454_v12, 4 }
 0x148   : > { %v5694_v45 = vmul.f32 %v9124_v20, %v8666_v7  ;;  %v5695_v52 = vmul.f32 %v9124_v20, %v8668_v1  ;;  %v5696_v14 = vmul.f32 %v9124_v20, %v8670_v8  ;;  %v5415_v53 = vadd.f32 %v5305_v11, %v5170_v36 }
 0x149   : > { %v5416_v35 = vadd.f32 %v5307_v19, %v5171_v55  ;;  %v5548_v58 = vsel %vm4823_vm5, %v5546_v27, %v5547_v2  ;;  %v4967_v47 = vmul.f32 %v8531_v3, %v8607_v59  ;;  %v5550_v31 = vsel %vm4823_vm5, %v5547_v2, %v5549_v41 }
 0x14a   : > { %v5782_v22 = vrot.slane %v5694_v45, 4  ;;  %v5783_v33 = vrot.slane %v5695_v52, 4  ;;  %v5785_v63 = vrot.slane %v5696_v14, 4  ;;  %v5657_v28 = vadd.f32 %v5548_v58, %v5415_v53 }
 0x14b   : > { %v5658_v51 = vadd.f32 %v5550_v31, %v5416_v35  ;;  %v4968_v18 = vmul.f32 %v8531_v3, %v8609_v60  ;;  %v4969_v37 = vmul.f32 %v9141_v24, %v8611_v61  ;;  %v5063_v23 = vrot.slane %v4967_v47, 4 }
 0x14c   : > { %v5784_v39 = vsel %vm4823_vm5, %v5782_v22, %v5783_v33  ;;  %v5786_v30 = vsel %vm4823_vm5, %v5783_v33, %v5785_v63  ;;  %v5210_v56 = vmul.f32 %v9088_v25, %v8585_v46  ;;  %v5211_v36 = vmul.f32 %v9088_v25, %v8587_v49 }
 0x14d   : > { %v5886_v12 = vadd.f32 %v5784_v39, %v5657_v28  ;;  %v5887_v11 = vadd.f32 %v5786_v30, %v5658_v51  ;;  %v5064_v19 = vrot.slane %v4968_v18, 4  ;;  %v5066_v3 = vrot.slane %v4969_v37, 4 }
 0x14e   : > { %v5212_v55 = vmul.f32 %v9088_v25, %v8598_v54  ;;  %v5308_v27 = vrot.slane %v5210_v56, 4  ;;  %v5455_v2 = vmul.f32 %v9093_v15, %v8666_v7  ;;  %v5456_v14 = vmul.f32 %v9093_v15, %v8668_v1 }
 0x14f   : > { %v5918_v41 = vpack.c.bf16 %v5887_v11, %v5886_v12  ;;  %v5065_v45 = vsel %vm4823_vm5, %v5063_v23, %v5064_v19  ;;  %v5067_v52 = vsel %vm4823_vm5, %v5064_v19, %v5066_v3  ;;  %v5309_v58 = vrot.slane %v5211_v36, 4  ;;  %v9173_v11 = vld [vmem:[%s12989_s2] ss:$0 sm:$0xff] }
 0x150   : > { %v5172_v53 = vadd.f32 %v5065_v45, %v4930_v57  ;;  %v5173_v35 = vadd.f32 %v5067_v52, %v4931_v62  ;;  %v5311_v47 = vrot.slane %v5212_v55, 4  ;;  %v5457_v31 = vmul.f32 %v9093_v15, %v8670_v8 }
 0x151   : > { %7846 = vmatprep.mubr.bf16.mxu1 %v5918_v41  ;;  %v5551_v22 = vrot.slane %v5455_v2, 4  ;;  %v5552_v33 = vrot.slane %v5456_v14, 4  ;;  %v5697_v63 = vmul.f32 %v9124_v20, %v8649_v43  ;;  %v5310_v28 = vsel %vm4823_vm5, %v5308_v27, %v5309_v58  ;;  %v9183_v27 = vld [vmem:[%s12989_s2 + $0x5] ss:$0 sm:$0xff] }
 0x152   : > { %v5312_v51 = vsel %vm4823_vm5, %v5309_v58, %v5311_v47  ;;  %v5698_v18 = vmul.f32 %v9124_v20, %v8651_v50  ;;  %v5699_v57 = vmul.f32 %v9124_v20, %v8653_v32  ;;  %v5417_v62 = vadd.f32 %v5310_v28, %v5172_v53  ;;  %v9194_v58 = vld [vmem:[%s12989_s2 + $0xa] ss:$0 sm:$0xff] }
 0x153   : > { %v5418_v37 = vadd.f32 %v5312_v51, %v5173_v35  ;;  %v5553_v39 = vsel %vm4823_vm5, %v5551_v22, %v5552_v33  ;;  %v5554_v30 = vrot.slane %v5457_v31, 4  ;;  %v5787_v23 = vrot.slane %v5697_v63, 4  ;;  %v9203_v63 = vld [vmem:[%s12989_s2 + $0xf] ss:$0 sm:$0xff] }
 0x154   : > { %v5788_v56 = vrot.slane %v5698_v18, 4  ;;  %v5790_v12 = vrot.slane %v5699_v57, 4  ;;  %v814_v19 = vmul.f32 %v9173_v11, %v8607_v59  ;;  %v5659_v36 = vadd.f32 %v5553_v39, %v5417_v62 }
 0x155   : > { %v5555_v3 = vsel %vm4823_vm5, %v5552_v33, %v5554_v30  ;;  %v815_v55 = vmul.f32 %v9173_v11, %v8609_v60  ;;  %v883_v2 = vmul.f32 %v9183_v27, %v8585_v46  ;;  %v884_v14 = vmul.f32 %v9183_v27, %v8587_v49 }
 0x156   : > { %v5660_v41 = vadd.f32 %v5555_v3, %v5418_v37  ;;  %v5789_v45 = vsel %vm4823_vm5, %v5787_v23, %v5788_v56  ;;  %v5791_v52 = vsel %vm4823_vm5, %v5788_v56, %v5790_v12  ;;  %v954_v47 = vmul.f32 %v9194_v58, %v8666_v7  ;;  %v9216_v37 = vld [vmem:[%s12989_s2 + $0x1] ss:$0 sm:$0xff] }
 0x157   : > { %v5888_v53 = vadd.f32 %v5789_v45, %v5659_v36  ;;  %v915_v35 = vadd.f32 %v883_v2, %v814_v19  ;;  %v955_v31 = vmul.f32 %v9194_v58, %v8668_v1  ;;  %v916_v33 = vadd.f32 %v884_v14, %v815_v55 }
 0x158   : > { %v5889_v22 = vadd.f32 %v5791_v52, %v5660_v41  ;;  %v1023_v28 = vmul.f32 %v9203_v63, %v8649_v43  ;;  %v1024_v51 = vmul.f32 %v9203_v63, %v8651_v50  ;;  %v1092_v57 = vmul.f32 %v8658_v48, %v8710_v34 }
 0x159   : > { %v986_v18 = vadd.f32 %v954_v47, %v915_v35  ;;  %v1093_v62 = vmul.f32 %v8658_v48, %v8712_v26  ;;  %v1171_v39 = vmul.f32 %v9216_v37, %v8607_v59  ;;  %v987_v23 = vadd.f32 %v955_v31, %v916_v33  ;;  %v9227_v48 = vld [vmem:[%s12989_s2 + $0x6] ss:$0 sm:$0xff] }
 0x15a   : > { %v5919_v30 = vpack.c.bf16 %v5889_v22, %v5888_v53  ;;  %v1172_v56 = vmul.f32 %v9216_v37, %v8609_v60  ;;  %v1173_v12 = vmul.f32 %v9216_v37, %v8611_v61  ;;  %v1405_v36 = vmul.f32 %v9227_v48, %v8585_v46 }
 0x15b   : > { %v1055_v19 = vadd.f32 %v1023_v28, %v986_v18  ;;  %v1262_v3 = vrot.slane %v1171_v39, 1  ;;  %v1406_v55 = vmul.f32 %v9227_v48, %v8587_v49  ;;  %v1056_v2 = vadd.f32 %v1024_v51, %v987_v23 }
 0x15c   : > { %7847 = vmatmul.mubr.bf16.vlgmr.msra.gmra.mxu1 %v5919_v30  ;;  %v1263_v41 = vrot.slane %v1172_v56, 1  ;;  %v1265_v45 = vrot.slane %v1173_v12, 1  ;;  %v1407_v52 = vmul.f32 %v9227_v48, %v8598_v54  ;;  %v1503_v53 = vrot.slane %v1405_v36, 1 }
 0x15d   : > { %v1122_v14 = vadd.f32 %v1092_v57, %v1055_v19  ;;  %v1504_v35 = vrot.slane %v1406_v55, 1  ;;  %v1649_v47 = vmul.f32 %v8725_v21, %v8666_v7  ;;  %v1123_v31 = vadd.f32 %v1093_v62, %v1056_v2 }
 0x15e   : > { %v1264_v22 = vsel %vm1257_vm2, %v1262_v3, %v1263_v41  ;;  %v1266_v33 = vsel %vm1257_vm2, %v1263_v41, %v1265_v45  ;;  %v1506_v28 = vrot.slane %v1407_v52, 1  ;;  %v1650_v39 = vmul.f32 %v8725_v21, %v8668_v1 }
 0x15f   : > { %v1366_v18 = vadd.f32 %v1264_v22, %v1122_v14  ;;  %v1505_v51 = vsel %vm1257_vm2, %v1503_v53, %v1504_v35  ;;  %v1651_v57 = vmul.f32 %v8725_v21, %v8670_v8  ;;  %v1367_v30 = vadd.f32 %v1266_v33, %v1123_v31 }
 0x160   : > { %v1507_v23 = vsel %vm1257_vm2, %v1504_v35, %v1506_v28  ;;  %v1749_v56 = vrot.slane %v1649_v47, 1  ;;  %v1894_v62 = vmul.f32 %v8766_v44, %v8649_v43  ;;  %v1750_v19 = vrot.slane %v1650_v39, 1 }
 0x161   : > { %v1609_v12 = vadd.f32 %v1505_v51, %v1366_v18  ;;  %v1752_v3 = vrot.slane %v1651_v57, 1  ;;  %v1895_v36 = vmul.f32 %v8766_v44, %v8651_v50  ;;  %v1610_v55 = vadd.f32 %v1507_v23, %v1367_v30  ;;  %v9263_v18 = vld [vmem:[%s12989_s2 + $0x2] ss:$0 sm:$0xff] }
 0x162   : > { %v1896_v2 = vmul.f32 %v8766_v44, %v8653_v32  ;;  %v1992_v41 = vrot.slane %v1894_v62, 1  ;;  %v2136_v21 = vmul.f32 %v8824_v6, %v8710_v34  ;;  %v1751_v45 = vsel %vm1257_vm2, %v1749_v56, %v1750_v19 }
 0x163   : > { %v1753_v52 = vsel %vm1257_vm2, %v1750_v19, %v1752_v3  ;;  %v1993_v14 = vrot.slane %v1895_v36, 1  ;;  %v2137_v53 = vmul.f32 %v8824_v6, %v8712_v26  ;;  %v1855_v35 = vadd.f32 %v1751_v45, %v1609_v12 }
 0x164   : > { %v1856_v47 = vadd.f32 %v1753_v52, %v1610_v55  ;;  %v1995_v31 = vrot.slane %v1896_v2, 1  ;;  %v2138_v22 = vmul.f32 %v8824_v6, %v8714_v4  ;;  %v2228_v33 = vrot.slane %v2136_v21, 1  ;;  %v9277_v55 = vld [vmem:[%s12989_s2 + $0x7] ss:$0 sm:$0xff] }
 0x165   : > { %v1994_v44 = vsel %vm1257_vm2, %v1992_v41, %v1993_v14  ;;  %v2229_v28 = vrot.slane %v2137_v53, 1  ;;  %v2361_v51 = vmul.f32 %v9263_v18, %v8607_v59  ;;  %v2362_v23 = vmul.f32 %v9263_v18, %v8609_v60 }
 0x166   : > { %v1996_v39 = vsel %vm1257_vm2, %v1993_v14, %v1995_v31  ;;  %v2097_v57 = vadd.f32 %v1994_v44, %v1855_v35  ;;  %v2231_v30 = vrot.slane %v2138_v22, 1  ;;  %v2363_v62 = vmul.f32 %v9263_v18, %v8611_v61 }
 0x167   : > { %v2098_v6 = vadd.f32 %v1996_v39, %v1856_v47  ;;  %v2230_v56 = vsel %vm1257_vm2, %v2228_v33, %v2229_v28  ;;  %v2452_v12 = vrot.slane %v2361_v51, 2  ;;  %v2453_v36 = vrot.slane %v2362_v23, 2 }
 0x168   : > { %v2232_v19 = vsel %vm1257_vm2, %v2229_v28, %v2231_v30  ;;  %v2326_v3 = vadd.f32 %v2230_v56, %v2097_v57  ;;  %v2594_v2 = vmul.f32 %v9277_v55, %v8585_v46  ;;  %v2455_v21 = vrot.slane %v2363_v62, 2 }
 0x169   : > { %v2327_v41 = vadd.f32 %v2232_v19, %v2098_v6  ;;  %v2595_v45 = vmul.f32 %v9277_v55, %v8587_v49  ;;  %v2596_v52 = vmul.f32 %v9277_v55, %v8598_v54  ;;  %v2454_v14 = vsel %vm2447_vm3, %v2452_v12, %v2453_v36 }
 0x16a   : > { %v2692_v53 = vrot.slane %v2594_v2, 2  ;;  %v2837_v35 = vmul.f32 %v8910_v17, %v8666_v7  ;;  %v2838_v47 = vmul.f32 %v8910_v17, %v8668_v1  ;;  %v2456_v31 = vsel %vm2447_vm3, %v2453_v36, %v2455_v21 }
 0x16b   : > { %v2556_v22 = vadd.f32 %v2454_v14, %v2326_v3  ;;  %v2693_v44 = vrot.slane %v2595_v45, 2  ;;  %v2695_v33 = vrot.slane %v2596_v52, 2  ;;  %v2557_v28 = vadd.f32 %v2456_v31, %v2327_v41 }
 0x16c   : > { %v2839_v51 = vmul.f32 %v8910_v17, %v8670_v8  ;;  %v2937_v39 = vrot.slane %v2837_v35, 2  ;;  %v2938_v57 = vrot.slane %v2838_v47, 2  ;;  %v3082_v6 = vmul.f32 %v8949_v9, %v8649_v43 }
 0x16d   : > { %v2694_v30 = vsel %vm2447_vm3, %v2692_v53, %v2693_v44  ;;  %v2696_v23 = vsel %vm2447_vm3, %v2693_v44, %v2695_v33  ;;  %v3083_v56 = vmul.f32 %v8949_v9, %v8651_v50  ;;  %v3084_v17 = vmul.f32 %v8949_v9, %v8653_v32  ;;  %v9313_v33 = vld [vmem:[%s12989_s2 + $0x3] ss:$0 sm:$0xff] }
 0x16e   : > { %v2798_v62 = vadd.f32 %v2694_v30, %v2556_v22  ;;  %v2799_v12 = vadd.f32 %v2696_v23, %v2557_v28  ;;  %v2939_v19 = vsel %vm2447_vm3, %v2937_v39, %v2938_v57  ;;  %v2940_v3 = vrot.slane %v2839_v51, 2 }
 0x16f   : > { %v3180_v36 = vrot.slane %v3082_v6, 2  ;;  %v3181_v2 = vrot.slane %v3083_v56, 2  ;;  %v3324_v41 = vmul.f32 %v8978_v0, %v8710_v34  ;;  %v3325_v52 = vmul.f32 %v8978_v0, %v8712_v26 }
 0x170   : > { %v2941_v21 = vsel %vm2447_vm3, %v2938_v57, %v2940_v3  ;;  %v3043_v45 = vadd.f32 %v2939_v19, %v2798_v62  ;;  %v3326_v14 = vmul.f32 %v8978_v0, %v8714_v4  ;;  %v3183_v47 = vrot.slane %v3084_v17, 2  ;;  %v9325_v57 = vld [vmem:[%s12989_s2 + $0x8] ss:$0 sm:$0xff] }
 0x171   : > { %v3044_v53 = vadd.f32 %v2941_v21, %v2799_v12  ;;  %v3182_v35 = vsel %vm2447_vm3, %v3180_v36, %v3181_v2  ;;  %v3416_v31 = vrot.slane %v3324_v41, 2  ;;  %v3417_v22 = vrot.slane %v3325_v52, 2 }
 0x172   : > { %v3285_v9 = vadd.f32 %v3182_v35, %v3043_v45  ;;  %v3419_v44 = vrot.slane %v3326_v14, 2  ;;  %v3549_v28 = vmul.f32 %v9313_v33, %v8607_v59  ;;  %v3184_v51 = vsel %vm2447_vm3, %v3181_v2, %v3183_v47 }
 0x173   : > { %v3550_v0 = vmul.f32 %v9313_v33, %v8609_v60  ;;  %v3551_v39 = vmul.f32 %v9313_v33, %v8611_v61  ;;  %v3782_v30 = vmul.f32 %v9325_v57, %v8585_v46  ;;  %v3286_v23 = vadd.f32 %v3184_v51, %v3044_v53 }
 0x174   : > { %v3418_v6 = vsel %vm2447_vm3, %v3416_v31, %v3417_v22  ;;  %v3420_v56 = vsel %vm2447_vm3, %v3417_v22, %v3419_v44  ;;  %v3640_v62 = vrot.slane %v3549_v28, 3  ;;  %v3783_v17 = vmul.f32 %v9325_v57, %v8587_v49 }
 0x175   : > { %v3514_v12 = vadd.f32 %v3418_v6, %v3285_v9  ;;  %v3641_v19 = vrot.slane %v3550_v0, 3  ;;  %v3643_v3 = vrot.slane %v3551_v39, 3  ;;  %v3515_v36 = vadd.f32 %v3420_v56, %v3286_v23 }
 0x176   : > { %v3784_v2 = vmul.f32 %v9325_v57, %v8598_v54  ;;  %v3880_v41 = vrot.slane %v3782_v30, 3  ;;  %v4025_v21 = vmul.f32 %v9009_v38, %v8666_v7  ;;  %v3881_v14 = vrot.slane %v3783_v17, 3 }
 0x177   : > { %v3642_v45 = vsel %vm3635_vm4, %v3640_v62, %v3641_v19  ;;  %v3644_v52 = vsel %vm3635_vm4, %v3641_v19, %v3643_v3  ;;  %v4026_v53 = vmul.f32 %v9009_v38, %v8668_v1  ;;  %v4027_v9 = vmul.f32 %v9009_v38, %v8670_v8 }
 0x178   : > { %v3744_v35 = vadd.f32 %v3642_v45, %v3514_v12  ;;  %v3745_v47 = vadd.f32 %v3644_v52, %v3515_v36  ;;  %v3883_v31 = vrot.slane %v3784_v2, 3  ;;  %v3882_v22 = vsel %vm3635_vm4, %v3880_v41, %v3881_v14 }
 0x179   : > { %v4125_v44 = vrot.slane %v4025_v21, 3  ;;  %v4126_v28 = vrot.slane %v4026_v53, 3  ;;  %v4270_v51 = vmul.f32 %v9032_v16, %v8649_v43  ;;  %v4128_v30 = vrot.slane %v4027_v9, 3 }
 0x17a   : > { %v3884_v0 = vsel %vm3635_vm4, %v3881_v14, %v3883_v31  ;;  %v3986_v39 = vadd.f32 %v3882_v22, %v3744_v35  ;;  %v4271_v23 = vmul.f32 %v9032_v16, %v8651_v50  ;;  %v4272_v38 = vmul.f32 %v9032_v16, %v8653_v32  ;;  %v9363_v14 = vld [vmem:[%s12989_s2 + $0x4] ss:$0 sm:$0xff] }
 0x17b   : > { %v3987_v6 = vadd.f32 %v3884_v0, %v3745_v47  ;;  %v4127_v56 = vsel %vm3635_vm4, %v4125_v44, %v4126_v28  ;;  %v4368_v62 = vrot.slane %v4270_v51, 3  ;;  %v4129_v12 = vsel %vm3635_vm4, %v4126_v28, %v4128_v30 }
 0x17c   : > { %v4231_v19 = vadd.f32 %v4127_v56, %v3986_v39  ;;  %v4369_v3 = vrot.slane %v4271_v23, 3  ;;  %v4512_v17 = vmul.f32 %v9065_v40, %v8710_v34  ;;  %v4371_v2 = vrot.slane %v4272_v38, 3 }
 0x17d   : > { %v4232_v36 = vadd.f32 %v4129_v12, %v3987_v6  ;;  %v4513_v41 = vmul.f32 %v9065_v40, %v8712_v26  ;;  %v4514_v21 = vmul.f32 %v9065_v40, %v8714_v4  ;;  %v4737_v53 = vmul.f32 %v9363_v14, %v8607_v59 }
 0x17e   : > { %v4370_v45 = vsel %vm3635_vm4, %v4368_v62, %v4369_v3  ;;  %v4604_v52 = vrot.slane %v4512_v17, 3  ;;  %v4738_v35 = vmul.f32 %v9363_v14, %v8609_v60  ;;  %v4372_v47 = vsel %vm3635_vm4, %v4369_v3, %v4371_v2 }
 0x17f   : > { %v4473_v31 = vadd.f32 %v4370_v45, %v4231_v19  ;;  %v4605_v9 = vrot.slane %v4513_v41, 3  ;;  %v4607_v22 = vrot.slane %v4514_v21, 3  ;;  %v4474_v44 = vadd.f32 %v4372_v47, %v4232_v36 }
 0x180   : > { %v4739_v28 = vmul.f32 %v9363_v14, %v8611_v61  ;;  %v4828_v51 = vrot.slane %v4737_v53, 4  ;;  %v4829_v0 = vrot.slane %v4738_v35, 4  ;;  %v4970_v59 = vmul.f32 %v9141_v24, %v8585_v46 }
 0x181   : > { %v4606_v39 = vsel %vm3635_vm4, %v4604_v52, %v4605_v9  ;;  %v4608_v30 = vsel %vm3635_vm4, %v4605_v9, %v4607_v22  ;;  %v4971_v60 = vmul.f32 %v9141_v24, %v8587_v49  ;;  %v4972_v61 = vmul.f32 %v9141_v24, %v8598_v54 }
 0x182   : > { %v4702_v23 = vadd.f32 %v4606_v39, %v4473_v31  ;;  %v4703_v6 = vadd.f32 %v4608_v30, %v4474_v44  ;;  %v4830_v56 = vsel %vm4823_vm5, %v4828_v51, %v4829_v0  ;;  %v4831_v38 = vrot.slane %v4739_v28, 4 }
 0x183   : > { %v5068_v62 = vrot.slane %v4970_v59, 4  ;;  %v5069_v12 = vrot.slane %v4971_v60, 4  ;;  %v5213_v19 = vmul.f32 %v9088_v25, %v8666_v7  ;;  %v5214_v36 = vmul.f32 %v9088_v25, %v8668_v1 }
 0x184   : > { %v4832_v3 = vsel %vm4823_vm5, %v4829_v0, %v4831_v38  ;;  %v4932_v17 = vadd.f32 %v4830_v56, %v4702_v23  ;;  %v5215_v2 = vmul.f32 %v9088_v25, %v8670_v8  ;;  %v5071_v45 = vrot.slane %v4972_v61, 4 }
 0x185   : > { %v4933_v41 = vadd.f32 %v4832_v3, %v4703_v6  ;;  %v5070_v21 = vsel %vm4823_vm5, %v5068_v62, %v5069_v12  ;;  %v5313_v52 = vrot.slane %v5213_v19, 4  ;;  %v5314_v35 = vrot.slane %v5214_v36, 4 }
 0x186   : > { %v5174_v53 = vadd.f32 %v5070_v21, %v4932_v17  ;;  %v5316_v47 = vrot.slane %v5215_v2, 4  ;;  %v5458_v31 = vmul.f32 %v9093_v15, %v8649_v43  ;;  %v5072_v9 = vsel %vm4823_vm5, %v5069_v12, %v5071_v45 }
 0x187   : > { %v5459_v22 = vmul.f32 %v9093_v15, %v8651_v50  ;;  %v5460_v44 = vmul.f32 %v9093_v15, %v8653_v32  ;;  %v5700_v28 = vmul.f32 %v9124_v20, %v8710_v34  ;;  %v5175_v51 = vadd.f32 %v5072_v9, %v4933_v41 }
 0x188   : > { %v5315_v0 = vsel %vm4823_vm5, %v5313_v52, %v5314_v35  ;;  %v5317_v39 = vsel %vm4823_vm5, %v5314_v35, %v5316_v47  ;;  %v5556_v30 = vrot.slane %v5458_v31, 4  ;;  %v5701_v6 = vmul.f32 %v9124_v20, %v8712_v26 }
 0x189   : > { %v5419_v59 = vadd.f32 %v5315_v0, %v5174_v53  ;;  %v5557_v60 = vrot.slane %v5459_v22, 4  ;;  %v5559_v23 = vrot.slane %v5460_v44, 4  ;;  %v5420_v56 = vadd.f32 %v5317_v39, %v5175_v51  ;;  %v9427_v0 = vld [vmem:[%s12989_s2 + $0x14] ss:$0 sm:$0xff]  ;;  %v13102_v39 = vld [vmem:[#allocation13_spill] sm:$0xff] }
 0x18a   : > { %v5702_v38 = vmul.f32 %v9124_v20, %v8714_v4  ;;  %v5792_v61 = vrot.slane %v5700_v28, 4  ;;  %v816_v62 = vmul.f32 %v9173_v11, %v8585_v46  ;;  %v5793_v3 = vrot.slane %v5701_v6, 4 }
 0x18b   : > { %v5558_v12 = vsel %vm4823_vm5, %v5556_v30, %v5557_v60  ;;  %v5560_v19 = vsel %vm4823_vm5, %v5557_v60, %v5559_v23  ;;  %v817_v17 = vmul.f32 %v9173_v11, %v8587_v49  ;;  %v885_v21 = vmul.f32 %v9183_v27, %v8666_v7  ;;  %v13103_v60 = vld [vmem:[#allocation14_spill] sm:$0xff] }
 0x18c   : > { %v5661_v36 = vadd.f32 %v5558_v12, %v5419_v59  ;;  %v5662_v2 = vadd.f32 %v5560_v19, %v5420_v56  ;;  %v5795_v41 = vrot.slane %v5702_v38, 4  ;;  %v5794_v45 = vsel %vm4823_vm5, %v5792_v61, %v5793_v3 }
 0x18d   : > { %v886_v52 = vmul.f32 %v9183_v27, %v8668_v1  ;;  %v956_v53 = vmul.f32 %v9194_v58, %v8649_v43  ;;  %v957_v35 = vmul.f32 %v9194_v58, %v8651_v50  ;;  %v917_v9 = vadd.f32 %v885_v21, %v816_v62 }
 0x18e   : > { %v5796_v47 = vsel %vm4823_vm5, %v5793_v3, %v5795_v41  ;;  %v5890_v31 = vadd.f32 %v5794_v45, %v5661_v36  ;;  %v1025_v22 = vmul.f32 %v9203_v63, %v8710_v34  ;;  %v1026_v51 = vmul.f32 %v9203_v63, %v8712_v26 }
 0x18f   : > { %v5891_v44 = vadd.f32 %v5796_v47, %v5662_v2  ;;  %v918_v28 = vadd.f32 %v886_v52, %v817_v17  ;;  %v1094_v30 = vmul.f32 %v9427_v0, %v13102_v39  ;;  %v988_v59 = vadd.f32 %v956_v53, %v917_v9  ;;  %v9449_v47 = vld [vmem:[%s12989_s2 + $0xb] ss:$0 sm:$0xff] }
 0x190   : > { %v1095_v23 = vmul.f32 %v9427_v0, %v13103_v60  ;;  %v1174_v6 = vmul.f32 %v9216_v37, %v8585_v46  ;;  %v1175_v56 = vmul.f32 %v9216_v37, %v8587_v49  ;;  %v1176_v62 = vmul.f32 %v9216_v37, %v8598_v54 }
 0x191   : > { %v5920_v38 = vpack.c.bf16 %v5891_v44, %v5890_v31  ;;  %v989_v61 = vadd.f32 %v957_v35, %v918_v28  ;;  %v1408_v12 = vmul.f32 %v9227_v48, %v8666_v7  ;;  %v1057_v19 = vadd.f32 %v1025_v22, %v988_v59 }
 0x192   : > { %v1267_v3 = vrot.slane %v1174_v6, 1  ;;  %v1268_v17 = vrot.slane %v1175_v56, 1  ;;  %v1409_v36 = vmul.f32 %v9227_v48, %v8668_v1  ;;  %v1270_v41 = vrot.slane %v1176_v62, 1 }
 0x193   : > { %7850 = vmatprep.mubr.bf16.mxu1 %v5920_v38  ;;  %v1058_v2 = vadd.f32 %v1026_v51, %v989_v61  ;;  %v1410_v21 = vmul.f32 %v9227_v48, %v8670_v8  ;;  %v1508_v45 = vrot.slane %v1408_v12, 1  ;;  %v1124_v52 = vadd.f32 %v1094_v30, %v1057_v19 }
 0x194   : > { %v1269_v53 = vsel %vm1257_vm2, %v1267_v3, %v1268_v17  ;;  %v1509_v35 = vrot.slane %v1409_v36, 1  ;;  %v1652_v31 = vmul.f32 %v9449_v47, %v8649_v43  ;;  %v1271_v22 = vsel %vm1257_vm2, %v1268_v17, %v1270_v41 }
 0x195   : > { %v1125_v9 = vadd.f32 %v1095_v23, %v1058_v2  ;;  %v1511_v44 = vrot.slane %v1410_v21, 1  ;;  %v1653_v28 = vmul.f32 %v9449_v47, %v8651_v50  ;;  %v1368_v51 = vadd.f32 %v1269_v53, %v1124_v52  ;;  %v9463_v23 = vld [vmem:[%s12989_s2 + $0x10] ss:$0 sm:$0xff]  ;;  %v9475_v21 = vld [vmem:[%s12989_s2 + $0x15] ss:$0 sm:$0xff] }
 0x196   : > { %v1510_v30 = vsel %vm1257_vm2, %v1508_v45, %v1509_v35  ;;  %v1654_v59 = vmul.f32 %v9449_v47, %v8653_v32  ;;  %v1754_v6 = vrot.slane %v1652_v31, 1  ;;  %v1897_v62 = vmul.f32 %v9463_v23, %v8710_v34 }
 0x197   : > { %v1369_v56 = vadd.f32 %v1271_v22, %v1125_v9  ;;  %v1512_v38 = vsel %vm1257_vm2, %v1509_v35, %v1511_v44  ;;  %v1755_v61 = vrot.slane %v1653_v28, 1  ;;  %v1611_v12 = vadd.f32 %v1510_v30, %v1368_v51  ;;  %v13104_v44 = vld [vmem:[#allocation15_spill] sm:$0xff] }
 0x198   : > { %v1757_v19 = vrot.slane %v1654_v59, 1  ;;  %v1898_v3 = vmul.f32 %v9463_v23, %v8712_v26  ;;  %v1899_v17 = vmul.f32 %v9463_v23, %v8714_v4  ;;  %v1997_v41 = vrot.slane %v1897_v62, 1 }
 0x199   : > { %v1612_v36 = vadd.f32 %v1512_v38, %v1369_v56  ;;  %v1756_v2 = vsel %vm1257_vm2, %v1754_v6, %v1755_v61  ;;  %v2139_v45 = vmul.f32 %v9475_v21, %v13102_v39  ;;  %v2140_v22 = vmul.f32 %v9475_v21, %v13103_v60 }
 0x19a   : > { %v1758_v52 = vsel %vm1257_vm2, %v1755_v61, %v1757_v19  ;;  %v1857_v53 = vadd.f32 %v1756_v2, %v1611_v12  ;;  %v1998_v35 = vrot.slane %v1898_v3, 1  ;;  %v2000_v31 = vrot.slane %v1899_v17, 1 }
 0x19b   : > { %v1858_v9 = vadd.f32 %v1758_v52, %v1612_v36  ;;  %v2141_v28 = vmul.f32 %v9475_v21, %v13104_v44  ;;  %v2233_v51 = vrot.slane %v2139_v45, 1  ;;  %v2364_v6 = vmul.f32 %v9263_v18, %v8585_v46 }
 0x19c   : > { %v1999_v30 = vsel %vm1257_vm2, %v1997_v41, %v1998_v35  ;;  %v2001_v59 = vsel %vm1257_vm2, %v1998_v35, %v2000_v31  ;;  %v2365_v56 = vmul.f32 %v9263_v18, %v8587_v49  ;;  %v2234_v62 = vrot.slane %v2140_v22, 1 }
 0x19d   : > { %v2099_v38 = vadd.f32 %v1999_v30, %v1857_v53  ;;  %v2100_v61 = vadd.f32 %v2001_v59, %v1858_v9  ;;  %v2236_v12 = vrot.slane %v2141_v28, 1  ;;  %v2366_v19 = vmul.f32 %v9263_v18, %v8598_v54 }
 0x19e   : > { %v2457_v3 = vrot.slane %v2364_v6, 2  ;;  %v2458_v17 = vrot.slane %v2365_v56, 2  ;;  %v2597_v36 = vmul.f32 %v9277_v55, %v8666_v7  ;;  %v2235_v2 = vsel %vm1257_vm2, %v2233_v51, %v2234_v62  ;;  %v9504_v51 = vld [vmem:[%s12989_s2 + $0xc] ss:$0 sm:$0xff] }
 0x19f   : > { %v2237_v41 = vsel %vm1257_vm2, %v2234_v62, %v2236_v12  ;;  %v2598_v45 = vmul.f32 %v9277_v55, %v8668_v1  ;;  %v2599_v52 = vmul.f32 %v9277_v55, %v8670_v8  ;;  %v2328_v53 = vadd.f32 %v2235_v2, %v2099_v38 }
 0x1a0   : > { %v2329_v35 = vadd.f32 %v2237_v41, %v2100_v61  ;;  %v2459_v31 = vsel %vm2447_vm3, %v2457_v3, %v2458_v17  ;;  %v2460_v9 = vrot.slane %v2366_v19, 2  ;;  %v2697_v22 = vrot.slane %v2597_v36, 2 }
 0x1a1   : > { %v2698_v28 = vrot.slane %v2598_v45, 2  ;;  %v2700_v30 = vrot.slane %v2599_v52, 2  ;;  %v2840_v59 = vmul.f32 %v9504_v51, %v8649_v43  ;;  %v2558_v56 = vadd.f32 %v2459_v31, %v2328_v53  ;;  %v9529_v31 = vld [vmem:[%s12989_s2 + $0x16] ss:$0 sm:$0xff] }
 0x1a2   : > { %v2461_v6 = vsel %vm2447_vm3, %v2458_v17, %v2460_v9  ;;  %v2841_v38 = vmul.f32 %v9504_v51, %v8651_v50  ;;  %v2842_v61 = vmul.f32 %v9504_v51, %v8653_v32  ;;  %v9518_v17 = vld [vmem:[%s12989_s2 + $0x11] ss:$0 sm:$0xff]  ;;  %v3327_v9 = vmul.f32 %v9529_v31, %v13102_v39 }
 0x1a3   : > { %v2559_v62 = vadd.f32 %v2461_v6, %v2329_v35  ;;  %v2699_v12 = vsel %vm2447_vm3, %v2697_v22, %v2698_v28  ;;  %v2701_v19 = vsel %vm2447_vm3, %v2698_v28, %v2700_v30  ;;  %v2942_v3 = vrot.slane %v2840_v59, 2 }
 0x1a4   : > { %v2800_v36 = vadd.f32 %v2699_v12, %v2558_v56  ;;  %v2943_v2 = vrot.slane %v2841_v38, 2  ;;  %v2945_v41 = vrot.slane %v2842_v61, 2  ;;  %v3085_v45 = vmul.f32 %v9518_v17, %v8710_v34 }
 0x1a5   : > { %v2801_v52 = vadd.f32 %v2701_v19, %v2559_v62  ;;  %v3086_v53 = vmul.f32 %v9518_v17, %v8712_v26  ;;  %v3087_v35 = vmul.f32 %v9518_v17, %v8714_v4  ;;  %v3328_v59 = vmul.f32 %v9529_v31, %v13103_v60 }
 0x1a6   : > { %v2944_v22 = vsel %vm2447_vm3, %v2942_v3, %v2943_v2  ;;  %v2946_v28 = vsel %vm2447_vm3, %v2943_v2, %v2945_v41  ;;  %v3185_v30 = vrot.slane %v3085_v45, 2  ;;  %v3329_v62 = vmul.f32 %v9529_v31, %v13104_v44 }
 0x1a7   : > { %v3045_v6 = vadd.f32 %v2944_v22, %v2800_v36  ;;  %v3046_v56 = vadd.f32 %v2946_v28, %v2801_v52  ;;  %v3186_v38 = vrot.slane %v3086_v53, 2  ;;  %v3188_v61 = vrot.slane %v3087_v35, 2 }
 0x1a8   : > { %v3421_v12 = vrot.slane %v3327_v9, 2  ;;  %v3422_v19 = vrot.slane %v3328_v59, 2  ;;  %v3552_v10 = vmul.f32 %v9313_v33, %v8585_v46  ;;  %v3553_v41 = vmul.f32 %v9313_v33, %v8587_v49 }
 0x1a9   : > { %v3187_v3 = vsel %vm2447_vm3, %v3185_v30, %v3186_v38  ;;  %v3189_v2 = vsel %vm2447_vm3, %v3186_v38, %v3188_v61  ;;  %v3554_v36 = vmul.f32 %v9313_v33, %v8598_v54  ;;  %v3424_v35 = vrot.slane %v3329_v62, 2 }
 0x1aa   : > { %v3287_v45 = vadd.f32 %v3187_v3, %v3045_v6  ;;  %v3288_v52 = vadd.f32 %v3189_v2, %v3046_v56  ;;  %v3423_v53 = vsel %vm2447_vm3, %v3421_v12, %v3422_v19  ;;  %v3645_v9 = vrot.slane %v3552_v10, 3 }
 0x1ab   : > { %v3646_v22 = vrot.slane %v3553_v41, 3  ;;  %v3648_v28 = vrot.slane %v3554_v36, 3  ;;  %v3785_v59 = vmul.f32 %v9325_v57, %v8666_v7  ;;  %v3425_v30 = vsel %vm2447_vm3, %v3422_v19, %v3424_v35  ;;  %v9560_v19 = vld [vmem:[%s12989_s2 + $0xd] ss:$0 sm:$0xff] }
 0x1ac   : > { %v3516_v38 = vadd.f32 %v3423_v53, %v3287_v45  ;;  %v3786_v61 = vmul.f32 %v9325_v57, %v8668_v1  ;;  %v3787_v5 = vmul.f32 %v9325_v57, %v8670_v8  ;;  %v3517_v6 = vadd.f32 %v3425_v30, %v3288_v52 }
 0x1ad   : > { %v3647_v56 = vsel %vm3635_vm4, %v3645_v9, %v3646_v22  ;;  %v3649_v62 = vsel %vm3635_vm4, %v3646_v22, %v3648_v28  ;;  %v3885_v10 = vrot.slane %v3785_v59, 3  ;;  %v4028_v41 = vmul.f32 %v9560_v19, %v8649_v43 }
 0x1ae   : > { %v3746_v12 = vadd.f32 %v3647_v56, %v3516_v38  ;;  %v3886_v3 = vrot.slane %v3786_v61, 3  ;;  %v3888_v2 = vrot.slane %v3787_v5, 3  ;;  %v3747_v36 = vadd.f32 %v3649_v62, %v3517_v6  ;;  %v9577_v61 = vld [vmem:[%s12989_s2 + $0x12] ss:$0 sm:$0xff] }
 0x1af   : > { %v4029_v45 = vmul.f32 %v9560_v19, %v8651_v50  ;;  %v4030_v52 = vmul.f32 %v9560_v19, %v8653_v32  ;;  %v4273_v53 = vmul.f32 %v9032_v16, %v8710_v34  ;;  %v4130_v9 = vrot.slane %v4028_v41, 3 }
 0x1b0   : > { %v3887_v5 = vsel %vm3635_vm4, %v3885_v10, %v3886_v3  ;;  %v3889_v35 = vsel %vm3635_vm4, %v3886_v3, %v3888_v2  ;;  %v4274_v22 = vmul.f32 %v9032_v16, %v8712_v26  ;;  %v4275_v6 = vmul.f32 %v9577_v61, %v8714_v4 }
 0x1b1   : > { %v3988_v28 = vadd.f32 %v3887_v5, %v3746_v12  ;;  %v3989_v59 = vadd.f32 %v3889_v35, %v3747_v36  ;;  %v4131_v30 = vrot.slane %v4029_v45, 3  ;;  %v4133_v38 = vrot.slane %v4030_v52, 3 }
 0x1b2   : > { %v4373_v56 = vrot.slane %v4273_v53, 3  ;;  %v4374_v62 = vrot.slane %v4274_v22, 3  ;;  %v4515_v10 = vmul.f32 %v9065_v40, %v13102_v39  ;;  %v4516_v12 = vmul.f32 %v9065_v40, %v13103_v60 }
 0x1b3   : > { %v4132_v3 = vsel %vm3635_vm4, %v4130_v9, %v4131_v30  ;;  %v4134_v16 = vsel %vm3635_vm4, %v4131_v30, %v4133_v38  ;;  %v4517_v2 = vmul.f32 %v9065_v40, %v13104_v44  ;;  %v4376_v52 = vrot.slane %v4275_v6, 3 }
 0x1b4   : > { %v4233_v41 = vadd.f32 %v4132_v3, %v3988_v28  ;;  %v4234_v36 = vadd.f32 %v4134_v16, %v3989_v59  ;;  %v4375_v45 = vsel %vm3635_vm4, %v4373_v56, %v4374_v62  ;;  %v4609_v53 = vrot.slane %v4515_v10, 3 }
 0x1b5   : > { %v4610_v5 = vrot.slane %v4516_v12, 3  ;;  %v4612_v35 = vrot.slane %v4517_v2, 3  ;;  %v4740_v22 = vmul.f32 %v9363_v14, %v8585_v46  ;;  %v4377_v9 = vsel %vm3635_vm4, %v4374_v62, %v4376_v52 }
 0x1b6   : > { %v4475_v30 = vadd.f32 %v4375_v45, %v4233_v41  ;;  %v4741_v38 = vmul.f32 %v9363_v14, %v8587_v49  ;;  %v4742_v40 = vmul.f32 %v9363_v14, %v8598_v54  ;;  %v4476_v28 = vadd.f32 %v4377_v9, %v4234_v36 }
 0x1b7   : > { %v4611_v59 = vsel %vm3635_vm4, %v4609_v53, %v4610_v5  ;;  %v4613_v6 = vsel %vm3635_vm4, %v4610_v5, %v4612_v35  ;;  %v4833_v56 = vrot.slane %v4740_v22, 4  ;;  %v4973_v46 = vmul.f32 %v9141_v24, %v8666_v7 }
 0x1b8   : > { %v4704_v10 = vadd.f32 %v4611_v59, %v4475_v30  ;;  %v4834_v3 = vrot.slane %v4741_v38, 4  ;;  %v4836_v16 = vrot.slane %v4742_v40, 4  ;;  %v4705_v62 = vadd.f32 %v4613_v6, %v4476_v28 }
 0x1b9   : > { %v4974_v12 = vmul.f32 %v9141_v24, %v8668_v1  ;;  %v4975_v49 = vmul.f32 %v9141_v24, %v8670_v8  ;;  %v5216_v54 = vmul.f32 %v9088_v25, %v8649_v43  ;;  %v5073_v36 = vrot.slane %v4973_v46, 4 }
 0x1ba   : > { %v4835_v2 = vsel %vm4823_vm5, %v4833_v56, %v4834_v3  ;;  %v4837_v41 = vsel %vm4823_vm5, %v4834_v3, %v4836_v16  ;;  %v5217_v45 = vmul.f32 %v9088_v25, %v8651_v50  ;;  %v5218_v22 = vmul.f32 %v9088_v25, %v8653_v32 }
 0x1bb   : > { %v4934_v52 = vadd.f32 %v4835_v2, %v4704_v10  ;;  %v4935_v53 = vadd.f32 %v4837_v41, %v4705_v62  ;;  %v5074_v5 = vrot.slane %v4974_v12, 4  ;;  %v5076_v35 = vrot.slane %v4975_v49, 4 }
 0x1bc   : > { %v5318_v9 = vrot.slane %v5216_v54, 4  ;;  %v5319_v24 = vrot.slane %v5217_v45, 4  ;;  %v5461_v30 = vmul.f32 %v9093_v15, %v8710_v34  ;;  %v5462_v28 = vmul.f32 %v9093_v15, %v8712_v26 }
 0x1bd   : > { %v5075_v38 = vsel %vm4823_vm5, %v5073_v36, %v5074_v5  ;;  %v5077_v40 = vsel %vm4823_vm5, %v5074_v5, %v5076_v35  ;;  %v5463_v59 = vmul.f32 %v9093_v15, %v8714_v4  ;;  %v5321_v25 = vrot.slane %v5218_v22, 4 }
 0x1be   : > { %v5176_v6 = vadd.f32 %v5075_v38, %v4934_v52  ;;  %v5177_v56 = vadd.f32 %v5077_v40, %v4935_v53  ;;  %v5320_v10 = vsel %vm4823_vm5, %v5318_v9, %v5319_v24  ;;  %v5561_v3 = vrot.slane %v5461_v30, 4 }
 0x1bf   : > { %v5562_v16 = vrot.slane %v5462_v28, 4  ;;  %v5564_v46 = vrot.slane %v5463_v59, 4  ;;  %v5703_v62 = vmul.f32 %v9124_v20, %v13102_v39  ;;  %v5322_v12 = vsel %vm4823_vm5, %v5319_v24, %v5321_v25  ;;  %v13105_v25 = vld [vmem:[#allocation21_spill] sm:$0xff] }
 0x1c0   : > { %v5421_v49 = vadd.f32 %v5320_v10, %v5176_v6  ;;  %v5704_v54 = vmul.f32 %v9124_v20, %v13103_v60  ;;  %v5705_v15 = vmul.f32 %v9124_v20, %v13104_v44  ;;  %v5422_v2 = vadd.f32 %v5322_v12, %v5177_v56 }
 0x1c1   : > { %v5563_v41 = vsel %vm4823_vm5, %v5561_v3, %v5562_v16  ;;  %v5565_v36 = vsel %vm4823_vm5, %v5562_v16, %v5564_v46  ;;  %v5797_v45 = vrot.slane %v5703_v62, 4  ;;  %v818_v35 = vmul.f32 %v9173_v11, %v8666_v7  ;;  %v13106_v16 = vld [vmem:[#allocation22_spill] sm:$0xff] }
 0x1c2   : > { %v5663_v52 = vadd.f32 %v5563_v41, %v5421_v49  ;;  %v5798_v53 = vrot.slane %v5704_v54, 4  ;;  %v5800_v5 = vrot.slane %v5705_v15, 4  ;;  %v5664_v22 = vadd.f32 %v5565_v36, %v5422_v2 }
 0x1c3   : > { %v819_v9 = vmul.f32 %v9173_v11, %v8668_v1  ;;  %v887_v24 = vmul.f32 %v9183_v27, %v8649_v43  ;;  %v888_v20 = vmul.f32 %v9183_v27, %v8651_v50  ;;  %v958_v40 = vmul.f32 %v9194_v58, %v8710_v34 }
 0x1c4   : > { %v5799_v30 = vsel %vm4823_vm5, %v5797_v45, %v5798_v53  ;;  %v5801_v38 = vsel %vm4823_vm5, %v5798_v53, %v5800_v5  ;;  %v959_v28 = vmul.f32 %v9194_v58, %v8712_v26  ;;  %v1027_v10 = vmul.f32 %v9203_v63, %v13102_v39 }
 0x1c5   : > { %v5892_v59 = vadd.f32 %v5799_v30, %v5663_v52  ;;  %v5893_v6 = vadd.f32 %v5801_v38, %v5664_v22  ;;  %v919_v56 = vadd.f32 %v887_v24, %v818_v35  ;;  %v920_v11 = vadd.f32 %v888_v20, %v819_v9 }
 0x1c6   : > { %v1028_v27 = vmul.f32 %v9203_v63, %v13103_v60  ;;  %v1096_v3 = vmul.f32 %v9427_v0, %v13105_v25  ;;  %v1097_v46 = vmul.f32 %v9427_v0, %v13106_v16  ;;  %v1177_v58 = vmul.f32 %v9216_v37, %v8666_v7 }
 0x1c7   : > { %v5921_v62 = vpack.c.bf16 %v5893_v6, %v5892_v59  ;;  %v990_v12 = vadd.f32 %v958_v40, %v919_v56  ;;  %v991_v49 = vadd.f32 %v959_v28, %v920_v11  ;;  %v1178_v54 = vmul.f32 %v9216_v37, %v8668_v1 }
 0x1c8   : > { %v1179_v15 = vmul.f32 %v9216_v37, %v8670_v8  ;;  %v1411_v63 = vmul.f32 %v9227_v48, %v8649_v43  ;;  %v1412_v2 = vmul.f32 %v9227_v48, %v8651_v50  ;;  %v1272_v45 = vrot.slane %v1177_v58, 1 }
 0x1c9   : > { %7851 = vmatmul.mubr.bf16.gmra.mxu1 %v5921_v62  ;;  %v1059_v41 = vadd.f32 %v1027_v10, %v990_v12  ;;  %v1060_v36 = vadd.f32 %v1028_v27, %v991_v49  ;;  %v1413_v52 = vmul.f32 %v9227_v48, %v8653_v32  ;;  %v1273_v53 = vrot.slane %v1178_v54, 1 }
 0x1ca   : > { %v1275_v5 = vrot.slane %v1179_v15, 1  ;;  %v1513_v35 = vrot.slane %v1411_v63, 1  ;;  %v1514_v22 = vrot.slane %v1412_v2, 1  ;;  %v1655_v20 = vmul.f32 %v9449_v47, %v8710_v34 }
 0x1cb   : > { %v1126_v9 = vadd.f32 %v1096_v3, %v1059_v41  ;;  %v1127_v24 = vadd.f32 %v1097_v46, %v1060_v36  ;;  %v1516_v37 = vrot.slane %v1413_v52, 1  ;;  %v1274_v30 = vsel %vm1257_vm2, %v1272_v45, %v1273_v53 }
 0x1cc   : > { %v1276_v38 = vsel %vm1257_vm2, %v1273_v53, %v1275_v5  ;;  %v1515_v40 = vsel %vm1257_vm2, %v1513_v35, %v1514_v22  ;;  %v1656_v28 = vmul.f32 %v9449_v47, %v8712_v26  ;;  %v1657_v56 = vmul.f32 %v9449_v47, %v8714_v4  ;;  %v13107_v5 = vld [vmem:[#allocation23_spill] sm:$0xff] }
 0x1cd   : > { %v1370_v48 = vadd.f32 %v1274_v30, %v1126_v9  ;;  %v1371_v59 = vadd.f32 %v1276_v38, %v1127_v24  ;;  %v1517_v6 = vsel %vm1257_vm2, %v1514_v22, %v1516_v37  ;;  %v1759_v11 = vrot.slane %v1655_v20, 1 }
 0x1ce   : > { %v1760_v10 = vrot.slane %v1656_v28, 1  ;;  %v1900_v27 = vmul.f32 %v9463_v23, %v13102_v39  ;;  %v1901_v3 = vmul.f32 %v9463_v23, %v13103_v60  ;;  %v1762_v12 = vrot.slane %v1657_v56, 1 }
 0x1cf   : > { %v1613_v46 = vadd.f32 %v1515_v40, %v1370_v48  ;;  %v1614_v62 = vadd.f32 %v1517_v6, %v1371_v59  ;;  %v1902_v49 = vmul.f32 %v9463_v23, %v13104_v44  ;;  %v2142_v63 = vmul.f32 %v9475_v21, %v13105_v25 }
 0x1d0   : > { %v1761_v58 = vsel %vm1257_vm2, %v1759_v11, %v1760_v10  ;;  %v2002_v54 = vrot.slane %v1900_v27, 1  ;;  %v2003_v15 = vrot.slane %v1901_v3, 1  ;;  %v1763_v2 = vsel %vm1257_vm2, %v1760_v10, %v1762_v12 }
 0x1d1   : > { %v1859_v41 = vadd.f32 %v1761_v58, %v1613_v46  ;;  %v2005_v36 = vrot.slane %v1902_v49, 1  ;;  %v2143_v45 = vmul.f32 %v9475_v21, %v13106_v16  ;;  %v1860_v52 = vadd.f32 %v1763_v2, %v1614_v62 }
 0x1d2   : > { %v2004_v53 = vsel %vm1257_vm2, %v2002_v54, %v2003_v15  ;;  %v2144_v35 = vmul.f32 %v9475_v21, %v13107_v5  ;;  %v2238_v22 = vrot.slane %v2142_v63, 1  ;;  %v2367_v20 = vmul.f32 %v9263_v18, %v8666_v7 }
 0x1d3   : > { %v2006_v9 = vsel %vm1257_vm2, %v2003_v15, %v2005_v36  ;;  %v2101_v24 = vadd.f32 %v2004_v53, %v1859_v41  ;;  %v2239_v37 = vrot.slane %v2143_v45, 1  ;;  %v2368_v40 = vmul.f32 %v9263_v18, %v8668_v1 }
 0x1d4   : > { %v2102_v30 = vadd.f32 %v2006_v9, %v1860_v52  ;;  %v2241_v38 = vrot.slane %v2144_v35, 1  ;;  %v2369_v28 = vmul.f32 %v9263_v18, %v8670_v8  ;;  %v2462_v59 = vrot.slane %v2367_v20, 2 }
 0x1d5   : > { %v2240_v48 = vsel %vm1257_vm2, %v2238_v22, %v2239_v37  ;;  %v2600_v6 = vmul.f32 %v9277_v55, %v8649_v43  ;;  %v2601_v56 = vmul.f32 %v9277_v55, %v8651_v50  ;;  %v2463_v27 = vrot.slane %v2368_v40, 2 }
 0x1d6   : > { %v2242_v11 = vsel %vm1257_vm2, %v2239_v37, %v2241_v38  ;;  %v2330_v10 = vadd.f32 %v2240_v48, %v2101_v24  ;;  %v2465_v3 = vrot.slane %v2369_v28, 2  ;;  %v2602_v62 = vmul.f32 %v9277_v55, %v8653_v32 }
 0x1d7   : > { %v2331_v46 = vadd.f32 %v2242_v11, %v2102_v30  ;;  %v2702_v12 = vrot.slane %v2600_v6, 2  ;;  %v2703_v18 = vrot.slane %v2601_v56, 2  ;;  %v2464_v49 = vsel %vm2447_vm3, %v2462_v59, %v2463_v27 }
 0x1d8   : > { %v2466_v58 = vsel %vm2447_vm3, %v2463_v27, %v2465_v3  ;;  %v2843_v54 = vmul.f32 %v9504_v51, %v8710_v34  ;;  %v2844_v15 = vmul.f32 %v9504_v51, %v8712_v26  ;;  %v2560_v63 = vadd.f32 %v2464_v49, %v2330_v10 }
 0x1d9   : > { %v2561_v2 = vadd.f32 %v2466_v58, %v2331_v46  ;;  %v2704_v41 = vsel %vm2447_vm3, %v2702_v12, %v2703_v18  ;;  %v2705_v36 = vrot.slane %v2602_v62, 2  ;;  %v2845_v55 = vmul.f32 %v9504_v51, %v8714_v4 }
 0x1da   : > { %v2947_v45 = vrot.slane %v2843_v54, 2  ;;  %v2948_v52 = vrot.slane %v2844_v15, 2  ;;  %v3088_v53 = vmul.f32 %v9518_v17, %v13102_v39  ;;  %v2802_v22 = vadd.f32 %v2704_v41, %v2560_v63 }
 0x1db   : > { %v2706_v35 = vsel %vm2447_vm3, %v2703_v18, %v2705_v36  ;;  %v3089_v9 = vmul.f32 %v9518_v17, %v13103_v60  ;;  %v3090_v24 = vmul.f32 %v9518_v17, %v13104_v44  ;;  %v2950_v30 = vrot.slane %v2845_v55, 2 }
 0x1dc   : > { %v2803_v37 = vadd.f32 %v2706_v35, %v2561_v2  ;;  %v2949_v20 = vsel %vm2447_vm3, %v2947_v45, %v2948_v52  ;;  %v3190_v38 = vrot.slane %v3088_v53, 2  ;;  %v3330_v59 = vmul.f32 %v9529_v31, %v13105_v25 }
 0x1dd   : > { %v3047_v40 = vadd.f32 %v2949_v20, %v2802_v22  ;;  %v3191_v28 = vrot.slane %v3089_v9, 2  ;;  %v3193_v48 = vrot.slane %v3090_v24, 2  ;;  %v2951_v6 = vsel %vm2447_vm3, %v2948_v52, %v2950_v30 }
 0x1de   : > { %v3331_v56 = vmul.f32 %v9529_v31, %v13106_v16  ;;  %v3332_v11 = vmul.f32 %v9529_v31, %v13107_v5  ;;  %v3555_v10 = vmul.f32 %v9313_v33, %v8666_v7  ;;  %v3048_v27 = vadd.f32 %v2951_v6, %v2803_v37 }
 0x1df   : > { %v3192_v3 = vsel %vm2447_vm3, %v3190_v38, %v3191_v28  ;;  %v3194_v46 = vsel %vm2447_vm3, %v3191_v28, %v3193_v48  ;;  %v3426_v62 = vrot.slane %v3330_v59, 2  ;;  %v3556_v58 = vmul.f32 %v9313_v33, %v8668_v1 }
 0x1e0   : > { %v3289_v12 = vadd.f32 %v3192_v3, %v3047_v40  ;;  %v3427_v18 = vrot.slane %v3331_v56, 2  ;;  %v3429_v49 = vrot.slane %v3332_v11, 2  ;;  %v3290_v54 = vadd.f32 %v3194_v46, %v3048_v27 }
 0x1e1   : > { %v3557_v15 = vmul.f32 %v9313_v33, %v8670_v8  ;;  %v3650_v63 = vrot.slane %v3555_v10, 3  ;;  %v3788_v2 = vmul.f32 %v9325_v57, %v8649_v43  ;;  %v3651_v55 = vrot.slane %v3556_v58, 3 }
 0x1e2   : > { %v3428_v41 = vsel %vm2447_vm3, %v3426_v62, %v3427_v18  ;;  %v3430_v36 = vsel %vm2447_vm3, %v3427_v18, %v3429_v49  ;;  %v3789_v45 = vmul.f32 %v9325_v57, %v8651_v50  ;;  %v3790_v22 = vmul.f32 %v9325_v57, %v8653_v32  ;;  %v9765_v49 = vld [vmem:[%s12989_s2 + $0x17] ss:$0 sm:$0xff] }
 0x1e3   : > { %v3518_v52 = vadd.f32 %v3428_v41, %v3289_v12  ;;  %v3519_v53 = vadd.f32 %v3430_v36, %v3290_v54  ;;  %v3653_v35 = vrot.slane %v3557_v15, 3  ;;  %v3652_v33 = vsel %vm3635_vm4, %v3650_v63, %v3651_v55 }
 0x1e4   : > { %v3890_v9 = vrot.slane %v3788_v2, 3  ;;  %v3891_v24 = vrot.slane %v3789_v45, 3  ;;  %v4031_v37 = vmul.f32 %v9560_v19, %v8710_v34  ;;  %v3893_v38 = vrot.slane %v3790_v22, 3 }
 0x1e5   : > { %v3654_v20 = vsel %vm3635_vm4, %v3651_v55, %v3653_v35  ;;  %v3748_v30 = vadd.f32 %v3652_v33, %v3518_v52  ;;  %v4032_v40 = vmul.f32 %v9560_v19, %v8712_v26  ;;  %v4033_v57 = vmul.f32 %v9560_v19, %v8714_v4 }
 0x1e6   : > { %v3749_v28 = vadd.f32 %v3654_v20, %v3519_v53  ;;  %v3892_v48 = vsel %vm3635_vm4, %v3890_v9, %v3891_v24  ;;  %v4135_v59 = vrot.slane %v4031_v37, 3  ;;  %v3894_v6 = vsel %vm3635_vm4, %v3891_v24, %v3893_v38 }
 0x1e7   : > { %v3990_v56 = vadd.f32 %v3892_v48, %v3748_v30  ;;  %v4136_v11 = vrot.slane %v4032_v40, 3  ;;  %v4276_v10 = vmul.f32 %v9577_v61, %v13102_v39  ;;  %v4138_v3 = vrot.slane %v4033_v57, 3 }
 0x1e8   : > { %v3991_v27 = vadd.f32 %v3894_v6, %v3749_v28  ;;  %v4277_v46 = vmul.f32 %v9577_v61, %v13103_v60  ;;  %v4278_v62 = vmul.f32 %v9577_v61, %v13104_v44  ;;  %v4518_v58 = vmul.f32 %v9765_v49, %v13105_v25  ;;  %v9786_v28 = vld [vmem:[%s12989_s2 + $0x9] ss:$0 sm:$0xff] }
 0x1e9   : > { %v4137_v12 = vsel %vm3635_vm4, %v4135_v59, %v4136_v11  ;;  %v4378_v18 = vrot.slane %v4276_v10, 3  ;;  %v4519_v54 = vmul.f32 %v9765_v49, %v13106_v16  ;;  %v4139_v15 = vsel %vm3635_vm4, %v4136_v11, %v4138_v3  ;;  %v9799_v3 = vld [vmem:[%s12989_s2 + $0xe] ss:$0 sm:$0xff] }
 0x1ea   : > { %v4235_v63 = vadd.f32 %v4137_v12, %v3990_v56  ;;  %v4379_v2 = vrot.slane %v4277_v46, 3  ;;  %v4381_v41 = vrot.slane %v4278_v62, 3  ;;  %v4236_v36 = vadd.f32 %v4139_v15, %v3991_v27 }
 0x1eb   : > { %v4520_v55 = vmul.f32 %v9765_v49, %v13107_v5  ;;  %v4614_v45 = vrot.slane %v4518_v58, 3  ;;  %v4615_v52 = vrot.slane %v4519_v54, 3  ;;  %v4743_v22 = vmul.f32 %v9363_v14, %v8666_v7  ;;  %v9811_v58 = vld [vmem:[%s12989_s2 + $0x13] ss:$0 sm:$0xff] }
 0x1ec   : > { %v4380_v53 = vsel %vm3635_vm4, %v4378_v18, %v4379_v2  ;;  %v4382_v35 = vsel %vm3635_vm4, %v4379_v2, %v4381_v41  ;;  %v4744_v33 = vmul.f32 %v9363_v14, %v8668_v1  ;;  %v4745_v30 = vmul.f32 %v9363_v14, %v8670_v8 }
 0x1ed   : > { %v4477_v9 = vadd.f32 %v4380_v53, %v4235_v63  ;;  %v4478_v24 = vadd.f32 %v4382_v35, %v4236_v36  ;;  %v4616_v37 = vsel %vm3635_vm4, %v4614_v45, %v4615_v52  ;;  %v4617_v20 = vrot.slane %v4520_v55, 3 }
 0x1ee   : > { %v4838_v38 = vrot.slane %v4743_v22, 4  ;;  %v4839_v40 = vrot.slane %v4744_v33, 4  ;;  %v4976_v7 = vmul.f32 %v9786_v28, %v8649_v43  ;;  %v4977_v57 = vmul.f32 %v9786_v28, %v8651_v50  ;;  %v9824_v33 = vld [vmem:[%s12989_s2 + $0x18] ss:$0 sm:$0xff] }
 0x1ef   : > { %v4618_v1 = vsel %vm3635_vm4, %v4615_v52, %v4617_v20  ;;  %v4706_v48 = vadd.f32 %v4616_v37, %v4477_v9  ;;  %v4978_v59 = vmul.f32 %v9786_v28, %v8653_v32  ;;  %v4841_v6 = vrot.slane %v4745_v30, 4 }
 0x1f0   : > { %v4707_v8 = vadd.f32 %v4618_v1, %v4478_v24  ;;  %v4840_v14 = vsel %vm4823_vm5, %v4838_v38, %v4839_v40  ;;  %v5078_v56 = vrot.slane %v4976_v7, 4  ;;  %v5079_v10 = vrot.slane %v4977_v57, 4 }
 0x1f1   : > { %v4936_v11 = vadd.f32 %v4840_v14, %v4706_v48  ;;  %v5081_v27 = vrot.slane %v4978_v59, 4  ;;  %v5219_v46 = vmul.f32 %v9799_v3, %v8710_v34  ;;  %v4842_v62 = vsel %vm4823_vm5, %v4839_v40, %v4841_v6 }
 0x1f2   : > { %v5220_v12 = vmul.f32 %v9799_v3, %v8712_v26  ;;  %v5221_v18 = vmul.f32 %v9799_v3, %v8714_v4  ;;  %v5464_v54 = vmul.f32 %v9811_v58, %v13102_v39  ;;  %v4937_v15 = vadd.f32 %v4842_v62, %v4707_v8  ;;  %v9838_v8 = vld [vmem:[%s12989_s2] ss:$0 sm:$0xff]  ;;  %v9849_v62 = vld [vmem:[%s12989_s2 + $0x5] ss:$0 sm:$0xff] }
 0x1f3   : > { %v5080_v63 = vsel %vm4823_vm5, %v5078_v56, %v5079_v10  ;;  %v5082_v2 = vsel %vm4823_vm5, %v5079_v10, %v5081_v27  ;;  %v5323_v41 = vrot.slane %v5219_v46, 4  ;;  %v5465_v52 = vmul.f32 %v9811_v58, %v13103_v60 }
 0x1f4   : > { %v5178_v36 = vadd.f32 %v5080_v63, %v4936_v11  ;;  %v5324_v55 = vrot.slane %v5220_v12, 4  ;;  %v5326_v45 = vrot.slane %v5221_v18, 4  ;;  %v5179_v53 = vadd.f32 %v5082_v2, %v4937_v15  ;;  %v9859_v63 = vld [vmem:[%s12989_s2 + $0xa] ss:$0 sm:$0xff] }
 0x1f5   : > { %v5466_v35 = vmul.f32 %v9811_v58, %v13104_v44  ;;  %v5566_v22 = vrot.slane %v5464_v54, 4  ;;  %v5706_v9 = vmul.f32 %v9824_v33, %v13105_v25  ;;  %v5567_v20 = vrot.slane %v5465_v52, 4  ;;  %v9868_v52 = vld [vmem:[%s12989_s2 + $0xf] ss:$0 sm:$0xff] }
 0x1f6   : > { %v5325_v24 = vsel %vm4823_vm5, %v5323_v41, %v5324_v55  ;;  %v5327_v37 = vsel %vm4823_vm5, %v5324_v55, %v5326_v45  ;;  %v5707_v30 = vmul.f32 %v9824_v33, %v13106_v16  ;;  %v5708_v1 = vmul.f32 %v9824_v33, %v13107_v5 }
 0x1f7   : > { %v5423_v38 = vadd.f32 %v5325_v24, %v5178_v36  ;;  %v5424_v40 = vadd.f32 %v5327_v37, %v5179_v53  ;;  %v5569_v7 = vrot.slane %v5466_v35, 4  ;;  %v5568_v48 = vsel %vm4823_vm5, %v5566_v22, %v5567_v20  ;;  %v13108_v22 = vld [vmem:[#allocation18_spill] sm:$0xff]  ;;  %v13109_v24 = vld [vmem:[#allocation19_spill] sm:$0xff] }
 0x1f8   : > { %v5802_v57 = vrot.slane %v5706_v9, 4  ;;  %v5803_v59 = vrot.slane %v5707_v30, 4  ;;  %v820_v14 = vmul.f32 %v9838_v8, %v8649_v43  ;;  %v5805_v11 = vrot.slane %v5708_v1, 4 }
 0x1f9   : > { %v5570_v6 = vsel %vm4823_vm5, %v5567_v20, %v5569_v7  ;;  %v5665_v56 = vadd.f32 %v5568_v48, %v5423_v38  ;;  %v821_v10 = vmul.f32 %v9838_v8, %v8651_v50  ;;  %v889_v12 = vmul.f32 %v9849_v62, %v8710_v34  ;;  %v9881_v20 = vld [vmem:[%s12989_s2 + $0x1] ss:$0 sm:$0xff] }
 0x1fa   : > { %v5666_v27 = vadd.f32 %v5570_v6, %v5424_v40  ;;  %v5804_v46 = vsel %vm4823_vm5, %v5802_v57, %v5803_v59  ;;  %v890_v18 = vmul.f32 %v9849_v62, %v8712_v26  ;;  %v5806_v54 = vsel %vm4823_vm5, %v5803_v59, %v5805_v11 }
 0x1fb   : > { %v5894_v15 = vadd.f32 %v5804_v46, %v5665_v56  ;;  %v960_v2 = vmul.f32 %v9859_v63, %v13102_v39  ;;  %v961_v41 = vmul.f32 %v9859_v63, %v13103_v60  ;;  %v921_v55 = vadd.f32 %v889_v12, %v820_v14 }
 0x1fc   : > { %v5895_v36 = vadd.f32 %v5806_v54, %v5666_v27  ;;  %v922_v45 = vadd.f32 %v890_v18, %v821_v10  ;;  %v1029_v53 = vmul.f32 %v9868_v52, %v13105_v25  ;;  %v1030_v35 = vmul.f32 %v9868_v52, %v13106_v16 }
 0x1fd   : > { %v1098_v9 = vmul.f32 %v9427_v0, %v13108_v22  ;;  %v1099_v37 = vmul.f32 %v9427_v0, %v13109_v24  ;;  %v1180_v30 = vmul.f32 %v9881_v20, %v8649_v43  ;;  %v992_v40 = vadd.f32 %v960_v2, %v921_v55  ;;  %v9892_v0 = vld [vmem:[%s12989_s2 + $0x6] ss:$0 sm:$0xff] }
 0x1fe   : > { %v5922_v38 = vpack.c.bf16 %v5895_v36, %v5894_v15  ;;  %v993_v7 = vadd.f32 %v961_v41, %v922_v45  ;;  %v1181_v1 = vmul.f32 %v9881_v20, %v8651_v50  ;;  %v1182_v48 = vmul.f32 %v9881_v20, %v8653_v32 }
 0x1ff   : > { %v1277_v57 = vrot.slane %v1180_v30, 1  ;;  %v1414_v59 = vmul.f32 %v9892_v0, %v8710_v34  ;;  %v1415_v14 = vmul.f32 %v9892_v0, %v8712_v26  ;;  %v1061_v6 = vadd.f32 %v1029_v53, %v992_v40 }
 0x200   : > { %7854 = vmatprep.mubr.bf16.mxu1 %v5922_v38  ;;  %v1062_v56 = vadd.f32 %v1030_v35, %v993_v7  ;;  %v1278_v11 = vrot.slane %v1181_v1, 1  ;;  %v1416_v10 = vmul.f32 %v9892_v0, %v8714_v4  ;;  %v1280_v27 = vrot.slane %v1182_v48, 1 }
 0x201   : > { %v1518_v46 = vrot.slane %v1414_v59, 1  ;;  %v1519_v12 = vrot.slane %v1415_v14, 1  ;;  %v1658_v18 = vmul.f32 %v9449_v47, %v13102_v39  ;;  %v1128_v54 = vadd.f32 %v1098_v9, %v1061_v6 }
 0x202   : > { %v1129_v15 = vadd.f32 %v1099_v37, %v1062_v56  ;;  %v1279_v2 = vsel %vm1257_vm2, %v1277_v57, %v1278_v11  ;;  %v1521_v41 = vrot.slane %v1416_v10, 1  ;;  %v1281_v36 = vsel %vm1257_vm2, %v1278_v11, %v1280_v27 }
 0x203   : > { %v1520_v55 = vsel %vm1257_vm2, %v1518_v46, %v1519_v12  ;;  %v1659_v45 = vmul.f32 %v9449_v47, %v13103_v60  ;;  %v1660_v53 = vmul.f32 %v9449_v47, %v13104_v44  ;;  %v1372_v35 = vadd.f32 %v1279_v2, %v1128_v54  ;;  %v13110_v54 = vld [vmem:[#allocation20_spill] sm:$0xff]  ;;  %v9928_v2 = vld [vmem:[%s12989_s2 + $0x2] ss:$0 sm:$0xff] }
 0x204   : > { %v1373_v30 = vadd.f32 %v1281_v36, %v1129_v15  ;;  %v1522_v38 = vsel %vm1257_vm2, %v1519_v12, %v1521_v41  ;;  %v1764_v40 = vrot.slane %v1658_v18, 1  ;;  %v1903_v7 = vmul.f32 %v9463_v23, %v13105_v25 }
 0x205   : > { %v1765_v9 = vrot.slane %v1659_v45, 1  ;;  %v1767_v37 = vrot.slane %v1660_v53, 1  ;;  %v1904_v1 = vmul.f32 %v9463_v23, %v13106_v16  ;;  %v1615_v48 = vadd.f32 %v1520_v55, %v1372_v35 }
 0x206   : > { %v1616_v57 = vadd.f32 %v1522_v38, %v1373_v30  ;;  %v1905_v59 = vmul.f32 %v9463_v23, %v13107_v5  ;;  %v2145_v47 = vmul.f32 %v9475_v21, %v13108_v22  ;;  %v2007_v56 = vrot.slane %v1903_v7, 1 }
 0x207   : > { %v1766_v14 = vsel %vm1257_vm2, %v1764_v40, %v1765_v9  ;;  %v1768_v6 = vsel %vm1257_vm2, %v1765_v9, %v1767_v37  ;;  %v2008_v11 = vrot.slane %v1904_v1, 1  ;;  %v2146_v12 = vmul.f32 %v9475_v21, %v13109_v24  ;;  %v9941_v37 = vld [vmem:[%s12989_s2 + $0x7] ss:$0 sm:$0xff] }
 0x208   : > { %v1861_v10 = vadd.f32 %v1766_v14, %v1615_v48  ;;  %v1862_v27 = vadd.f32 %v1768_v6, %v1616_v57  ;;  %v2010_v46 = vrot.slane %v1905_v59, 1  ;;  %v2147_v23 = vmul.f32 %v9475_v21, %v13110_v54 }
 0x209   : > { %v2009_v18 = vsel %vm1257_vm2, %v2007_v56, %v2008_v11  ;;  %v2243_v15 = vrot.slane %v2145_v47, 1  ;;  %v2370_v41 = vmul.f32 %v9928_v2, %v8649_v43  ;;  %v2244_v45 = vrot.slane %v2146_v12, 1 }
 0x20a   : > { %v2011_v36 = vsel %vm1257_vm2, %v2008_v11, %v2010_v46  ;;  %v2103_v55 = vadd.f32 %v2009_v18, %v1861_v10  ;;  %v2371_v53 = vmul.f32 %v9928_v2, %v8651_v50  ;;  %v2246_v30 = vrot.slane %v2147_v23, 1 }
 0x20b   : > { %v2104_v35 = vadd.f32 %v2011_v36, %v1862_v27  ;;  %v2372_v21 = vmul.f32 %v9928_v2, %v8653_v32  ;;  %v2467_v38 = vrot.slane %v2370_v41, 2  ;;  %v2245_v40 = vsel %vm1257_vm2, %v2243_v15, %v2244_v45 }
 0x20c   : > { %v2468_v9 = vrot.slane %v2371_v53, 2  ;;  %v2603_v7 = vmul.f32 %v9941_v37, %v8710_v34  ;;  %v2604_v1 = vmul.f32 %v9941_v37, %v8712_v26  ;;  %v2247_v48 = vsel %vm1257_vm2, %v2244_v45, %v2246_v30 }
 0x20d   : > { %v2332_v57 = vadd.f32 %v2245_v40, %v2103_v55  ;;  %v2470_v59 = vrot.slane %v2372_v21, 2  ;;  %v2605_v47 = vmul.f32 %v9941_v37, %v8714_v4  ;;  %v2333_v14 = vadd.f32 %v2247_v48, %v2104_v35 }
 0x20e   : > { %v2469_v6 = vsel %vm2447_vm3, %v2467_v38, %v2468_v9  ;;  %v2707_v56 = vrot.slane %v2603_v7, 2  ;;  %v2708_v11 = vrot.slane %v2604_v1, 2  ;;  %v2846_v12 = vmul.f32 %v9504_v51, %v13102_v39 }
 0x20f   : > { %v2471_v10 = vsel %vm2447_vm3, %v2468_v9, %v2470_v59  ;;  %v2562_v27 = vadd.f32 %v2469_v6, %v2332_v57  ;;  %v2710_v46 = vrot.slane %v2605_v47, 2  ;;  %v2847_v15 = vmul.f32 %v9504_v51, %v13103_v60 }
 0x210   : > { %v2563_v18 = vadd.f32 %v2471_v10, %v2333_v14  ;;  %v2709_v23 = vsel %vm2447_vm3, %v2707_v56, %v2708_v11  ;;  %v2848_v41 = vmul.f32 %v9504_v51, %v13104_v44  ;;  %v2952_v45 = vrot.slane %v2846_v12, 2 }
 0x211   : > { %v2711_v36 = vsel %vm2447_vm3, %v2708_v11, %v2710_v46  ;;  %v2804_v55 = vadd.f32 %v2709_v23, %v2562_v27  ;;  %v3091_v53 = vmul.f32 %v9518_v17, %v13105_v25  ;;  %v2953_v30 = vrot.slane %v2847_v15, 2  ;;  %v9978_v27 = vld [vmem:[%s12989_s2 + $0x3] ss:$0 sm:$0xff] }
 0x212   : > { %v2805_v35 = vadd.f32 %v2711_v36, %v2563_v18  ;;  %v2955_v21 = vrot.slane %v2848_v41, 2  ;;  %v3092_v38 = vmul.f32 %v9518_v17, %v13106_v16  ;;  %v3093_v40 = vmul.f32 %v9518_v17, %v13107_v5 }
 0x213   : > { %v3195_v9 = vrot.slane %v3091_v53, 2  ;;  %v3333_v51 = vmul.f32 %v9529_v31, %v13108_v22  ;;  %v3334_v7 = vmul.f32 %v9529_v31, %v13109_v24  ;;  %v2954_v1 = vsel %vm2447_vm3, %v2952_v45, %v2953_v30 }
 0x214   : > { %v2956_v48 = vsel %vm2447_vm3, %v2953_v30, %v2955_v21  ;;  %v3196_v57 = vrot.slane %v3092_v38, 2  ;;  %v3335_v59 = vmul.f32 %v9529_v31, %v13110_v54  ;;  %v3049_v47 = vadd.f32 %v2954_v1, %v2804_v55  ;;  %v9992_v30 = vld [vmem:[%s12989_s2 + $0x8] ss:$0 sm:$0xff] }
 0x215   : > { %v3050_v14 = vadd.f32 %v2956_v48, %v2805_v35  ;;  %v3198_v6 = vrot.slane %v3093_v40, 2  ;;  %v3431_v56 = vrot.slane %v3333_v51, 2  ;;  %v3432_v11 = vrot.slane %v3334_v7, 2 }
 0x216   : > { %v3197_v17 = vsel %vm2447_vm3, %v3195_v9, %v3196_v57  ;;  %v3434_v10 = vrot.slane %v3335_v59, 2  ;;  %v3558_v46 = vmul.f32 %v9978_v27, %v8649_v43  ;;  %v3559_v31 = vmul.f32 %v9978_v27, %v8651_v50 }
 0x217   : > { %v3199_v12 = vsel %vm2447_vm3, %v3196_v57, %v3198_v6  ;;  %v3291_v18 = vadd.f32 %v3197_v17, %v3049_v47  ;;  %v3560_v23 = vmul.f32 %v9978_v27, %v8653_v32  ;;  %v3433_v41 = vsel %vm2447_vm3, %v3431_v56, %v3432_v11 }
 0x218   : > { %v3292_v15 = vadd.f32 %v3199_v12, %v3050_v14  ;;  %v3435_v36 = vsel %vm2447_vm3, %v3432_v11, %v3434_v10  ;;  %v3655_v55 = vrot.slane %v3558_v46, 3  ;;  %v3656_v53 = vrot.slane %v3559_v31, 3 }
 0x219   : > { %v3520_v45 = vadd.f32 %v3433_v41, %v3291_v18  ;;  %v3658_v35 = vrot.slane %v3560_v23, 3  ;;  %v3791_v21 = vmul.f32 %v9992_v30, %v8710_v34  ;;  %v3792_v40 = vmul.f32 %v9992_v30, %v8712_v26 }
 0x21a   : > { %v3521_v38 = vadd.f32 %v3435_v36, %v3292_v15  ;;  %v3793_v9 = vmul.f32 %v9992_v30, %v8714_v4  ;;  %v4034_v51 = vmul.f32 %v9560_v19, %v13102_v39  ;;  %v3657_v7 = vsel %vm3635_vm4, %v3655_v55, %v3656_v53 }
 0x21b   : > { %v3659_v1 = vsel %vm3635_vm4, %v3656_v53, %v3658_v35  ;;  %v3895_v48 = vrot.slane %v3791_v21, 3  ;;  %v4035_v57 = vmul.f32 %v9560_v19, %v13103_v60  ;;  %v3750_v59 = vadd.f32 %v3657_v7, %v3520_v45 }
 0x21c   : > { %v3751_v47 = vadd.f32 %v3659_v1, %v3521_v38  ;;  %v3896_v14 = vrot.slane %v3792_v40, 3  ;;  %v3898_v6 = vrot.slane %v3793_v9, 3  ;;  %v4036_v56 = vmul.f32 %v9560_v19, %v13104_v44 }
 0x21d   : > { %v4140_v17 = vrot.slane %v4034_v51, 3  ;;  %v4141_v11 = vrot.slane %v4035_v57, 3  ;;  %v4279_v10 = vmul.f32 %v9577_v61, %v13105_v25  ;;  %v4280_v18 = vmul.f32 %v9577_v61, %v13106_v16 }
 0x21e   : > { %v3897_v46 = vsel %vm3635_vm4, %v3895_v48, %v3896_v14  ;;  %v3899_v12 = vsel %vm3635_vm4, %v3896_v14, %v3898_v6  ;;  %v4281_v31 = vmul.f32 %v9577_v61, %v13107_v5  ;;  %v4143_v19 = vrot.slane %v4036_v56, 3 }
 0x21f   : > { %v3992_v23 = vadd.f32 %v3897_v46, %v3750_v59  ;;  %v3993_v15 = vadd.f32 %v3899_v12, %v3751_v47  ;;  %v4142_v41 = vsel %vm3635_vm4, %v4140_v17, %v4141_v11  ;;  %v4383_v36 = vrot.slane %v4279_v10, 3  ;;  %v10029_v59 = vld [vmem:[%s12989_s2 + $0x4] ss:$0 sm:$0xff] }
 0x220   : > { %v4384_v55 = vrot.slane %v4280_v18, 3  ;;  %v4386_v45 = vrot.slane %v4281_v31, 3  ;;  %v4521_v53 = vmul.f32 %v9765_v49, %v13108_v22  ;;  %v4144_v35 = vsel %vm3635_vm4, %v4141_v11, %v4143_v19 }
 0x221   : > { %v4237_v21 = vadd.f32 %v4142_v41, %v3992_v23  ;;  %v4522_v38 = vmul.f32 %v9765_v49, %v13109_v24  ;;  %v4523_v61 = vmul.f32 %v9765_v49, %v13110_v54  ;;  %v4238_v40 = vadd.f32 %v4144_v35, %v3993_v15 }
 0x222   : > { %v4385_v9 = vsel %vm3635_vm4, %v4383_v36, %v4384_v55  ;;  %v4387_v51 = vsel %vm3635_vm4, %v4384_v55, %v4386_v45  ;;  %v4619_v7 = vrot.slane %v4521_v53, 3  ;;  %v4746_v47 = vmul.f32 %v10029_v59, %v8649_v43 }
 0x223   : > { %v4479_v1 = vadd.f32 %v4385_v9, %v4237_v21  ;;  %v4620_v48 = vrot.slane %v4522_v38, 3  ;;  %v4622_v57 = vrot.slane %v4523_v61, 3  ;;  %v4480_v14 = vadd.f32 %v4387_v51, %v4238_v40 }
 0x224   : > { %v4747_v6 = vmul.f32 %v10029_v59, %v8651_v50  ;;  %v4748_v56 = vmul.f32 %v10029_v59, %v8653_v32  ;;  %v4979_v17 = vmul.f32 %v9786_v28, %v8710_v34  ;;  %v4843_v46 = vrot.slane %v4746_v47, 4 }
 0x225   : > { %v4621_v11 = vsel %vm3635_vm4, %v4619_v7, %v4620_v48  ;;  %v4623_v10 = vsel %vm3635_vm4, %v4620_v48, %v4622_v57  ;;  %v4980_v12 = vmul.f32 %v9786_v28, %v8712_v26  ;;  %v4981_v50 = vmul.f32 %v9786_v28, %v8714_v4 }
 0x226   : > { %v4708_v18 = vadd.f32 %v4621_v11, %v4479_v1  ;;  %v4709_v43 = vadd.f32 %v4623_v10, %v4480_v14  ;;  %v4844_v31 = vrot.slane %v4747_v6, 4  ;;  %v4846_v23 = vrot.slane %v4748_v56, 4 }
 0x227   : > { %v5083_v15 = vrot.slane %v4979_v17, 4  ;;  %v5084_v32 = vrot.slane %v4980_v12, 4  ;;  %v5222_v41 = vmul.f32 %v9799_v3, %v13102_v39  ;;  %v5223_v55 = vmul.f32 %v9799_v3, %v13103_v60 }
 0x228   : > { %v4845_v19 = vsel %vm4823_vm5, %v4843_v46, %v4844_v31  ;;  %v4847_v36 = vsel %vm4823_vm5, %v4844_v31, %v4846_v23  ;;  %v5224_v45 = vmul.f32 %v9799_v3, %v13104_v44  ;;  %v5086_v38 = vrot.slane %v4981_v50, 4 }
 0x229   : > { %v4938_v53 = vadd.f32 %v4845_v19, %v4708_v18  ;;  %v4939_v35 = vadd.f32 %v4847_v36, %v4709_v43  ;;  %v5085_v21 = vsel %vm4823_vm5, %v5083_v15, %v5084_v32  ;;  %v5328_v61 = vrot.slane %v5222_v41, 4 }
 0x22a   : > { %v5329_v40 = vrot.slane %v5223_v55, 4  ;;  %v5331_v9 = vrot.slane %v5224_v45, 4  ;;  %v5467_v51 = vmul.f32 %v9811_v58, %v13105_v25  ;;  %v5087_v7 = vsel %vm4823_vm5, %v5084_v32, %v5086_v38 }
 0x22b   : > { %v5180_v1 = vadd.f32 %v5085_v21, %v4938_v53  ;;  %v5468_v48 = vmul.f32 %v9811_v58, %v13106_v16  ;;  %v5469_v57 = vmul.f32 %v9811_v58, %v13107_v5  ;;  %v5181_v47 = vadd.f32 %v5087_v7, %v4939_v35 }
 0x22c   : > { %v5330_v14 = vsel %vm4823_vm5, %v5328_v61, %v5329_v40  ;;  %v5332_v6 = vsel %vm4823_vm5, %v5329_v40, %v5331_v9  ;;  %v5571_v56 = vrot.slane %v5467_v51, 4  ;;  %v5709_v46 = vmul.f32 %v9824_v33, %v13108_v22 }
 0x22d   : > { %v5425_v17 = vadd.f32 %v5330_v14, %v5180_v1  ;;  %v5572_v11 = vrot.slane %v5468_v48, 4  ;;  %v5574_v10 = vrot.slane %v5469_v57, 4  ;;  %v5426_v12 = vadd.f32 %v5332_v6, %v5181_v47  ;;  %v10092_v57 = vld [vmem:[%s12989_s2 + $0x14] ss:$0 sm:$0xff]  ;;  %v13111_v47 = vld [vmem:[#allocation29_spill] sm:$0xff]  ;;  %v13112_v6 = vld [vmem:[#allocation30_spill] sm:$0xff] }
 0x22e   : > { %v5710_v18 = vmul.f32 %v9824_v33, %v13109_v24  ;;  %v5711_v43 = vmul.f32 %v9824_v33, %v13110_v54  ;;  %v822_v31 = vmul.f32 %v9838_v8, %v8710_v34  ;;  %v5807_v15 = vrot.slane %v5709_v46, 4 }
 0x22f   : > { %v5573_v23 = vsel %vm4823_vm5, %v5571_v56, %v5572_v11  ;;  %v5575_v50 = vsel %vm4823_vm5, %v5572_v11, %v5574_v10  ;;  %v823_v32 = vmul.f32 %v9838_v8, %v8712_v26  ;;  %v891_v45 = vmul.f32 %v9849_v62, %v13102_v39 }
 0x230   : > { %v5667_v41 = vadd.f32 %v5573_v23, %v5425_v17  ;;  %v5668_v19 = vadd.f32 %v5575_v50, %v5426_v12  ;;  %v5808_v36 = vrot.slane %v5710_v18, 4  ;;  %v5810_v55 = vrot.slane %v5711_v43, 4 }
 0x231   : > { %v892_v53 = vmul.f32 %v9849_v62, %v13103_v60  ;;  %v962_v35 = vmul.f32 %v9859_v63, %v13105_v25  ;;  %v963_v21 = vmul.f32 %v9859_v63, %v13106_v16  ;;  %v1031_v40 = vmul.f32 %v9868_v52, %v13108_v22 }
 0x232   : > { %v5809_v38 = vsel %vm4823_vm5, %v5807_v15, %v5808_v36  ;;  %v5811_v61 = vsel %vm4823_vm5, %v5808_v36, %v5810_v55  ;;  %v1032_v9 = vmul.f32 %v9868_v52, %v13109_v24  ;;  %v923_v1 = vadd.f32 %v891_v45, %v822_v31 }
 0x233   : > { %v5896_v51 = vadd.f32 %v5809_v38, %v5667_v41  ;;  %v5897_v7 = vadd.f32 %v5811_v61, %v5668_v19  ;;  %v924_v48 = vadd.f32 %v892_v53, %v823_v32  ;;  %v1100_v14 = vmul.f32 %v10092_v57, %v13111_v47  ;;  %v10114_v53 = vld [vmem:[%s12989_s2 + $0xb] ss:$0 sm:$0xff] }
 0x234   : > { %v1101_v56 = vmul.f32 %v10092_v57, %v13112_v6  ;;  %v1183_v17 = vmul.f32 %v9881_v20, %v8710_v34  ;;  %v1184_v11 = vmul.f32 %v9881_v20, %v8712_v26  ;;  %v994_v46 = vadd.f32 %v962_v35, %v923_v1 }
 0x235   : > { %v5923_v10 = vpack.c.bf16 %v5897_v7, %v5896_v51  ;;  %v995_v12 = vadd.f32 %v963_v21, %v924_v48  ;;  %v1185_v18 = vmul.f32 %v9881_v20, %v8714_v4  ;;  %v1417_v23 = vmul.f32 %v9892_v0, %v13102_v39 }
 0x236   : > { %v1282_v43 = vrot.slane %v1183_v17, 1  ;;  %v1283_v31 = vrot.slane %v1184_v11, 1  ;;  %v1418_v50 = vmul.f32 %v9892_v0, %v13103_v60  ;;  %v1063_v15 = vadd.f32 %v1031_v40, %v994_v46 }
 0x237   : > { %7855 = vmatmul.mubr.bf16.gmra.mxu1 %v5923_v10  ;;  %v1064_v32 = vadd.f32 %v1032_v9, %v995_v12  ;;  %v1285_v41 = vrot.slane %v1185_v18, 1  ;;  %v1419_v19 = vmul.f32 %v9892_v0, %v13104_v44  ;;  %v1523_v55 = vrot.slane %v1417_v23, 1 }
 0x238   : > { %v1284_v36 = vsel %vm1257_vm2, %v1282_v43, %v1283_v31  ;;  %v1524_v45 = vrot.slane %v1418_v50, 1  ;;  %v1661_v35 = vmul.f32 %v10114_v53, %v13105_v25  ;;  %v1130_v21 = vadd.f32 %v1100_v14, %v1063_v15  ;;  %v10128_v14 = vld [vmem:[%s12989_s2 + $0x10] ss:$0 sm:$0xff]  ;;  %v10139_v50 = vld [vmem:[%s12989_s2 + $0x15] ss:$0 sm:$0xff] }
 0x239   : > { %v1131_v38 = vadd.f32 %v1101_v56, %v1064_v32  ;;  %v1286_v61 = vsel %vm1257_vm2, %v1283_v31, %v1285_v41  ;;  %v1526_v40 = vrot.slane %v1419_v19, 1  ;;  %v1662_v51 = vmul.f32 %v10114_v53, %v13106_v16 }
 0x23a   : > { %v1525_v9 = vsel %vm1257_vm2, %v1523_v55, %v1524_v45  ;;  %v1663_v7 = vmul.f32 %v10114_v53, %v13107_v5  ;;  %v1769_v1 = vrot.slane %v1661_v35, 1  ;;  %v1374_v48 = vadd.f32 %v1284_v36, %v1130_v21  ;;  %v13113_v21 = vld [vmem:[#allocation31_spill] sm:$0xff] }
 0x23b   : > { %v1375_v17 = vadd.f32 %v1286_v61, %v1131_v38  ;;  %v1527_v11 = vsel %vm1257_vm2, %v1524_v45, %v1526_v40  ;;  %v1906_v56 = vmul.f32 %v10128_v14, %v13108_v22  ;;  %v1770_v10 = vrot.slane %v1662_v51, 1 }
 0x23c   : > { %v1772_v46 = vrot.slane %v1663_v7, 1  ;;  %v1907_v12 = vmul.f32 %v10128_v14, %v13109_v24  ;;  %v1908_v18 = vmul.f32 %v10128_v14, %v13110_v54  ;;  %v1617_v43 = vadd.f32 %v1525_v9, %v1374_v48 }
 0x23d   : > { %v1618_v31 = vadd.f32 %v1527_v11, %v1375_v17  ;;  %v2012_v23 = vrot.slane %v1906_v56, 1  ;;  %v2148_v15 = vmul.f32 %v10139_v50, %v13111_v47  ;;  %v1771_v32 = vsel %vm1257_vm2, %v1769_v1, %v1770_v10 }
 0x23e   : > { %v1773_v41 = vsel %vm1257_vm2, %v1770_v10, %v1772_v46  ;;  %v2013_v19 = vrot.slane %v1907_v12, 1  ;;  %v2015_v36 = vrot.slane %v1908_v18, 1  ;;  %v1863_v55 = vadd.f32 %v1771_v32, %v1617_v43 }
 0x23f   : > { %v1864_v45 = vadd.f32 %v1773_v41, %v1618_v31  ;;  %v2149_v35 = vmul.f32 %v10139_v50, %v13112_v6  ;;  %v2150_v38 = vmul.f32 %v10139_v50, %v13113_v21  ;;  %v2248_v9 = vrot.slane %v2148_v15, 1 }
 0x240   : > { %v2014_v61 = vsel %vm1257_vm2, %v2012_v23, %v2013_v19  ;;  %v2016_v40 = vsel %vm1257_vm2, %v2013_v19, %v2015_v36  ;;  %v2373_v51 = vmul.f32 %v9928_v2, %v8710_v34  ;;  %v2374_v11 = vmul.f32 %v9928_v2, %v8712_v26 }
 0x241   : > { %v2105_v7 = vadd.f32 %v2014_v61, %v1863_v55  ;;  %v2106_v1 = vadd.f32 %v2016_v40, %v1864_v45  ;;  %v2249_v48 = vrot.slane %v2149_v35, 1  ;;  %v2251_v17 = vrot.slane %v2150_v38, 1  ;;  %v10168_v45 = vld [vmem:[%s12989_s2 + $0xc] ss:$0 sm:$0xff] }
 0x242   : > { %v2375_v56 = vmul.f32 %v9928_v2, %v8714_v4  ;;  %v2472_v10 = vrot.slane %v2373_v51, 2  ;;  %v2606_v46 = vmul.f32 %v9941_v37, %v13102_v39  ;;  %v2607_v43 = vmul.f32 %v9941_v37, %v13103_v60 }
 0x243   : > { %v2250_v12 = vsel %vm1257_vm2, %v2248_v9, %v2249_v48  ;;  %v2252_v18 = vsel %vm1257_vm2, %v2249_v48, %v2251_v17  ;;  %v2608_v31 = vmul.f32 %v9941_v37, %v13104_v44  ;;  %v2473_v32 = vrot.slane %v2374_v11, 2 }
 0x244   : > { %v2334_v23 = vadd.f32 %v2250_v12, %v2105_v7  ;;  %v2335_v15 = vadd.f32 %v2252_v18, %v2106_v1  ;;  %v2475_v41 = vrot.slane %v2375_v56, 2  ;;  %v2712_v19 = vrot.slane %v2606_v46, 2 }
 0x245   : > { %v2713_v36 = vrot.slane %v2607_v43, 2  ;;  %v2715_v55 = vrot.slane %v2608_v31, 2  ;;  %v2849_v35 = vmul.f32 %v10168_v45, %v13105_v25  ;;  %v2474_v38 = vsel %vm2447_vm3, %v2472_v10, %v2473_v32  ;;  %v10183_v10 = vld [vmem:[%s12989_s2 + $0x11] ss:$0 sm:$0xff] }
 0x246   : > { %v2476_v61 = vsel %vm2447_vm3, %v2473_v32, %v2475_v41  ;;  %v2850_v40 = vmul.f32 %v10168_v45, %v13106_v16  ;;  %v2851_v9 = vmul.f32 %v10168_v45, %v13107_v5  ;;  %v2564_v51 = vadd.f32 %v2474_v38, %v2334_v23  ;;  %v10196_v41 = vld [vmem:[%s12989_s2 + $0x16] ss:$0 sm:$0xff] }
 0x247   : > { %v2565_v7 = vadd.f32 %v2476_v61, %v2335_v15  ;;  %v2714_v1 = vsel %vm2447_vm3, %v2712_v19, %v2713_v36  ;;  %v2716_v48 = vsel %vm2447_vm3, %v2713_v36, %v2715_v55  ;;  %v2957_v17 = vrot.slane %v2849_v35, 2 }
 0x248   : > { %v2958_v11 = vrot.slane %v2850_v40, 2  ;;  %v2960_v56 = vrot.slane %v2851_v9, 2  ;;  %v3094_v46 = vmul.f32 %v10183_v10, %v13108_v22  ;;  %v2806_v12 = vadd.f32 %v2714_v1, %v2564_v51 }
 0x249   : > { %v2807_v18 = vadd.f32 %v2716_v48, %v2565_v7  ;;  %v3095_v43 = vmul.f32 %v10183_v10, %v13109_v24  ;;  %v3096_v31 = vmul.f32 %v10183_v10, %v13110_v54  ;;  %v3336_v19 = vmul.f32 %v10196_v41, %v13111_v47 }
 0x24a   : > { %v2959_v23 = vsel %vm2447_vm3, %v2957_v17, %v2958_v11  ;;  %v2961_v15 = vsel %vm2447_vm3, %v2958_v11, %v2960_v56  ;;  %v3200_v32 = vrot.slane %v3094_v46, 2  ;;  %v3337_v61 = vmul.f32 %v10196_v41, %v13112_v6 }
 0x24b   : > { %v3051_v36 = vadd.f32 %v2959_v23, %v2806_v12  ;;  %v3052_v55 = vadd.f32 %v2961_v15, %v2807_v18  ;;  %v3201_v35 = vrot.slane %v3095_v43, 2  ;;  %v3203_v38 = vrot.slane %v3096_v31, 2 }
 0x24c   : > { %v3338_v40 = vmul.f32 %v10196_v41, %v13113_v21  ;;  %v3436_v9 = vrot.slane %v3336_v19, 2  ;;  %v3561_v51 = vmul.f32 %v9978_v27, %v8710_v34  ;;  %v3562_v48 = vmul.f32 %v9978_v27, %v8712_v26 }
 0x24d   : > { %v3202_v7 = vsel %vm2447_vm3, %v3200_v32, %v3201_v35  ;;  %v3204_v1 = vsel %vm2447_vm3, %v3201_v35, %v3203_v38  ;;  %v3563_v17 = vmul.f32 %v9978_v27, %v8714_v4  ;;  %v3437_v46 = vrot.slane %v3337_v61, 2 }
 0x24e   : > { %v3293_v11 = vadd.f32 %v3202_v7, %v3051_v36  ;;  %v3294_v56 = vadd.f32 %v3204_v1, %v3052_v55  ;;  %v3439_v12 = vrot.slane %v3338_v40, 2  ;;  %v3660_v18 = vrot.slane %v3561_v51, 3 }
 0x24f   : > { %v3661_v43 = vrot.slane %v3562_v48, 3  ;;  %v3663_v31 = vrot.slane %v3563_v17, 3  ;;  %v3794_v23 = vmul.f32 %v9992_v30, %v13102_v39  ;;  %v3438_v15 = vsel %vm2447_vm3, %v3436_v9, %v3437_v46  ;;  %v10225_v9 = vld [vmem:[%s12989_s2 + $0xd] ss:$0 sm:$0xff] }
 0x250   : > { %v3440_v32 = vsel %vm2447_vm3, %v3437_v46, %v3439_v12  ;;  %v3795_v19 = vmul.f32 %v9992_v30, %v13103_v60  ;;  %v3796_v35 = vmul.f32 %v9992_v30, %v13104_v44  ;;  %v3522_v36 = vadd.f32 %v3438_v15, %v3293_v11 }
 0x251   : > { %v3523_v55 = vadd.f32 %v3440_v32, %v3294_v56  ;;  %v3662_v38 = vsel %vm3635_vm4, %v3660_v18, %v3661_v43  ;;  %v3664_v61 = vsel %vm3635_vm4, %v3661_v43, %v3663_v31  ;;  %v3900_v40 = vrot.slane %v3794_v23, 3  ;;  %v10238_v43 = vld [vmem:[%s12989_s2 + $0x12] ss:$0 sm:$0xff] }
 0x252   : > { %v3901_v51 = vrot.slane %v3795_v19, 3  ;;  %v3903_v7 = vrot.slane %v3796_v35, 3  ;;  %v4037_v1 = vmul.f32 %v10225_v9, %v13105_v25  ;;  %v3752_v48 = vadd.f32 %v3662_v38, %v3522_v36 }
 0x253   : > { %v3753_v17 = vadd.f32 %v3664_v61, %v3523_v55  ;;  %v4038_v11 = vmul.f32 %v10225_v9, %v13106_v16  ;;  %v4039_v56 = vmul.f32 %v10225_v9, %v13107_v5  ;;  %v4282_v31 = vmul.f32 %v10238_v43, %v13108_v22 }
 0x254   : > { %v3902_v46 = vsel %vm3635_vm4, %v3900_v40, %v3901_v51  ;;  %v3904_v12 = vsel %vm3635_vm4, %v3901_v51, %v3903_v7  ;;  %v4145_v18 = vrot.slane %v4037_v1, 3  ;;  %v4283_v35 = vmul.f32 %v10238_v43, %v13109_v24 }
 0x255   : > { %v3994_v23 = vadd.f32 %v3902_v46, %v3752_v48  ;;  %v3995_v15 = vadd.f32 %v3904_v12, %v3753_v17  ;;  %v4146_v32 = vrot.slane %v4038_v11, 3  ;;  %v4148_v19 = vrot.slane %v4039_v56, 3 }
 0x256   : > { %v4284_v36 = vmul.f32 %v10238_v43, %v13110_v54  ;;  %v4388_v55 = vrot.slane %v4282_v31, 3  ;;  %v4524_v38 = vmul.f32 %v9765_v49, %v13111_v47  ;;  %v4525_v51 = vmul.f32 %v9765_v49, %v13112_v6 }
 0x257   : > { %v4147_v61 = vsel %vm3635_vm4, %v4145_v18, %v4146_v32  ;;  %v4149_v40 = vsel %vm3635_vm4, %v4146_v32, %v4148_v19  ;;  %v4526_v7 = vmul.f32 %v9765_v49, %v13113_v21  ;;  %v4389_v17 = vrot.slane %v4283_v35, 3 }
 0x258   : > { %v4239_v1 = vadd.f32 %v4147_v61, %v3994_v23  ;;  %v4240_v48 = vadd.f32 %v4149_v40, %v3995_v15  ;;  %v4391_v11 = vrot.slane %v4284_v36, 3  ;;  %v4624_v56 = vrot.slane %v4524_v38, 3 }
 0x259   : > { %v4625_v46 = vrot.slane %v4525_v51, 3  ;;  %v4627_v12 = vrot.slane %v4526_v7, 3  ;;  %v4749_v31 = vmul.f32 %v10029_v59, %v8710_v34  ;;  %v4390_v18 = vsel %vm3635_vm4, %v4388_v55, %v4389_v17 }
 0x25a   : > { %v4392_v32 = vsel %vm3635_vm4, %v4389_v17, %v4391_v11  ;;  %v4750_v19 = vmul.f32 %v10029_v59, %v8712_v26  ;;  %v4751_v49 = vmul.f32 %v10029_v59, %v8714_v4  ;;  %v4481_v23 = vadd.f32 %v4390_v18, %v4239_v1 }
 0x25b   : > { %v4482_v15 = vadd.f32 %v4392_v32, %v4240_v48  ;;  %v4626_v35 = vsel %vm3635_vm4, %v4624_v56, %v4625_v46  ;;  %v4628_v36 = vsel %vm3635_vm4, %v4625_v46, %v4627_v12  ;;  %v4848_v38 = vrot.slane %v4749_v31, 4 }
 0x25c   : > { %v4849_v61 = vrot.slane %v4750_v19, 4  ;;  %v4851_v40 = vrot.slane %v4751_v49, 4  ;;  %v4982_v34 = vmul.f32 %v9786_v28, %v13102_v39  ;;  %v4710_v55 = vadd.f32 %v4626_v35, %v4481_v23 }
 0x25d   : > { %v4711_v51 = vadd.f32 %v4628_v36, %v4482_v15  ;;  %v4983_v26 = vmul.f32 %v9786_v28, %v13103_v60  ;;  %v4984_v4 = vmul.f32 %v9786_v28, %v13104_v44  ;;  %v5225_v17 = vmul.f32 %v9799_v3, %v13105_v25 }
 0x25e   : > { %v4850_v7 = vsel %vm4823_vm5, %v4848_v38, %v4849_v61  ;;  %v4852_v1 = vsel %vm4823_vm5, %v4849_v61, %v4851_v40  ;;  %v5088_v48 = vrot.slane %v4982_v34, 4  ;;  %v5226_v31 = vmul.f32 %v9799_v3, %v13106_v16 }
 0x25f   : > { %v4940_v11 = vadd.f32 %v4850_v7, %v4710_v55  ;;  %v4941_v56 = vadd.f32 %v4852_v1, %v4711_v51  ;;  %v5089_v46 = vrot.slane %v4983_v26, 4  ;;  %v5091_v12 = vrot.slane %v4984_v4, 4 }
 0x260   : > { %v5227_v18 = vmul.f32 %v9799_v3, %v13107_v5  ;;  %v5333_v32 = vrot.slane %v5225_v17, 4  ;;  %v5470_v28 = vmul.f32 %v9811_v58, %v13108_v22  ;;  %v5471_v23 = vmul.f32 %v9811_v58, %v13109_v24 }
 0x261   : > { %v5090_v19 = vsel %vm4823_vm5, %v5088_v48, %v5089_v46  ;;  %v5092_v49 = vsel %vm4823_vm5, %v5089_v46, %v5091_v12  ;;  %v5472_v15 = vmul.f32 %v9811_v58, %v13110_v54  ;;  %v5334_v38 = vrot.slane %v5226_v31, 4 }
 0x262   : > { %v5182_v35 = vadd.f32 %v5090_v19, %v4940_v11  ;;  %v5183_v36 = vadd.f32 %v5092_v49, %v4941_v56  ;;  %v5336_v61 = vrot.slane %v5227_v18, 4  ;;  %v5576_v40 = vrot.slane %v5470_v28, 4 }
 0x263   : > { %v5577_v3 = vrot.slane %v5471_v23, 4  ;;  %v5579_v34 = vrot.slane %v5472_v15, 4  ;;  %v5712_v55 = vmul.f32 %v9824_v33, %v13111_v47  ;;  %v5335_v51 = vsel %vm4823_vm5, %v5333_v32, %v5334_v38 }
 0x264   : > { %v5337_v26 = vsel %vm4823_vm5, %v5334_v38, %v5336_v61  ;;  %v5713_v4 = vmul.f32 %v9824_v33, %v13112_v6  ;;  %v5714_v58 = vmul.f32 %v9824_v33, %v13113_v21  ;;  %v5427_v7 = vadd.f32 %v5335_v51, %v5182_v35  ;;  %v13115_v51 = vld [vmem:[#allocation27_spill] sm:$0xff] }
 0x265   : > { %v5428_v1 = vadd.f32 %v5337_v26, %v5183_v36  ;;  %v5578_v48 = vsel %vm4823_vm5, %v5576_v40, %v5577_v3  ;;  %v5580_v17 = vsel %vm4823_vm5, %v5577_v3, %v5579_v34  ;;  %v5812_v11 = vrot.slane %v5712_v55, 4  ;;  %v13114_v3 = vld [vmem:[#allocation26_spill] sm:$0xff] }
 0x266   : > { %v5813_v56 = vrot.slane %v5713_v4, 4  ;;  %v5815_v46 = vrot.slane %v5714_v58, 4  ;;  %v824_v12 = vmul.f32 %v9838_v8, %v13102_v39  ;;  %v5669_v31 = vadd.f32 %v5578_v48, %v5427_v7 }
 0x267   : > { %v5670_v18 = vadd.f32 %v5580_v17, %v5428_v1  ;;  %v825_v32 = vmul.f32 %v9838_v8, %v13103_v60  ;;  %v893_v33 = vmul.f32 %v9849_v62, %v13105_v25  ;;  %v894_v49 = vmul.f32 %v9849_v62, %v13106_v16 }
 0x268   : > { %v5814_v28 = vsel %vm4823_vm5, %v5812_v11, %v5813_v56  ;;  %v5816_v19 = vsel %vm4823_vm5, %v5813_v56, %v5815_v46  ;;  %v964_v23 = vmul.f32 %v9859_v63, %v13108_v22  ;;  %v965_v38 = vmul.f32 %v9859_v63, %v13109_v24 }
 0x269   : > { %v5898_v15 = vadd.f32 %v5814_v28, %v5669_v31  ;;  %v5899_v35 = vadd.f32 %v5816_v19, %v5670_v18  ;;  %v925_v36 = vadd.f32 %v893_v33, %v824_v12  ;;  %v926_v8 = vadd.f32 %v894_v49, %v825_v32 }
 0x26a   : > { %v1033_v61 = vmul.f32 %v9868_v52, %v13111_v47  ;;  %v1034_v40 = vmul.f32 %v9868_v52, %v13112_v6  ;;  %v1102_v34 = vmul.f32 %v10092_v57, %v13114_v3  ;;  %v1103_v26 = vmul.f32 %v10092_v57, %v13115_v51 }
 0x26b   : > { %v5924_v62 = vpack.c.bf16 %v5899_v35, %v5898_v15  ;;  %v996_v55 = vadd.f32 %v964_v23, %v925_v36  ;;  %v1186_v4 = vmul.f32 %v9881_v20, %v13102_v39  ;;  %v997_v58 = vadd.f32 %v965_v38, %v926_v8 }
 0x26c   : > { %v1187_v63 = vmul.f32 %v9881_v20, %v13103_v60  ;;  %v1188_v7 = vmul.f32 %v9881_v20, %v13104_v44  ;;  %v1420_v52 = vmul.f32 %v9892_v0, %v13105_v25  ;;  %v1421_v17 = vmul.f32 %v9892_v0, %v13106_v16 }
 0x26d   : > { %7858 = vmatprep.mubr.bf16.mxu1 %v5924_v62  ;;  %v1065_v1 = vadd.f32 %v1033_v61, %v996_v55  ;;  %v1287_v48 = vrot.slane %v1186_v4, 1  ;;  %v1422_v11 = vmul.f32 %v9892_v0, %v13107_v5  ;;  %v1066_v56 = vadd.f32 %v1034_v40, %v997_v58 }
 0x26e   : > { %v1288_v46 = vrot.slane %v1187_v63, 1  ;;  %v1290_v12 = vrot.slane %v1188_v7, 1  ;;  %v1528_v31 = vrot.slane %v1420_v52, 1  ;;  %v1529_v32 = vrot.slane %v1421_v17, 1 }
 0x26f   : > { %v1132_v18 = vadd.f32 %v1102_v34, %v1065_v1  ;;  %v1531_v33 = vrot.slane %v1422_v11, 1  ;;  %v1664_v20 = vmul.f32 %v10114_v53, %v13108_v22  ;;  %v1133_v28 = vadd.f32 %v1103_v26, %v1066_v56 }
 0x270   : > { %v1289_v19 = vsel %vm1257_vm2, %v1287_v48, %v1288_v46  ;;  %v1291_v49 = vsel %vm1257_vm2, %v1288_v46, %v1290_v12  ;;  %v1665_v23 = vmul.f32 %v10114_v53, %v13109_v24  ;;  %v1530_v0 = vsel %vm1257_vm2, %v1528_v31, %v1529_v32  ;;  %v13116_v46 = vld [vmem:[#allocation28_spill] sm:$0xff] }
 0x271   : > { %v1376_v15 = vadd.f32 %v1289_v19, %v1132_v18  ;;  %v1532_v35 = vsel %vm1257_vm2, %v1529_v32, %v1531_v33  ;;  %v1666_v36 = vmul.f32 %v10114_v53, %v13110_v54  ;;  %v1377_v38 = vadd.f32 %v1291_v49, %v1133_v28 }
 0x272   : > { %v1774_v8 = vrot.slane %v1664_v20, 1  ;;  %v1775_v61 = vrot.slane %v1665_v23, 1  ;;  %v1909_v40 = vmul.f32 %v10128_v14, %v13111_v47  ;;  %v1910_v55 = vmul.f32 %v10128_v14, %v13112_v6 }
 0x273   : > { %v1619_v34 = vadd.f32 %v1530_v0, %v1376_v15  ;;  %v1777_v62 = vrot.slane %v1666_v36, 1  ;;  %v1911_v26 = vmul.f32 %v10128_v14, %v13113_v21  ;;  %v1620_v4 = vadd.f32 %v1532_v35, %v1377_v38 }
 0x274   : > { %v1776_v58 = vsel %vm1257_vm2, %v1774_v8, %v1775_v61  ;;  %v2017_v63 = vrot.slane %v1909_v40, 1  ;;  %v2151_v7 = vmul.f32 %v10139_v50, %v13114_v3  ;;  %v2018_v48 = vrot.slane %v1910_v55, 1 }
 0x275   : > { %v1778_v52 = vsel %vm1257_vm2, %v1775_v61, %v1777_v62  ;;  %v1865_v1 = vadd.f32 %v1776_v58, %v1619_v34  ;;  %v2020_v17 = vrot.slane %v1911_v26, 1  ;;  %v2152_v56 = vmul.f32 %v10139_v50, %v13115_v51 }
 0x276   : > { %v1866_v11 = vadd.f32 %v1778_v52, %v1620_v4  ;;  %v2153_v12 = vmul.f32 %v10139_v50, %v13116_v46  ;;  %v2253_v31 = vrot.slane %v2151_v7, 1  ;;  %v2019_v18 = vsel %vm1257_vm2, %v2017_v63, %v2018_v48 }
 0x277   : > { %v2021_v32 = vsel %vm1257_vm2, %v2018_v48, %v2020_v17  ;;  %v2376_v33 = vmul.f32 %v9928_v2, %v13102_v39  ;;  %v2377_v20 = vmul.f32 %v9928_v2, %v13103_v60  ;;  %v2107_v28 = vadd.f32 %v2019_v18, %v1865_v1 }
 0x278   : > { %v2108_v19 = vadd.f32 %v2021_v32, %v1866_v11  ;;  %v2254_v49 = vrot.slane %v2152_v56, 1  ;;  %v2256_v23 = vrot.slane %v2153_v12, 1  ;;  %v2378_v15 = vmul.f32 %v9928_v2, %v13104_v44 }
 0x279   : > { %v2477_v0 = vrot.slane %v2376_v33, 2  ;;  %v2478_v35 = vrot.slane %v2377_v20, 2  ;;  %v2609_v36 = vmul.f32 %v9941_v37, %v13105_v25  ;;  %v2610_v61 = vmul.f32 %v9941_v37, %v13106_v16 }
 0x27a   : > { %v2255_v38 = vsel %vm1257_vm2, %v2253_v31, %v2254_v49  ;;  %v2257_v8 = vsel %vm1257_vm2, %v2254_v49, %v2256_v23  ;;  %v2611_v40 = vmul.f32 %v9941_v37, %v13107_v5  ;;  %v2480_v2 = vrot.slane %v2378_v15, 2 }
 0x27b   : > { %v2336_v34 = vadd.f32 %v2255_v38, %v2107_v28  ;;  %v2337_v62 = vadd.f32 %v2257_v8, %v2108_v19  ;;  %v2479_v55 = vsel %vm2447_vm3, %v2477_v0, %v2478_v35  ;;  %v2717_v26 = vrot.slane %v2609_v36, 2 }
 0x27c   : > { %v2718_v4 = vrot.slane %v2610_v61, 2  ;;  %v2720_v58 = vrot.slane %v2611_v40, 2  ;;  %v2852_v63 = vmul.f32 %v10168_v45, %v13108_v22  ;;  %v2481_v7 = vsel %vm2447_vm3, %v2478_v35, %v2480_v2 }
 0x27d   : > { %v2566_v52 = vadd.f32 %v2479_v55, %v2336_v34  ;;  %v2853_v1 = vmul.f32 %v10168_v45, %v13109_v24  ;;  %v2854_v37 = vmul.f32 %v10168_v45, %v13110_v54  ;;  %v2567_v48 = vadd.f32 %v2481_v7, %v2337_v62 }
 0x27e   : > { %v2719_v17 = vsel %vm2447_vm3, %v2717_v26, %v2718_v4  ;;  %v2721_v11 = vsel %vm2447_vm3, %v2718_v4, %v2720_v58  ;;  %v2962_v56 = vrot.slane %v2852_v63, 2  ;;  %v3097_v32 = vmul.f32 %v10183_v10, %v13111_v47 }
 0x27f   : > { %v2808_v12 = vadd.f32 %v2719_v17, %v2566_v52  ;;  %v2963_v31 = vrot.slane %v2853_v1, 2  ;;  %v2965_v18 = vrot.slane %v2854_v37, 2  ;;  %v2809_v33 = vadd.f32 %v2721_v11, %v2567_v48 }
 0x280   : > { %v3098_v20 = vmul.f32 %v10183_v10, %v13112_v6  ;;  %v3099_v28 = vmul.f32 %v10183_v10, %v13113_v21  ;;  %v3339_v19 = vmul.f32 %v10196_v41, %v13114_v3  ;;  %v3205_v15 = vrot.slane %v3097_v32, 2 }
 0x281   : > { %v2964_v49 = vsel %vm2447_vm3, %v2962_v56, %v2963_v31  ;;  %v2966_v23 = vsel %vm2447_vm3, %v2963_v31, %v2965_v18  ;;  %v3340_v0 = vmul.f32 %v10196_v41, %v13115_v51  ;;  %v3341_v61 = vmul.f32 %v10196_v41, %v13116_v46 }
 0x282   : > { %v3053_v35 = vadd.f32 %v2964_v49, %v2808_v12  ;;  %v3054_v36 = vadd.f32 %v2966_v23, %v2809_v33  ;;  %v3206_v38 = vrot.slane %v3098_v20, 2  ;;  %v3208_v8 = vrot.slane %v3099_v28, 2 }
 0x283   : > { %v3441_v40 = vrot.slane %v3339_v19, 2  ;;  %v3442_v34 = vrot.slane %v3340_v0, 2  ;;  %v3564_v62 = vmul.f32 %v9978_v27, %v13102_v39  ;;  %v3565_v26 = vmul.f32 %v9978_v27, %v13103_v60 }
 0x284   : > { %v3207_v55 = vsel %vm2447_vm3, %v3205_v15, %v3206_v38  ;;  %v3209_v2 = vsel %vm2447_vm3, %v3206_v38, %v3208_v8  ;;  %v3566_v4 = vmul.f32 %v9978_v27, %v13104_v44  ;;  %v3444_v52 = vrot.slane %v3341_v61, 2 }
 0x285   : > { %v3295_v58 = vadd.f32 %v3207_v55, %v3053_v35  ;;  %v3296_v63 = vadd.f32 %v3209_v2, %v3054_v36  ;;  %v3443_v7 = vsel %vm2447_vm3, %v3441_v40, %v3442_v34  ;;  %v3665_v1 = vrot.slane %v3564_v62, 3 }
 0x286   : > { %v3666_v37 = vrot.slane %v3565_v26, 3  ;;  %v3668_v48 = vrot.slane %v3566_v4, 3  ;;  %v3797_v17 = vmul.f32 %v9992_v30, %v13105_v25  ;;  %v3445_v11 = vsel %vm2447_vm3, %v3442_v34, %v3444_v52  ;;  %v10429_v4 = vld [vmem:[%s12989_s2 + $0x17] ss:$0 sm:$0xff] }
 0x287   : > { %v3524_v56 = vadd.f32 %v3443_v7, %v3295_v58  ;;  %v3798_v12 = vmul.f32 %v9992_v30, %v13106_v16  ;;  %v3799_v27 = vmul.f32 %v9992_v30, %v13107_v5  ;;  %v3525_v31 = vadd.f32 %v3445_v11, %v3296_v63 }
 0x288   : > { %v3667_v18 = vsel %vm3635_vm4, %v3665_v1, %v3666_v37  ;;  %v3669_v32 = vsel %vm3635_vm4, %v3666_v37, %v3668_v48  ;;  %v3905_v33 = vrot.slane %v3797_v17, 3  ;;  %v4040_v49 = vmul.f32 %v10225_v9, %v13108_v22 }
 0x289   : > { %v3754_v20 = vadd.f32 %v3667_v18, %v3524_v56  ;;  %v3906_v28 = vrot.slane %v3798_v12, 3  ;;  %v3908_v19 = vrot.slane %v3799_v27, 3  ;;  %v3755_v23 = vadd.f32 %v3669_v32, %v3525_v31 }
 0x28a   : > { %v4041_v15 = vmul.f32 %v10225_v9, %v13109_v24  ;;  %v4042_v0 = vmul.f32 %v10225_v9, %v13110_v54  ;;  %v4285_v30 = vmul.f32 %v10238_v43, %v13111_v47  ;;  %v4150_v38 = vrot.slane %v4040_v49, 3 }
 0x28b   : > { %v3907_v35 = vsel %vm3635_vm4, %v3905_v33, %v3906_v28  ;;  %v3909_v36 = vsel %vm3635_vm4, %v3906_v28, %v3908_v19  ;;  %v4286_v8 = vmul.f32 %v10238_v43, %v13112_v6  ;;  %v4287_v55 = vmul.f32 %v10238_v43, %v13113_v21 }
 0x28c   : > { %v3996_v61 = vadd.f32 %v3907_v35, %v3754_v20  ;;  %v3997_v40 = vadd.f32 %v3909_v36, %v3755_v23  ;;  %v4151_v34 = vrot.slane %v4041_v15, 3  ;;  %v4153_v62 = vrot.slane %v4042_v0, 3  ;;  %v10463_v36 = vld [vmem:[%s12989_s2 + $0xe] ss:$0 sm:$0xff] }
 0x28d   : > { %v4393_v2 = vrot.slane %v4285_v30, 3  ;;  %v4394_v26 = vrot.slane %v4286_v8, 3  ;;  %v4527_v58 = vmul.f32 %v10429_v4, %v13114_v3  ;;  %v4528_v52 = vmul.f32 %v10429_v4, %v13115_v51 }
 0x28e   : > { %v4152_v63 = vsel %vm3635_vm4, %v4150_v38, %v4151_v34  ;;  %v4154_v7 = vsel %vm3635_vm4, %v4151_v34, %v4153_v62  ;;  %v4529_v1 = vmul.f32 %v10429_v4, %v13116_v46  ;;  %v4396_v11 = vrot.slane %v4287_v55, 3 }
 0x28f   : > { %v4241_v37 = vadd.f32 %v4152_v63, %v3996_v61  ;;  %v4242_v48 = vadd.f32 %v4154_v7, %v3997_v40  ;;  %v4395_v17 = vsel %vm3635_vm4, %v4393_v2, %v4394_v26  ;;  %v4629_v56 = vrot.slane %v4527_v58, 3 }
 0x290   : > { %v4630_v12 = vrot.slane %v4528_v52, 3  ;;  %v4632_v27 = vrot.slane %v4529_v1, 3  ;;  %v4752_v31 = vmul.f32 %v10029_v59, %v13102_v39  ;;  %v4397_v18 = vsel %vm3635_vm4, %v4394_v26, %v4396_v11  ;;  %v10452_v39 = vld [vmem:[%s12989_s2 + $0x9] ss:$0 sm:$0xff]  ;;  %v10476_v52 = vld [vmem:[%s12989_s2 + $0x13] ss:$0 sm:$0xff] }
 0x291   : > { %v4483_v32 = vadd.f32 %v4395_v17, %v4241_v37  ;;  %v4753_v33 = vmul.f32 %v10029_v59, %v13103_v60  ;;  %v4754_v20 = vmul.f32 %v10029_v59, %v13104_v44  ;;  %v4484_v28 = vadd.f32 %v4397_v18, %v4242_v48 }
 0x292   : > { %v4631_v19 = vsel %vm3635_vm4, %v4629_v56, %v4630_v12  ;;  %v4633_v49 = vsel %vm3635_vm4, %v4630_v12, %v4632_v27  ;;  %v4853_v23 = vrot.slane %v4752_v31, 4  ;;  %v4985_v60 = vmul.f32 %v10452_v39, %v13105_v25 }
 0x293   : > { %v4712_v15 = vadd.f32 %v4631_v19, %v4483_v32  ;;  %v4854_v0 = vrot.slane %v4753_v33, 4  ;;  %v4856_v30 = vrot.slane %v4754_v20, 4  ;;  %v4713_v35 = vadd.f32 %v4633_v49, %v4484_v28  ;;  %v10490_v20 = vld [vmem:[%s12989_s2 + $0x18] ss:$0 sm:$0xff] }
 0x294   : > { %v4986_v44 = vmul.f32 %v10452_v39, %v13106_v16  ;;  %v4987_v59 = vmul.f32 %v10452_v39, %v13107_v5  ;;  %v5228_v38 = vmul.f32 %v10463_v36, %v13108_v22  ;;  %v5093_v40 = vrot.slane %v4985_v60, 4 }
 0x295   : > { %v4855_v8 = vsel %vm4823_vm5, %v4853_v23, %v4854_v0  ;;  %v4857_v61 = vsel %vm4823_vm5, %v4854_v0, %v4856_v30  ;;  %v5229_v34 = vmul.f32 %v10463_v36, %v13109_v24  ;;  %v5230_v58 = vmul.f32 %v10463_v36, %v13110_v54 }
 0x296   : > { %v4942_v62 = vadd.f32 %v4855_v8, %v4712_v15  ;;  %v4943_v55 = vadd.f32 %v4857_v61, %v4713_v35  ;;  %v5094_v2 = vrot.slane %v4986_v44, 4  ;;  %v5096_v26 = vrot.slane %v4987_v59, 4  ;;  %v10504_v8 = vld [vmem:[%s12989_s2] ss:$0 sm:$0xff] }
 0x297   : > { %v5338_v63 = vrot.slane %v5228_v38, 4  ;;  %v5339_v7 = vrot.slane %v5229_v34, 4  ;;  %v5473_v1 = vmul.f32 %v10476_v52, %v13111_v47  ;;  %v5474_v17 = vmul.f32 %v10476_v52, %v13112_v6 }
 0x298   : > { %v5095_v37 = vsel %vm4823_vm5, %v5093_v40, %v5094_v2  ;;  %v5097_v48 = vsel %vm4823_vm5, %v5094_v2, %v5096_v26  ;;  %v5475_v11 = vmul.f32 %v10476_v52, %v13113_v21  ;;  %v5341_v31 = vrot.slane %v5230_v58, 4 }
 0x299   : > { %v5184_v56 = vadd.f32 %v5095_v37, %v4942_v62  ;;  %v5185_v12 = vadd.f32 %v5097_v48, %v4943_v55  ;;  %v5340_v27 = vsel %vm4823_vm5, %v5338_v63, %v5339_v7  ;;  %v5581_v18 = vrot.slane %v5473_v1, 4  ;;  %v10513_v62 = vld [vmem:[%s12989_s2 + $0x5] ss:$0 sm:$0xff]  ;;  %v10524_v63 = vld [vmem:[%s12989_s2 + $0xa] ss:$0 sm:$0xff] }
 0x29a   : > { %v5582_v32 = vrot.slane %v5474_v17, 4  ;;  %v5584_v33 = vrot.slane %v5475_v11, 4  ;;  %v5715_v28 = vmul.f32 %v10490_v20, %v13114_v3  ;;  %v5342_v19 = vsel %vm4823_vm5, %v5339_v7, %v5341_v31  ;;  %v13117_v31 = vld [vmem:[#allocation37_spill] sm:$0xff] }
 0x29b   : > { %v5429_v49 = vadd.f32 %v5340_v27, %v5184_v56  ;;  %v5716_v23 = vmul.f32 %v10490_v20, %v13115_v51  ;;  %v5717_v15 = vmul.f32 %v10490_v20, %v13116_v46  ;;  %v5430_v0 = vadd.f32 %v5342_v19, %v5185_v12  ;;  %v10533_v56 = vld [vmem:[%s12989_s2 + $0xf] ss:$0 sm:$0xff] }
 0x29c   : > { %v5583_v30 = vsel %vm4823_vm5, %v5581_v18, %v5582_v32  ;;  %v5585_v60 = vsel %vm4823_vm5, %v5582_v32, %v5584_v33  ;;  %v5817_v35 = vrot.slane %v5715_v28, 4  ;;  %v826_v61 = vmul.f32 %v10504_v8, %v13105_v25  ;;  %v13118_v32 = vld [vmem:[#allocation38_spill] sm:$0xff] }
 0x29d   : > { %v5671_v44 = vadd.f32 %v5583_v30, %v5429_v49  ;;  %v5818_v59 = vrot.slane %v5716_v23, 4  ;;  %v5820_v38 = vrot.slane %v5717_v15, 4  ;;  %v5672_v40 = vadd.f32 %v5585_v60, %v5430_v0  ;;  %v10546_v23 = vld [vmem:[%s12989_s2 + $0x1] ss:$0 sm:$0xff] }
 0x29e   : > { %v827_v34 = vmul.f32 %v10504_v8, %v13106_v16  ;;  %v895_v55 = vmul.f32 %v10513_v62, %v13108_v22  ;;  %v896_v2 = vmul.f32 %v10513_v62, %v13109_v24  ;;  %v966_v7 = vmul.f32 %v10524_v63, %v13111_v47 }
 0x29f   : > { %v5819_v26 = vsel %vm4823_vm5, %v5817_v35, %v5818_v59  ;;  %v5821_v58 = vsel %vm4823_vm5, %v5818_v59, %v5820_v38  ;;  %v967_v1 = vmul.f32 %v10524_v63, %v13112_v6  ;;  %v1035_v12 = vmul.f32 %v10533_v56, %v13114_v3 }
 0x2a0   : > { %v5900_v37 = vadd.f32 %v5819_v26, %v5671_v44  ;;  %v5901_v48 = vadd.f32 %v5821_v58, %v5672_v40  ;;  %v927_v17 = vadd.f32 %v895_v55, %v826_v61  ;;  %v928_v11 = vadd.f32 %v896_v2, %v827_v34 }
 0x2a1   : > { %v1036_v27 = vmul.f32 %v10533_v56, %v13115_v51  ;;  %v1104_v18 = vmul.f32 %v10092_v57, %v13117_v31  ;;  %v1105_v33 = vmul.f32 %v10092_v57, %v13118_v32  ;;  %v1189_v15 = vmul.f32 %v10546_v23, %v13105_v25  ;;  %v10557_v57 = vld [vmem:[%s12989_s2 + $0x6] ss:$0 sm:$0xff] }
 0x2a2   : > { %v5925_v28 = vpack.c.bf16 %v5901_v48, %v5900_v37  ;;  %v998_v19 = vadd.f32 %v966_v7, %v927_v17  ;;  %v999_v49 = vadd.f32 %v967_v1, %v928_v11  ;;  %v1190_v0 = vmul.f32 %v10546_v23, %v13106_v16 }
 0x2a3   : > { %v1191_v30 = vmul.f32 %v10546_v23, %v13107_v5  ;;  %v1423_v60 = vmul.f32 %v10557_v57, %v13108_v22  ;;  %v1424_v35 = vmul.f32 %v10557_v57, %v13109_v24  ;;  %v1292_v38 = vrot.slane %v1189_v15, 1 }
 0x2a4   : > { %7859 = vmatmul.mubr.bf16.gmra.mxu1 %v5925_v28  ;;  %v1067_v44 = vadd.f32 %v1035_v12, %v998_v19  ;;  %v1068_v59 = vadd.f32 %v1036_v27, %v999_v49  ;;  %v1425_v61 = vmul.f32 %v10557_v57, %v13110_v54  ;;  %v1293_v40 = vrot.slane %v1190_v0, 1 }
 0x2a5   : > { %v1295_v34 = vrot.slane %v1191_v30, 1  ;;  %v1533_v55 = vrot.slane %v1423_v60, 1  ;;  %v1534_v2 = vrot.slane %v1424_v35, 1  ;;  %v1667_v1 = vmul.f32 %v10114_v53, %v13111_v47 }
 0x2a6   : > { %v1134_v26 = vadd.f32 %v1104_v18, %v1067_v44  ;;  %v1135_v58 = vadd.f32 %v1105_v33, %v1068_v59  ;;  %v1536_v7 = vrot.slane %v1425_v61, 1  ;;  %v1294_v37 = vsel %vm1257_vm2, %v1292_v38, %v1293_v40 }
 0x2a7   : > { %v1296_v48 = vsel %vm1257_vm2, %v1293_v40, %v1295_v34  ;;  %v1535_v17 = vsel %vm1257_vm2, %v1533_v55, %v1534_v2  ;;  %v1668_v11 = vmul.f32 %v10114_v53, %v13112_v6  ;;  %v1669_v18 = vmul.f32 %v10114_v53, %v13113_v21 }
 0x2a8   : > { %v1378_v12 = vadd.f32 %v1294_v37, %v1134_v26  ;;  %v1379_v27 = vadd.f32 %v1296_v48, %v1135_v58  ;;  %v1537_v28 = vsel %vm1257_vm2, %v1534_v2, %v1536_v7  ;;  %v1779_v33 = vrot.slane %v1667_v1, 1  ;;  %v13119_v58 = vld [vmem:[#allocation39_spill] sm:$0xff] }
 0x2a9   : > { %v1780_v19 = vrot.slane %v1668_v11, 1  ;;  %v1912_v49 = vmul.f32 %v10128_v14, %v13114_v3  ;;  %v1913_v15 = vmul.f32 %v10128_v14, %v13115_v51  ;;  %v1782_v60 = vrot.slane %v1669_v18, 1 }
 0x2aa   : > { %v1621_v0 = vadd.f32 %v1535_v17, %v1378_v12  ;;  %v1622_v30 = vadd.f32 %v1537_v28, %v1379_v27  ;;  %v1914_v35 = vmul.f32 %v10128_v14, %v13116_v46  ;;  %v2154_v53 = vmul.f32 %v10139_v50, %v13117_v31  ;;  %v10594_v17 = vld [vmem:[%s12989_s2 + $0x2] ss:$0 sm:$0xff] }
 0x2ab   : > { %v1781_v44 = vsel %vm1257_vm2, %v1779_v33, %v1780_v19  ;;  %v2022_v59 = vrot.slane %v1912_v49, 1  ;;  %v2023_v38 = vrot.slane %v1913_v15, 1  ;;  %v1783_v61 = vsel %vm1257_vm2, %v1780_v19, %v1782_v60  ;;  %v10606_v19 = vld [vmem:[%s12989_s2 + $0x7] ss:$0 sm:$0xff] }
 0x2ac   : > { %v1867_v40 = vadd.f32 %v1781_v44, %v1621_v0  ;;  %v2025_v34 = vrot.slane %v1914_v35, 1  ;;  %v2155_v55 = vmul.f32 %v10139_v50, %v13118_v32  ;;  %v1868_v2 = vadd.f32 %v1783_v61, %v1622_v30 }
 0x2ad   : > { %v2024_v26 = vsel %vm1257_vm2, %v2022_v59, %v2023_v38  ;;  %v2156_v14 = vmul.f32 %v10139_v50, %v13119_v58  ;;  %v2258_v7 = vrot.slane %v2154_v53, 1  ;;  %v2379_v11 = vmul.f32 %v10594_v17, %v13105_v25 }
 0x2ae   : > { %v2026_v1 = vsel %vm1257_vm2, %v2023_v38, %v2025_v34  ;;  %v2109_v37 = vadd.f32 %v2024_v26, %v1867_v40  ;;  %v2259_v48 = vrot.slane %v2155_v55, 1  ;;  %v2380_v28 = vmul.f32 %v10594_v17, %v13106_v16 }
 0x2af   : > { %v2110_v12 = vadd.f32 %v2026_v1, %v1868_v2  ;;  %v2261_v27 = vrot.slane %v2156_v14, 1  ;;  %v2381_v50 = vmul.f32 %v10594_v17, %v13107_v5  ;;  %v2482_v33 = vrot.slane %v2379_v11, 2 }
 0x2b0   : > { %v2260_v18 = vsel %vm1257_vm2, %v2258_v7, %v2259_v48  ;;  %v2612_v49 = vmul.f32 %v10606_v19, %v13108_v22  ;;  %v2613_v15 = vmul.f32 %v10606_v19, %v13109_v24  ;;  %v2483_v60 = vrot.slane %v2380_v28, 2 }
 0x2b1   : > { %v2262_v0 = vsel %vm1257_vm2, %v2259_v48, %v2261_v27  ;;  %v2338_v30 = vadd.f32 %v2260_v18, %v2109_v37  ;;  %v2485_v35 = vrot.slane %v2381_v50, 2  ;;  %v2614_v59 = vmul.f32 %v10606_v19, %v13110_v54 }
 0x2b2   : > { %v2339_v44 = vadd.f32 %v2262_v0, %v2110_v12  ;;  %v2722_v38 = vrot.slane %v2612_v49, 2  ;;  %v2723_v53 = vrot.slane %v2613_v15, 2  ;;  %v2484_v61 = vsel %vm2447_vm3, %v2482_v33, %v2483_v60 }
 0x2b3   : > { %v2486_v40 = vsel %vm2447_vm3, %v2483_v60, %v2485_v35  ;;  %v2855_v34 = vmul.f32 %v10168_v45, %v13111_v47  ;;  %v2856_v55 = vmul.f32 %v10168_v45, %v13112_v6  ;;  %v2568_v2 = vadd.f32 %v2484_v61, %v2338_v30 }
 0x2b4   : > { %v2569_v26 = vadd.f32 %v2486_v40, %v2339_v44  ;;  %v2724_v14 = vsel %vm2447_vm3, %v2722_v38, %v2723_v53  ;;  %v2725_v7 = vrot.slane %v2614_v59, 2  ;;  %v2857_v1 = vmul.f32 %v10168_v45, %v13113_v21 }
 0x2b5   : > { %v2967_v37 = vrot.slane %v2855_v34, 2  ;;  %v2968_v48 = vrot.slane %v2856_v55, 2  ;;  %v3100_v11 = vmul.f32 %v10183_v10, %v13114_v3  ;;  %v2810_v27 = vadd.f32 %v2724_v14, %v2568_v2 }
 0x2b6   : > { %v2726_v12 = vsel %vm2447_vm3, %v2723_v53, %v2725_v7  ;;  %v3101_v28 = vmul.f32 %v10183_v10, %v13115_v51  ;;  %v3102_v50 = vmul.f32 %v10183_v10, %v13116_v46  ;;  %v2970_v49 = vrot.slane %v2857_v1, 2  ;;  %v10642_v10 = vld [vmem:[%s12989_s2 + $0x3] ss:$0 sm:$0xff] }
 0x2b7   : > { %v2811_v18 = vadd.f32 %v2726_v12, %v2569_v26  ;;  %v2969_v33 = vsel %vm2447_vm3, %v2967_v37, %v2968_v48  ;;  %v3210_v15 = vrot.slane %v3100_v11, 2  ;;  %v3342_v60 = vmul.f32 %v10196_v41, %v13117_v31  ;;  %v10655_v37 = vld [vmem:[%s12989_s2 + $0x8] ss:$0 sm:$0xff] }
 0x2b8   : > { %v3055_v45 = vadd.f32 %v2969_v33, %v2810_v27  ;;  %v3211_v0 = vrot.slane %v3101_v28, 2  ;;  %v3213_v30 = vrot.slane %v3102_v50, 2  ;;  %v2971_v35 = vsel %vm2447_vm3, %v2968_v48, %v2970_v49 }
 0x2b9   : > { %v3343_v44 = vmul.f32 %v10196_v41, %v13118_v32  ;;  %v3344_v59 = vmul.f32 %v10196_v41, %v13119_v58  ;;  %v3567_v38 = vmul.f32 %v10642_v10, %v13105_v25  ;;  %v3056_v53 = vadd.f32 %v2971_v35, %v2811_v18 }
 0x2ba   : > { %v3212_v61 = vsel %vm2447_vm3, %v3210_v15, %v3211_v0  ;;  %v3214_v40 = vsel %vm2447_vm3, %v3211_v0, %v3213_v30  ;;  %v3446_v34 = vrot.slane %v3342_v60, 2  ;;  %v3568_v41 = vmul.f32 %v10642_v10, %v13106_v16 }
 0x2bb   : > { %v3297_v55 = vadd.f32 %v3212_v61, %v3055_v45  ;;  %v3447_v2 = vrot.slane %v3343_v44, 2  ;;  %v3449_v26 = vrot.slane %v3344_v59, 2  ;;  %v3298_v14 = vadd.f32 %v3214_v40, %v3056_v53 }
 0x2bc   : > { %v3569_v7 = vmul.f32 %v10642_v10, %v13107_v5  ;;  %v3670_v1 = vrot.slane %v3567_v38, 3  ;;  %v3800_v48 = vmul.f32 %v10655_v37, %v13108_v22  ;;  %v3671_v27 = vrot.slane %v3568_v41, 3 }
 0x2bd   : > { %v3448_v11 = vsel %vm2447_vm3, %v3446_v34, %v3447_v2  ;;  %v3450_v12 = vsel %vm2447_vm3, %v3447_v2, %v3449_v26  ;;  %v3801_v28 = vmul.f32 %v10655_v37, %v13109_v24  ;;  %v3802_v49 = vmul.f32 %v10655_v37, %v13110_v54 }
 0x2be   : > { %v3526_v50 = vadd.f32 %v3448_v11, %v3297_v55  ;;  %v3527_v18 = vadd.f32 %v3450_v12, %v3298_v14  ;;  %v3673_v33 = vrot.slane %v3569_v7, 3  ;;  %v3672_v15 = vsel %vm3635_vm4, %v3670_v1, %v3671_v27 }
 0x2bf   : > { %v3910_v45 = vrot.slane %v3800_v48, 3  ;;  %v3911_v0 = vrot.slane %v3801_v28, 3  ;;  %v4043_v30 = vmul.f32 %v10225_v9, %v13111_v47  ;;  %v3913_v44 = vrot.slane %v3802_v49, 3 }
 0x2c0   : > { %v3674_v60 = vsel %vm3635_vm4, %v3671_v27, %v3673_v33  ;;  %v3756_v35 = vadd.f32 %v3672_v15, %v3526_v50  ;;  %v4044_v59 = vmul.f32 %v10225_v9, %v13112_v6  ;;  %v4045_v61 = vmul.f32 %v10225_v9, %v13113_v21 }
 0x2c1   : > { %v3757_v38 = vadd.f32 %v3674_v60, %v3527_v18  ;;  %v3912_v53 = vsel %vm3635_vm4, %v3910_v45, %v3911_v0  ;;  %v4155_v40 = vrot.slane %v4043_v30, 3  ;;  %v3914_v34 = vsel %vm3635_vm4, %v3911_v0, %v3913_v44  ;;  %v10694_v30 = vld [vmem:[%s12989_s2 + $0x4] ss:$0 sm:$0xff] }
 0x2c2   : > { %v3998_v55 = vadd.f32 %v3912_v53, %v3756_v35  ;;  %v4156_v2 = vrot.slane %v4044_v59, 3  ;;  %v4288_v26 = vmul.f32 %v10238_v43, %v13114_v3  ;;  %v4158_v14 = vrot.slane %v4045_v61, 3 }
 0x2c3   : > { %v3999_v41 = vadd.f32 %v3914_v34, %v3757_v38  ;;  %v4289_v7 = vmul.f32 %v10238_v43, %v13115_v51  ;;  %v4290_v1 = vmul.f32 %v10238_v43, %v13116_v46  ;;  %v4530_v9 = vmul.f32 %v10429_v4, %v13117_v31 }
 0x2c4   : > { %v4157_v48 = vsel %vm3635_vm4, %v4155_v40, %v4156_v2  ;;  %v4398_v11 = vrot.slane %v4288_v26, 3  ;;  %v4531_v12 = vmul.f32 %v10429_v4, %v13118_v32  ;;  %v4159_v27 = vsel %vm3635_vm4, %v4156_v2, %v4158_v14 }
 0x2c5   : > { %v4243_v28 = vadd.f32 %v4157_v48, %v3998_v55  ;;  %v4399_v50 = vrot.slane %v4289_v7, 3  ;;  %v4401_v18 = vrot.slane %v4290_v1, 3  ;;  %v4244_v33 = vadd.f32 %v4159_v27, %v3999_v41 }
 0x2c6   : > { %v4532_v49 = vmul.f32 %v10429_v4, %v13119_v58  ;;  %v4634_v15 = vrot.slane %v4530_v9, 3  ;;  %v4635_v43 = vrot.slane %v4531_v12, 3  ;;  %v4755_v60 = vmul.f32 %v10694_v30, %v13105_v25 }
 0x2c7   : > { %v4400_v45 = vsel %vm3635_vm4, %v4398_v11, %v4399_v50  ;;  %v4402_v0 = vsel %vm3635_vm4, %v4399_v50, %v4401_v18  ;;  %v4756_v35 = vmul.f32 %v10694_v30, %v13106_v16  ;;  %v4757_v61 = vmul.f32 %v10694_v30, %v13107_v5 }
 0x2c8   : > { %v4485_v44 = vadd.f32 %v4400_v45, %v4243_v28  ;;  %v4486_v59 = vadd.f32 %v4402_v0, %v4244_v33  ;;  %v4636_v38 = vsel %vm3635_vm4, %v4634_v15, %v4635_v43  ;;  %v4637_v53 = vrot.slane %v4532_v49, 3 }
 0x2c9   : > { %v4858_v40 = vrot.slane %v4755_v60, 4  ;;  %v4859_v34 = vrot.slane %v4756_v35, 4  ;;  %v4988_v55 = vmul.f32 %v10452_v39, %v13108_v22  ;;  %v4989_v25 = vmul.f32 %v10452_v39, %v13109_v24 }
 0x2ca   : > { %v4638_v2 = vsel %vm3635_vm4, %v4635_v43, %v4637_v53  ;;  %v4714_v26 = vadd.f32 %v4636_v38, %v4485_v44  ;;  %v4990_v16 = vmul.f32 %v10452_v39, %v13110_v54  ;;  %v4861_v7 = vrot.slane %v4757_v61, 4 }
 0x2cb   : > { %v4715_v41 = vadd.f32 %v4638_v2, %v4486_v59  ;;  %v4860_v14 = vsel %vm4823_vm5, %v4858_v40, %v4859_v34  ;;  %v5098_v1 = vrot.slane %v4988_v55, 4  ;;  %v5099_v48 = vrot.slane %v4989_v25, 4 }
 0x2cc   : > { %v4944_v5 = vadd.f32 %v4860_v14, %v4714_v26  ;;  %v5101_v11 = vrot.slane %v4990_v16, 4  ;;  %v5231_v9 = vmul.f32 %v10463_v36, %v13111_v47  ;;  %v4862_v12 = vsel %vm4823_vm5, %v4859_v34, %v4861_v7 }
 0x2cd   : > { %v5232_v27 = vmul.f32 %v10463_v36, %v13112_v6  ;;  %v5233_v28 = vmul.f32 %v10463_v36, %v13113_v21  ;;  %v5476_v50 = vmul.f32 %v10476_v52, %v13114_v3  ;;  %v4945_v18 = vadd.f32 %v4862_v12, %v4715_v41 }
 0x2ce   : > { %v5100_v33 = vsel %vm4823_vm5, %v5098_v1, %v5099_v48  ;;  %v5102_v49 = vsel %vm4823_vm5, %v5099_v48, %v5101_v11  ;;  %v5343_v15 = vrot.slane %v5231_v9, 4  ;;  %v5477_v60 = vmul.f32 %v10476_v52, %v13115_v51 }
 0x2cf   : > { %v5186_v43 = vadd.f32 %v5100_v33, %v4944_v5  ;;  %v5344_v45 = vrot.slane %v5232_v27, 4  ;;  %v5346_v0 = vrot.slane %v5233_v28, 4  ;;  %v5187_v35 = vadd.f32 %v5102_v49, %v4945_v18 }
 0x2d0   : > { %v5478_v44 = vmul.f32 %v10476_v52, %v13116_v46  ;;  %v5586_v59 = vrot.slane %v5476_v50, 4  ;;  %v5718_v38 = vmul.f32 %v10490_v20, %v13117_v31  ;;  %v5587_v40 = vrot.slane %v5477_v60, 4 }
 0x2d1   : > { %v5345_v53 = vsel %vm4823_vm5, %v5343_v15, %v5344_v45  ;;  %v5347_v61 = vsel %vm4823_vm5, %v5344_v45, %v5346_v0  ;;  %v5719_v34 = vmul.f32 %v10490_v20, %v13118_v32  ;;  %v5720_v25 = vmul.f32 %v10490_v20, %v13119_v58 }
 0x2d2   : > { %v5431_v55 = vadd.f32 %v5345_v53, %v5186_v43  ;;  %v5432_v2 = vadd.f32 %v5347_v61, %v5187_v35  ;;  %v5589_v26 = vrot.slane %v5478_v44, 4  ;;  %v5588_v16 = vsel %vm4823_vm5, %v5586_v59, %v5587_v40  ;;  %v10757_v35 = vld [vmem:[%s12989_s2 + $0x14] ss:$0 sm:$0xff]  ;;  %v13120_v44 = vld [vmem:[#allocation34_spill] sm:$0xff] }
 0x2d3   : > { %v5822_v41 = vrot.slane %v5718_v38, 4  ;;  %v5823_v14 = vrot.slane %v5719_v34, 4  ;;  %v828_v7 = vmul.f32 %v10504_v8, %v13108_v22  ;;  %v5825_v48 = vrot.slane %v5720_v25, 4  ;;  %v13121_v38 = vld [vmem:[#allocation35_spill] sm:$0xff] }
 0x2d4   : > { %v5590_v1 = vsel %vm4823_vm5, %v5587_v40, %v5589_v26  ;;  %v5673_v5 = vadd.f32 %v5588_v16, %v5431_v55  ;;  %v829_v11 = vmul.f32 %v10504_v8, %v13109_v24  ;;  %v897_v27 = vmul.f32 %v10513_v62, %v13111_v47 }
 0x2d5   : > { %v5674_v9 = vadd.f32 %v5590_v1, %v5432_v2  ;;  %v5824_v12 = vsel %vm4823_vm5, %v5822_v41, %v5823_v14  ;;  %v898_v28 = vmul.f32 %v10513_v62, %v13112_v6  ;;  %v5826_v50 = vsel %vm4823_vm5, %v5823_v14, %v5825_v48 }
 0x2d6   : > { %v5902_v18 = vadd.f32 %v5824_v12, %v5673_v5  ;;  %v968_v33 = vmul.f32 %v10524_v63, %v13114_v3  ;;  %v969_v49 = vmul.f32 %v10524_v63, %v13115_v51  ;;  %v929_v43 = vadd.f32 %v897_v27, %v828_v7  ;;  %v10778_v12 = vld [vmem:[%s12989_s2 + $0xb] ss:$0 sm:$0xff] }
 0x2d7   : > { %v5903_v15 = vadd.f32 %v5826_v50, %v5674_v9  ;;  %v930_v45 = vadd.f32 %v898_v28, %v829_v11  ;;  %v1037_v0 = vmul.f32 %v10533_v56, %v13117_v31  ;;  %v1038_v60 = vmul.f32 %v10533_v56, %v13118_v32 }
 0x2d8   : > { %v1106_v59 = vmul.f32 %v10757_v35, %v13120_v44  ;;  %v1107_v53 = vmul.f32 %v10757_v35, %v13121_v38  ;;  %v1192_v61 = vmul.f32 %v10546_v23, %v13108_v22  ;;  %v1000_v34 = vadd.f32 %v968_v33, %v929_v43 }
 0x2d9   : > { %v5926_v40 = vpack.c.bf16 %v5903_v15, %v5902_v18  ;;  %v1001_v55 = vadd.f32 %v969_v49, %v930_v45  ;;  %v1193_v2 = vmul.f32 %v10546_v23, %v13109_v24  ;;  %v1194_v26 = vmul.f32 %v10546_v23, %v13110_v54 }
 0x2da   : > { %v1297_v25 = vrot.slane %v1192_v61, 1  ;;  %v1426_v16 = vmul.f32 %v10557_v57, %v13111_v47  ;;  %v1427_v41 = vmul.f32 %v10557_v57, %v13112_v6  ;;  %v1069_v14 = vadd.f32 %v1037_v0, %v1000_v34  ;;  %v10793_v34 = vld [vmem:[%s12989_s2 + $0x10] ss:$0 sm:$0xff] }
 0x2db   : > { %7862 = vmatprep.mubr.bf16.mxu1 %v5926_v40  ;;  %v1070_v7 = vadd.f32 %v1038_v60, %v1001_v55  ;;  %v1298_v1 = vrot.slane %v1193_v2, 1  ;;  %v1428_v5 = vmul.f32 %v10557_v57, %v13113_v21  ;;  %v1300_v48 = vrot.slane %v1194_v26, 1 }
 0x2dc   : > { %v1538_v11 = vrot.slane %v1426_v16, 1  ;;  %v1539_v9 = vrot.slane %v1427_v41, 1  ;;  %v1670_v27 = vmul.f32 %v10778_v12, %v13114_v3  ;;  %v1136_v28 = vadd.f32 %v1106_v59, %v1069_v14  ;;  %v10804_v41 = vld [vmem:[%s12989_s2 + $0x15] ss:$0 sm:$0xff] }
 0x2dd   : > { %v1137_v50 = vadd.f32 %v1107_v53, %v1070_v7  ;;  %v1299_v18 = vsel %vm1257_vm2, %v1297_v25, %v1298_v1  ;;  %v1541_v33 = vrot.slane %v1428_v5, 1  ;;  %v1301_v49 = vsel %vm1257_vm2, %v1298_v1, %v1300_v48 }
 0x2de   : > { %v1540_v15 = vsel %vm1257_vm2, %v1538_v11, %v1539_v9  ;;  %v1671_v43 = vmul.f32 %v10778_v12, %v13115_v51  ;;  %v1672_v45 = vmul.f32 %v10778_v12, %v13116_v46  ;;  %v1380_v0 = vadd.f32 %v1299_v18, %v1136_v28  ;;  %v13122_v18 = vld [vmem:[#allocation36_spill] sm:$0xff] }
 0x2df   : > { %v1381_v60 = vadd.f32 %v1301_v49, %v1137_v50  ;;  %v1542_v61 = vsel %vm1257_vm2, %v1539_v9, %v1541_v33  ;;  %v1784_v40 = vrot.slane %v1670_v27, 1  ;;  %v1915_v55 = vmul.f32 %v10793_v34, %v13117_v31 }
 0x2e0   : > { %v1785_v59 = vrot.slane %v1671_v43, 1  ;;  %v1787_v53 = vrot.slane %v1672_v45, 1  ;;  %v1916_v2 = vmul.f32 %v10793_v34, %v13118_v32  ;;  %v1623_v26 = vadd.f32 %v1540_v15, %v1380_v0 }
 0x2e1   : > { %v1624_v25 = vadd.f32 %v1542_v61, %v1381_v60  ;;  %v1917_v16 = vmul.f32 %v10793_v34, %v13119_v58  ;;  %v2157_v14 = vmul.f32 %v10804_v41, %v13120_v44  ;;  %v2027_v5 = vrot.slane %v1915_v55, 1 }
 0x2e2   : > { %v1786_v7 = vsel %vm1257_vm2, %v1784_v40, %v1785_v59  ;;  %v1788_v1 = vsel %vm1257_vm2, %v1785_v59, %v1787_v53  ;;  %v2028_v48 = vrot.slane %v1916_v2, 1  ;;  %v2158_v28 = vmul.f32 %v10804_v41, %v13121_v38 }
 0x2e3   : > { %v1869_v11 = vadd.f32 %v1786_v7, %v1623_v26  ;;  %v1870_v9 = vadd.f32 %v1788_v1, %v1624_v25  ;;  %v2030_v27 = vrot.slane %v1917_v16, 1  ;;  %v2159_v33 = vmul.f32 %v10804_v41, %v13122_v18 }
 0x2e4   : > { %v2029_v50 = vsel %vm1257_vm2, %v2027_v5, %v2028_v48  ;;  %v2263_v49 = vrot.slane %v2157_v14, 1  ;;  %v2382_v15 = vmul.f32 %v10594_v17, %v13108_v22  ;;  %v2264_v0 = vrot.slane %v2158_v28, 1 }
 0x2e5   : > { %v2031_v43 = vsel %vm1257_vm2, %v2028_v48, %v2030_v27  ;;  %v2111_v45 = vadd.f32 %v2029_v50, %v1869_v11  ;;  %v2383_v60 = vmul.f32 %v10594_v17, %v13109_v24  ;;  %v2266_v40 = vrot.slane %v2159_v33, 1  ;;  %v10835_v33 = vld [vmem:[%s12989_s2 + $0xc] ss:$0 sm:$0xff] }
 0x2e6   : > { %v2112_v61 = vadd.f32 %v2031_v43, %v1870_v9  ;;  %v2384_v59 = vmul.f32 %v10594_v17, %v13110_v54  ;;  %v2487_v53 = vrot.slane %v2382_v15, 2  ;;  %v2265_v55 = vsel %vm1257_vm2, %v2263_v49, %v2264_v0 }
 0x2e7   : > { %v2488_v2 = vrot.slane %v2383_v60, 2  ;;  %v2615_v26 = vmul.f32 %v10606_v19, %v13111_v47  ;;  %v2616_v25 = vmul.f32 %v10606_v19, %v13112_v6  ;;  %v2267_v16 = vsel %vm1257_vm2, %v2264_v0, %v2266_v40 }
 0x2e8   : > { %v2340_v14 = vadd.f32 %v2265_v55, %v2111_v45  ;;  %v2490_v7 = vrot.slane %v2384_v59, 2  ;;  %v2617_v1 = vmul.f32 %v10606_v19, %v13113_v21  ;;  %v2341_v5 = vadd.f32 %v2267_v16, %v2112_v61  ;;  %v10848_v59 = vld [vmem:[%s12989_s2 + $0x11] ss:$0 sm:$0xff] }
 0x2e9   : > { %v2489_v48 = vsel %vm2447_vm3, %v2487_v53, %v2488_v2  ;;  %v2727_v11 = vrot.slane %v2615_v26, 2  ;;  %v2728_v9 = vrot.slane %v2616_v25, 2  ;;  %v2858_v49 = vmul.f32 %v10835_v33, %v13114_v3 }
 0x2ea   : > { %v2491_v27 = vsel %vm2447_vm3, %v2488_v2, %v2490_v7  ;;  %v2570_v28 = vadd.f32 %v2489_v48, %v2340_v14  ;;  %v2730_v50 = vrot.slane %v2617_v1, 2  ;;  %v2859_v45 = vmul.f32 %v10835_v33, %v13115_v51  ;;  %v10859_v7 = vld [vmem:[%s12989_s2 + $0x16] ss:$0 sm:$0xff] }
 0x2eb   : > { %v2571_v15 = vadd.f32 %v2491_v27, %v2341_v5  ;;  %v2729_v43 = vsel %vm2447_vm3, %v2727_v11, %v2728_v9  ;;  %v2860_v0 = vmul.f32 %v10835_v33, %v13116_v46  ;;  %v2972_v40 = vrot.slane %v2858_v49, 2 }
 0x2ec   : > { %v2731_v60 = vsel %vm2447_vm3, %v2728_v9, %v2730_v50  ;;  %v2812_v61 = vadd.f32 %v2729_v43, %v2570_v28  ;;  %v3103_v53 = vmul.f32 %v10848_v59, %v13117_v31  ;;  %v2973_v2 = vrot.slane %v2859_v45, 2 }
 0x2ed   : > { %v2813_v55 = vadd.f32 %v2731_v60, %v2571_v15  ;;  %v2975_v26 = vrot.slane %v2860_v0, 2  ;;  %v3104_v25 = vmul.f32 %v10848_v59, %v13118_v32  ;;  %v3105_v16 = vmul.f32 %v10848_v59, %v13119_v58 }
 0x2ee   : > { %v3215_v14 = vrot.slane %v3103_v53, 2  ;;  %v3345_v1 = vmul.f32 %v10859_v7, %v13120_v44  ;;  %v3346_v5 = vmul.f32 %v10859_v7, %v13121_v38  ;;  %v2974_v48 = vsel %vm2447_vm3, %v2972_v40, %v2973_v2 }
 0x2ef   : > { %v2976_v11 = vsel %vm2447_vm3, %v2973_v2, %v2975_v26  ;;  %v3216_v9 = vrot.slane %v3104_v25, 2  ;;  %v3347_v27 = vmul.f32 %v10859_v7, %v13122_v18  ;;  %v3057_v28 = vadd.f32 %v2974_v48, %v2812_v61 }
 0x2f0   : > { %v3058_v50 = vadd.f32 %v2976_v11, %v2813_v55  ;;  %v3218_v49 = vrot.slane %v3105_v16, 2  ;;  %v3451_v15 = vrot.slane %v3345_v1, 2  ;;  %v3452_v45 = vrot.slane %v3346_v5, 2 }
 0x2f1   : > { %v3217_v43 = vsel %vm2447_vm3, %v3215_v14, %v3216_v9  ;;  %v3454_v0 = vrot.slane %v3347_v27, 2  ;;  %v3570_v60 = vmul.f32 %v10642_v10, %v13108_v22  ;;  %v3571_v2 = vmul.f32 %v10642_v10, %v13109_v24 }
 0x2f2   : > { %v3219_v53 = vsel %vm2447_vm3, %v3216_v9, %v3218_v49  ;;  %v3299_v40 = vadd.f32 %v3217_v43, %v3057_v28  ;;  %v3572_v26 = vmul.f32 %v10642_v10, %v13110_v54  ;;  %v3453_v55 = vsel %vm2447_vm3, %v3451_v15, %v3452_v45  ;;  %v10888_v28 = vld [vmem:[%s12989_s2 + $0xd] ss:$0 sm:$0xff] }
 0x2f3   : > { %v3300_v61 = vadd.f32 %v3219_v53, %v3058_v50  ;;  %v3455_v25 = vsel %vm2447_vm3, %v3452_v45, %v3454_v0  ;;  %v3675_v16 = vrot.slane %v3570_v60, 3  ;;  %v3676_v1 = vrot.slane %v3571_v2, 3 }
 0x2f4   : > { %v3528_v14 = vadd.f32 %v3453_v55, %v3299_v40  ;;  %v3678_v5 = vrot.slane %v3572_v26, 3  ;;  %v3803_v48 = vmul.f32 %v10655_v37, %v13111_v47  ;;  %v3804_v9 = vmul.f32 %v10655_v37, %v13112_v6  ;;  %v10901_v55 = vld [vmem:[%s12989_s2 + $0x12] ss:$0 sm:$0xff] }
 0x2f5   : > { %v3529_v11 = vadd.f32 %v3455_v25, %v3300_v61  ;;  %v3805_v27 = vmul.f32 %v10655_v37, %v13113_v21  ;;  %v4046_v50 = vmul.f32 %v10888_v28, %v13114_v3  ;;  %v3677_v49 = vsel %vm3635_vm4, %v3675_v16, %v3676_v1 }
 0x2f6   : > { %v3679_v15 = vsel %vm3635_vm4, %v3676_v1, %v3678_v5  ;;  %v3915_v43 = vrot.slane %v3803_v48, 3  ;;  %v4047_v45 = vmul.f32 %v10888_v28, %v13115_v51  ;;  %v3758_v0 = vadd.f32 %v3677_v49, %v3528_v14 }
 0x2f7   : > { %v3759_v60 = vadd.f32 %v3679_v15, %v3529_v11  ;;  %v3916_v53 = vrot.slane %v3804_v9, 3  ;;  %v3918_v40 = vrot.slane %v3805_v27, 3  ;;  %v4048_v2 = vmul.f32 %v10888_v28, %v13116_v46 }
 0x2f8   : > { %v4160_v26 = vrot.slane %v4046_v50, 3  ;;  %v4161_v61 = vrot.slane %v4047_v45, 3  ;;  %v4291_v25 = vmul.f32 %v10901_v55, %v13117_v31  ;;  %v4292_v1 = vmul.f32 %v10901_v55, %v13118_v32 }
 0x2f9   : > { %v3917_v16 = vsel %vm3635_vm4, %v3915_v43, %v3916_v53  ;;  %v3919_v14 = vsel %vm3635_vm4, %v3916_v53, %v3918_v40  ;;  %v4293_v5 = vmul.f32 %v10901_v55, %v13119_v58  ;;  %v4163_v27 = vrot.slane %v4048_v2, 3 }
 0x2fa   : > { %v4000_v48 = vadd.f32 %v3917_v16, %v3758_v0  ;;  %v4001_v11 = vadd.f32 %v3919_v14, %v3759_v60  ;;  %v4162_v9 = vsel %vm3635_vm4, %v4160_v26, %v4161_v61  ;;  %v4403_v50 = vrot.slane %v4291_v25, 3 }
 0x2fb   : > { %v4404_v49 = vrot.slane %v4292_v1, 3  ;;  %v4406_v15 = vrot.slane %v4293_v5, 3  ;;  %v4533_v45 = vmul.f32 %v10429_v4, %v13120_v44  ;;  %v4164_v43 = vsel %vm3635_vm4, %v4161_v61, %v4163_v27 }
 0x2fc   : > { %v4245_v53 = vadd.f32 %v4162_v9, %v4000_v48  ;;  %v4534_v40 = vmul.f32 %v10429_v4, %v13121_v38  ;;  %v4535_v13 = vmul.f32 %v10429_v4, %v13122_v18  ;;  %v4246_v0 = vadd.f32 %v4164_v43, %v4001_v11 }
 0x2fd   : > { %v4405_v60 = vsel %vm3635_vm4, %v4403_v50, %v4404_v49  ;;  %v4407_v2 = vsel %vm3635_vm4, %v4404_v49, %v4406_v15  ;;  %v4639_v26 = vrot.slane %v4533_v45, 3  ;;  %v4758_v1 = vmul.f32 %v10694_v30, %v13108_v22 }
 0x2fe   : > { %v4487_v25 = vadd.f32 %v4405_v60, %v4245_v53  ;;  %v4640_v16 = vrot.slane %v4534_v40, 3  ;;  %v4642_v14 = vrot.slane %v4535_v13, 3  ;;  %v4488_v61 = vadd.f32 %v4407_v2, %v4246_v0 }
 0x2ff   : > { %v4759_v5 = vmul.f32 %v10694_v30, %v13109_v24  ;;  %v4760_v48 = vmul.f32 %v10694_v30, %v13110_v54  ;;  %v4991_v4 = vmul.f32 %v10452_v39, %v13111_v47  ;;  %v4863_v27 = vrot.slane %v4758_v1, 4 }
 0x300   : > { %v4641_v11 = vsel %vm3635_vm4, %v4639_v26, %v4640_v16  ;;  %v4643_v9 = vsel %vm3635_vm4, %v4640_v16, %v4642_v14  ;;  %v4992_v13 = vmul.f32 %v10452_v39, %v13112_v6  ;;  %v4993_v24 = vmul.f32 %v10452_v39, %v13113_v21 }
 0x301   : > { %v4716_v50 = vadd.f32 %v4641_v11, %v4487_v25  ;;  %v4717_v22 = vadd.f32 %v4643_v9, %v4488_v61  ;;  %v4864_v49 = vrot.slane %v4759_v5, 4  ;;  %v4866_v15 = vrot.slane %v4760_v48, 4 }
 0x302   : > { %v5103_v45 = vrot.slane %v4991_v4, 4  ;;  %v5104_v54 = vrot.slane %v4992_v13, 4  ;;  %v5234_v43 = vmul.f32 %v10463_v36, %v13114_v3  ;;  %v5235_v0 = vmul.f32 %v10463_v36, %v13115_v51 }
 0x303   : > { %v4865_v53 = vsel %vm4823_vm5, %v4863_v27, %v4864_v49  ;;  %v4867_v40 = vsel %vm4823_vm5, %v4864_v49, %v4866_v15  ;;  %v5236_v60 = vmul.f32 %v10463_v36, %v13116_v46  ;;  %v5106_v39 = vrot.slane %v4993_v24, 4 }
 0x304   : > { %v4946_v2 = vadd.f32 %v4865_v53, %v4716_v50  ;;  %v4947_v26 = vadd.f32 %v4867_v40, %v4717_v22  ;;  %v5105_v25 = vsel %vm4823_vm5, %v5103_v45, %v5104_v54  ;;  %v5348_v16 = vrot.slane %v5234_v43, 4 }
 0x305   : > { %v5349_v14 = vrot.slane %v5235_v0, 4  ;;  %v5351_v1 = vrot.slane %v5236_v60, 4  ;;  %v5479_v61 = vmul.f32 %v10476_v52, %v13117_v31  ;;  %v5107_v5 = vsel %vm4823_vm5, %v5104_v54, %v5106_v39 }
 0x306   : > { %v5188_v48 = vadd.f32 %v5105_v25, %v4946_v2  ;;  %v5480_v4 = vmul.f32 %v10476_v52, %v13118_v32  ;;  %v5481_v36 = vmul.f32 %v10476_v52, %v13119_v58  ;;  %v5189_v11 = vadd.f32 %v5107_v5, %v4947_v26 }
 0x307   : > { %v5350_v9 = vsel %vm4823_vm5, %v5348_v16, %v5349_v14  ;;  %v5352_v27 = vsel %vm4823_vm5, %v5349_v14, %v5351_v1  ;;  %v5591_v13 = vrot.slane %v5479_v61, 4  ;;  %v5721_v15 = vmul.f32 %v10490_v20, %v13120_v44 }
 0x308   : > { %v5433_v50 = vadd.f32 %v5350_v9, %v5188_v48  ;;  %v5592_v22 = vrot.slane %v5480_v4, 4  ;;  %v5594_v49 = vrot.slane %v5481_v36, 4  ;;  %v5434_v24 = vadd.f32 %v5352_v27, %v5189_v11  ;;  %v13123_v9 = vld [vmem:[#allocation45_spill] sm:$0xff] }
 0x309   : > { %v5722_v45 = vmul.f32 %v10490_v20, %v13121_v38  ;;  %v5723_v54 = vmul.f32 %v10490_v20, %v13122_v18  ;;  %v830_v52 = vmul.f32 %v10504_v8, %v13111_v47  ;;  %v5827_v40 = vrot.slane %v5721_v15, 4 }
 0x30a   : > { %v5593_v43 = vsel %vm4823_vm5, %v5591_v13, %v5592_v22  ;;  %v5595_v53 = vsel %vm4823_vm5, %v5592_v22, %v5594_v49  ;;  %v831_v0 = vmul.f32 %v10504_v8, %v13112_v6  ;;  %v899_v39 = vmul.f32 %v10513_v62, %v13114_v3 }
 0x30b   : > { %v5675_v60 = vadd.f32 %v5593_v43, %v5433_v50  ;;  %v5676_v2 = vadd.f32 %v5595_v53, %v5434_v24  ;;  %v5828_v26 = vrot.slane %v5722_v45, 4  ;;  %v5830_v25 = vrot.slane %v5723_v54, 4 }
 0x30c   : > { %v900_v20 = vmul.f32 %v10513_v62, %v13115_v51  ;;  %v970_v16 = vmul.f32 %v10524_v63, %v13117_v31  ;;  %v971_v14 = vmul.f32 %v10524_v63, %v13118_v32  ;;  %v1039_v61 = vmul.f32 %v10533_v56, %v13120_v44 }
 0x30d   : > { %v5829_v1 = vsel %vm4823_vm5, %v5827_v40, %v5828_v26  ;;  %v5831_v8 = vsel %vm4823_vm5, %v5828_v26, %v5830_v25  ;;  %v1040_v5 = vmul.f32 %v10533_v56, %v13121_v38  ;;  %v931_v36 = vadd.f32 %v899_v39, %v830_v52 }
 0x30e   : > { %v5904_v48 = vadd.f32 %v5829_v1, %v5675_v60  ;;  %v5905_v4 = vadd.f32 %v5831_v8, %v5676_v2  ;;  %v932_v62 = vadd.f32 %v900_v20, %v831_v0  ;;  %v1108_v11 = vmul.f32 %v10757_v35, %v8895_v42 }
 0x30f   : > { %v1109_v63 = vmul.f32 %v10757_v35, %v13123_v9  ;;  %v1195_v27 = vmul.f32 %v10546_v23, %v13111_v47  ;;  %v1196_v13 = vmul.f32 %v10546_v23, %v13112_v6  ;;  %v1002_v22 = vadd.f32 %v970_v16, %v931_v36 }
 0x310   : > { %v5927_v50 = vpack.c.bf16 %v5905_v4, %v5904_v48  ;;  %v1003_v49 = vadd.f32 %v971_v14, %v932_v62  ;;  %v1197_v56 = vmul.f32 %v10546_v23, %v13113_v21  ;;  %v1429_v45 = vmul.f32 %v10557_v57, %v13114_v3 }
 0x311   : > { %v1302_v15 = vrot.slane %v1195_v27, 1  ;;  %v1303_v24 = vrot.slane %v1196_v13, 1  ;;  %v1430_v54 = vmul.f32 %v10557_v57, %v13115_v51  ;;  %v1071_v52 = vadd.f32 %v1039_v61, %v1002_v22 }
 0x312   : > { %7863 = vmatmul.mubr.bf16.gmra.mxu1 %v5927_v50  ;;  %v1072_v43 = vadd.f32 %v1040_v5, %v1003_v49  ;;  %v1305_v53 = vrot.slane %v1197_v56, 1  ;;  %v1431_v40 = vmul.f32 %v10557_v57, %v13116_v46  ;;  %v1543_v60 = vrot.slane %v1429_v45, 1 }
 0x313   : > { %v1304_v0 = vsel %vm1257_vm2, %v1302_v15, %v1303_v24  ;;  %v1544_v2 = vrot.slane %v1430_v54, 1  ;;  %v1673_v23 = vmul.f32 %v10778_v12, %v13117_v31  ;;  %v1138_v26 = vadd.f32 %v1108_v11, %v1071_v52  ;;  %v13124_v52 = vld [vmem:[#allocation46_spill] sm:$0xff] }
 0x314   : > { %v1139_v25 = vadd.f32 %v1109_v63, %v1072_v43  ;;  %v1306_v39 = vsel %vm1257_vm2, %v1303_v24, %v1305_v53  ;;  %v1546_v20 = vrot.slane %v1431_v40, 1  ;;  %v1674_v14 = vmul.f32 %v10778_v12, %v13118_v32 }
 0x315   : > { %v1545_v16 = vsel %vm1257_vm2, %v1543_v60, %v1544_v2  ;;  %v1675_v57 = vmul.f32 %v10778_v12, %v13119_v58  ;;  %v1789_v1 = vrot.slane %v1673_v23, 1  ;;  %v1382_v8 = vadd.f32 %v1304_v0, %v1138_v26 }
 0x316   : > { %v1383_v61 = vadd.f32 %v1306_v39, %v1139_v25  ;;  %v1547_v5 = vsel %vm1257_vm2, %v1544_v2, %v1546_v20  ;;  %v1918_v48 = vmul.f32 %v10793_v34, %v13120_v44  ;;  %v1790_v4 = vrot.slane %v1674_v14, 1 }
 0x317   : > { %v1792_v36 = vrot.slane %v1675_v57, 1  ;;  %v1919_v62 = vmul.f32 %v10793_v34, %v13121_v38  ;;  %v1920_v11 = vmul.f32 %v10793_v34, %v13122_v18  ;;  %v1625_v63 = vadd.f32 %v1545_v16, %v1382_v8 }
 0x318   : > { %v1626_v27 = vadd.f32 %v1547_v5, %v1383_v61  ;;  %v2032_v13 = vrot.slane %v1918_v48, 1  ;;  %v2160_v50 = vmul.f32 %v10804_v41, %v8895_v42  ;;  %v1791_v22 = vsel %vm1257_vm2, %v1789_v1, %v1790_v4 }
 0x319   : > { %v1793_v49 = vsel %vm1257_vm2, %v1790_v4, %v1792_v36  ;;  %v2033_v56 = vrot.slane %v1919_v62, 1  ;;  %v2035_v15 = vrot.slane %v1920_v11, 1  ;;  %v1871_v24 = vadd.f32 %v1791_v22, %v1625_v63 }
 0x31a   : > { %v1872_v45 = vadd.f32 %v1793_v49, %v1626_v27  ;;  %v2161_v54 = vmul.f32 %v10804_v41, %v13123_v9  ;;  %v2162_v43 = vmul.f32 %v10804_v41, %v13124_v52  ;;  %v2268_v0 = vrot.slane %v2160_v50, 1 }
 0x31b   : > { %v2034_v53 = vsel %vm1257_vm2, %v2032_v13, %v2033_v56  ;;  %v2036_v40 = vsel %vm1257_vm2, %v2033_v56, %v2035_v15  ;;  %v2385_v60 = vmul.f32 %v10594_v17, %v13111_v47  ;;  %v2386_v39 = vmul.f32 %v10594_v17, %v13112_v6 }
 0x31c   : > { %v2113_v2 = vadd.f32 %v2034_v53, %v1871_v24  ;;  %v2114_v23 = vadd.f32 %v2036_v40, %v1872_v45  ;;  %v2269_v26 = vrot.slane %v2161_v54, 1  ;;  %v2271_v25 = vrot.slane %v2162_v43, 1 }
 0x31d   : > { %v2387_v20 = vmul.f32 %v10594_v17, %v13113_v21  ;;  %v2492_v16 = vrot.slane %v2385_v60, 2  ;;  %v2618_v14 = vmul.f32 %v10606_v19, %v13114_v3  ;;  %v2619_v8 = vmul.f32 %v10606_v19, %v13115_v51 }
 0x31e   : > { %v2270_v57 = vsel %vm1257_vm2, %v2268_v0, %v2269_v26  ;;  %v2272_v1 = vsel %vm1257_vm2, %v2269_v26, %v2271_v25  ;;  %v2620_v61 = vmul.f32 %v10606_v19, %v13116_v46  ;;  %v2493_v4 = vrot.slane %v2386_v39, 2 }
 0x31f   : > { %v2342_v5 = vadd.f32 %v2270_v57, %v2113_v2  ;;  %v2343_v48 = vadd.f32 %v2272_v1, %v2114_v23  ;;  %v2495_v36 = vrot.slane %v2387_v20, 2  ;;  %v2732_v62 = vrot.slane %v2618_v14, 2 }
 0x320   : > { %v2733_v17 = vrot.slane %v2619_v8, 2  ;;  %v2735_v11 = vrot.slane %v2620_v61, 2  ;;  %v2861_v63 = vmul.f32 %v10835_v33, %v13117_v31  ;;  %v2494_v27 = vsel %vm2447_vm3, %v2492_v16, %v2493_v4 }
 0x321   : > { %v2496_v13 = vsel %vm2447_vm3, %v2493_v4, %v2495_v36  ;;  %v2862_v50 = vmul.f32 %v10835_v33, %v13118_v32  ;;  %v2863_v19 = vmul.f32 %v10835_v33, %v13119_v58  ;;  %v2572_v22 = vadd.f32 %v2494_v27, %v2342_v5 }
 0x322   : > { %v2573_v49 = vadd.f32 %v2496_v13, %v2343_v48  ;;  %v2734_v56 = vsel %vm2447_vm3, %v2732_v62, %v2733_v17  ;;  %v2736_v15 = vsel %vm2447_vm3, %v2733_v17, %v2735_v11  ;;  %v2977_v24 = vrot.slane %v2861_v63, 2 }
 0x323   : > { %v2978_v45 = vrot.slane %v2862_v50, 2  ;;  %v2980_v54 = vrot.slane %v2863_v19, 2  ;;  %v3106_v43 = vmul.f32 %v10848_v59, %v13120_v44  ;;  %v2814_v53 = vadd.f32 %v2734_v56, %v2572_v22 }
 0x324   : > { %v2815_v40 = vadd.f32 %v2736_v15, %v2573_v49  ;;  %v3107_v0 = vmul.f32 %v10848_v59, %v13121_v38  ;;  %v3108_v60 = vmul.f32 %v10848_v59, %v13122_v18  ;;  %v3348_v25 = vmul.f32 %v10859_v7, %v8895_v42 }
 0x325   : > { %v2979_v2 = vsel %vm2447_vm3, %v2977_v24, %v2978_v45  ;;  %v2981_v23 = vsel %vm2447_vm3, %v2978_v45, %v2980_v54  ;;  %v3220_v26 = vrot.slane %v3106_v43, 2  ;;  %v3349_v57 = vmul.f32 %v10859_v7, %v13123_v9 }
 0x326   : > { %v3059_v39 = vadd.f32 %v2979_v2, %v2814_v53  ;;  %v3060_v20 = vadd.f32 %v2981_v23, %v2815_v40  ;;  %v3221_v16 = vrot.slane %v3107_v0, 2  ;;  %v3223_v14 = vrot.slane %v3108_v60, 2 }
 0x327   : > { %v3350_v1 = vmul.f32 %v10859_v7, %v13124_v52  ;;  %v3456_v8 = vrot.slane %v3348_v25, 2  ;;  %v3573_v61 = vmul.f32 %v10642_v10, %v13111_v47  ;;  %v3574_v4 = vmul.f32 %v10642_v10, %v13112_v6 }
 0x328   : > { %v3222_v5 = vsel %vm2447_vm3, %v3220_v26, %v3221_v16  ;;  %v3224_v48 = vsel %vm2447_vm3, %v3221_v16, %v3223_v14  ;;  %v3575_v36 = vmul.f32 %v10642_v10, %v13113_v21  ;;  %v3457_v11 = vrot.slane %v3349_v57, 2 }
 0x329   : > { %v3301_v62 = vadd.f32 %v3222_v5, %v3059_v39  ;;  %v3302_v17 = vadd.f32 %v3224_v48, %v3060_v20  ;;  %v3459_v63 = vrot.slane %v3350_v1, 2  ;;  %v3680_v27 = vrot.slane %v3573_v61, 3  ;;  %v11094_v48 = vld [vmem:[%s12989_s2 + $0x17] ss:$0 sm:$0xff] }
 0x32a   : > { %v3681_v13 = vrot.slane %v3574_v4, 3  ;;  %v3683_v50 = vrot.slane %v3575_v36, 3  ;;  %v3806_v19 = vmul.f32 %v10655_v37, %v13114_v3  ;;  %v3458_v22 = vsel %vm2447_vm3, %v3456_v8, %v3457_v11 }
 0x32b   : > { %v3460_v49 = vsel %vm2447_vm3, %v3457_v11, %v3459_v63  ;;  %v3807_v56 = vmul.f32 %v10655_v37, %v13115_v51  ;;  %v3808_v10 = vmul.f32 %v10655_v37, %v13116_v46  ;;  %v3530_v15 = vadd.f32 %v3458_v22, %v3301_v62 }
 0x32c   : > { %v3531_v24 = vadd.f32 %v3460_v49, %v3302_v17  ;;  %v3682_v45 = vsel %vm3635_vm4, %v3680_v27, %v3681_v13  ;;  %v3684_v54 = vsel %vm3635_vm4, %v3681_v13, %v3683_v50  ;;  %v3920_v43 = vrot.slane %v3806_v19, 3 }
 0x32d   : > { %v3921_v53 = vrot.slane %v3807_v56, 3  ;;  %v3923_v40 = vrot.slane %v3808_v10, 3  ;;  %v4049_v0 = vmul.f32 %v10888_v28, %v13117_v31  ;;  %v3760_v60 = vadd.f32 %v3682_v45, %v3530_v15 }
 0x32e   : > { %v3761_v2 = vadd.f32 %v3684_v54, %v3531_v24  ;;  %v4050_v23 = vmul.f32 %v10888_v28, %v13118_v32  ;;  %v4051_v37 = vmul.f32 %v10888_v28, %v13119_v58  ;;  %v4294_v20 = vmul.f32 %v10901_v55, %v13120_v44 }
 0x32f   : > { %v3922_v26 = vsel %vm3635_vm4, %v3920_v43, %v3921_v53  ;;  %v3924_v25 = vsel %vm3635_vm4, %v3921_v53, %v3923_v40  ;;  %v4165_v39 = vrot.slane %v4049_v0, 3  ;;  %v4295_v8 = vmul.f32 %v10901_v55, %v13121_v38 }
 0x330   : > { %v4002_v16 = vadd.f32 %v3922_v26, %v3760_v60  ;;  %v4003_v14 = vadd.f32 %v3924_v25, %v3761_v2  ;;  %v4166_v57 = vrot.slane %v4050_v23, 3  ;;  %v4168_v1 = vrot.slane %v4051_v37, 3 }
 0x331   : > { %v4296_v61 = vmul.f32 %v10901_v55, %v13122_v18  ;;  %v4408_v5 = vrot.slane %v4294_v20, 3  ;;  %v4536_v4 = vmul.f32 %v11094_v48, %v8895_v42  ;;  %v4537_v17 = vmul.f32 %v11094_v48, %v13123_v9  ;;  %v11130_v20 = vld [vmem:[%s12989_s2 + $0xe] ss:$0 sm:$0xff] }
 0x332   : > { %v4167_v36 = vsel %vm3635_vm4, %v4165_v39, %v4166_v57  ;;  %v4169_v62 = vsel %vm3635_vm4, %v4166_v57, %v4168_v1  ;;  %v4538_v11 = vmul.f32 %v11094_v48, %v13124_v52  ;;  %v4409_v13 = vrot.slane %v4295_v8, 3 }
 0x333   : > { %v4247_v63 = vadd.f32 %v4167_v36, %v4002_v16  ;;  %v4248_v27 = vadd.f32 %v4169_v62, %v4003_v14  ;;  %v4411_v50 = vrot.slane %v4296_v61, 3  ;;  %v4644_v19 = vrot.slane %v4536_v4, 3  ;;  %v11141_v36 = vld [vmem:[%s12989_s2 + $0x13] ss:$0 sm:$0xff] }
 0x334   : > { %v4645_v22 = vrot.slane %v4537_v17, 3  ;;  %v4647_v49 = vrot.slane %v4538_v11, 3  ;;  %v4761_v56 = vmul.f32 %v10694_v30, %v13111_v47  ;;  %v4410_v10 = vsel %vm3635_vm4, %v4408_v5, %v4409_v13  ;;  %v11117_v47 = vld [vmem:[%s12989_s2 + $0x9] ss:$0 sm:$0xff] }
 0x335   : > { %v4412_v15 = vsel %vm3635_vm4, %v4409_v13, %v4411_v50  ;;  %v4762_v24 = vmul.f32 %v10694_v30, %v13112_v6  ;;  %v4763_v45 = vmul.f32 %v10694_v30, %v13113_v21  ;;  %v4489_v54 = vadd.f32 %v4410_v10, %v4247_v63 }
 0x336   : > { %v4490_v43 = vadd.f32 %v4412_v15, %v4248_v27  ;;  %v4646_v53 = vsel %vm3635_vm4, %v4644_v19, %v4645_v22  ;;  %v4648_v40 = vsel %vm3635_vm4, %v4645_v22, %v4647_v49  ;;  %v4868_v0 = vrot.slane %v4761_v56, 4  ;;  %v11154_v15 = vld [vmem:[%s12989_s2 + $0x18] ss:$0 sm:$0xff] }
 0x337   : > { %v4869_v60 = vrot.slane %v4762_v24, 4  ;;  %v4871_v2 = vrot.slane %v4763_v45, 4  ;;  %v4994_v6 = vmul.f32 %v11117_v47, %v13114_v3  ;;  %v4718_v23 = vadd.f32 %v4646_v53, %v4489_v54 }
 0x338   : > { %v4719_v37 = vadd.f32 %v4648_v40, %v4490_v43  ;;  %v4995_v21 = vmul.f32 %v11117_v47, %v13115_v51  ;;  %v4996_v30 = vmul.f32 %v11117_v47, %v13116_v46  ;;  %v5237_v16 = vmul.f32 %v11130_v20, %v13117_v31 }
 0x339   : > { %v4870_v26 = vsel %vm4823_vm5, %v4868_v0, %v4869_v60  ;;  %v4872_v25 = vsel %vm4823_vm5, %v4869_v60, %v4871_v2  ;;  %v5108_v39 = vrot.slane %v4994_v6, 4  ;;  %v5238_v61 = vmul.f32 %v11130_v20, %v13118_v32 }
 0x33a   : > { %v4948_v14 = vadd.f32 %v4870_v26, %v4718_v23  ;;  %v4949_v57 = vadd.f32 %v4872_v25, %v4719_v37  ;;  %v5109_v1 = vrot.slane %v4995_v21, 4  ;;  %v5111_v8 = vrot.slane %v4996_v30, 4  ;;  %v11169_v21 = vld [vmem:[%s12989_s2] ss:$0 sm:$0xff] }
 0x33b   : > { %v5239_v5 = vmul.f32 %v11130_v20, %v13119_v58  ;;  %v5353_v4 = vrot.slane %v5237_v16, 4  ;;  %v5482_v62 = vmul.f32 %v11141_v36, %v13120_v44  ;;  %v5483_v63 = vmul.f32 %v11141_v36, %v13121_v38  ;;  %v11178_v16 = vld [vmem:[%s12989_s2 + $0x5] ss:$0 sm:$0xff] }
 0x33c   : > { %v5110_v17 = vsel %vm4823_vm5, %v5108_v39, %v5109_v1  ;;  %v5112_v11 = vsel %vm4823_vm5, %v5109_v1, %v5111_v8  ;;  %v5484_v27 = vmul.f32 %v11141_v36, %v13122_v18  ;;  %v5354_v19 = vrot.slane %v5238_v61, 4  ;;  %v11189_v61 = vld [vmem:[%s12989_s2 + $0xa] ss:$0 sm:$0xff] }
 0x33d   : > { %v5190_v13 = vadd.f32 %v5110_v17, %v4948_v14  ;;  %v5191_v50 = vadd.f32 %v5112_v11, %v4949_v57  ;;  %v5356_v22 = vrot.slane %v5239_v5, 4  ;;  %v5596_v49 = vrot.slane %v5482_v62, 4 }
 0x33e   : > { %v5597_v56 = vrot.slane %v5483_v63, 4  ;;  %v5599_v10 = vrot.slane %v5484_v27, 4  ;;  %v5724_v24 = vmul.f32 %v11154_v15, %v8895_v42  ;;  %v5355_v45 = vsel %vm4823_vm5, %v5353_v4, %v5354_v19  ;;  %v11198_v27 = vld [vmem:[%s12989_s2 + $0xf] ss:$0 sm:$0xff] }
 0x33f   : > { %v5357_v54 = vsel %vm4823_vm5, %v5354_v19, %v5356_v22  ;;  %v5725_v43 = vmul.f32 %v11154_v15, %v13123_v9  ;;  %v5726_v53 = vmul.f32 %v11154_v15, %v13124_v52  ;;  %v5435_v40 = vadd.f32 %v5355_v45, %v5190_v13  ;;  %v13125_v19 = vld [vmem:[#allocation42_spill] sm:$0xff]  ;;  %v11211_v45 = vld [vmem:[%s12989_s2 + $0x1] ss:$0 sm:$0xff] }
 0x340   : > { %v5436_v0 = vadd.f32 %v5357_v54, %v5191_v50  ;;  %v5598_v60 = vsel %vm4823_vm5, %v5596_v49, %v5597_v56  ;;  %v5600_v2 = vsel %vm4823_vm5, %v5597_v56, %v5599_v10  ;;  %v5832_v6 = vrot.slane %v5724_v24, 4  ;;  %v13126_v10 = vld [vmem:[#allocation43_spill] sm:$0xff] }
 0x341   : > { %v5833_v23 = vrot.slane %v5725_v43, 4  ;;  %v5835_v37 = vrot.slane %v5726_v53, 4  ;;  %v832_v30 = vmul.f32 %v11169_v21, %v13114_v3  ;;  %v5677_v26 = vadd.f32 %v5598_v60, %v5435_v40 }
 0x342   : > { %v5678_v25 = vadd.f32 %v5600_v2, %v5436_v0  ;;  %v833_v39 = vmul.f32 %v11169_v21, %v13115_v51  ;;  %v901_v14 = vmul.f32 %v11178_v16, %v13117_v31  ;;  %v902_v8 = vmul.f32 %v11178_v16, %v13118_v32  ;;  %v11222_v0 = vld [vmem:[%s12989_s2 + $0x6] ss:$0 sm:$0xff] }
 0x343   : > { %v5834_v57 = vsel %vm4823_vm5, %v5832_v6, %v5833_v23  ;;  %v5836_v1 = vsel %vm4823_vm5, %v5833_v23, %v5835_v37  ;;  %v972_v5 = vmul.f32 %v11189_v61, %v13120_v44  ;;  %v973_v11 = vmul.f32 %v11189_v61, %v13121_v38 }
 0x344   : > { %v5906_v4 = vadd.f32 %v5834_v57, %v5677_v26  ;;  %v5907_v62 = vadd.f32 %v5836_v1, %v5678_v25  ;;  %v933_v17 = vadd.f32 %v901_v14, %v832_v30  ;;  %v934_v63 = vadd.f32 %v902_v8, %v833_v39 }
 0x345   : > { %v1041_v13 = vmul.f32 %v11198_v27, %v8895_v42  ;;  %v1042_v50 = vmul.f32 %v11198_v27, %v13123_v9  ;;  %v1110_v22 = vmul.f32 %v10757_v35, %v13125_v19  ;;  %v1111_v24 = vmul.f32 %v10757_v35, %v13126_v10 }
 0x346   : > { %v5928_v49 = vpack.c.bf16 %v5907_v62, %v5906_v4  ;;  %v1004_v56 = vadd.f32 %v972_v5, %v933_v17  ;;  %v1198_v54 = vmul.f32 %v11211_v45, %v13114_v3  ;;  %v1005_v43 = vadd.f32 %v973_v11, %v934_v63 }
 0x347   : > { %v1199_v53 = vmul.f32 %v11211_v45, %v13115_v51  ;;  %v1200_v40 = vmul.f32 %v11211_v45, %v13116_v46  ;;  %v1432_v35 = vmul.f32 %v11222_v0, %v13117_v31  ;;  %v1433_v6 = vmul.f32 %v11222_v0, %v13118_v32 }
 0x348   : > { %7866 = vmatprep.mubr.bf16.mxu1 %v5928_v49  ;;  %v1073_v60 = vadd.f32 %v1041_v13, %v1004_v56  ;;  %v1307_v2 = vrot.slane %v1198_v54, 1  ;;  %v1434_v23 = vmul.f32 %v11222_v0, %v13119_v58  ;;  %v1074_v37 = vadd.f32 %v1042_v50, %v1005_v43 }
 0x349   : > { %v1308_v30 = vrot.slane %v1199_v53, 1  ;;  %v1310_v26 = vrot.slane %v1200_v40, 1  ;;  %v1548_v25 = vrot.slane %v1432_v35, 1  ;;  %v1549_v14 = vrot.slane %v1433_v6, 1 }
 0x34a   : > { %v1140_v39 = vadd.f32 %v1110_v22, %v1073_v60  ;;  %v1551_v57 = vrot.slane %v1434_v23, 1  ;;  %v1676_v1 = vmul.f32 %v10778_v12, %v13120_v44  ;;  %v1141_v8 = vadd.f32 %v1111_v24, %v1074_v37 }
 0x34b   : > { %v1309_v5 = vsel %vm1257_vm2, %v1307_v2, %v1308_v30  ;;  %v1311_v4 = vsel %vm1257_vm2, %v1308_v30, %v1310_v26  ;;  %v1677_v62 = vmul.f32 %v10778_v12, %v13121_v38  ;;  %v1550_v11 = vsel %vm1257_vm2, %v1548_v25, %v1549_v14  ;;  %v13127_v25 = vld [vmem:[#allocation44_spill] sm:$0xff] }
 0x34c   : > { %v1384_v17 = vadd.f32 %v1309_v5, %v1140_v39  ;;  %v1552_v63 = vsel %vm1257_vm2, %v1549_v14, %v1551_v57  ;;  %v1678_v13 = vmul.f32 %v10778_v12, %v13122_v18  ;;  %v1385_v50 = vadd.f32 %v1311_v4, %v1141_v8 }
 0x34d   : > { %v1794_v22 = vrot.slane %v1676_v1, 1  ;;  %v1795_v49 = vrot.slane %v1677_v62, 1  ;;  %v1921_v56 = vmul.f32 %v10793_v34, %v8895_v42  ;;  %v1922_v43 = vmul.f32 %v10793_v34, %v13123_v9  ;;  %v11259_v1 = vld [vmem:[%s12989_s2 + $0x2] ss:$0 sm:$0xff] }
 0x34e   : > { %v1627_v24 = vadd.f32 %v1550_v11, %v1384_v17  ;;  %v1797_v54 = vrot.slane %v1678_v13, 1  ;;  %v1923_v53 = vmul.f32 %v10793_v34, %v13124_v52  ;;  %v1628_v40 = vadd.f32 %v1552_v63, %v1385_v50  ;;  %v11270_v50 = vld [vmem:[%s12989_s2 + $0x7] ss:$0 sm:$0xff] }
 0x34f   : > { %v1796_v35 = vsel %vm1257_vm2, %v1794_v22, %v1795_v49  ;;  %v2037_v60 = vrot.slane %v1921_v56, 1  ;;  %v2163_v12 = vmul.f32 %v10804_v41, %v13125_v19  ;;  %v2038_v23 = vrot.slane %v1922_v43, 1 }
 0x350   : > { %v1798_v2 = vsel %vm1257_vm2, %v1795_v49, %v1797_v54  ;;  %v1873_v6 = vadd.f32 %v1796_v35, %v1627_v24  ;;  %v2040_v37 = vrot.slane %v1923_v53, 1  ;;  %v2164_v26 = vmul.f32 %v10804_v41, %v13126_v10 }
 0x351   : > { %v1874_v30 = vadd.f32 %v1798_v2, %v1628_v40  ;;  %v2165_v39 = vmul.f32 %v10804_v41, %v13127_v25  ;;  %v2273_v34 = vrot.slane %v2163_v12, 1  ;;  %v2039_v14 = vsel %vm1257_vm2, %v2037_v60, %v2038_v23 }
 0x352   : > { %v2041_v57 = vsel %vm1257_vm2, %v2038_v23, %v2040_v37  ;;  %v2388_v8 = vmul.f32 %v11259_v1, %v13114_v3  ;;  %v2389_v5 = vmul.f32 %v11259_v1, %v13115_v51  ;;  %v2115_v4 = vadd.f32 %v2039_v14, %v1873_v6 }
 0x353   : > { %v2116_v62 = vadd.f32 %v2041_v57, %v1874_v30  ;;  %v2274_v17 = vrot.slane %v2164_v26, 1  ;;  %v2276_v41 = vrot.slane %v2165_v39, 1  ;;  %v2390_v11 = vmul.f32 %v11259_v1, %v13116_v46 }
 0x354   : > { %v2497_v63 = vrot.slane %v2388_v8, 2  ;;  %v2498_v13 = vrot.slane %v2389_v5, 2  ;;  %v2621_v22 = vmul.f32 %v11270_v50, %v13117_v31  ;;  %v2622_v24 = vmul.f32 %v11270_v50, %v13118_v32 }
 0x355   : > { %v2275_v49 = vsel %vm1257_vm2, %v2273_v34, %v2274_v17  ;;  %v2277_v56 = vsel %vm1257_vm2, %v2274_v17, %v2276_v41  ;;  %v2623_v54 = vmul.f32 %v11270_v50, %v13119_v58  ;;  %v2500_v35 = vrot.slane %v2390_v11, 2 }
 0x356   : > { %v2344_v43 = vadd.f32 %v2275_v49, %v2115_v4  ;;  %v2345_v53 = vadd.f32 %v2277_v56, %v2116_v62  ;;  %v2499_v40 = vsel %vm2447_vm3, %v2497_v63, %v2498_v13  ;;  %v2737_v60 = vrot.slane %v2621_v22, 2 }
 0x357   : > { %v2738_v12 = vrot.slane %v2622_v24, 2  ;;  %v2740_v2 = vrot.slane %v2623_v54, 2  ;;  %v2864_v6 = vmul.f32 %v10835_v33, %v13120_v44  ;;  %v2501_v23 = vsel %vm2447_vm3, %v2498_v13, %v2500_v35  ;;  %v11307_v35 = vld [vmem:[%s12989_s2 + $0x3] ss:$0 sm:$0xff] }
 0x358   : > { %v2574_v37 = vadd.f32 %v2499_v40, %v2344_v43  ;;  %v2865_v30 = vmul.f32 %v10835_v33, %v13121_v38  ;;  %v2866_v26 = vmul.f32 %v10835_v33, %v13122_v18  ;;  %v2575_v39 = vadd.f32 %v2501_v23, %v2345_v53 }
 0x359   : > { %v2739_v34 = vsel %vm2447_vm3, %v2737_v60, %v2738_v12  ;;  %v2741_v14 = vsel %vm2447_vm3, %v2738_v12, %v2740_v2  ;;  %v2982_v57 = vrot.slane %v2864_v6, 2  ;;  %v3109_v62 = vmul.f32 %v10848_v59, %v8895_v42 }
 0x35a   : > { %v2816_v8 = vadd.f32 %v2739_v34, %v2574_v37  ;;  %v2983_v5 = vrot.slane %v2865_v30, 2  ;;  %v2985_v4 = vrot.slane %v2866_v26, 2  ;;  %v2817_v17 = vadd.f32 %v2741_v14, %v2575_v39 }
 0x35b   : > { %v3110_v41 = vmul.f32 %v10848_v59, %v13123_v9  ;;  %v3111_v11 = vmul.f32 %v10848_v59, %v13124_v52  ;;  %v3351_v33 = vmul.f32 %v10859_v7, %v13125_v19  ;;  %v3225_v22 = vrot.slane %v3109_v62, 2 }
 0x35c   : > { %v2984_v63 = vsel %vm2447_vm3, %v2982_v57, %v2983_v5  ;;  %v2986_v13 = vsel %vm2447_vm3, %v2983_v5, %v2985_v4  ;;  %v3352_v49 = vmul.f32 %v10859_v7, %v13126_v10  ;;  %v3353_v53 = vmul.f32 %v10859_v7, %v13127_v25  ;;  %v11321_v57 = vld [vmem:[%s12989_s2 + $0x8] ss:$0 sm:$0xff] }
 0x35d   : > { %v3061_v56 = vadd.f32 %v2984_v63, %v2816_v8  ;;  %v3062_v24 = vadd.f32 %v2986_v13, %v2817_v17  ;;  %v3226_v54 = vrot.slane %v3110_v41, 2  ;;  %v3228_v43 = vrot.slane %v3111_v11, 2 }
 0x35e   : > { %v3461_v40 = vrot.slane %v3351_v33, 2  ;;  %v3462_v59 = vrot.slane %v3352_v49, 2  ;;  %v3576_v60 = vmul.f32 %v11307_v35, %v13114_v3  ;;  %v3577_v6 = vmul.f32 %v11307_v35, %v13115_v51 }
 0x35f   : > { %v3227_v12 = vsel %vm2447_vm3, %v3225_v22, %v3226_v54  ;;  %v3229_v2 = vsel %vm2447_vm3, %v3226_v54, %v3228_v43  ;;  %v3578_v7 = vmul.f32 %v11307_v35, %v13116_v46  ;;  %v3464_v26 = vrot.slane %v3353_v53, 2 }
 0x360   : > { %v3303_v23 = vadd.f32 %v3227_v12, %v3061_v56  ;;  %v3304_v37 = vadd.f32 %v3229_v2, %v3062_v24  ;;  %v3463_v30 = vsel %vm2447_vm3, %v3461_v40, %v3462_v59  ;;  %v3685_v39 = vrot.slane %v3576_v60, 3 }
 0x361   : > { %v3686_v34 = vrot.slane %v3577_v6, 3  ;;  %v3688_v14 = vrot.slane %v3578_v7, 3  ;;  %v3809_v8 = vmul.f32 %v11321_v57, %v13117_v31  ;;  %v3465_v5 = vsel %vm2447_vm3, %v3462_v59, %v3464_v26 }
 0x362   : > { %v3532_v4 = vadd.f32 %v3463_v30, %v3303_v23  ;;  %v3810_v62 = vmul.f32 %v11321_v57, %v13118_v32  ;;  %v3811_v17 = vmul.f32 %v11321_v57, %v13119_v58  ;;  %v3533_v41 = vadd.f32 %v3465_v5, %v3304_v37 }
 0x363   : > { %v3687_v11 = vsel %vm3635_vm4, %v3685_v39, %v3686_v34  ;;  %v3689_v33 = vsel %vm3635_vm4, %v3686_v34, %v3688_v14  ;;  %v3925_v63 = vrot.slane %v3809_v8, 3  ;;  %v4052_v56 = vmul.f32 %v10888_v28, %v13120_v44 }
 0x364   : > { %v3762_v13 = vadd.f32 %v3687_v11, %v3532_v4  ;;  %v3926_v22 = vrot.slane %v3810_v62, 3  ;;  %v3928_v49 = vrot.slane %v3811_v17, 3  ;;  %v3763_v24 = vadd.f32 %v3689_v33, %v3533_v41  ;;  %v11358_v33 = vld [vmem:[%s12989_s2 + $0x4] ss:$0 sm:$0xff] }
 0x365   : > { %v4053_v54 = vmul.f32 %v10888_v28, %v13121_v38  ;;  %v4054_v43 = vmul.f32 %v10888_v28, %v13122_v18  ;;  %v4297_v53 = vmul.f32 %v10901_v55, %v8895_v42  ;;  %v4170_v60 = vrot.slane %v4052_v56, 3 }
 0x366   : > { %v3927_v40 = vsel %vm3635_vm4, %v3925_v63, %v3926_v22  ;;  %v3929_v59 = vsel %vm3635_vm4, %v3926_v22, %v3928_v49  ;;  %v4298_v12 = vmul.f32 %v10901_v55, %v13123_v9  ;;  %v4299_v37 = vmul.f32 %v10901_v55, %v13124_v52 }
 0x367   : > { %v4004_v2 = vadd.f32 %v3927_v40, %v3762_v13  ;;  %v4005_v6 = vadd.f32 %v3929_v59, %v3763_v24  ;;  %v4171_v7 = vrot.slane %v4053_v54, 3  ;;  %v4173_v23 = vrot.slane %v4054_v43, 3 }
 0x368   : > { %v4413_v30 = vrot.slane %v4297_v53, 3  ;;  %v4414_v28 = vrot.slane %v4298_v12, 3  ;;  %v4539_v26 = vmul.f32 %v11094_v48, %v13125_v19  ;;  %v4540_v14 = vmul.f32 %v11094_v48, %v13126_v10 }
 0x369   : > { %v4172_v39 = vsel %vm3635_vm4, %v4170_v60, %v4171_v7  ;;  %v4174_v34 = vsel %vm3635_vm4, %v4171_v7, %v4173_v23  ;;  %v4541_v8 = vmul.f32 %v11094_v48, %v13127_v25  ;;  %v4416_v55 = vrot.slane %v4299_v37, 3 }
 0x36a   : > { %v4249_v5 = vadd.f32 %v4172_v39, %v4004_v2  ;;  %v4250_v4 = vadd.f32 %v4174_v34, %v4005_v6  ;;  %v4415_v62 = vsel %vm3635_vm4, %v4413_v30, %v4414_v28  ;;  %v4649_v17 = vrot.slane %v4539_v26, 3 }
 0x36b   : > { %v4650_v41 = vrot.slane %v4540_v14, 3  ;;  %v4652_v11 = vrot.slane %v4541_v8, 3  ;;  %v4764_v63 = vmul.f32 %v11358_v33, %v13114_v3  ;;  %v4417_v13 = vsel %vm3635_vm4, %v4414_v28, %v4416_v55 }
 0x36c   : > { %v4491_v22 = vadd.f32 %v4415_v62, %v4249_v5  ;;  %v4765_v49 = vmul.f32 %v11358_v33, %v13115_v51  ;;  %v4766_v56 = vmul.f32 %v11358_v33, %v13116_v46  ;;  %v4492_v24 = vadd.f32 %v4417_v13, %v4250_v4 }
 0x36d   : > { %v4651_v54 = vsel %vm3635_vm4, %v4649_v17, %v4650_v41  ;;  %v4653_v43 = vsel %vm3635_vm4, %v4650_v41, %v4652_v11  ;;  %v4873_v53 = vrot.slane %v4764_v63, 4  ;;  %v4997_v3 = vmul.f32 %v11117_v47, %v13117_v31 }
 0x36e   : > { %v4720_v40 = vadd.f32 %v4651_v54, %v4491_v22  ;;  %v4874_v59 = vrot.slane %v4765_v49, 4  ;;  %v4876_v60 = vrot.slane %v4766_v56, 4  ;;  %v4721_v12 = vadd.f32 %v4653_v43, %v4492_v24 }
 0x36f   : > { %v4998_v2 = vmul.f32 %v11117_v47, %v13118_v32  ;;  %v4999_v51 = vmul.f32 %v11117_v47, %v13119_v58  ;;  %v5240_v46 = vmul.f32 %v11130_v20, %v13120_v44  ;;  %v5113_v23 = vrot.slane %v4997_v3, 4 }
 0x370   : > { %v4875_v6 = vsel %vm4823_vm5, %v4873_v53, %v4874_v59  ;;  %v4877_v7 = vsel %vm4823_vm5, %v4874_v59, %v4876_v60  ;;  %v5241_v37 = vmul.f32 %v11130_v20, %v13121_v38  ;;  %v5242_v34 = vmul.f32 %v11130_v20, %v13122_v18 }
 0x371   : > { %v4950_v30 = vadd.f32 %v4875_v6, %v4720_v40  ;;  %v4951_v28 = vadd.f32 %v4877_v7, %v4721_v12  ;;  %v5114_v26 = vrot.slane %v4998_v2, 4  ;;  %v5116_v39 = vrot.slane %v4999_v51, 4 }
 0x372   : > { %v5358_v14 = vrot.slane %v5240_v46, 4  ;;  %v5359_v8 = vrot.slane %v5241_v37, 4  ;;  %v5485_v5 = vmul.f32 %v11141_v36, %v8895_v42  ;;  %v5486_v55 = vmul.f32 %v11141_v36, %v13123_v9 }
 0x373   : > { %v5115_v4 = vsel %vm4823_vm5, %v5113_v23, %v5114_v26  ;;  %v5117_v62 = vsel %vm4823_vm5, %v5114_v26, %v5116_v39  ;;  %v5487_v17 = vmul.f32 %v11141_v36, %v13124_v52  ;;  %v5361_v13 = vrot.slane %v5242_v34, 4 }
 0x374   : > { %v5192_v41 = vadd.f32 %v5115_v4, %v4950_v30  ;;  %v5193_v11 = vadd.f32 %v5117_v62, %v4951_v28  ;;  %v5360_v63 = vsel %vm4823_vm5, %v5358_v14, %v5359_v8  ;;  %v5601_v22 = vrot.slane %v5485_v5, 4 }
 0x375   : > { %v5602_v49 = vrot.slane %v5486_v55, 4  ;;  %v5604_v56 = vrot.slane %v5487_v17, 4  ;;  %v5727_v24 = vmul.f32 %v11154_v15, %v13125_v19  ;;  %v5362_v54 = vsel %vm4823_vm5, %v5359_v8, %v5361_v13  ;;  %v11422_v17 = vld [vmem:[%s12989_s2 + $0x14] ss:$0 sm:$0xff] }
 0x376   : > { %v5437_v43 = vadd.f32 %v5360_v63, %v5192_v41  ;;  %v5728_v53 = vmul.f32 %v11154_v15, %v13126_v10  ;;  %v5729_v40 = vmul.f32 %v11154_v15, %v13127_v25  ;;  %v5438_v59 = vadd.f32 %v5362_v54, %v5193_v11  ;;  %v13128_v41 = vld [vmem:[#allocation52_spill] sm:$0xff]  ;;  %v13129_v63 = vld [vmem:[#allocation53_spill] sm:$0xff] }
 0x377   : > { %v5603_v60 = vsel %vm4823_vm5, %v5601_v22, %v5602_v49  ;;  %v5605_v3 = vsel %vm4823_vm5, %v5602_v49, %v5604_v56  ;;  %v5837_v12 = vrot.slane %v5727_v24, 4  ;;  %v834_v6 = vmul.f32 %v11169_v21, %v13117_v31 }
 0x378   : > { %v5679_v2 = vadd.f32 %v5603_v60, %v5437_v43  ;;  %v5838_v51 = vrot.slane %v5728_v53, 4  ;;  %v5840_v46 = vrot.slane %v5729_v40, 4  ;;  %v5680_v7 = vadd.f32 %v5605_v3, %v5438_v59 }
 0x379   : > { %v835_v23 = vmul.f32 %v11169_v21, %v13118_v32  ;;  %v903_v37 = vmul.f32 %v11178_v16, %v13120_v44  ;;  %v904_v30 = vmul.f32 %v11178_v16, %v13121_v38  ;;  %v974_v39 = vmul.f32 %v11189_v61, %v8895_v42 }
 0x37a   : > { %v5839_v28 = vsel %vm4823_vm5, %v5837_v12, %v5838_v51  ;;  %v5841_v26 = vsel %vm4823_vm5, %v5838_v51, %v5840_v46  ;;  %v975_v34 = vmul.f32 %v11189_v61, %v13123_v9  ;;  %v1043_v62 = vmul.f32 %v11198_v27, %v13125_v19 }
 0x37b   : > { %v5908_v14 = vadd.f32 %v5839_v28, %v5679_v2  ;;  %v5909_v8 = vadd.f32 %v5841_v26, %v5680_v7  ;;  %v935_v5 = vadd.f32 %v903_v37, %v834_v6  ;;  %v936_v4 = vadd.f32 %v904_v30, %v835_v23  ;;  %v11443_v30 = vld [vmem:[%s12989_s2 + $0xb] ss:$0 sm:$0xff] }
 0x37c   : > { %v1044_v55 = vmul.f32 %v11198_v27, %v13126_v10  ;;  %v1112_v11 = vmul.f32 %v11422_v17, %v13128_v41  ;;  %v1113_v13 = vmul.f32 %v11422_v17, %v13129_v63  ;;  %v1201_v24 = vmul.f32 %v11211_v45, %v13117_v31 }
 0x37d   : > { %v5929_v22 = vpack.c.bf16 %v5909_v8, %v5908_v14  ;;  %v1006_v49 = vadd.f32 %v974_v39, %v935_v5  ;;  %v1007_v56 = vadd.f32 %v975_v34, %v936_v4  ;;  %v1202_v54 = vmul.f32 %v11211_v45, %v13118_v32 }
 0x37e   : > { %v1203_v43 = vmul.f32 %v11211_v45, %v13119_v58  ;;  %v1435_v53 = vmul.f32 %v11222_v0, %v13120_v44  ;;  %v1436_v40 = vmul.f32 %v11222_v0, %v13121_v38  ;;  %v1312_v3 = vrot.slane %v1201_v24, 1 }
 0x37f   : > { %7867 = vmatmul.mubr.bf16.gmra.mxu1 %v5929_v22  ;;  %v1075_v59 = vadd.f32 %v1043_v62, %v1006_v49  ;;  %v1076_v60 = vadd.f32 %v1044_v55, %v1007_v56  ;;  %v1437_v12 = vmul.f32 %v11222_v0, %v13122_v18  ;;  %v1313_v2 = vrot.slane %v1202_v54, 1 }
 0x380   : > { %v1315_v51 = vrot.slane %v1203_v43, 1  ;;  %v1553_v46 = vrot.slane %v1435_v53, 1  ;;  %v1554_v6 = vrot.slane %v1436_v40, 1  ;;  %v1679_v28 = vmul.f32 %v11443_v30, %v8895_v42 }
 0x381   : > { %v1142_v7 = vadd.f32 %v1112_v11, %v1075_v59  ;;  %v1143_v23 = vadd.f32 %v1113_v13, %v1076_v60  ;;  %v1556_v37 = vrot.slane %v1437_v12, 1  ;;  %v1314_v26 = vsel %vm1257_vm2, %v1312_v3, %v1313_v2  ;;  %v11458_v13 = vld [vmem:[%s12989_s2 + $0x10] ss:$0 sm:$0xff]  ;;  %v11470_v60 = vld [vmem:[%s12989_s2 + $0x15] ss:$0 sm:$0xff] }
 0x382   : > { %v1316_v39 = vsel %vm1257_vm2, %v1313_v2, %v1315_v51  ;;  %v1555_v34 = vsel %vm1257_vm2, %v1553_v46, %v1554_v6  ;;  %v1680_v14 = vmul.f32 %v11443_v30, %v13123_v9  ;;  %v1681_v62 = vmul.f32 %v11443_v30, %v13124_v52 }
 0x383   : > { %v1386_v8 = vadd.f32 %v1314_v26, %v1142_v7  ;;  %v1387_v5 = vadd.f32 %v1316_v39, %v1143_v23  ;;  %v1557_v4 = vsel %vm1257_vm2, %v1554_v6, %v1556_v37  ;;  %v1799_v55 = vrot.slane %v1679_v28, 1  ;;  %v13130_v23 = vld [vmem:[#allocation54_spill] sm:$0xff] }
 0x384   : > { %v1800_v11 = vrot.slane %v1680_v14, 1  ;;  %v1924_v22 = vmul.f32 %v11458_v13, %v13125_v19  ;;  %v1925_v49 = vmul.f32 %v11458_v13, %v13126_v10  ;;  %v1802_v54 = vrot.slane %v1681_v62, 1 }
 0x385   : > { %v1629_v56 = vadd.f32 %v1555_v34, %v1386_v8  ;;  %v1630_v24 = vadd.f32 %v1557_v4, %v1387_v5  ;;  %v1926_v43 = vmul.f32 %v11458_v13, %v13127_v25  ;;  %v2166_v3 = vmul.f32 %v11470_v60, %v13128_v41 }
 0x386   : > { %v1801_v53 = vsel %vm1257_vm2, %v1799_v55, %v1800_v11  ;;  %v2042_v40 = vrot.slane %v1924_v22, 1  ;;  %v2043_v59 = vrot.slane %v1925_v49, 1  ;;  %v1803_v12 = vsel %vm1257_vm2, %v1800_v11, %v1802_v54 }
 0x387   : > { %v1875_v2 = vadd.f32 %v1801_v53, %v1629_v56  ;;  %v2045_v51 = vrot.slane %v1926_v43, 1  ;;  %v2167_v46 = vmul.f32 %v11470_v60, %v13129_v63  ;;  %v1876_v6 = vadd.f32 %v1803_v12, %v1630_v24 }
 0x388   : > { %v2044_v7 = vsel %vm1257_vm2, %v2042_v40, %v2043_v59  ;;  %v2168_v37 = vmul.f32 %v11470_v60, %v13130_v23  ;;  %v2278_v28 = vrot.slane %v2166_v3, 1  ;;  %v2391_v14 = vmul.f32 %v11259_v1, %v13117_v31 }
 0x389   : > { %v2046_v26 = vsel %vm1257_vm2, %v2043_v59, %v2045_v51  ;;  %v2117_v39 = vadd.f32 %v2044_v7, %v1875_v2  ;;  %v2279_v34 = vrot.slane %v2167_v46, 1  ;;  %v2392_v4 = vmul.f32 %v11259_v1, %v13118_v32  ;;  %v11500_v51 = vld [vmem:[%s12989_s2 + $0xc] ss:$0 sm:$0xff] }
 0x38a   : > { %v2118_v8 = vadd.f32 %v2046_v26, %v1876_v6  ;;  %v2281_v5 = vrot.slane %v2168_v37, 1  ;;  %v2393_v62 = vmul.f32 %v11259_v1, %v13119_v58  ;;  %v2502_v11 = vrot.slane %v2391_v14, 2 }
 0x38b   : > { %v2280_v55 = vsel %vm1257_vm2, %v2278_v28, %v2279_v34  ;;  %v2624_v22 = vmul.f32 %v11270_v50, %v13120_v44  ;;  %v2625_v49 = vmul.f32 %v11270_v50, %v13121_v38  ;;  %v2503_v54 = vrot.slane %v2392_v4, 2 }
 0x38c   : > { %v2282_v56 = vsel %vm1257_vm2, %v2279_v34, %v2281_v5  ;;  %v2346_v24 = vadd.f32 %v2280_v55, %v2117_v39  ;;  %v2505_v43 = vrot.slane %v2393_v62, 2  ;;  %v2626_v40 = vmul.f32 %v11270_v50, %v13122_v18 }
 0x38d   : > { %v2347_v53 = vadd.f32 %v2282_v56, %v2118_v8  ;;  %v2742_v59 = vrot.slane %v2624_v22, 2  ;;  %v2743_v3 = vrot.slane %v2625_v49, 2  ;;  %v2504_v12 = vsel %vm2447_vm3, %v2502_v11, %v2503_v54  ;;  %v11512_v8 = vld [vmem:[%s12989_s2 + $0x11] ss:$0 sm:$0xff] }
 0x38e   : > { %v2506_v2 = vsel %vm2447_vm3, %v2503_v54, %v2505_v43  ;;  %v2867_v46 = vmul.f32 %v11500_v51, %v8895_v42  ;;  %v2868_v6 = vmul.f32 %v11500_v51, %v13123_v9  ;;  %v2576_v7 = vadd.f32 %v2504_v12, %v2346_v24 }
 0x38f   : > { %v2577_v37 = vadd.f32 %v2506_v2, %v2347_v53  ;;  %v2744_v28 = vsel %vm2447_vm3, %v2742_v59, %v2743_v3  ;;  %v2745_v26 = vrot.slane %v2626_v40, 2  ;;  %v2869_v39 = vmul.f32 %v11500_v51, %v13124_v52  ;;  %v11525_v40 = vld [vmem:[%s12989_s2 + $0x16] ss:$0 sm:$0xff] }
 0x390   : > { %v2987_v34 = vrot.slane %v2867_v46, 2  ;;  %v2988_v14 = vrot.slane %v2868_v6, 2  ;;  %v3112_v5 = vmul.f32 %v11512_v8, %v13125_v19  ;;  %v2818_v62 = vadd.f32 %v2744_v28, %v2576_v7 }
 0x391   : > { %v2746_v4 = vsel %vm2447_vm3, %v2743_v3, %v2745_v26  ;;  %v3113_v55 = vmul.f32 %v11512_v8, %v13126_v10  ;;  %v3114_v11 = vmul.f32 %v11512_v8, %v13127_v25  ;;  %v2990_v56 = vrot.slane %v2869_v39, 2 }
 0x392   : > { %v2819_v22 = vadd.f32 %v2746_v4, %v2577_v37  ;;  %v2989_v49 = vsel %vm2447_vm3, %v2987_v34, %v2988_v14  ;;  %v3230_v24 = vrot.slane %v3112_v5, 2  ;;  %v3354_v59 = vmul.f32 %v11525_v40, %v13128_v41 }
 0x393   : > { %v3063_v54 = vadd.f32 %v2989_v49, %v2818_v62  ;;  %v3231_v43 = vrot.slane %v3113_v55, 2  ;;  %v3233_v53 = vrot.slane %v3114_v11, 2  ;;  %v2991_v3 = vsel %vm2447_vm3, %v2988_v14, %v2990_v56 }
 0x394   : > { %v3355_v12 = vmul.f32 %v11525_v40, %v13129_v63  ;;  %v3356_v2 = vmul.f32 %v11525_v40, %v13130_v23  ;;  %v3579_v46 = vmul.f32 %v11307_v35, %v13117_v31  ;;  %v3064_v6 = vadd.f32 %v2991_v3, %v2819_v22 }
 0x395   : > { %v3232_v7 = vsel %vm2447_vm3, %v3230_v24, %v3231_v43  ;;  %v3234_v37 = vsel %vm2447_vm3, %v3231_v43, %v3233_v53  ;;  %v3466_v28 = vrot.slane %v3354_v59, 2  ;;  %v3580_v14 = vmul.f32 %v11307_v35, %v13118_v32 }
 0x396   : > { %v3305_v26 = vadd.f32 %v3232_v7, %v3063_v54  ;;  %v3467_v39 = vrot.slane %v3355_v12, 2  ;;  %v3469_v34 = vrot.slane %v3356_v2, 2  ;;  %v3306_v5 = vadd.f32 %v3234_v37, %v3064_v6  ;;  %v11554_v2 = vld [vmem:[%s12989_s2 + $0xd] ss:$0 sm:$0xff] }
 0x397   : > { %v3581_v4 = vmul.f32 %v11307_v35, %v13119_v58  ;;  %v3690_v62 = vrot.slane %v3579_v46, 3  ;;  %v3812_v55 = vmul.f32 %v11321_v57, %v13120_v44  ;;  %v3691_v49 = vrot.slane %v3580_v14, 3 }
 0x398   : > { %v3468_v11 = vsel %vm2447_vm3, %v3466_v28, %v3467_v39  ;;  %v3470_v22 = vsel %vm2447_vm3, %v3467_v39, %v3469_v34  ;;  %v3813_v56 = vmul.f32 %v11321_v57, %v13121_v38  ;;  %v3814_v53 = vmul.f32 %v11321_v57, %v13122_v18 }
 0x399   : > { %v3534_v24 = vadd.f32 %v3468_v11, %v3305_v26  ;;  %v3535_v54 = vadd.f32 %v3470_v22, %v3306_v5  ;;  %v3693_v43 = vrot.slane %v3581_v4, 3  ;;  %v3692_v59 = vsel %vm3635_vm4, %v3690_v62, %v3691_v49 }
 0x39a   : > { %v3930_v3 = vrot.slane %v3812_v55, 3  ;;  %v3931_v12 = vrot.slane %v3813_v56, 3  ;;  %v4055_v46 = vmul.f32 %v11554_v2, %v8895_v42  ;;  %v3933_v37 = vrot.slane %v3814_v53, 3  ;;  %v11568_v55 = vld [vmem:[%s12989_s2 + $0x12] ss:$0 sm:$0xff] }
 0x39b   : > { %v3694_v6 = vsel %vm3635_vm4, %v3691_v49, %v3693_v43  ;;  %v3764_v7 = vadd.f32 %v3692_v59, %v3534_v24  ;;  %v4056_v28 = vmul.f32 %v11554_v2, %v13123_v9  ;;  %v4057_v34 = vmul.f32 %v11554_v2, %v13124_v52 }
 0x39c   : > { %v3765_v26 = vadd.f32 %v3694_v6, %v3535_v54  ;;  %v3932_v39 = vsel %vm3635_vm4, %v3930_v3, %v3931_v12  ;;  %v4175_v14 = vrot.slane %v4055_v46, 3  ;;  %v3934_v5 = vsel %vm3635_vm4, %v3931_v12, %v3933_v37 }
 0x39d   : > { %v4006_v4 = vadd.f32 %v3932_v39, %v3764_v7  ;;  %v4176_v62 = vrot.slane %v4056_v28, 3  ;;  %v4300_v11 = vmul.f32 %v11568_v55, %v13125_v19  ;;  %v4178_v49 = vrot.slane %v4057_v34, 3 }
 0x39e   : > { %v4007_v22 = vadd.f32 %v3934_v5, %v3765_v26  ;;  %v4301_v56 = vmul.f32 %v11568_v55, %v13126_v10  ;;  %v4302_v24 = vmul.f32 %v11568_v55, %v13127_v25  ;;  %v4542_v53 = vmul.f32 %v11094_v48, %v13128_v41 }
 0x39f   : > { %v4177_v54 = vsel %vm3635_vm4, %v4175_v14, %v4176_v62  ;;  %v4418_v43 = vrot.slane %v4300_v11, 3  ;;  %v4543_v59 = vmul.f32 %v11094_v48, %v13129_v63  ;;  %v4179_v3 = vsel %vm3635_vm4, %v4176_v62, %v4178_v49 }
 0x3a0   : > { %v4251_v12 = vadd.f32 %v4177_v54, %v4006_v4  ;;  %v4419_v46 = vrot.slane %v4301_v56, 3  ;;  %v4421_v6 = vrot.slane %v4302_v24, 3  ;;  %v4252_v7 = vadd.f32 %v4179_v3, %v4007_v22 }
 0x3a1   : > { %v4544_v37 = vmul.f32 %v11094_v48, %v13130_v23  ;;  %v4654_v28 = vrot.slane %v4542_v53, 3  ;;  %v4655_v26 = vrot.slane %v4543_v59, 3  ;;  %v4767_v14 = vmul.f32 %v11358_v33, %v13117_v31 }
 0x3a2   : > { %v4420_v39 = vsel %vm3635_vm4, %v4418_v43, %v4419_v46  ;;  %v4422_v34 = vsel %vm3635_vm4, %v4419_v46, %v4421_v6  ;;  %v4768_v5 = vmul.f32 %v11358_v33, %v13118_v32  ;;  %v4769_v48 = vmul.f32 %v11358_v33, %v13119_v58 }
 0x3a3   : > { %v4493_v62 = vadd.f32 %v4420_v39, %v4251_v12  ;;  %v4494_v4 = vadd.f32 %v4422_v34, %v4252_v7  ;;  %v4656_v11 = vsel %vm3635_vm4, %v4654_v28, %v4655_v26  ;;  %v4657_v22 = vrot.slane %v4544_v37, 3 }
 0x3a4   : > { %v4878_v49 = vrot.slane %v4767_v14, 4  ;;  %v4879_v56 = vrot.slane %v4768_v5, 4  ;;  %v5000_v24 = vmul.f32 %v11117_v47, %v13120_v44  ;;  %v5001_v31 = vmul.f32 %v11117_v47, %v13121_v38 }
 0x3a5   : > { %v4658_v54 = vsel %vm3635_vm4, %v4655_v26, %v4657_v22  ;;  %v4722_v43 = vadd.f32 %v4656_v11, %v4493_v62  ;;  %v5002_v32 = vmul.f32 %v11117_v47, %v13122_v18  ;;  %v4881_v3 = vrot.slane %v4769_v48, 4 }
 0x3a6   : > { %v4723_v53 = vadd.f32 %v4658_v54, %v4494_v4  ;;  %v4880_v59 = vsel %vm4823_vm5, %v4878_v49, %v4879_v56  ;;  %v5118_v12 = vrot.slane %v5000_v24, 4  ;;  %v5119_v46 = vrot.slane %v5001_v31, 4 }
 0x3a7   : > { %v4952_v58 = vadd.f32 %v4880_v59, %v4722_v43  ;;  %v5121_v6 = vrot.slane %v5002_v32, 4  ;;  %v5243_v7 = vmul.f32 %v11130_v20, %v8895_v42  ;;  %v4882_v37 = vsel %vm4823_vm5, %v4879_v56, %v4881_v3 }
 0x3a8   : > { %v5244_v28 = vmul.f32 %v11130_v20, %v13123_v9  ;;  %v5245_v26 = vmul.f32 %v11130_v20, %v13124_v52  ;;  %v5488_v47 = vmul.f32 %v11141_v36, %v13125_v19  ;;  %v4953_v39 = vadd.f32 %v4882_v37, %v4723_v53 }
 0x3a9   : > { %v5120_v34 = vsel %vm4823_vm5, %v5118_v12, %v5119_v46  ;;  %v5122_v14 = vsel %vm4823_vm5, %v5119_v46, %v5121_v6  ;;  %v5363_v5 = vrot.slane %v5243_v7, 4  ;;  %v5489_v22 = vmul.f32 %v11141_v36, %v13126_v10 }
 0x3aa   : > { %v5194_v62 = vadd.f32 %v5120_v34, %v4952_v58  ;;  %v5364_v4 = vrot.slane %v5244_v28, 4  ;;  %v5366_v11 = vrot.slane %v5245_v26, 4  ;;  %v5195_v48 = vadd.f32 %v5122_v14, %v4953_v39 }
 0x3ab   : > { %v5490_v49 = vmul.f32 %v11141_v36, %v13127_v25  ;;  %v5606_v20 = vrot.slane %v5488_v47, 4  ;;  %v5730_v56 = vmul.f32 %v11154_v15, %v13128_v41  ;;  %v5607_v43 = vrot.slane %v5489_v22, 4 }
 0x3ac   : > { %v5365_v24 = vsel %vm4823_vm5, %v5363_v5, %v5364_v4  ;;  %v5367_v54 = vsel %vm4823_vm5, %v5364_v4, %v5366_v11  ;;  %v5731_v31 = vmul.f32 %v11154_v15, %v13129_v63  ;;  %v5732_v3 = vmul.f32 %v11154_v15, %v13130_v23 }
 0x3ad   : > { %v5439_v32 = vadd.f32 %v5365_v24, %v5194_v62  ;;  %v5440_v53 = vadd.f32 %v5367_v54, %v5195_v48  ;;  %v5609_v59 = vrot.slane %v5490_v49, 4  ;;  %v5608_v36 = vsel %vm4823_vm5, %v5606_v20, %v5607_v43  ;;  %v13131_v49 = vld [vmem:[#allocation49_spill] sm:$0xff]  ;;  %v13132_v20 = vld [vmem:[#allocation50_spill] sm:$0xff] }
 0x3ae   : > { %v5842_v12 = vrot.slane %v5730_v56, 4  ;;  %v5843_v58 = vrot.slane %v5731_v31, 4  ;;  %v836_v46 = vmul.f32 %v11169_v21, %v13120_v44  ;;  %v5845_v37 = vrot.slane %v5732_v3, 4 }
 0x3af   : > { %v5610_v6 = vsel %vm4823_vm5, %v5607_v43, %v5609_v59  ;;  %v5681_v7 = vadd.f32 %v5608_v36, %v5439_v32  ;;  %v837_v28 = vmul.f32 %v11169_v21, %v13121_v38  ;;  %v905_v15 = vmul.f32 %v11178_v16, %v8895_v42 }
 0x3b0   : > { %v5682_v26 = vadd.f32 %v5610_v6, %v5440_v53  ;;  %v5844_v47 = vsel %vm4823_vm5, %v5842_v12, %v5843_v58  ;;  %v906_v39 = vmul.f32 %v11178_v16, %v13123_v9  ;;  %v5846_v34 = vsel %vm4823_vm5, %v5843_v58, %v5845_v37 }
 0x3b1   : > { %v5910_v14 = vadd.f32 %v5844_v47, %v5681_v7  ;;  %v976_v5 = vmul.f32 %v11189_v61, %v13125_v19  ;;  %v977_v62 = vmul.f32 %v11189_v61, %v13126_v10  ;;  %v937_v21 = vadd.f32 %v905_v15, %v836_v46 }
 0x3b2   : > { %v5911_v4 = vadd.f32 %v5846_v34, %v5682_v26  ;;  %v938_v11 = vadd.f32 %v906_v39, %v837_v28  ;;  %v1045_v22 = vmul.f32 %v11198_v27, %v13128_v41  ;;  %v1046_v48 = vmul.f32 %v11198_v27, %v13129_v63 }
 0x3b3   : > { %v1114_v16 = vmul.f32 %v11422_v17, %v13131_v49  ;;  %v1115_v56 = vmul.f32 %v11422_v17, %v13132_v20  ;;  %v1204_v24 = vmul.f32 %v11211_v45, %v13120_v44  ;;  %v1008_v61 = vadd.f32 %v976_v5, %v937_v21 }
 0x3b4   : > { %v5930_v54 = vpack.c.bf16 %v5911_v4, %v5910_v14  ;;  %v1009_v43 = vadd.f32 %v977_v62, %v938_v11  ;;  %v1205_v31 = vmul.f32 %v11211_v45, %v13121_v38  ;;  %v1206_v32 = vmul.f32 %v11211_v45, %v13122_v18 }
 0x3b5   : > { %v1317_v53 = vrot.slane %v1204_v24, 1  ;;  %v1438_v27 = vmul.f32 %v11222_v0, %v8895_v42  ;;  %v1439_v59 = vmul.f32 %v11222_v0, %v13123_v9  ;;  %v1077_v3 = vadd.f32 %v1045_v22, %v1008_v61 }
 0x3b6   : > { %7870 = vmatprep.mubr.bf16.mxu1 %v5930_v54  ;;  %v1078_v36 = vadd.f32 %v1046_v48, %v1009_v43  ;;  %v1318_v12 = vrot.slane %v1205_v31, 1  ;;  %v1440_v58 = vmul.f32 %v11222_v0, %v13124_v52  ;;  %v1320_v46 = vrot.slane %v1206_v32, 1 }
 0x3b7   : > { %v1558_v6 = vrot.slane %v1438_v27, 1  ;;  %v1559_v7 = vrot.slane %v1439_v59, 1  ;;  %v1682_v45 = vmul.f32 %v11443_v30, %v13125_v19  ;;  %v1144_v37 = vadd.f32 %v1114_v16, %v1077_v3 }
 0x3b8   : > { %v1145_v28 = vadd.f32 %v1115_v56, %v1078_v36  ;;  %v1319_v26 = vsel %vm1257_vm2, %v1317_v53, %v1318_v12  ;;  %v1561_v47 = vrot.slane %v1440_v58, 1  ;;  %v1321_v15 = vsel %vm1257_vm2, %v1318_v12, %v1320_v46  ;;  %v13133_v12 = vld [vmem:[#allocation51_spill] sm:$0xff] }
 0x3b9   : > { %v1560_v39 = vsel %vm1257_vm2, %v1558_v6, %v1559_v7  ;;  %v1683_v34 = vmul.f32 %v11443_v30, %v13126_v10  ;;  %v1684_v0 = vmul.f32 %v11443_v30, %v13127_v25  ;;  %v1388_v14 = vadd.f32 %v1319_v26, %v1144_v37 }
 0x3ba   : > { %v1389_v5 = vadd.f32 %v1321_v15, %v1145_v28  ;;  %v1562_v62 = vsel %vm1257_vm2, %v1559_v7, %v1561_v47  ;;  %v1804_v4 = vrot.slane %v1682_v45, 1  ;;  %v1927_v22 = vmul.f32 %v11458_v13, %v13128_v41 }
 0x3bb   : > { %v1805_v21 = vrot.slane %v1683_v34, 1  ;;  %v1807_v11 = vrot.slane %v1684_v0, 1  ;;  %v1928_v48 = vmul.f32 %v11458_v13, %v13129_v63  ;;  %v1631_v16 = vadd.f32 %v1560_v39, %v1388_v14 }
 0x3bc   : > { %v1632_v56 = vadd.f32 %v1562_v62, %v1389_v5  ;;  %v1929_v24 = vmul.f32 %v11458_v13, %v13130_v23  ;;  %v2169_v54 = vmul.f32 %v11470_v60, %v13131_v49  ;;  %v2047_v31 = vrot.slane %v1927_v22, 1 }
 0x3bd   : > { %v1806_v61 = vsel %vm1257_vm2, %v1804_v4, %v1805_v21  ;;  %v1808_v43 = vsel %vm1257_vm2, %v1805_v21, %v1807_v11  ;;  %v2048_v32 = vrot.slane %v1928_v48, 1  ;;  %v2170_v3 = vmul.f32 %v11470_v60, %v13132_v20 }
 0x3be   : > { %v1877_v53 = vadd.f32 %v1806_v61, %v1631_v16  ;;  %v1878_v27 = vadd.f32 %v1808_v43, %v1632_v56  ;;  %v2050_v59 = vrot.slane %v1929_v24, 1  ;;  %v2171_v58 = vmul.f32 %v11470_v60, %v13133_v12 }
 0x3bf   : > { %v2049_v36 = vsel %vm1257_vm2, %v2047_v31, %v2048_v32  ;;  %v2283_v46 = vrot.slane %v2169_v54, 1  ;;  %v2394_v6 = vmul.f32 %v11259_v1, %v13120_v44  ;;  %v2284_v37 = vrot.slane %v2170_v3, 1 }
 0x3c0   : > { %v2051_v7 = vsel %vm1257_vm2, %v2048_v32, %v2050_v59  ;;  %v2119_v45 = vadd.f32 %v2049_v36, %v1877_v53  ;;  %v2395_v28 = vmul.f32 %v11259_v1, %v13121_v38  ;;  %v2286_v47 = vrot.slane %v2171_v58, 1 }
 0x3c1   : > { %v2120_v26 = vadd.f32 %v2051_v7, %v1878_v27  ;;  %v2396_v15 = vmul.f32 %v11259_v1, %v13122_v18  ;;  %v2507_v39 = vrot.slane %v2394_v6, 2  ;;  %v2285_v34 = vsel %vm1257_vm2, %v2283_v46, %v2284_v37 }
 0x3c2   : > { %v2508_v0 = vrot.slane %v2395_v28, 2  ;;  %v2627_v14 = vmul.f32 %v11270_v50, %v8895_v42  ;;  %v2628_v5 = vmul.f32 %v11270_v50, %v13123_v9  ;;  %v2287_v62 = vsel %vm1257_vm2, %v2284_v37, %v2286_v47 }
 0x3c3   : > { %v2348_v4 = vadd.f32 %v2285_v34, %v2119_v45  ;;  %v2510_v21 = vrot.slane %v2396_v15, 2  ;;  %v2629_v11 = vmul.f32 %v11270_v50, %v13124_v52  ;;  %v2349_v22 = vadd.f32 %v2287_v62, %v2120_v26 }
 0x3c4   : > { %v2509_v1 = vsel %vm2447_vm3, %v2507_v39, %v2508_v0  ;;  %v2747_v48 = vrot.slane %v2627_v14, 2  ;;  %v2748_v16 = vrot.slane %v2628_v5, 2  ;;  %v2870_v61 = vmul.f32 %v11500_v51, %v13125_v19 }
 0x3c5   : > { %v2511_v56 = vsel %vm2447_vm3, %v2508_v0, %v2510_v21  ;;  %v2578_v24 = vadd.f32 %v2509_v1, %v2348_v4  ;;  %v2750_v54 = vrot.slane %v2629_v11, 2  ;;  %v2871_v32 = vmul.f32 %v11500_v51, %v13126_v10 }
 0x3c6   : > { %v2579_v43 = vadd.f32 %v2511_v56, %v2349_v22  ;;  %v2749_v31 = vsel %vm2447_vm3, %v2747_v48, %v2748_v16  ;;  %v2872_v50 = vmul.f32 %v11500_v51, %v13127_v25  ;;  %v2992_v59 = vrot.slane %v2870_v61, 2 }
 0x3c7   : > { %v2751_v53 = vsel %vm2447_vm3, %v2748_v16, %v2750_v54  ;;  %v2820_v27 = vadd.f32 %v2749_v31, %v2578_v24  ;;  %v3115_v3 = vmul.f32 %v11512_v8, %v13128_v41  ;;  %v2993_v58 = vrot.slane %v2871_v32, 2 }
 0x3c8   : > { %v2821_v36 = vadd.f32 %v2751_v53, %v2579_v43  ;;  %v2995_v46 = vrot.slane %v2872_v50, 2  ;;  %v3116_v6 = vmul.f32 %v11512_v8, %v13129_v63  ;;  %v3117_v7 = vmul.f32 %v11512_v8, %v13130_v23 }
 0x3c9   : > { %v3235_v45 = vrot.slane %v3115_v3, 2  ;;  %v3357_v37 = vmul.f32 %v11525_v40, %v13131_v49  ;;  %v3358_v28 = vmul.f32 %v11525_v40, %v13132_v20  ;;  %v2994_v26 = vsel %vm2447_vm3, %v2992_v59, %v2993_v58 }
 0x3ca   : > { %v2996_v47 = vsel %vm2447_vm3, %v2993_v58, %v2995_v46  ;;  %v3236_v15 = vrot.slane %v3116_v6, 2  ;;  %v3359_v39 = vmul.f32 %v11525_v40, %v13133_v12  ;;  %v3065_v34 = vadd.f32 %v2994_v26, %v2820_v27 }
 0x3cb   : > { %v3066_v0 = vadd.f32 %v2996_v47, %v2821_v36  ;;  %v3238_v14 = vrot.slane %v3117_v7, 2  ;;  %v3471_v5 = vrot.slane %v3357_v37, 2  ;;  %v3472_v4 = vrot.slane %v3358_v28, 2 }
 0x3cc   : > { %v3237_v62 = vsel %vm2447_vm3, %v3235_v45, %v3236_v15  ;;  %v3474_v21 = vrot.slane %v3359_v39, 2  ;;  %v3582_v11 = vmul.f32 %v11307_v35, %v13120_v44  ;;  %v3583_v48 = vmul.f32 %v11307_v35, %v13121_v38 }
 0x3cd   : > { %v3239_v22 = vsel %vm2447_vm3, %v3236_v15, %v3238_v14  ;;  %v3307_v1 = vadd.f32 %v3237_v62, %v3065_v34  ;;  %v3584_v16 = vmul.f32 %v11307_v35, %v13122_v18  ;;  %v3473_v24 = vsel %vm2447_vm3, %v3471_v5, %v3472_v4 }
 0x3ce   : > { %v3308_v56 = vadd.f32 %v3239_v22, %v3066_v0  ;;  %v3475_v54 = vsel %vm2447_vm3, %v3472_v4, %v3474_v21  ;;  %v3695_v61 = vrot.slane %v3582_v11, 3  ;;  %v3696_v31 = vrot.slane %v3583_v48, 3 }
 0x3cf   : > { %v3536_v43 = vadd.f32 %v3473_v24, %v3307_v1  ;;  %v3698_v32 = vrot.slane %v3584_v16, 3  ;;  %v3815_v50 = vmul.f32 %v11321_v57, %v8895_v42  ;;  %v3816_v27 = vmul.f32 %v11321_v57, %v13123_v9  ;;  %v11760_v1 = vld [vmem:[%s12989_s2 + $0x17] ss:$0 sm:$0xff] }
 0x3d0   : > { %v3537_v53 = vadd.f32 %v3475_v54, %v3308_v56  ;;  %v3817_v59 = vmul.f32 %v11321_v57, %v13124_v52  ;;  %v4058_v35 = vmul.f32 %v11554_v2, %v13125_v19  ;;  %v3697_v3 = vsel %vm3635_vm4, %v3695_v61, %v3696_v31 }
 0x3d1   : > { %v3699_v36 = vsel %vm3635_vm4, %v3696_v31, %v3698_v32  ;;  %v3935_v58 = vrot.slane %v3815_v50, 3  ;;  %v4059_v46 = vmul.f32 %v11554_v2, %v13126_v10  ;;  %v3766_v6 = vadd.f32 %v3697_v3, %v3536_v43 }
 0x3d2   : > { %v3767_v7 = vadd.f32 %v3699_v36, %v3537_v53  ;;  %v3936_v45 = vrot.slane %v3816_v27, 3  ;;  %v3938_v37 = vrot.slane %v3817_v59, 3  ;;  %v4060_v28 = vmul.f32 %v11554_v2, %v13127_v25 }
 0x3d3   : > { %v4180_v26 = vrot.slane %v4058_v35, 3  ;;  %v4181_v57 = vrot.slane %v4059_v46, 3  ;;  %v4303_v47 = vmul.f32 %v11568_v55, %v13128_v41  ;;  %v4304_v34 = vmul.f32 %v11568_v55, %v13129_v63 }
 0x3d4   : > { %v3937_v15 = vsel %vm3635_vm4, %v3935_v58, %v3936_v45  ;;  %v3939_v39 = vsel %vm3635_vm4, %v3936_v45, %v3938_v37  ;;  %v4305_v0 = vmul.f32 %v11568_v55, %v13130_v23  ;;  %v4183_v4 = vrot.slane %v4060_v28, 3  ;;  %v11780_v58 = vld [vmem:[%s12989_s2 + $0x9] ss:$0 sm:$0xff] }
 0x3d5   : > { %v4008_v14 = vadd.f32 %v3937_v15, %v3766_v6  ;;  %v4009_v5 = vadd.f32 %v3939_v39, %v3767_v7  ;;  %v4182_v62 = vsel %vm3635_vm4, %v4180_v26, %v4181_v57  ;;  %v4423_v21 = vrot.slane %v4303_v47, 3  ;;  %v11793_v47 = vld [vmem:[%s12989_s2 + $0xe] ss:$0 sm:$0xff] }
 0x3d6   : > { %v4424_v11 = vrot.slane %v4304_v34, 3  ;;  %v4426_v22 = vrot.slane %v4305_v0, 3  ;;  %v4545_v48 = vmul.f32 %v11760_v1, %v13131_v49  ;;  %v4184_v16 = vsel %vm3635_vm4, %v4181_v57, %v4183_v4 }
 0x3d7   : > { %v4253_v56 = vadd.f32 %v4182_v62, %v4008_v14  ;;  %v4546_v24 = vmul.f32 %v11760_v1, %v13132_v20  ;;  %v4547_v54 = vmul.f32 %v11760_v1, %v13133_v12  ;;  %v4254_v61 = vadd.f32 %v4184_v16, %v4009_v5  ;;  %v11807_v16 = vld [vmem:[%s12989_s2 + $0x13] ss:$0 sm:$0xff] }
 0x3d8   : > { %v4425_v43 = vsel %vm3635_vm4, %v4423_v21, %v4424_v11  ;;  %v4427_v31 = vsel %vm3635_vm4, %v4424_v11, %v4426_v22  ;;  %v4659_v32 = vrot.slane %v4545_v48, 3  ;;  %v4770_v59 = vmul.f32 %v11358_v33, %v13120_v44 }
 0x3d9   : > { %v4495_v50 = vadd.f32 %v4425_v43, %v4253_v56  ;;  %v4660_v53 = vrot.slane %v4546_v24, 3  ;;  %v4662_v27 = vrot.slane %v4547_v54, 3  ;;  %v4496_v35 = vadd.f32 %v4427_v31, %v4254_v61 }
 0x3da   : > { %v4771_v3 = vmul.f32 %v11358_v33, %v13121_v38  ;;  %v4772_v36 = vmul.f32 %v11358_v33, %v13122_v18  ;;  %v5003_v46 = vmul.f32 %v11780_v58, %v8895_v42  ;;  %v4883_v44 = vrot.slane %v4770_v59, 4 }
 0x3db   : > { %v4661_v6 = vsel %vm3635_vm4, %v4659_v32, %v4660_v53  ;;  %v4663_v7 = vsel %vm3635_vm4, %v4660_v53, %v4662_v27  ;;  %v5004_v45 = vmul.f32 %v11780_v58, %v13123_v9  ;;  %v5005_v33 = vmul.f32 %v11780_v58, %v13124_v52 }
 0x3dc   : > { %v4724_v38 = vadd.f32 %v4661_v6, %v4495_v50  ;;  %v4725_v37 = vadd.f32 %v4663_v7, %v4496_v35  ;;  %v4884_v28 = vrot.slane %v4771_v3, 4  ;;  %v4886_v18 = vrot.slane %v4772_v36, 4  ;;  %v11821_v3 = vld [vmem:[%s12989_s2 + $0x18] ss:$0 sm:$0xff] }
 0x3dd   : > { %v5123_v26 = vrot.slane %v5003_v46, 4  ;;  %v5124_v57 = vrot.slane %v5004_v45, 4  ;;  %v5246_v15 = vmul.f32 %v11793_v47, %v13125_v19  ;;  %v5247_v0 = vmul.f32 %v11793_v47, %v13126_v10 }
 0x3de   : > { %v4885_v39 = vsel %vm4823_vm5, %v4883_v44, %v4884_v28  ;;  %v4887_v34 = vsel %vm4823_vm5, %v4884_v28, %v4886_v18  ;;  %v5248_v14 = vmul.f32 %v11793_v47, %v13127_v25  ;;  %v5126_v21 = vrot.slane %v5005_v33, 4  ;;  %v11832_v44 = vld [vmem:[%s12989_s2] ss:$0 sm:$0xff] }
 0x3df   : > { %v4954_v5 = vadd.f32 %v4885_v39, %v4724_v38  ;;  %v4955_v62 = vadd.f32 %v4887_v34, %v4725_v37  ;;  %v5125_v4 = vsel %vm4823_vm5, %v5123_v26, %v5124_v57  ;;  %v5368_v11 = vrot.slane %v5246_v15, 4  ;;  %v11843_v39 = vld [vmem:[%s12989_s2 + $0x5] ss:$0 sm:$0xff] }
 0x3e0   : > { %v5369_v22 = vrot.slane %v5247_v0, 4  ;;  %v5371_v48 = vrot.slane %v5248_v14, 4  ;;  %v5491_v56 = vmul.f32 %v11807_v16, %v13128_v41  ;;  %v5127_v24 = vsel %vm4823_vm5, %v5124_v57, %v5126_v21  ;;  %v11852_v14 = vld [vmem:[%s12989_s2 + $0xa] ss:$0 sm:$0xff] }
 0x3e1   : > { %v5196_v54 = vadd.f32 %v5125_v4, %v4954_v5  ;;  %v5492_v61 = vmul.f32 %v11807_v16, %v13129_v63  ;;  %v5493_v43 = vmul.f32 %v11807_v16, %v13130_v23  ;;  %v5197_v31 = vadd.f32 %v5127_v24, %v4955_v62 }
 0x3e2   : > { %v5370_v32 = vsel %vm4823_vm5, %v5368_v11, %v5369_v22  ;;  %v5372_v50 = vsel %vm4823_vm5, %v5369_v22, %v5371_v48  ;;  %v5611_v53 = vrot.slane %v5491_v56, 4  ;;  %v5733_v36 = vmul.f32 %v11821_v3, %v13131_v49  ;;  %v11863_v11 = vld [vmem:[%s12989_s2 + $0xf] ss:$0 sm:$0xff] }
 0x3e3   : > { %v5441_v27 = vadd.f32 %v5370_v32, %v5196_v54  ;;  %v5612_v59 = vrot.slane %v5492_v61, 4  ;;  %v5614_v35 = vrot.slane %v5493_v43, 4  ;;  %v5442_v46 = vadd.f32 %v5372_v50, %v5197_v31  ;;  %v13134_v43 = vld [vmem:[#allocation5_spill] sm:$0xff]  ;;  %v13135_v32 = vld [vmem:[#allocation6_spill] sm:$0xff] }
 0x3e4   : > { %v5734_v6 = vmul.f32 %v11821_v3, %v13132_v20  ;;  %v5735_v7 = vmul.f32 %v11821_v3, %v13133_v12  ;;  %v838_v45 = vmul.f32 %v11832_v44, %v8895_v42  ;;  %v5847_v28 = vrot.slane %v5733_v36, 4 }
 0x3e5   : > { %v5613_v38 = vsel %vm4823_vm5, %v5611_v53, %v5612_v59  ;;  %v5615_v37 = vsel %vm4823_vm5, %v5612_v59, %v5614_v35  ;;  %v839_v18 = vmul.f32 %v11832_v44, %v13123_v9  ;;  %v907_v34 = vmul.f32 %v11843_v39, %v13125_v19  ;;  %v11880_v53 = vld [vmem:[%s12989_s2 + $0x1] ss:$0 sm:$0xff] }
 0x3e6   : > { %v5683_v33 = vadd.f32 %v5613_v38, %v5441_v27  ;;  %v5684_v26 = vadd.f32 %v5615_v37, %v5442_v46  ;;  %v5848_v57 = vrot.slane %v5734_v6, 4  ;;  %v5850_v15 = vrot.slane %v5735_v7, 4 }
 0x3e7   : > { %v908_v0 = vmul.f32 %v11843_v39, %v13126_v10  ;;  %v978_v5 = vmul.f32 %v11852_v14, %v13128_v41  ;;  %v979_v62 = vmul.f32 %v11852_v14, %v13129_v63  ;;  %v1047_v22 = vmul.f32 %v11863_v11, %v13131_v49 }
 0x3e8   : > { %v5849_v4 = vsel %vm4823_vm5, %v5847_v28, %v5848_v57  ;;  %v5851_v21 = vsel %vm4823_vm5, %v5848_v57, %v5850_v15  ;;  %v1048_v48 = vmul.f32 %v11863_v11, %v13132_v20  ;;  %v939_v54 = vadd.f32 %v907_v34, %v838_v45  ;;  %v11891_v45 = vld [vmem:[%s12989_s2 + $0x6] ss:$0 sm:$0xff] }
 0x3e9   : > { %v5912_v56 = vadd.f32 %v5849_v4, %v5683_v33  ;;  %v5913_v24 = vadd.f32 %v5851_v21, %v5684_v26  ;;  %v940_v61 = vadd.f32 %v908_v0, %v839_v18  ;;  %v11871_v31 = vmul.f32 %v11422_v17, %v13134_v43 }
 0x3ea   : > { %v11875_v50 = vmul.f32 %v11422_v17, %v13135_v32  ;;  %v1207_v27 = vmul.f32 %v11880_v53, %v8895_v42  ;;  %v1208_v59 = vmul.f32 %v11880_v53, %v13123_v9  ;;  %v1010_v36 = vadd.f32 %v978_v5, %v939_v54 }
 0x3eb   : > { %v5931_v35 = vpack.c.bf16 %v5913_v24, %v5912_v56  ;;  %v1011_v46 = vadd.f32 %v979_v62, %v940_v61  ;;  %v1209_v6 = vmul.f32 %v11880_v53, %v13124_v52  ;;  %v1441_v38 = vmul.f32 %v11891_v45, %v13125_v19 }
 0x3ec   : > { %v1322_v7 = vrot.slane %v1207_v27, 1  ;;  %v1323_v17 = vrot.slane %v1208_v59, 1  ;;  %v1442_v37 = vmul.f32 %v11891_v45, %v13126_v10  ;;  %v1079_v28 = vadd.f32 %v1047_v22, %v1010_v36  ;;  %v11905_v22 = vpop.f32.mrf.mxu1 }
 0x3ed   : > { %7871 = vmatmul.mubr.bf16.gmra.mxu1 %v5931_v35  ;;  %v1080_v18 = vadd.f32 %v1048_v48, %v1011_v46  ;;  %v1325_v33 = vrot.slane %v1209_v6, 1  ;;  %v1443_v26 = vmul.f32 %v11891_v45, %v13127_v25  ;;  %v1563_v15 = vrot.slane %v1441_v38, 1 }
 0x3ee   : > { %v1324_v57 = vsel %vm1257_vm2, %v1322_v7, %v1323_v17  ;;  %v1564_v34 = vrot.slane %v1442_v37, 1  ;;  %v1685_v0 = vmul.f32 %v11443_v30, %v13128_v41  ;;  %v1146_v5 = vadd.f32 %v11871_v31, %v1079_v28  ;;  %v11921_v28 = vpop.f32.mrf.mxu1 }
 0x3ef   : > { %v1147_v62 = vadd.f32 %v11875_v50, %v1080_v18  ;;  %v1326_v4 = vsel %vm1257_vm2, %v1323_v17, %v1325_v33  ;;  %v1566_v21 = vrot.slane %v1443_v26, 1  ;;  %v1686_v56 = vmul.f32 %v11443_v30, %v13129_v63 }
 0x3f0   : > { %v1565_v48 = vsel %vm1257_vm2, %v1563_v15, %v1564_v34  ;;  %v1687_v24 = vmul.f32 %v11443_v30, %v13130_v23  ;;  %v1809_v54 = vrot.slane %v1685_v0, 1  ;;  %v1390_v61 = vadd.f32 %v1324_v57, %v1146_v5 }
 0x3f1   : > { %v1391_v27 = vadd.f32 %v1326_v4, %v1147_v62  ;;  %v1567_v59 = vsel %vm1257_vm2, %v1564_v34, %v1566_v21  ;;  %v1930_v35 = vmul.f32 %v11458_v13, %v13131_v49  ;;  %v1810_v36 = vrot.slane %v1686_v56, 1  ;;  %v11932_v4 = vld [vmem:[%s12989_s2 + $0x2] ss:$0 sm:$0xff] }
 0x3f2   : > { %v1812_v46 = vrot.slane %v1687_v24, 1  ;;  %v1931_v6 = vmul.f32 %v11458_v13, %v13132_v20  ;;  %v1932_v7 = vmul.f32 %v11458_v13, %v13133_v12  ;;  %v1633_v17 = vadd.f32 %v1565_v48, %v1390_v61  ;;  %v11940_v61 = vpop.f32.mrf.mxu1 }
 0x3f3   : > { %v1634_v38 = vadd.f32 %v1567_v59, %v1391_v27  ;;  %v2052_v37 = vrot.slane %v1930_v35, 1  ;;  %v2172_v30 = vmul.f32 %v11470_v60, %v13134_v43  ;;  %v1811_v18 = vsel %vm1257_vm2, %v1809_v54, %v1810_v36  ;;  %v11945_v35 = vld [vmem:[%s12989_s2 + $0x7] ss:$0 sm:$0xff] }
 0x3f4   : > { %v1813_v33 = vsel %vm1257_vm2, %v1810_v36, %v1812_v46  ;;  %v2053_v26 = vrot.slane %v1931_v6, 1  ;;  %v2055_v57 = vrot.slane %v1932_v7, 1  ;;  %v1879_v15 = vadd.f32 %v1811_v18, %v1633_v17 }
 0x3f5   : > { %v1880_v34 = vadd.f32 %v1813_v33, %v1634_v38  ;;  %v2173_v0 = vmul.f32 %v11470_v60, %v13135_v32  ;;  %v2288_v13 = vrot.slane %v2172_v30, 1  ;;  %v2397_v21 = vmul.f32 %v11932_v4, %v8895_v42 }
 0x3f6   : > { %v2054_v5 = vsel %vm1257_vm2, %v2052_v37, %v2053_v26  ;;  %v2056_v62 = vsel %vm1257_vm2, %v2053_v26, %v2055_v57  ;;  %v2398_v48 = vmul.f32 %v11932_v4, %v13123_v9  ;;  %v2399_v60 = vmul.f32 %v11932_v4, %v13124_v52 }
 0x3f7   : > { %v2121_v56 = vadd.f32 %v2054_v5, %v1879_v15  ;;  %v2122_v24 = vadd.f32 %v2056_v62, %v1880_v34  ;;  %v2289_v54 = vrot.slane %v2173_v0, 1  ;;  %v2512_v27 = vrot.slane %v2397_v21, 2  ;;  %v11965_v0 = vpop.f32.mrf.mxu1 }
 0x3f8   : > { %v2513_v59 = vrot.slane %v2398_v48, 2  ;;  %v2630_v36 = vmul.f32 %v11945_v35, %v13125_v19  ;;  %v2631_v46 = vmul.f32 %v11945_v35, %v13126_v10  ;;  %v2515_v17 = vrot.slane %v2399_v60, 2 }
 0x3f9   : > { %v11952_v6 = vsel %vm1257_vm2, %v2288_v13, %v2289_v54  ;;  %v11955_v7 = vsel %vm1257_vm2, %v2289_v54, %v2288_v13  ;;  %v2632_v38 = vmul.f32 %v11945_v35, %v13127_v25  ;;  %v2873_v34 = vmul.f32 %v11500_v51, %v13128_v41 }
 0x3fa   : > { %v2350_v37 = vadd.f32 %v11952_v6, %v2121_v56  ;;  %v2351_v30 = vadd.f32 %v11955_v7, %v2122_v24  ;;  %v2514_v18 = vsel %vm2447_vm3, %v2512_v27, %v2513_v59  ;;  %v2752_v33 = vrot.slane %v2630_v36, 2 }
 0x3fb   : > { %v2516_v26 = vsel %vm2447_vm3, %v2513_v59, %v2515_v17  ;;  %v2753_v57 = vrot.slane %v2631_v46, 2  ;;  %v2755_v15 = vrot.slane %v2632_v38, 2  ;;  %v2874_v62 = vmul.f32 %v11500_v51, %v13129_v63 }
 0x3fc   : > { %v2580_v13 = vadd.f32 %v2514_v18, %v2350_v37  ;;  %v2581_v5 = vadd.f32 %v2516_v26, %v2351_v30  ;;  %v2875_v21 = vmul.f32 %v11500_v51, %v13130_v23  ;;  %v2997_v24 = vrot.slane %v2873_v34, 2  ;;  %v11981_v37 = vpop.f32.mrf.mxu1  ;;  %v11990_v26 = vld [vmem:[%s12989_s2 + $0x3] ss:$0 sm:$0xff] }
 0x3fd   : > { %v2754_v48 = vsel %vm2447_vm3, %v2752_v33, %v2753_v57  ;;  %v2756_v56 = vsel %vm2447_vm3, %v2753_v57, %v2755_v15  ;;  %v3118_v54 = vmul.f32 %v11512_v8, %v13131_v49  ;;  %v2998_v59 = vrot.slane %v2874_v62, 2 }
 0x3fe   : > { %v2822_v60 = vadd.f32 %v2754_v48, %v2580_v13  ;;  %v2823_v27 = vadd.f32 %v2756_v56, %v2581_v5  ;;  %v3000_v36 = vrot.slane %v2875_v21, 2  ;;  %v3119_v46 = vmul.f32 %v11512_v8, %v13132_v20  ;;  %v11998_v48 = vpop.permute.xlu0 %6385 }
 0x3ff   : > { %v3120_v17 = vmul.f32 %v11512_v8, %v13133_v12  ;;  %v3240_v38 = vrot.slane %v3118_v54, 2  ;;  %v3360_v51 = vmul.f32 %v11525_v40, %v13134_v43  ;;  %v2999_v30 = vsel %vm2447_vm3, %v2997_v24, %v2998_v59  ;;  %13136 = vst [vmem:[#allocation13_spill] sm:$0xff] %v11998_v48 }
 0x400   : > { %v3001_v18 = vsel %vm2447_vm3, %v2998_v59, %v3000_v36  ;;  %v3361_v33 = vmul.f32 %v11525_v40, %v13135_v32  ;;  %v3585_v8 = vmul.f32 %v11990_v26, %v8895_v42  ;;  %v3067_v57 = vadd.f32 %v2999_v30, %v2822_v60  ;;  %v12005_v60 = vld [vmem:[%s12989_s2 + $0x8] ss:$0 sm:$0xff]  ;;  %v12009_v59 = vpop.f32.mrf.mxu1 }
 0x401   : > { %v3068_v15 = vadd.f32 %v3001_v18, %v2823_v27  ;;  %v3241_v34 = vrot.slane %v3119_v46, 2  ;;  %v3243_v13 = vrot.slane %v3120_v17, 2  ;;  %v3476_v5 = vrot.slane %v3360_v51, 2 }
 0x402   : > { %v3477_v62 = vrot.slane %v3361_v33, 2  ;;  %v3586_v21 = vmul.f32 %v11990_v26, %v13123_v9  ;;  %v3587_v40 = vmul.f32 %v11990_v26, %v13124_v52  ;;  %v3700_v54 = vrot.slane %v3585_v8, 3 }
 0x403   : > { %v3242_v56 = vsel %vm2447_vm3, %v3240_v38, %v3241_v34  ;;  %v3244_v24 = vsel %vm2447_vm3, %v3241_v34, %v3243_v13  ;;  %v3818_v27 = vmul.f32 %v12005_v60, %v13125_v19  ;;  %v3819_v18 = vmul.f32 %v12005_v60, %v13126_v10 }
 0x404   : > { %v3309_v36 = vadd.f32 %v3242_v56, %v3067_v57  ;;  %v3310_v46 = vadd.f32 %v3244_v24, %v3068_v15  ;;  %v12012_v17 = vsel %vm2447_vm3, %v3476_v5, %v3477_v62  ;;  %v12015_v38 = vsel %vm2447_vm3, %v3477_v62, %v3476_v5 }
 0x405   : > { %v3701_v51 = vrot.slane %v3586_v21, 3  ;;  %v3703_v30 = vrot.slane %v3587_v40, 3  ;;  %v3820_v33 = vmul.f32 %v12005_v60, %v13127_v25  ;;  %v3940_v57 = vrot.slane %v3818_v27, 3  ;;  %v12027_v40 = vpop.f32.mrf.mxu1  ;;  %v12033_v27 = vpop.permute.xlu0 %6287 }
 0x406   : > { %v3538_v8 = vadd.f32 %v12012_v17, %v3309_v36  ;;  %v3539_v34 = vadd.f32 %v12015_v38, %v3310_v46  ;;  %v4061_v15 = vmul.f32 %v11554_v2, %v13128_v41  ;;  %v3941_v62 = vrot.slane %v3819_v18, 3  ;;  %13137 = vst [vmem:[#allocation14_spill] sm:$0xff] %v12033_v27 }
 0x407   : > { %v3702_v13 = vsel %vm3635_vm4, %v3700_v54, %v3701_v51  ;;  %v3704_v5 = vsel %vm3635_vm4, %v3701_v51, %v3703_v30  ;;  %v3943_v21 = vrot.slane %v3820_v33, 3  ;;  %v4062_v48 = vmul.f32 %v11554_v2, %v13129_v63 }
 0x408   : > { %v3768_v56 = vadd.f32 %v3702_v13, %v3538_v8  ;;  %v3769_v24 = vadd.f32 %v3704_v5, %v3539_v34  ;;  %v4063_v36 = vmul.f32 %v11554_v2, %v13130_v23  ;;  %v3942_v46 = vsel %vm3635_vm4, %v3940_v57, %v3941_v62  ;;  %v12045_v5 = vpop.f32.mrf.mxu1 }
 0x409   : > { %v3944_v54 = vsel %vm3635_vm4, %v3941_v62, %v3943_v21  ;;  %v4185_v29 = vrot.slane %v4061_v15, 3  ;;  %v4306_v51 = vmul.f32 %v11568_v55, %v13131_v49  ;;  %v4186_v33 = vrot.slane %v4062_v48, 3  ;;  %13138 = vst [vmem:[#allocation15_spill] sm:$0xff] %v12045_v5  ;;  %v12054_v21 = vld [vmem:[%s12989_s2 + $0x4] ss:$0 sm:$0xff] }
 0x40a   : > { %v4010_v30 = vadd.f32 %v3942_v46, %v3768_v56  ;;  %v4011_v18 = vadd.f32 %v3944_v54, %v3769_v24  ;;  %v4188_v8 = vrot.slane %v4063_v36, 3  ;;  %v4307_v34 = vmul.f32 %v11568_v55, %v13132_v20 }
 0x40b   : > { %v4308_v2 = vmul.f32 %v11568_v55, %v13133_v12  ;;  %v4428_v13 = vrot.slane %v4306_v51, 3  ;;  %v4548_v57 = vmul.f32 %v11760_v1, %v13134_v43  ;;  %v4187_v15 = vsel %vm3635_vm4, %v4185_v29, %v4186_v33 }
 0x40c   : > { %v4189_v62 = vsel %vm3635_vm4, %v4186_v33, %v4188_v8  ;;  %v4549_v48 = vmul.f32 %v11760_v1, %v13135_v32  ;;  %v4773_v55 = vmul.f32 %v12054_v21, %v8895_v42  ;;  %v4255_v56 = vadd.f32 %v4187_v15, %v4010_v30  ;;  %v12062_v33 = vpop.permute.xlu0 %6389  ;;  %v12068_v30 = vpop.f32.mrf.mxu1 }
 0x40d   : > { %v4256_v24 = vadd.f32 %v4189_v62, %v4011_v18  ;;  %v4429_v36 = vrot.slane %v4307_v34, 3  ;;  %v4431_v46 = vrot.slane %v4308_v2, 3  ;;  %v4664_v54 = vrot.slane %v4548_v57, 3  ;;  %13139 = vst [vmem:[#allocation21_spill] sm:$0xff] %v12062_v33 }
 0x40e   : > { %v4665_v51 = vrot.slane %v4549_v48, 3  ;;  %v4774_v29 = vmul.f32 %v12054_v21, %v13123_v9  ;;  %v4775_v1 = vmul.f32 %v12054_v21, %v13124_v52  ;;  %v4888_v5 = vrot.slane %v4773_v55, 4 }
 0x40f   : > { %v4430_v8 = vsel %vm3635_vm4, %v4428_v13, %v4429_v36  ;;  %v4432_v27 = vsel %vm3635_vm4, %v4429_v36, %v4431_v46  ;;  %v5006_v42 = vmul.f32 %v11780_v58, %v13125_v19  ;;  %v5007_v13 = vmul.f32 %v11780_v58, %v13126_v10 }
 0x410   : > { %v4497_v18 = vadd.f32 %v4430_v8, %v4255_v56  ;;  %v4498_v34 = vadd.f32 %v4432_v27, %v4256_v24  ;;  %v12071_v2 = vsel %vm3635_vm4, %v4664_v54, %v4665_v51  ;;  %v12074_v9 = vsel %vm3635_vm4, %v4665_v51, %v4664_v54  ;;  %v12086_v54 = vpop.f32.mrf.mxu1 }
 0x411   : > { %v4889_v52 = vrot.slane %v4774_v29, 4  ;;  %v4891_v57 = vrot.slane %v4775_v1, 4  ;;  %v5008_v15 = vmul.f32 %v11780_v58, %v13127_v25  ;;  %v5128_v55 = vrot.slane %v5006_v42, 4  ;;  %13140 = vst [vmem:[#allocation22_spill] sm:$0xff] %v12086_v54  ;;  %v12092_v42 = vpop.permute.xlu0 %6387 }
 0x412   : > { %v4726_v62 = vadd.f32 %v12071_v2, %v4497_v18  ;;  %v4727_v48 = vadd.f32 %v12074_v9, %v4498_v34  ;;  %v5249_v27 = vmul.f32 %v11793_v47, %v13128_v41  ;;  %v5129_v36 = vrot.slane %v5007_v13, 4  ;;  %13141 = vst [vmem:[#allocation23_spill] sm:$0xff] %v12092_v42  ;;  %v12104_v42 = vpop.f32.mrf.mxu1 }
 0x413   : > { %v4890_v56 = vsel %vm4823_vm5, %v4888_v5, %v4889_v52  ;;  %v4892_v24 = vsel %vm4823_vm5, %v4889_v52, %v4891_v57  ;;  %v5131_v46 = vrot.slane %v5008_v15, 4  ;;  %v5250_v1 = vmul.f32 %v11793_v47, %v13129_v63 }
 0x414   : > { %v4956_v51 = vadd.f32 %v4890_v56, %v4726_v62  ;;  %v4957_v29 = vadd.f32 %v4892_v24, %v4727_v48  ;;  %v5251_v8 = vmul.f32 %v11793_v47, %v13130_v23  ;;  %v5130_v18 = vsel %vm4823_vm5, %v5128_v55, %v5129_v36 }
 0x415   : > { %v5132_v5 = vsel %vm4823_vm5, %v5129_v36, %v5131_v46  ;;  %v5373_v34 = vrot.slane %v5249_v27, 4  ;;  %v5494_v52 = vmul.f32 %v11807_v16, %v13131_v49  ;;  %v5374_v15 = vrot.slane %v5250_v1, 4  ;;  %v12116_v54 = vpop.permute.xlu0 %6393 }
 0x416   : > { %v5198_v57 = vadd.f32 %v5130_v18, %v4956_v51  ;;  %v5199_v13 = vadd.f32 %v5132_v5, %v4957_v29  ;;  %v5376_v62 = vrot.slane %v5251_v8, 4  ;;  %v5495_v48 = vmul.f32 %v11807_v16, %v13132_v20  ;;  %13142 = vst [vmem:[#allocation18_spill] sm:$0xff] %v12116_v54 }
 0x417   : > { %v5496_v56 = vmul.f32 %v11807_v16, %v13133_v12  ;;  %v5616_v24 = vrot.slane %v5494_v52, 4  ;;  %v5736_v55 = vmul.f32 %v11821_v3, %v13134_v43  ;;  %v5375_v27 = vsel %vm4823_vm5, %v5373_v34, %v5374_v15 }
 0x418   : > { %v5377_v36 = vsel %vm4823_vm5, %v5374_v15, %v5376_v62  ;;  %v5737_v46 = vmul.f32 %v11821_v3, %v13135_v32  ;;  %v840_v51 = vmul.f32 %v11832_v44, %v13125_v19  ;;  %v5443_v29 = vadd.f32 %v5375_v27, %v5198_v57  ;;  %v12124_v62 = vpop.f32.mrf.mxu1 }
 0x419   : > { %v5444_v1 = vadd.f32 %v5377_v36, %v5199_v13  ;;  %v5617_v8 = vrot.slane %v5495_v48, 4  ;;  %v5619_v18 = vrot.slane %v5496_v56, 4  ;;  %v5852_v5 = vrot.slane %v5736_v55, 4 }
 0x41a   : > { %v5853_v52 = vrot.slane %v5737_v46, 4  ;;  %v841_v33 = vmul.f32 %v11832_v44, %v13126_v10  ;;  %v909_v34 = vmul.f32 %v11843_v39, %v13128_v41  ;;  %v910_v57 = vmul.f32 %v11843_v39, %v13129_v63 }
 0x41b   : > { %v5618_v15 = vsel %vm4823_vm5, %v5616_v24, %v5617_v8  ;;  %v5620_v3 = vsel %vm4823_vm5, %v5617_v8, %v5619_v18  ;;  %v980_v13 = vmul.f32 %v11852_v14, %v13131_v49  ;;  %v981_v36 = vmul.f32 %v11852_v14, %v13132_v20 }
 0x41c   : > { %v5685_v48 = vadd.f32 %v5618_v15, %v5443_v29  ;;  %v5686_v56 = vadd.f32 %v5620_v3, %v5444_v1  ;;  %v12127_v44 = vsel %vm4823_vm5, %v5852_v5, %v5853_v52  ;;  %v12130_v55 = vsel %vm4823_vm5, %v5853_v52, %v5852_v5  ;;  %v12152_v3 = vpop.permute.xlu0 %6391 }
 0x41d   : > { %v941_v27 = vadd.f32 %v909_v34, %v840_v51  ;;  %v942_v24 = vadd.f32 %v910_v57, %v841_v33  ;;  %v1049_v39 = vmul.f32 %v11863_v11, %v13134_v43  ;;  %v1050_v29 = vmul.f32 %v11863_v11, %v13135_v32  ;;  %v12146_v51 = vpop.f32.mrf.mxu1  ;;  %13143 = vst [vmem:[#allocation19_spill] sm:$0xff] %v12152_v3 }
 0x41e   : > { %v5914_v46 = vadd.f32 %v12127_v44, %v5685_v48  ;;  %v5915_v8 = vadd.f32 %v12130_v55, %v5686_v56  ;;  %v1210_v1 = vmul.f32 %v11880_v53, %v13125_v19  ;;  %v1211_v33 = vmul.f32 %v11880_v53, %v13126_v10 }
 0x41f   : > { %v1012_v18 = vadd.f32 %v980_v13, %v941_v27  ;;  %v1013_v5 = vadd.f32 %v981_v36, %v942_v24  ;;  %v1212_v14 = vmul.f32 %v11880_v53, %v13127_v25  ;;  %v1444_v15 = vmul.f32 %v11891_v45, %v13128_v41  ;;  %v8209_v36 = vld [vmem:[%s12989_s2 + $0xb] ss:$0 sm:$0xff] }
 0x420   : > { %v5932_v52 = vpack.c.bf16 %v5915_v8, %v5914_v46  ;;  %v1327_v34 = vrot.slane %v1210_v1, 1  ;;  %v1445_v11 = vmul.f32 %v11891_v45, %v13129_v63  ;;  %v1328_v48 = vrot.slane %v1211_v33, 1 }
 0x421   : > { %v1081_v57 = vadd.f32 %v1049_v39, %v1012_v18  ;;  %v1082_v13 = vadd.f32 %v1050_v29, %v1013_v5  ;;  %v1330_v56 = vrot.slane %v1212_v14, 1  ;;  %v1446_v53 = vmul.f32 %v11891_v45, %v13130_v23  ;;  %v12164_v18 = vpop.f32.mrf.mxu1 }
 0x422   : > { %7874 = vmatprep.mubr.bf16.mxu1 %v5932_v52  ;;  %v1568_v27 = vrot.slane %v1444_v15, 1  ;;  %v1569_v24 = vrot.slane %v1445_v11, 1  ;;  %v1688_v46 = vmul.f32 %v8209_v36, %v13131_v49  ;;  %v1329_v39 = vsel %vm1257_vm2, %v1327_v34, %v1328_v48  ;;  %v12173_v34 = vpop.permute.xlu1 %6289 }
 0x423   : > { %v1148_v8 = vadd.f32 %v11871_v31, %v1081_v57  ;;  %v1149_v1 = vadd.f32 %v11875_v50, %v1082_v13  ;;  %v1331_v29 = vsel %vm1257_vm2, %v1328_v48, %v1330_v56  ;;  %v1571_v5 = vrot.slane %v1446_v53, 1  ;;  %v8210_v31 = vld [vmem:[%s12989_s2 + $0x10] ss:$0 sm:$0xff]  ;;  %v12177_v53 = vpop.permute.xlu0 %6397 }
 0x424   : > { %v1570_v45 = vsel %vm1257_vm2, %v1568_v27, %v1569_v24  ;;  %v1689_v33 = vmul.f32 %v8209_v36, %v13132_v20  ;;  %v1690_v14 = vmul.f32 %v8209_v36, %v13133_v12  ;;  %v1814_v11 = vrot.slane %v1688_v46, 1  ;;  %13144 = vst [vmem:[#allocation20_spill] sm:$0xff] %v12177_v53 }
 0x425   : > { %v1392_v52 = vadd.f32 %v1329_v39, %v1148_v8  ;;  %v1393_v15 = vadd.f32 %v1331_v29, %v1149_v1  ;;  %v1933_v50 = vmul.f32 %v8210_v31, %v13134_v43  ;;  %v1572_v57 = vsel %vm1257_vm2, %v1569_v24, %v1571_v5  ;;  %v12181_v1 = vpop.f32.mrf.mxu1 }
 0x426   : > { %v1815_v13 = vrot.slane %v1689_v33, 1  ;;  %v1817_v48 = vrot.slane %v1690_v14, 1  ;;  %v1934_v56 = vmul.f32 %v8210_v31, %v13135_v32  ;;  %v2400_v46 = vmul.f32 %v11932_v4, %v13125_v19 }
 0x427   : > { %v1635_v27 = vadd.f32 %v1570_v45, %v1392_v52  ;;  %v1636_v36 = vadd.f32 %v1572_v57, %v1393_v15  ;;  %v2057_v8 = vrot.slane %v1933_v50, 1  ;;  %v2401_v24 = vmul.f32 %v11932_v4, %v13126_v10  ;;  %v12193_v50 = vpop.permute.xlu1 %6293 }
 0x428   : > { %v1816_v39 = vsel %vm1257_vm2, %v1814_v11, %v1815_v13  ;;  %v1818_v29 = vsel %vm1257_vm2, %v1815_v13, %v1817_v48  ;;  %v2058_v3 = vrot.slane %v1934_v56, 1  ;;  %v2402_v45 = vmul.f32 %v11932_v4, %v13127_v25 }
 0x429   : > { %v1881_v5 = vadd.f32 %v1816_v39, %v1635_v27  ;;  %v1882_v33 = vadd.f32 %v1818_v29, %v1636_v36  ;;  %v2517_v14 = vrot.slane %v2400_v46, 2  ;;  %v2518_v31 = vrot.slane %v2401_v24, 2  ;;  %v12197_v27 = vpop.f32.mrf.mxu1  ;;  %v12206_v39 = vpop.permute.xlu0 %6395 }
 0x42a   : > { %v2059_v52 = vsel %vm1257_vm2, %v2057_v8, %v2058_v3  ;;  %v2060_v15 = vsel %vm1257_vm2, %v2058_v3, %v2057_v8  ;;  %v2633_v11 = vmul.f32 %v11945_v35, %v13128_v41  ;;  %v2520_v48 = vrot.slane %v2402_v45, 2  ;;  %v8211_v8 = vld [vmem:[%s12989_s2 + $0xc] ss:$0 sm:$0xff]  ;;  %13145 = vst [vmem:[#allocation29_spill] sm:$0xff] %v12206_v39  ;;  %v8212_v39 = vld [vmem:[%s12989_s2 + $0x11] ss:$0 sm:$0xff] }
 0x42b   : > { %v2123_v57 = vadd.f32 %v2059_v52, %v1881_v5  ;;  %v2124_v13 = vadd.f32 %v2060_v15, %v1882_v33  ;;  %v2634_v56 = vmul.f32 %v11945_v35, %v13129_v63  ;;  %v2519_v4 = vsel %vm2447_vm3, %v2517_v14, %v2518_v31 }
 0x42c   : > { %v2635_v36 = vmul.f32 %v11945_v35, %v13130_v23  ;;  %v2757_v3 = vrot.slane %v2633_v11, 2  ;;  %v2876_v46 = vmul.f32 %v8211_v8, %v13131_v49  ;;  %v2521_v5 = vsel %vm2447_vm3, %v2518_v31, %v2520_v48 }
 0x42d   : > { %v2352_v29 = vadd.f32 %v11952_v6, %v2123_v57  ;;  %v2353_v24 = vadd.f32 %v11955_v7, %v2124_v13  ;;  %v2758_v33 = vrot.slane %v2634_v56, 2  ;;  %v2877_v14 = vmul.f32 %v8211_v8, %v13132_v20  ;;  %v12218_v7 = vpop.f32.mrf.mxu1  ;;  %v12222_v56 = vpop.permute.xlu1 %6291 }
 0x42e   : > { %v2760_v45 = vrot.slane %v2635_v36, 2  ;;  %v2878_v35 = vmul.f32 %v8211_v8, %v13133_v12  ;;  %v3002_v52 = vrot.slane %v2876_v46, 2  ;;  %v3121_v6 = vmul.f32 %v8212_v39, %v13134_v43 }
 0x42f   : > { %v2582_v15 = vadd.f32 %v2519_v4, %v2352_v29  ;;  %v2583_v11 = vadd.f32 %v2521_v5, %v2353_v24  ;;  %v2759_v54 = vsel %vm2447_vm3, %v2757_v3, %v2758_v33  ;;  %v3003_v57 = vrot.slane %v2877_v14, 2 }
 0x430   : > { %v2761_v31 = vsel %vm2447_vm3, %v2758_v33, %v2760_v45  ;;  %v3005_v13 = vrot.slane %v2878_v35, 2  ;;  %v3122_v48 = vmul.f32 %v8212_v39, %v13135_v32  ;;  %v3245_v8 = vrot.slane %v3121_v6, 2  ;;  %v12230_v33 = vpop.permute.xlu0 %6401  ;;  %v12234_v35 = vpop.f32.mrf.mxu1 }
 0x431   : > { %v2824_v4 = vadd.f32 %v2759_v54, %v2582_v15  ;;  %v2825_v36 = vadd.f32 %v2761_v31, %v2583_v11  ;;  %v3588_v3 = vmul.f32 %v11990_v26, %v13125_v19  ;;  %v3004_v46 = vsel %vm2447_vm3, %v3002_v52, %v3003_v57  ;;  %13146 = vst [vmem:[#allocation30_spill] sm:$0xff] %v12230_v33 }
 0x432   : > { %v3006_v29 = vsel %vm2447_vm3, %v3003_v57, %v3005_v13  ;;  %v3246_v24 = vrot.slane %v3122_v48, 2  ;;  %v3589_v5 = vmul.f32 %v11990_v26, %v13126_v10  ;;  %v3590_v54 = vmul.f32 %v11990_v26, %v13127_v25 }
 0x433   : > { %v3069_v45 = vadd.f32 %v3004_v46, %v2824_v4  ;;  %v3070_v39 = vadd.f32 %v3006_v29, %v2825_v36  ;;  %v3705_v14 = vrot.slane %v3588_v3, 3  ;;  %v3821_v6 = vmul.f32 %v12005_v60, %v13128_v41  ;;  %v12249_v46 = vpop.permute.xlu1 %6297 }
 0x434   : > { %v3247_v15 = vsel %vm2447_vm3, %v3245_v8, %v3246_v24  ;;  %v3248_v52 = vsel %vm2447_vm3, %v3246_v24, %v3245_v8  ;;  %v3706_v11 = vrot.slane %v3589_v5, 3  ;;  %v3708_v13 = vrot.slane %v3590_v54, 3  ;;  %v8213_v8 = vld [vmem:[%s12989_s2 + $0xd] ss:$0 sm:$0xff] }
 0x435   : > { %v3311_v31 = vadd.f32 %v3247_v15, %v3069_v45  ;;  %v3312_v57 = vadd.f32 %v3248_v52, %v3070_v39  ;;  %v3822_v48 = vmul.f32 %v12005_v60, %v13129_v63  ;;  %v3823_v26 = vmul.f32 %v12005_v60, %v13130_v23  ;;  %v12254_v39 = vpop.f32.mrf.mxu1  ;;  %v12258_v52 = vpop.permute.xlu0 %6303 }
 0x436   : > { %v3707_v4 = vsel %vm3635_vm4, %v3705_v14, %v3706_v11  ;;  %v3945_v36 = vrot.slane %v3821_v6, 3  ;;  %v4064_v3 = vmul.f32 %v8213_v8, %v13131_v49  ;;  %v3709_v5 = vsel %vm3635_vm4, %v3706_v11, %v3708_v13 }
 0x437   : > { %v3540_v29 = vadd.f32 %v12012_v17, %v3311_v31  ;;  %v3541_v24 = vadd.f32 %v12015_v38, %v3312_v57  ;;  %v3946_v45 = vrot.slane %v3822_v48, 3  ;;  %v3948_v54 = vrot.slane %v3823_v26, 3  ;;  %v8214_v17 = vld [vmem:[%s12989_s2 + $0x12] ss:$0 sm:$0xff] }
 0x438   : > { %v4065_v60 = vmul.f32 %v8213_v8, %v13132_v20  ;;  %v4066_v14 = vmul.f32 %v8213_v8, %v13133_v12  ;;  %v4190_v15 = vrot.slane %v4064_v3, 3  ;;  %v4309_v38 = vmul.f32 %v8214_v17, %v13134_v43  ;;  %v6099_v3 = vpop.f32.mrf.mxu1 }
 0x439   : > { %v3770_v6 = vadd.f32 %v3707_v4, %v3540_v29  ;;  %v3771_v33 = vadd.f32 %v3709_v5, %v3541_v24  ;;  %v3947_v53 = vsel %vm3635_vm4, %v3945_v36, %v3946_v45  ;;  %v3949_v11 = vsel %vm3635_vm4, %v3946_v45, %v3948_v54  ;;  %v12273_v45 = vpop.permute.xlu1 %6295 }
 0x43a   : > { %v4191_v31 = vrot.slane %v4065_v60, 3  ;;  %v4193_v57 = vrot.slane %v4066_v14, 3  ;;  %v4310_v13 = vmul.f32 %v8214_v17, %v13135_v32  ;;  %v4433_v8 = vrot.slane %v4309_v38, 3  ;;  %v12281_v17 = vpop.permute.xlu0 %6399 }
 0x43b   : > { %v4012_v48 = vadd.f32 %v3947_v53, %v3770_v6  ;;  %v4013_v26 = vadd.f32 %v3949_v11, %v3771_v33  ;;  %v4776_v4 = vmul.f32 %v12054_v21, %v13125_v19  ;;  %v4777_v5 = vmul.f32 %v12054_v21, %v13126_v10 }
 0x43c   : > { %v4192_v36 = vsel %vm3635_vm4, %v4190_v15, %v4191_v31  ;;  %v4194_v29 = vsel %vm3635_vm4, %v4191_v31, %v4193_v57  ;;  %v4434_v24 = vrot.slane %v4310_v13, 3  ;;  %v4778_v53 = vmul.f32 %v12054_v21, %v13127_v25 }
 0x43d   : > { %v4257_v54 = vadd.f32 %v4192_v36, %v4012_v48  ;;  %v4258_v60 = vadd.f32 %v4194_v29, %v4013_v26  ;;  %v4893_v33 = vrot.slane %v4776_v4, 4  ;;  %v4894_v6 = vrot.slane %v4777_v5, 4 }
 0x43e   : > { %v4435_v14 = vsel %vm3635_vm4, %v4433_v8, %v4434_v24  ;;  %v4436_v19 = vsel %vm3635_vm4, %v4434_v24, %v4433_v8  ;;  %v5009_v15 = vmul.f32 %v11780_v58, %v13128_v41  ;;  %v4896_v11 = vrot.slane %v4778_v53, 4 }
 0x43f   : > { %v4499_v38 = vadd.f32 %v4435_v14, %v4257_v54  ;;  %v4500_v10 = vadd.f32 %v4436_v19, %v4258_v60  ;;  %v5010_v31 = vmul.f32 %v11780_v58, %v13129_v63  ;;  %v12285_v57 = vpop.f32.mrf.mxu1  ;;  %v4895_v25 = vsel %vm4823_vm5, %v4893_v33, %v4894_v6  ;;  %v6310_v33 = vpop.permute.xlu0 %6309 }
 0x440   : > { %v5011_v21 = vmul.f32 %v11780_v58, %v13130_v23  ;;  %v5133_v13 = vrot.slane %v5009_v15, 4  ;;  %v5252_v48 = vmul.f32 %v11793_v47, %v13131_v49  ;;  %v4897_v8 = vsel %vm4823_vm5, %v4894_v6, %v4896_v11  ;;  %v12299_v23 = vpop.permute.xlu1 %6301 }
 0x441   : > { %v4728_v41 = vadd.f32 %v12071_v2, %v4499_v38  ;;  %v4729_v26 = vadd.f32 %v12074_v9, %v4500_v10  ;;  %v5134_v4 = vrot.slane %v5010_v31, 4  ;;  %v5253_v63 = vmul.f32 %v11793_v47, %v13132_v20  ;;  %v6112_v58 = vpop.f32.mrf.mxu1 }
 0x442   : > { %v5136_v36 = vrot.slane %v5011_v21, 4  ;;  %v5254_v29 = vmul.f32 %v11793_v47, %v13133_v12  ;;  %v5378_v24 = vrot.slane %v5252_v48, 4  ;;  %v5497_v9 = vmul.f32 %v11807_v16, %v13134_v43 }
 0x443   : > { %v4958_v5 = vadd.f32 %v4895_v25, %v4728_v41  ;;  %v4959_v49 = vadd.f32 %v4897_v8, %v4729_v26  ;;  %v5135_v2 = vsel %vm4823_vm5, %v5133_v13, %v5134_v4  ;;  %v5379_v60 = vrot.slane %v5253_v63, 4  ;;  %v7869_v38 = vpop.f32.mrf.mxu1  ;;  %v12323_v21 = vpop.permute.xlu0 %6405 }
 0x444   : > { %v5137_v54 = vsel %vm4823_vm5, %v5134_v4, %v5136_v36  ;;  %v5381_v53 = vrot.slane %v5254_v29, 4  ;;  %v5498_v20 = vmul.f32 %v11807_v16, %v13135_v32  ;;  %v5621_v14 = vrot.slane %v5497_v9, 4  ;;  %v12317_v31 = vpop.permute.xlu1 %6299 }
 0x445   : > { %v5200_v12 = vadd.f32 %v5135_v2, %v4958_v5  ;;  %v5201_v47 = vadd.f32 %v5137_v54, %v4959_v49  ;;  %v12309_v19 = vpack.c.bf16 %v11940_v61, %v11905_v22  ;;  %v5380_v6 = vsel %vm4823_vm5, %v5378_v24, %v5379_v60  ;;  %v6115_v48 = vpop.f32.mrf.mxu1 }
 0x446   : > { %v5382_v15 = vsel %vm4823_vm5, %v5379_v60, %v5381_v53  ;;  %v5622_v43 = vrot.slane %v5498_v20, 4  ;;  %v12321_v61 = vpack.c.bf16 %v11965_v0, %v11921_v28  ;;  %v12326_v13 = vpack.c.bf16 %v6099_v3, %v12234_v35 }
 0x447   : > { %v5445_v10 = vadd.f32 %v5380_v6, %v5200_v12  ;;  %v5446_v11 = vadd.f32 %v5382_v15, %v5201_v47  ;;  %6417 = vrot.lane.b32.xlu1 %v12309_v19, %s8279_s24  ;;  %v12334_v8 = vpack.c.bf16 %v12027_v40, %v11981_v37  ;;  %v12338_v28 = vpack.c.bf16 %v12254_v39, %v12218_v7  ;;  %v6308_v40 = vpop.permute.xlu0 %6307  ;;  %v13148_v7 = vld [vmem:[#allocation15_spill] sm:$0xff] }
 0x448   : > { %v5623_v16 = vsel %vm4823_vm5, %v5621_v14, %v5622_v43  ;;  %v5624_v32 = vsel %vm4823_vm5, %v5622_v43, %v5621_v14  ;;  %v6353_v0 = vsel %vm437_vm0, %v12258_v52, %v12326_v13  ;;  %v13147_v3 = vmov 0  }
 0x449   : > { %v5687_v25 = vadd.f32 %v5623_v16, %v5445_v10  ;;  %v5688_v22 = vadd.f32 %v5624_v32, %v5446_v11  ;;  %v12344_v4 = vpack.c.bf16 %v6115_v48, %v6112_v58  ;;  %v12352_v39 = vpack.c.bf16 %v13148_v7, %v12009_v59  ;;  %v13149_v58 = vld [vmem:[#allocation22_spill] sm:$0xff] }
 0x44a   : > { %v12361_v63 = vpack.c.bf16 %v12104_v42, %v12068_v30  ;;  %v12364_v29 = vpack.c.bf16 %v7869_v38, %v12285_v57  ;;  %v12373_v5 = vpack.c.bf16 %v12124_v62, %v13149_v58  ;;  %v12380_v42 = vpack.c.bf16 %v12181_v1, %v12146_v51 }
 0x44b   : > { %v5916_v41 = vadd.f32 %v12127_v44, %v5687_v25  ;;  %v5917_v26 = vadd.f32 %v12130_v55, %v5688_v22  ;;  %6415 = vrot.lane.b32.xlu1 %v12321_v61, %s8279_s24  ;;  %v6519_v44 = vmax.bf16 %v13147_v3, %v6353_v0  ;;  %v6306_v55 = vpop.permute.xlu1 %6305  ;;  %v6361_v52 = vsel %vm437_vm0, %v6308_v40, %v12344_v4  ;;  %v12398_v62 = vpop.permute.xlu0 %6403  ;;  %v13150_v0 = vld [vmem:[#allocation14_spill] sm:$0xff] }
 0x44c   : > { %v6357_v37 = vsel %vm437_vm0, %v6306_v55, %v12338_v28  ;;  %v6521_v24 = vmax.bf16 %v13147_v3, %v6361_v52  ;;  %v6365_v59 = vsel %vm437_vm0, %v6310_v33, %v12364_v29  ;;  %v12386_v57 = vpack.c.bf16 %v12197_v27, %v12164_v18 }
 0x44d   : > { %v5933_v35 = vpack.c.bf16 %v5917_v26, %v5916_v41  ;;  %6577 = vxpose.xlu0.c.b16.start [1/8] (narrow) %v6519_v44, 64  ;;  %v6520_v36 = vmax.bf16 %v13147_v3, %v6357_v37  ;;  %v6522_v30 = vmax.bf16 %v13147_v3, %v6365_v59  ;;  %v6325_v37 = vsel %vm437_vm0, %v12173_v34, %v12309_v19 }
 0x44e   : > { %v6512_v40 = vmax.bf16 %v13147_v3, %v6325_v37  ;;  %v6333_v34 = vsel %vm437_vm0, %v12193_v50, %v12334_v8  ;;  %v6345_v59 = vsel %vm437_vm0, %v12317_v31, %v12386_v57 }
 0x44f   : > { %7875 = vmatmul.mubr.bf16.gmra.mxu1 %v5933_v35  ;;  %6421 = vrot.lane.b32.xlu1 %v12334_v8, %s8279_s24  ;;  %v6314_v51 = vpop.permute.xlu0 %6313  ;;  %v6321_v35 = vsel %vm437_vm0, %v13150_v0, %v12321_v61  ;;  %v6514_v52 = vmax.bf16 %v13147_v3, %v6333_v34  ;;  %v13157_v34 = vld [vmem:[#allocation23_spill] sm:$0xff] }
 0x450   : > { %v6511_v55 = vmax.bf16 %v13147_v3, %v6321_v35  ;;  %v13155_v35 = vld [vmem:[#allocation21_spill] sm:$0xff] }
 0x451   : > { %6578 = vxpose.xlu0.c.b16.cont [2/8] (narrow) %v6520_v36, 64  ;;  %v6341_v36 = vsel %vm437_vm0, %v12249_v46, %v12361_v63 }
 0x452   : > { %v6516_v50 = vmax.bf16 %v13147_v3, %v6341_v36 }
 0x453   : > { %6419 = vrot.lane.b32.xlu1 %v12352_v39, %s8279_s24  ;;  %v12400_v1 = vpop.permute.xlu0 %6409 }
 0x455   : > { %6579 = vxpose.xlu0.c.b16.cont [3/8] (narrow) %v6521_v24, 64 }
 0x457   : > { %6425 = vrot.lane.b32.xlu1 %v12361_v63, %s8279_s24  ;;  %v6312_v60 = vpop.permute.xlu0 %6311 }
 0x459   : > { %6580 = vxpose.xlu0.c.b16.cont [4/8] (narrow) %v6522_v30, 64  ;;  %v6517_v30 = vmax.bf16 %v13147_v3, %v6345_v59 }
 0x45b   : > { %6423 = vrot.lane.b32.xlu1 %v12373_v5, %s8279_s24  ;;  %v12412_v47 = vpop.permute.xlu0 %6407 }
 0x45f   : > { %6429 = vrot.lane.b32.xlu1 %v12380_v42, %s8279_s24  ;;  %v6318_v14 = vpop.permute.xlu0 %6317 }
 0x463   : > { %6427 = vrot.lane.b32.xlu1 %v12386_v57, %s8279_s24  ;;  %v12414_v15 = vpop.permute.xlu0 %6413 }
 0x467   : > { %6433 = vrot.lane.b32.xlu1 %v12338_v28, %s8279_s24  ;;  %v6316_v32 = vpop.permute.xlu0 %6315 }
 0x46b   : > { %6431 = vrot.lane.b32.xlu1 %v12326_v13, %s8279_s24 }
 0x46f   : > { %6437 = vrot.lane.b32.xlu1 %v12364_v29, %s8279_s24 }
 0x473   : > { %6435 = vrot.lane.b32.xlu1 %v12344_v4, %s8279_s24 }
 0x4ad   : > { %v7872_v18 = vpop.f32.mrf.mxu1 }
 0x4af   : > { %v6128_v27 = vpop.f32.mrf.mxu1 }
 0x4b1   : > { %v7873_v49 = vpop.f32.mrf.mxu1 }
 0x4b2   : > { %v12402_v2 = vpack.c.bf16 %v7873_v49, %v7872_v18 }
 0x4b3   : > { %v6131_v9 = vpop.f32.mrf.mxu1 }
 0x4b4   : > { %v6171_v54 = vpack.c.bf16 %v6131_v9, %v6128_v27  ;;  %6441 = vrot.lane.b32.xlu1 %v12402_v2, %s8279_s24  ;;  %v6373_v33 = vsel %vm437_vm0, %v6314_v51, %v12402_v2  ;;  %v12480_v51 = vpop.permute.xlu0 %6383  ;;  %v13151_v9 = vld [vmem:[#allocation20_spill] sm:$0xff] }
 0x4b5   : > { %v6524_v12 = vmax.bf16 %v13147_v3, %v6373_v33 }
 0x4b6   : > { %v6369_v53 = vsel %vm437_vm0, %v6312_v60, %v6171_v54 }
 0x4b7   : > { %v6523_v20 = vmax.bf16 %v13147_v3, %v6369_v53 }
 0x4b8   : > { %6439 = vrot.lane.b32.xlu1 %v6171_v54, %s8279_s24  ;;  %v6412_v31 = vpop.permute.xlu0 %6411 }
 0x4b9   : > { %6581 = vxpose.xlu0.c.b16.cont [5/8] (narrow) %v6523_v20, 64  ;;  %v12434_v26 = vpop.permute.xlu1 %6417 }
 0x4bd   : > { %6582 = vxpose.xlu0.c.b16.cont [6/8] (narrow) %v6524_v12, 64  ;;  %v12441_v44 = vpop.permute.xlu1 %6415 }
 0x50f   : > { %v7876_v6 = vpop.f32.mrf.mxu1 }
 0x511   : > { %v6144_v43 = vpop.f32.mrf.mxu1 }
 0x513   : > { %v7877_v38 = vpop.f32.mrf.mxu1 }
 0x514   : > { %v12416_v10 = vpack.c.bf16 %v7877_v38, %v7876_v6  ;;  %v13153_v38 = vld [vmem:[#allocation18_spill] sm:$0xff] }
 0x515   : > { %v6147_v11 = vpop.f32.mrf.mxu1 }
 0x516   : > { %v6173_v16 = vpack.c.bf16 %v6147_v11, %v6144_v43  ;;  %6445 = vrot.lane.b32.xlu1 %v12416_v10, %s8279_s24  ;;  %v6381_v48 = vsel %vm437_vm0, %v6318_v14, %v12416_v10 }
 0x517   : > { %v6526_v41 = vmax.bf16 %v13147_v3, %v6381_v48 }
 0x518   : > { %v6377_v25 = vsel %vm437_vm0, %v6316_v32, %v6173_v16  ;;  %v13154_v32 = vld [vmem:[#allocation19_spill] sm:$0xff] }
 0x519   : > { %v6525_v22 = vmax.bf16 %v13147_v3, %v6377_v25 }
 0x51a   : > { %6443 = vrot.lane.b32.xlu1 %v6173_v16, %s8279_s24  ;;  %s8281_s24 = smov [#allocation2]  }
 0x51b   : > { %6583 = vxpose.xlu0.c.b16.cont [7/8] (narrow) %v6525_v22, 64  ;;  %s8219_s12 = sshll.u32 %s8281_s24, 4  ;;  %s8220_s12 = int_to_ptr.vmem [resolvable:$false] %s8219_s12 }
 0x51f   : > { %6584 = vxpose.xlu0.c.b16.end [8/8] (narrow) %v6526_v41, 64 }
 0x528   : > { %6191 = vrot.lane.b32.xlu0 %v12321_v61, %s8280_s10  ;;  %v6329_v61 = vsel %vm437_vm0, %v12222_v56, %v12352_v39  ;;  %v6337_v56 = vsel %vm437_vm0, %v12273_v45, %v12373_v5  ;;  %v6349_v45 = vsel %vm437_vm0, %v12299_v23, %v12380_v42 }
 0x529   : > { %v6513_v7 = vmax.bf16 %v13147_v3, %v6329_v61 }
 0x52c   : > { %6195 = vrot.lane.b32.xlu0 %v12352_v39, %s8280_s10  ;;  %v6515_v39 = vmax.bf16 %v13147_v3, %v6337_v56 }
 0x530   : > { %6199 = vrot.lane.b32.xlu0 %v12373_v5, %s8280_s10  ;;  %v6518_v5 = vmax.bf16 %v13147_v3, %v6349_v45 }
 0x534   : > { %6203 = vrot.lane.b32.xlu0 %v12386_v57, %s8280_s10 }
 0x538   : > { %6207 = vrot.lane.b32.xlu0 %v12326_v13, %s8280_s10  ;;  %v12454_v13 = vpop.permute.xlu1 %6421 }
 0x53c   : > { %6211 = vrot.lane.b32.xlu0 %v12344_v4, %s8280_s10  ;;  %v12461_v4 = vpop.permute.xlu1 %6419 }
 0x53d   : > { %6561 = vxpose.xlu1.c.b16.start [1/8] (narrow) %v6511_v55, 64 }
 0x540   : > { %6215 = vrot.lane.b32.xlu0 %v6171_v54, %s8280_s10  ;;  %v6426_v24 = vpop.permute.xlu1 %6425 }
 0x541   : > { %6562 = vxpose.xlu1.c.b16.cont [2/8] (narrow) %v6512_v40, 64 }
 0x544   : > { %6219 = vrot.lane.b32.xlu0 %v6173_v16, %s8280_s10  ;;  %v6424_v58 = vpop.permute.xlu1 %6423 }
 0x545   : > { %6563 = vxpose.xlu1.c.b16.cont [3/8] (narrow) %v6513_v7, 64  ;;  %v6461_v25 = vsel %vm437_vm0, %v13154_v32, %v6424_v58  ;;  %v13156_v7 = vld [vmem:[#allocation8_spill] sm:$0xff] }
 0x546   : > { %v6537_v0 = vsel %vm6527_vm6, %v6461_v25, 1065369472 }
 0x548   : > { %v6430_v46 = vpop.permute.xlu1 %6429 }
 0x549   : > { %6564 = vxpose.xlu1.c.b16.cont [4/8] (narrow) %v6514_v52, 64  ;;  %v6455_v52 = vsel %vm437_vm0, %v13157_v34, %v12461_v4 }
 0x54c   : > { %v6428_v18 = vpop.permute.xlu1 %6427 }
 0x54d   : > { %6565 = vxpose.xlu1.c.b16.cont [5/8] (narrow) %v6515_v39, 64  ;;  %v13158_v39 = vld [vmem:[#allocation30_spill] sm:$0xff] }
 0x550   : > { %v6434_v57 = vpop.permute.xlu1 %6433 }
 0x551   : > { %6566 = vxpose.xlu1.c.b16.cont [6/8] (narrow) %v6516_v50, 64  ;;  %v6476_v36 = vsel %vm437_vm0, %v13158_v39, %v6434_v57  ;;  %v13161_v39 = vld [vmem:[#allocation10_spill] sm:$0xff] }
 0x552   : > { %v6547_v4 = vsel %vm6527_vm6, %v6476_v36, 1065369472 }
 0x554   : > { %v6432_v27 = vpop.permute.xlu1 %6431 }
 0x555   : > { %6567 = vxpose.xlu1.c.b16.cont [7/8] (narrow) %v6517_v30, 64  ;;  %v6473_v59 = vsel %vm437_vm0, %v12281_v17, %v6432_v27  ;;  %v6449_v30 = vsel %vm437_vm0, %v12480_v51, %v12441_v44 }
 0x556   : > { %v6545_v45 = vsel %vm6527_vm6, %v6473_v59, 1065369472  ;;  %v13162_v59 = vld [vmem:[#allocation9_spill] sm:$0xff] }
 0x558   : > { %v6438_v49 = vpop.permute.xlu1 %6437 }
 0x559   : > { %6568 = vxpose.xlu1.c.b16.end [8/8] (narrow) %v6518_v5, 64  ;;  %v6482_v41 = vsel %vm437_vm0, %v12323_v21, %v6438_v49  ;;  %v6529_v5 = vsel %vm6527_vm6, %v6449_v30, 1065369472  ;;  %v13163_v30 = vld [vmem:[#allocation12_spill] sm:$0xff] }
 0x55a   : > { %v6551_v55 = vsel %vm6527_vm6, %v6482_v41, 1065369472 }
 0x55d   : > { %6193 = vrot.lane.b32.xlu1 %v12309_v19, %s8280_s10  ;;  %v6436_v19 = vpop.permute.xlu1 %6435 }
 0x55e   : > { %v6479_v37 = vsel %vm437_vm0, %v12398_v62, %v6436_v19  ;;  %v6533_v62 = vsel %vm6527_vm6, %v6455_v52, 1065369472 }
 0x561   : > { %6197 = vrot.lane.b32.xlu1 %v12334_v8, %s8280_s10  ;;  %v6442_v8 = vpop.permute.xlu1 %6441 }
 0x562   : > { %v6488_v12 = vsel %vm437_vm0, %v12400_v1, %v6442_v8 }
 0x563   : > { %v6555_v11 = vsel %vm6527_vm6, %v6488_v12, 1065369472  ;;  %v6665_v12 = vld [vmem:[%s12991_s4 + $0x38] sm:$0xff] }
 0x565   : > { %6201 = vrot.lane.b32.xlu1 %v12361_v63, %s8280_s10  ;;  %v6585_v23 = vpop.trf.xlu0  ;;  %v6440_v63 = vpop.permute.xlu1 %6439 }
 0x566   : > { %6625 = vmatprep.mubr.bf16.mxu0 %v6585_v23  ;;  %v6485_v16 = vsel %vm437_vm0, %v12412_v47, %v6440_v63  ;;  %v6458_v47 = vsel %vm437_vm0, %v13155_v35, %v12454_v13  ;;  %v6549_v13 = vsel %vm6527_vm6, %v6479_v37, 1065369472  ;;  %v6659_v35 = vld [vmem:[%s12991_s4 + $0x8] sm:$0xff]  ;;  %v6658_v37 = vld [vmem:[%s12991_s4] sm:$0xff] }
 0x567   : > { %v6553_v22 = vsel %vm6527_vm6, %v6485_v16, 1065369472  ;;  %v6535_v61 = vsel %vm6527_vm6, %v6458_v47, 1065369472  ;;  %v6661_v16 = vld [vmem:[%s12991_s4 + $0x18] sm:$0xff] }
 0x569   : > { %6205 = vrot.lane.b32.xlu1 %v12380_v42, %s8280_s10  ;;  %v6470_v42 = vsel %vm437_vm0, %v13151_v9, %v6430_v46  ;;  %v6586_v60 = vpop.trf.xlu0 }
 0x56a   : > { %v6543_v53 = vsel %vm6527_vm6, %v6470_v42, 1065369472 }
 0x56d   : > { %6209 = vrot.lane.b32.xlu1 %v12338_v28, %s8280_s10  ;;  %v6587_v43 = vpop.trf.xlu0 }
 0x571   : > { %6213 = vrot.lane.b32.xlu1 %v12364_v29, %s8280_s10  ;;  %v6588_v48 = vpop.trf.xlu0 }
 0x575   : > { %6217 = vrot.lane.b32.xlu1 %v12402_v2, %s8280_s10  ;;  %v13152_v2 = vld [vmem:[#allocation29_spill] sm:$0xff] }
 0x576   : > { %v6467_v20 = vsel %vm437_vm0, %v13152_v2, %v6428_v18  ;;  %v6663_v2 = vld [vmem:[%s12991_s4 + $0x28] sm:$0xff] }
 0x579   : > { %6221 = vrot.lane.b32.xlu1 %v12416_v10, %s8280_s10  ;;  %v6464_v10 = vsel %vm437_vm0, %v13153_v38, %v6426_v24  ;;  %v13159_v24 = vld [vmem:[#allocation13_spill] sm:$0xff] }
 0x57a   : > { %v6539_v1 = vsel %vm6527_vm6, %v6464_v10, 1065369472  ;;  %v6452_v50 = vsel %vm437_vm0, %v13159_v24, %v12434_v26 }
 0x57b   : > { %v6531_v58 = vsel %vm6527_vm6, %v6452_v50, 1065369472 }
 0x588   : > { %v6446_v54 = vpop.permute.xlu1 %6445 }
 0x589   : > { %v6494_v28 = vsel %vm437_vm0, %v12414_v15, %v6446_v54  ;;  %v6541_v15 = vsel %vm6527_vm6, %v6467_v20, 1065369472  ;;  %v6664_v20 = vld [vmem:[%s12991_s4 + $0x30] sm:$0xff] }
 0x58a   : > { %v6559_v29 = vsel %vm6527_vm6, %v6494_v28, 1065369472 }
 0x58b   : > { %7714 = vmatprep.subr.bf16.mxu0 %v6559_v29 }
 0x58c   : > { %7715 = vmatpush3.bf16.msra.mxu0 %v6543_v53  ;;  %v6444_v33 = vpop.permute.xlu1 %6443 }
 0x58d   : > { %v6491_v14 = vsel %vm437_vm0, %v6412_v31, %v6444_v33 }
 0x58e   : > { %v6557_v6 = vsel %vm6527_vm6, %v6491_v14, 1065369472 }
 0x58f   : > { %7716 = vmatprep.subr.bf16.mxu0 %v6557_v6 }
 0x590   : > { %7717 = vmatpush3.bf16.msra.mxu0 %v6541_v15 }
 0x591   : > { %7718 = vmatprep.subr.bf16.mxu0 %v6555_v11 }
 0x594   : > { %7719 = vmatpush3.bf16.msra.mxu0 %v6539_v1 }
 0x595   : > { %7720 = vmatprep.subr.bf16.mxu0 %v6553_v22  ;;  %v6660_v22 = vld [vmem:[%s12991_s4 + $0x10] sm:$0xff] }
 0x598   : > { %7721 = vmatpush3.bf16.msra.mxu0 %v6537_v0 }
 0x599   : > { %7722 = vmatprep.subr.bf16.mxu0 %v6551_v55 }
 0x59a   : > { %v6192_v40 = vpop.permute.xlu0 %6191 }
 0x59b   : > { %v6225_v21 = vsel %vm437_vm0, %v13156_v7, %v6192_v40 }
 0x59c   : > { %v6495_v56 = vmax.bf16 %v13147_v3, %v6225_v21  ;;  %7723 = vmatpush3.bf16.msra.mxu0 %v6535_v61 }
 0x59d   : > { %7724 = vmatprep.subr.bf16.mxu0 %v6549_v13 }
 0x59e   : > { %7886 = vmatprep.mubr.msk.bf16.mxu1 %vm6527_vm6, %v6495_v56  ;;  %v6196_v52 = vpop.permute.xlu0 %6195  ;;  %v13160_v56 = vld [vmem:[#allocation7_spill] sm:$0xff] }
 0x59f   : > { %v6569_v26 = vpop.trf.xlu1  ;;  %v6233_v36 = vsel %vm437_vm0, %v13161_v39, %v6196_v52 }
 0x5a0   : > { %7725 = vmatpush3.bf16.msra.mxu0 %v6533_v62  ;;  %v6497_v24 = vmax.bf16 %v13147_v3, %v6233_v36 }
 0x5a1   : > { %7726 = vmatprep.subr.bf16.mxu0 %v6547_v4 }
 0x5a2   : > { %v6200_v4 = vpop.permute.xlu0 %6199 }
 0x5a3   : > { %v6570_v46 = vpop.trf.xlu1 }
 0x5a4   : > { %7727 = vmatpush3.bf16.msra.mxu0 %v6531_v58 }
 0x5a5   : > { %7728 = vmatprep.subr.bf16.mxu0 %v6545_v45  ;;  %v6241_v45 = vsel %vm437_vm0, %v13163_v30, %v6200_v4 }
 0x5a7   : > { %v6571_v17 = vpop.trf.xlu1 }
 0x5a8   : > { %7729 = vmatpush3.bf16.msra.mxu0 %v6529_v5 }
 0x5ab   : > { %6626 = vmatmul.mubr.bf16.vlgmr.msra.gmra.mxu0 %v6569_v26  ;;  %v6572_v18 = vpop.trf.xlu1  ;;  %v6499_v26 = vmax.bf16 %v13147_v3, %v6241_v45 }
 0x5ac   : > { %6633 = vmatprep.mubr.bf16.mxu0 %v6586_v60 }
 0x5b3   : > { %6634 = vmatmul.mubr.bf16.gmra.mxu0 %v6570_v46 }
 0x5b4   : > { %6641 = vmatprep.mubr.bf16.mxu0 %v6587_v43  ;;  %v6662_v43 = vld [vmem:[%s12991_s4 + $0x20] sm:$0xff] }
 0x5bb   : > { %6642 = vmatmul.mubr.bf16.gmra.mxu0 %v6571_v17  ;;  %v6204_v17 = vpop.permute.xlu0 %6203 }
 0x5bc   : > { %6649 = vmatprep.mubr.bf16.mxu0 %v6588_v48 }
 0x5c3   : > { %6650 = vmatmul.mubr.bf16.gmra.mxu0 %v6572_v18  ;;  %v13164_v18 = vld [vmem:[#allocation11_spill] sm:$0xff] }
 0x5cf   : > { %v6194_v21 = vpop.permute.xlu1 %6193 }
 0x5d0   : > { %v6229_v13 = vsel %vm437_vm0, %v13160_v56, %v6194_v21 }
 0x5d1   : > { %v6496_v62 = vmax.bf16 %v13147_v3, %v6229_v13  ;;  %v8030_v13 = vld [vmem:[%s12992_s5 + $0x10] sm:$0xff]  }
 0x5d3   : > { %v6198_v50 = vpop.permute.xlu1 %6197 }
 0x5d4   : > { %v6237_v58 = vsel %vm437_vm0, %v13162_v59, %v6198_v50 }
 0x5d5   : > { %v6498_v5 = vmax.bf16 %v13147_v3, %v6237_v58  ;;  %v8031_v58 = vld [vmem:[%s12992_s5 + $0x8] sm:$0xff]  }
 0x5d7   : > { %v6202_v46 = vpop.permute.xlu1 %6201 }
 0x66b   : > { %v7730_v31 = vpop.f32.mrf.mxu0 }
 0x66d   : > { %v7731_v44 = vpop.f32.mrf.mxu0 }
 0x66e   : > { %v7732_v47 = vadd.f32 %v7731_v44, %v7730_v31  ;;  %v6245_v31 = vsel %vm437_vm0, %v13164_v18, %v6202_v46  ;;  %v13165_v44 = vld [vmem:[#allocation17_spill] sm:$0xff] }
 0x66f   : > { %v7733_v51 = vpop.f32.mrf.mxu0  ;;  %v8032_v46 = vld [vmem:[%s12992_s5] sm:$0xff]  }
 0x670   : > { %v6666_v7 = vmul.f32 %v7732_v47, %v6658_v37 }
 0x671   : > { %v7734_v57 = vpop.f32.mrf.mxu0 }
 0x672   : > { %v7735_v48 = vadd.f32 %v7734_v57, %v7733_v51  ;;  %v6249_v51 = vsel %vm437_vm0, %v13165_v44, %v6204_v17  ;;  %v6500_v57 = vmax.bf16 %v13147_v3, %v6245_v31 }
 0x673   : > { %v7736_v23 = vpop.f32.mrf.mxu0 }
 0x674   : > { %v6667_v40 = vmul.f32 %v7735_v48, %v6659_v35  ;;  %v13173_v48 = vld [vmem:[#allocation48_spill] sm:$0xff] }
 0x675   : > { %v7737_v27 = vpop.f32.mrf.mxu0 }
 0x676   : > { %v7738_v1 = vadd.f32 %v7737_v27, %v7736_v23  ;;  %v6674_v34 = vpack.c.bf16 %v6667_v40, %v6666_v7  ;;  %v6501_v23 = vmax.bf16 %v13147_v3, %v6249_v51  ;;  %v6206_v27 = vpop.permute.xlu1 %6205 }
 0x677   : > { %v7739_v49 = vpop.f32.mrf.mxu0 }
 0x678   : > { %v6668_v55 = vmul.f32 %v7738_v1, %v6660_v22 }
 0x679   : > { %v7740_v19 = vpop.f32.mrf.mxu0 }
 0x67a   : > { %v7741_v15 = vadd.f32 %v7740_v19, %v7739_v49  ;;  %v6208_v49 = vpop.permute.xlu0 %6207  ;;  %v13166_v19 = vld [vmem:[#allocation16_spill] sm:$0xff] }
 0x67b   : > { %v7742_v8 = vpop.f32.mrf.mxu0 }
 0x67c   : > { %v6669_v41 = vmul.f32 %v7741_v15, %v6661_v16 }
 0x67d   : > { %v7743_v63 = vpop.f32.mrf.mxu0 }
 0x67e   : > { %v7744_v14 = vadd.f32 %v7743_v63, %v7742_v8  ;;  %v6675_v61 = vpack.c.bf16 %v6669_v41, %v6668_v55  ;;  %v6253_v8 = vsel %vm437_vm0, %v13166_v19, %v6206_v27  ;;  %v13167_v63 = vld [vmem:[#allocation25_spill] sm:$0xff]  ;;  %v13174_v55 = vld [vmem:[#allocation47_spill] sm:$0xff] }
 0x67f   : > { %v7745_v9 = vpop.f32.mrf.mxu0 }
 0x680   : > { %v6670_v32 = vmul.f32 %v7744_v14, %v6662_v43  ;;  %v13170_v43 = vld [vmem:[#allocation32_spill] sm:$0xff] }
 0x681   : > { %v7746_v42 = vpop.f32.mrf.mxu0 }
 0x682   : > { %v7747_v29 = vadd.f32 %v7746_v42, %v7745_v9  ;;  %v6257_v9 = vsel %vm437_vm0, %v13167_v63, %v6208_v49  ;;  %v6502_v42 = vmax.bf16 %v13147_v3, %v6253_v8 }
 0x683   : > { %v7748_v54 = vpop.f32.mrf.mxu0 }
 0x684   : > { %v6671_v38 = vmul.f32 %v7747_v29, %v6663_v2  ;;  %v13168_v29 = vld [vmem:[#allocation24_spill] sm:$0xff]  ;;  %v13169_v2 = vld [vmem:[#allocation33_spill] sm:$0xff] }
 0x685   : > { %v7749_v60 = vpop.f32.mrf.mxu0 }
 0x686   : > { %v7750_v53 = vadd.f32 %v7749_v60, %v7748_v54  ;;  %v6676_v0 = vpack.c.bf16 %v6671_v38, %v6670_v32  ;;  %v6503_v54 = vmax.bf16 %v13147_v3, %v6257_v9  ;;  %v6210_v60 = vpop.permute.xlu1 %6209  ;;  %v13171_v38 = vld [vmem:[#allocation41_spill] sm:$0xff] }
 0x687   : > { %v7751_v28 = vpop.f32.mrf.mxu0 }
 0x688   : > { %v6672_v10 = vmul.f32 %v7750_v53, %v6664_v20  ;;  %v6261_v53 = vsel %vm437_vm0, %v13168_v29, %v6210_v60 }
 0x689   : > { %v7752_v33 = vpop.f32.mrf.mxu0 }
 0x68a   : > { %v7753_v6 = vadd.f32 %v7752_v33, %v7751_v28  ;;  %v6212_v28 = vpop.permute.xlu0 %6211  ;;  %v6504_v33 = vmax.bf16 %v13147_v3, %v6261_v53  ;;  %v6214_v14 = vpop.permute.xlu1 %6213 }
 0x68b   : > { %v6265_v20 = vsel %vm437_vm0, %v13169_v2, %v6212_v28  ;;  %v6269_v15 = vsel %vm437_vm0, %v13170_v43, %v6214_v14 }
 0x68c   : > { %v6673_v11 = vmul.f32 %v7753_v6, %v6665_v12  ;;  %v6505_v12 = vmax.bf16 %v13147_v3, %v6265_v20 }
 0x68e   : > { %v6677_v25 = vpack.c.bf16 %v6673_v11, %v6672_v10  ;;  %v6216_v6 = vpop.permute.xlu0 %6215  ;;  %v6506_v11 = vmax.bf16 %v13147_v3, %v6269_v15  ;;  %v6218_v1 = vpop.permute.xlu1 %6217 }
 0x68f   : > { %v6273_v10 = vsel %vm437_vm0, %v13171_v38, %v6216_v6 }
 0x690   : > { %7878 = vmatprep.subr.bf16.mxu1 %v6677_v25  ;;  %v6507_v16 = vmax.bf16 %v13147_v3, %v6273_v10 }
 0x691   : > { %7879 = vmatpush3.bf16.msra.mxu1 %v6677_v25  ;;  %v13172_v25 = vld [vmem:[#allocation40_spill] sm:$0xff] }
 0x692   : > { %7880 = vmatprep.subr.bf16.mxu1 %v6676_v0  ;;  %v6220_v32 = vpop.permute.xlu0 %6219  ;;  %v6277_v22 = vsel %vm437_vm0, %v13172_v25, %v6218_v1  ;;  %v6222_v47 = vpop.permute.xlu1 %6221 }
 0x693   : > { %v6281_v41 = vsel %vm437_vm0, %v13173_v48, %v6220_v32  ;;  %v6285_v37 = vsel %vm437_vm0, %v13174_v55, %v6222_v47 }
 0x694   : > { %v6509_v35 = vmax.bf16 %v13147_v3, %v6281_v41  ;;  %v6510_v40 = vmax.bf16 %v13147_v3, %v6285_v37 }
 0x695   : > { %7881 = vmatpush3.bf16.msra.mxu1 %v6676_v0  ;;  %v6508_v0 = vmax.bf16 %v13147_v3, %v6277_v22 }
 0x696   : > { %7882 = vmatprep.subr.bf16.mxu1 %v6675_v61 }
 0x699   : > { %7883 = vmatpush3.bf16.msra.mxu1 %v6675_v61  ;;  %v8029_v61 = vld [vmem:[%s12992_s5 + $0x18] sm:$0xff]  }
 0x69a   : > { %7884 = vmatprep.subr.bf16.mxu1 %v6674_v34  ;;  %7918 = vmatprep.subr.bf16.mxu0 %v8029_v61 }
 0x69b   : > { %7919 = vmatpush3.bf16.msra.mxu0 %v8029_v61 }
 0x69c   : > { %7920 = vmatprep.subr.bf16.mxu0 %v8030_v13 }
 0x69d   : > { %7885 = vmatpush3.bf16.msra.mxu1 %v6674_v34 }
 0x69f   : > { %7921 = vmatpush3.bf16.msra.mxu0 %v8030_v13 }
 0x6a0   : > { %7887 = vmatmul.mubr.msk.bf16.vlgmr.msra.gmra.mxu1 %vm6527_vm6, %v6496_v62  ;;  %7922 = vmatprep.subr.bf16.mxu0 %v8031_v58 }
 0x6a1   : > { %7890 = vmatprep.mubr.msk.bf16.mxu1 %vm6527_vm6, %v6497_v24 }
 0x6a3   : > { %7923 = vmatpush3.bf16.msra.mxu0 %v8031_v58 }
 0x6a4   : > { %7924 = vmatprep.subr.bf16.mxu0 %v8032_v46 }
 0x6a7   : > { %7925 = vmatpush3.bf16.msra.mxu0 %v8032_v46 }
 0x6a8   : > { %7891 = vmatmul.mubr.msk.bf16.gmra.mxu1 %vm6527_vm6, %v6498_v5 }
 0x6a9   : > { %7894 = vmatprep.mubr.msk.bf16.mxu1 %vm6527_vm6, %v6499_v26 }
 0x6b0   : > { %7895 = vmatmul.mubr.msk.bf16.gmra.mxu1 %vm6527_vm6, %v6500_v57 }
 0x6b1   : > { %7898 = vmatprep.mubr.msk.bf16.mxu1 %vm6527_vm6, %v6501_v23 }
 0x6b8   : > { %7899 = vmatmul.mubr.msk.bf16.gmra.mxu1 %vm6527_vm6, %v6502_v42 }
 0x6b9   : > { %7902 = vmatprep.mubr.msk.bf16.mxu1 %vm6527_vm6, %v6503_v54 }
 0x6c0   : > { %7903 = vmatmul.mubr.msk.bf16.gmra.mxu1 %vm6527_vm6, %v6504_v33 }
 0x6c1   : > { %7906 = vmatprep.mubr.msk.bf16.mxu1 %vm6527_vm6, %v6505_v12 }
 0x6c8   : > { %7907 = vmatmul.mubr.msk.bf16.gmra.mxu1 %vm6527_vm6, %v6506_v11 }
 0x6c9   : > { %7910 = vmatprep.mubr.msk.bf16.mxu1 %vm6527_vm6, %v6507_v16 }
 0x6d0   : > { %7911 = vmatmul.mubr.msk.bf16.gmra.mxu1 %vm6527_vm6, %v6508_v0 }
 0x6d1   : > { %7914 = vmatprep.mubr.msk.bf16.mxu1 %vm6527_vm6, %v6509_v35 }
 0x6d8   : > { %7915 = vmatmul.mubr.msk.bf16.gmra.mxu1 %vm6527_vm6, %v6510_v40 }
 0x760   : > { %v12640_v7 = vpop.f32.mrf.mxu1 }
 0x761   : > { %v6889_v52 = vadd.f32 1e-05, %v12640_v7 }
 0x762   : > { %v12642_v21 = vpop.f32.mrf.mxu1 }
 0x763   : > { %v6887_v34 = vadd.f32 1e-05, %v12642_v21 }
 0x764   : > { %v12646_v56 = vpop.f32.mrf.mxu1 }
 0x765   : > { %8033 = vrcp.f32 %v6887_v34  ;;  %v6890_v36 = vadd.f32 1e-05, %v12646_v56 }
 0x766   : > { %v12648_v3 = vpop.f32.mrf.mxu1  ;;  %8035 = vrcp.f32 %v6889_v52 }
 0x767   : > { %v6888_v39 = vadd.f32 1e-05, %v12648_v3 }
 0x768   : > { %v12655_v62 = vpop.f32.mrf.mxu1 }
 0x769   : > { %8037 = vrcp.f32 %v6888_v39  ;;  %v6893_v4 = vadd.f32 1e-05, %v12655_v62 }
 0x76a   : > { %v12657_v24 = vpop.f32.mrf.mxu1  ;;  %8039 = vrcp.f32 %v6890_v36 }
 0x76b   : > { %v6891_v50 = vadd.f32 1e-05, %v12657_v24 }
 0x76c   : > { %v12661_v59 = vpop.f32.mrf.mxu1 }
 0x76d   : > { %8041 = vrcp.f32 %v6891_v50  ;;  %v6894_v5 = vadd.f32 1e-05, %v12661_v59 }
 0x76e   : > { %v12666_v30 = vpop.f32.mrf.mxu1  ;;  %8043 = vrcp.f32 %v6893_v4 }
 0x76f   : > { %v6892_v45 = vadd.f32 1e-05, %v12666_v30 }
 0x770   : > { %v12670_v26 = vpop.f32.mrf.mxu1 }
 0x771   : > { %8045 = vrcp.f32 %v6892_v45  ;;  %v6897_v44 = vadd.f32 1e-05, %v12670_v26 }
 0x772   : > { %v8034_v17 = vpop.eup %8033  ;;  %v12675_v18 = vpop.f32.mrf.mxu1  ;;  %8047 = vrcp.f32 %v6894_v5 }
 0x773   : > { %v6895_v31 = vadd.f32 1e-05, %v12675_v18  ;;  %6983 = vrot.lane.b32.xlu0 %v8034_v17, %s8278_s23  ;;  %v8036_v57 = vpop.eup %8035 }
 0x774   : > { %v12680_v51 = vpop.f32.mrf.mxu1 }
 0x775   : > { %8049 = vrcp.f32 %v6895_v31  ;;  %v6898_v19 = vadd.f32 1e-05, %v12680_v51 }
 0x776   : > { %v8038_v23 = vpop.eup %8037  ;;  %v12682_v27 = vpop.f32.mrf.mxu1  ;;  %8051 = vrcp.f32 %v6897_v44 }
 0x777   : > { %v6896_v49 = vadd.f32 1e-05, %v12682_v27  ;;  %6987 = vrot.lane.b32.xlu0 %v8036_v57, %s8278_s23  ;;  %6985 = vrot.lane.b32.xlu1 %v8038_v23, %s8278_s23  ;;  %v8040_v63 = vpop.eup %8039 }
 0x778   : > { %v12688_v8 = vpop.f32.mrf.mxu1 }
 0x779   : > { %8053 = vrcp.f32 %v6896_v49  ;;  %v6901_v60 = vadd.f32 1e-05, %v12688_v8 }
 0x77a   : > { %v8042_v9 = vpop.eup %8041  ;;  %v12690_v42 = vpop.f32.mrf.mxu1  ;;  %8055 = vrcp.f32 %v6898_v19 }
 0x77b   : > { %v6899_v54 = vadd.f32 1e-05, %v12690_v42  ;;  %6989 = vrot.lane.b32.xlu1 %v8040_v63, %s8278_s23  ;;  %6991 = vrot.lane.b32.xlu0 %v8042_v9, %s8278_s23  ;;  %v8044_v29 = vpop.eup %8043 }
 0x77c   : > { %v12696_v28 = vpop.f32.mrf.mxu1 }
 0x77d   : > { %8057 = vrcp.f32 %v6899_v54  ;;  %v6902_v33 = vadd.f32 1e-05, %v12696_v28 }
 0x77e   : > { %v8046_v53 = vpop.eup %8045  ;;  %v12698_v2 = vpop.f32.mrf.mxu1  ;;  %8059 = vrcp.f32 %v6901_v60 }
 0x77f   : > { %v6900_v20 = vadd.f32 1e-05, %v12698_v2  ;;  %6995 = vrot.lane.b32.xlu0 %v8044_v29, %s8278_s23  ;;  %6993 = vrot.lane.b32.xlu1 %v8046_v53, %s8278_s23  ;;  %v8048_v14 = vpop.eup %8047 }
 0x780   : > { %v12704_v12 = vpop.f32.mrf.mxu1 }
 0x781   : > { %8061 = vrcp.f32 %v6900_v20  ;;  %v6905_v38 = vadd.f32 1e-05, %v12704_v12 }
 0x782   : > { %v8050_v6 = vpop.eup %8049  ;;  %v12706_v43 = vpop.f32.mrf.mxu1  ;;  %8063 = vrcp.f32 %v6902_v33 }
 0x783   : > { %v6903_v15 = vadd.f32 1e-05, %v12706_v43  ;;  %6997 = vrot.lane.b32.xlu1 %v8048_v14, %s8278_s23  ;;  %6999 = vrot.lane.b32.xlu0 %v8050_v6, %s8278_s23  ;;  %v8052_v11 = vpop.eup %8051 }
 0x784   : > { %v12712_v10 = vpop.f32.mrf.mxu1 }
 0x785   : > { %8065 = vrcp.f32 %v6903_v15  ;;  %v6906_v25 = vadd.f32 1e-05, %v12712_v10 }
 0x786   : > { %v8054_v16 = vpop.eup %8053  ;;  %v12714_v1 = vpop.f32.mrf.mxu1  ;;  %8067 = vrcp.f32 %v6905_v38 }
 0x787   : > { %v6904_v32 = vadd.f32 1e-05, %v12714_v1  ;;  %7003 = vrot.lane.b32.xlu0 %v8052_v11, %s8278_s23  ;;  %7001 = vrot.lane.b32.xlu1 %v8054_v16, %s8278_s23  ;;  %v8056_v48 = vpop.eup %8055 }
 0x788   : > { %v12720_v22 = vpop.f32.mrf.mxu1 }
 0x789   : > { %8069 = vrcp.f32 %v6904_v32  ;;  %v6909_v47 = vadd.f32 1e-05, %v12720_v22 }
 0x78a   : > { %v8058_v41 = vpop.eup %8057  ;;  %v12722_v0 = vpop.f32.mrf.mxu1  ;;  %8071 = vrcp.f32 %v6906_v25 }
 0x78b   : > { %v6907_v35 = vadd.f32 1e-05, %v12722_v0  ;;  %7005 = vrot.lane.b32.xlu1 %v8056_v48, %s8278_s23  ;;  %7007 = vrot.lane.b32.xlu0 %v8058_v41, %s8278_s23  ;;  %v8060_v37 = vpop.eup %8059 }
 0x78c   : > { %v12728_v55 = vpop.f32.mrf.mxu1 }
 0x78d   : > { %8073 = vrcp.f32 %v6907_v35  ;;  %v6910_v52 = vadd.f32 1e-05, %v12728_v55 }
 0x78e   : > { %v8062_v40 = vpop.eup %8061  ;;  %v12730_v61 = vpop.f32.mrf.mxu1  ;;  %8075 = vrcp.f32 %v6909_v47 }
 0x78f   : > { %v6908_v34 = vadd.f32 1e-05, %v12730_v61  ;;  %7011 = vrot.lane.b32.xlu0 %v8060_v37, %s8278_s23  ;;  %7009 = vrot.lane.b32.xlu1 %v8062_v40, %s8278_s23  ;;  %v8064_v39 = vpop.eup %8063 }
 0x790   : > { %v12736_v13 = vpop.f32.mrf.mxu1 }
 0x791   : > { %8077 = vrcp.f32 %v6908_v34  ;;  %v6913_v58 = vadd.f32 1e-05, %v12736_v13 }
 0x792   : > { %v8066_v36 = vpop.eup %8065  ;;  %v12738_v50 = vpop.f32.mrf.mxu1  ;;  %8079 = vrcp.f32 %v6910_v52 }
 0x793   : > { %v6911_v4 = vadd.f32 1e-05, %v12738_v50  ;;  %7013 = vrot.lane.b32.xlu1 %v8064_v39, %s8278_s23  ;;  %7015 = vrot.lane.b32.xlu0 %v8066_v36, %s8278_s23  ;;  %v8068_v5 = vpop.eup %8067 }
 0x794   : > { %v12744_v45 = vpop.f32.mrf.mxu1 }
 0x795   : > { %8081 = vrcp.f32 %v6911_v4  ;;  %v6914_v44 = vadd.f32 1e-05, %v12744_v45 }
 0x796   : > { %v8070_v46 = vpop.eup %8069  ;;  %v12746_v17 = vpop.f32.mrf.mxu1  ;;  %8083 = vrcp.f32 %v6913_v58 }
 0x797   : > { %v6912_v31 = vadd.f32 1e-05, %v12746_v17  ;;  %7019 = vrot.lane.b32.xlu0 %v8068_v5, %s8278_s23  ;;  %7017 = vrot.lane.b32.xlu1 %v8070_v46, %s8278_s23  ;;  %v8072_v23 = vpop.eup %8071 }
 0x798   : > { %v12752_v57 = vpop.f32.mrf.mxu1 }
 0x799   : > { %8085 = vrcp.f32 %v6912_v31  ;;  %v6917_v9 = vadd.f32 1e-05, %v12752_v57 }
 0x79a   : > { %v8074_v49 = vpop.eup %8073  ;;  %v12754_v19 = vpop.f32.mrf.mxu1  ;;  %8087 = vrcp.f32 %v6914_v44 }
 0x79b   : > { %v6915_v63 = vadd.f32 1e-05, %v12754_v19  ;;  %7021 = vrot.lane.b32.xlu1 %v8072_v23, %s8278_s23  ;;  %7023 = vrot.lane.b32.xlu0 %v8074_v49, %s8278_s23  ;;  %v8076_v60 = vpop.eup %8075 }
 0x79c   : > { %v12760_v54 = vpop.f32.mrf.mxu1 }
 0x79d   : > { %8089 = vrcp.f32 %v6915_v63  ;;  %v6918_v14 = vadd.f32 1e-05, %v12760_v54 }
 0x79e   : > { %v8078_v29 = vpop.eup %8077  ;;  %v12762_v53 = vpop.f32.mrf.mxu1  ;;  %8091 = vrcp.f32 %v6917_v9 }
 0x79f   : > { %v6916_v20 = vadd.f32 1e-05, %v12762_v53  ;;  %7027 = vrot.lane.b32.xlu0 %v8076_v60, %s8278_s23  ;;  %7025 = vrot.lane.b32.xlu1 %v8078_v29, %s8278_s23  ;;  %v8080_v33 = vpop.eup %8079 }
 0x7a1   : > { %8093 = vrcp.f32 %v6916_v20 }
 0x7a2   : > { %v8082_v6 = vpop.eup %8081  ;;  %8095 = vrcp.f32 %v6918_v14 }
 0x7a3   : > { %7029 = vrot.lane.b32.xlu1 %v8080_v33, %s8278_s23  ;;  %7031 = vrot.lane.b32.xlu0 %v8082_v6, %s8278_s23  ;;  %v8084_v15 = vpop.eup %8083 }
 0x7a6   : > { %v8086_v38 = vpop.eup %8085 }
 0x7a7   : > { %7035 = vrot.lane.b32.xlu0 %v8084_v15, %s8278_s23  ;;  %7033 = vrot.lane.b32.xlu1 %v8086_v38, %s8278_s23  ;;  %v8088_v11 = vpop.eup %8087 }
 0x7aa   : > { %v8090_v16 = vpop.eup %8089 }
 0x7ab   : > { %7037 = vrot.lane.b32.xlu1 %v8088_v11, %s8278_s23  ;;  %7039 = vrot.lane.b32.xlu0 %v8090_v16, %s8278_s23  ;;  %v8092_v32 = vpop.eup %8091 }
 0x7ae   : > { %v8094_v25 = vpop.eup %8093 }
 0x7af   : > { %7043 = vrot.lane.b32.xlu0 %v8092_v32, %s8278_s23  ;;  %7041 = vrot.lane.b32.xlu1 %v8094_v25, %s8278_s23  ;;  %v8096_v48 = vpop.eup %8095 }
 0x7b3   : > { %7045 = vrot.lane.b32.xlu1 %v8096_v48, %s8278_s23  ;;  %s297_s23 = sand.u32 1, %s8267_s28  }
 0x7b4   : > { %s7558_s13 = sshll.u32 %s297_s23, 8  ;;  %s12947_s9 = scalar_lea.sflag [#allocation3], %s297_s23 }
 0x7b5   : > { %s12841_s19 = scalar_lea.vmem [#allocation2], %s7558_s13  ;;  %s8221_s13 = scalar_lea.vmem %s8220_s12, 8192 }
 0x7b6   : > { %s7492_s21 = sshll.u32 %s12841_s19, 4  ;;  %s12940_s21 = int_to_ptr.vmem [resolvable:$true] %s7492_s21 }
 0x7b7   : > { %s8215_s10 = scalar_lea.vmem %s12940_s21, 4096  ;;  %p8222_p0 = scmp.lt.s32.totalorder %s12940_s21, %s8220_s12 }
 0x7b8   : > { %p8216_p11 = scmp.ne.s32.totalorder %s12940_s21, %s8215_s10  ;;  %p8223_p1 = scmp.lt.s32.totalorder %s8221_s13, %s8215_s10 }
 0x7ba   : > { %p8217_p12 = pnand %p8216_p11, %p8367_p5  ;;  %p8224_p2 = por %p8223_p1, %p8222_p0 }
 0x7bc   : > { %p8218_p13 = pneg %p8217_p12 }
 0x7be   : > { %p8225_p3 = pnand %p8224_p2, %p8218_p13 }
 0x7e5   : > { %v6984_v41 = vpop.permute.xlu0 %6983 }
 0x7e6   : > { %v7079_v37 = vmul.f32 %v6984_v41, %v12642_v21 }
 0x7e9   : > { %v6986_v35 = vpop.permute.xlu1 %6985  ;;  %v6988_v47 = vpop.permute.xlu0 %6987 }
 0x7ea   : > { %v7080_v40 = vmul.f32 %v6986_v35, %v12648_v3  ;;  %v7081_v36 = vmul.f32 %v12640_v7, %v6988_v47 }
 0x7ec   : > { %v7111_v34 = vpack.c.bf16 %v7080_v40, %v7079_v37 }
 0x7ed   : > { %v6990_v52 = vpop.permute.xlu1 %6989  ;;  %v6992_v39 = vpop.permute.xlu0 %6991 }
 0x7ee   : > { %v7082_v4 = vmul.f32 %v12646_v56, %v6990_v52  ;;  %7926 = vmatprep.mubr.msk.bf16.mxu0 %vm6527_vm6, %v7111_v34  ;;  %v7083_v31 = vmul.f32 %v6992_v39, %v12657_v24 }
 0x7f0   : > { %v7112_v58 = vpack.c.bf16 %v7082_v4, %v7081_v36 }
 0x7f1   : > { %v6994_v5 = vpop.permute.xlu1 %6993  ;;  %v6996_v46 = vpop.permute.xlu0 %6995 }
 0x7f2   : > { %v7084_v44 = vmul.f32 %v6994_v5, %v12666_v30  ;;  %7927 = vmatmul.mubr.msk.bf16.vlgmr.msra.gmra.mxu0 %vm6527_vm6, %v7112_v58  ;;  %v7085_v49 = vmul.f32 %v12655_v62, %v6996_v46 }
 0x7f4   : > { %v7113_v21 = vpack.c.bf16 %v7084_v44, %v7083_v31 }
 0x7f5   : > { %v6998_v3 = vpop.permute.xlu1 %6997  ;;  %v7000_v23 = vpop.permute.xlu0 %6999 }
 0x7f6   : > { %v7086_v7 = vmul.f32 %v12661_v59, %v6998_v3  ;;  %7930 = vmatprep.mubr.msk.bf16.mxu0 %vm6527_vm6, %v7113_v21  ;;  %v7087_v60 = vmul.f32 %v7000_v23, %v12675_v18 }
 0x7f8   : > { %v7114_v56 = vpack.c.bf16 %v7086_v7, %v7085_v49 }
 0x7f9   : > { %v7002_v63 = vpop.permute.xlu1 %7001  ;;  %v7004_v9 = vpop.permute.xlu0 %7003 }
 0x7fa   : > { %v7088_v24 = vmul.f32 %v7002_v63, %v12682_v27  ;;  %7931 = vmatmul.mubr.msk.bf16.gmra.mxu0 %vm6527_vm6, %v7114_v56  ;;  %v7089_v33 = vmul.f32 %v12670_v26, %v7004_v9 }
 0x7fc   : > { %v7115_v30 = vpack.c.bf16 %v7088_v24, %v7087_v60 }
 0x7fd   : > { %v7006_v29 = vpop.permute.xlu1 %7005  ;;  %v7008_v20 = vpop.permute.xlu0 %7007 }
 0x7fe   : > { %v7090_v62 = vmul.f32 %v12680_v51, %v7006_v29  ;;  %7934 = vmatprep.mubr.msk.bf16.mxu0 %vm6527_vm6, %v7115_v30  ;;  %v7091_v15 = vmul.f32 %v7008_v20, %v12690_v42 }
 0x800   : > { %v7116_v59 = vpack.c.bf16 %v7090_v62, %v7089_v33 }
 0x801   : > { %v7010_v14 = vpop.permute.xlu1 %7009  ;;  %v7012_v6 = vpop.permute.xlu0 %7011 }
 0x802   : > { %v7092_v18 = vmul.f32 %v7010_v14, %v12698_v2  ;;  %7935 = vmatmul.mubr.msk.bf16.gmra.mxu0 %vm6527_vm6, %v7116_v59  ;;  %v7093_v16 = vmul.f32 %v12688_v8, %v7012_v6 }
 0x804   : > { %v7117_v27 = vpack.c.bf16 %v7092_v18, %v7091_v15 }
 0x805   : > { %v7014_v38 = vpop.permute.xlu1 %7013  ;;  %v7016_v11 = vpop.permute.xlu0 %7015 }
 0x806   : > { %v7094_v26 = vmul.f32 %v12696_v28, %v7014_v38  ;;  %7938 = vmatprep.mubr.msk.bf16.mxu0 %vm6527_vm6, %v7117_v27  ;;  %v7095_v48 = vmul.f32 %v7016_v11, %v12706_v43 }
 0x808   : > { %v7118_v51 = vpack.c.bf16 %v7094_v26, %v7093_v16 }
 0x809   : > { %v7018_v32 = vpop.permute.xlu1 %7017  ;;  %v7020_v25 = vpop.permute.xlu0 %7019 }
 0x80a   : > { %v7096_v42 = vmul.f32 %v7018_v32, %v12714_v1  ;;  %7939 = vmatmul.mubr.msk.bf16.gmra.mxu0 %vm6527_vm6, %v7118_v51  ;;  %v7097_v47 = vmul.f32 %v12704_v12, %v7020_v25 }
 0x80c   : > { %v7119_v2 = vpack.c.bf16 %v7096_v42, %v7095_v48 }
 0x80d   : > { %v7022_v41 = vpop.permute.xlu1 %7021  ;;  %v7024_v35 = vpop.permute.xlu0 %7023 }
 0x80e   : > { %v7098_v8 = vmul.f32 %v12712_v10, %v7022_v41  ;;  %7942 = vmatprep.mubr.msk.bf16.mxu0 %vm6527_vm6, %v7119_v2  ;;  %v7099_v34 = vmul.f32 %v7024_v35, %v12722_v0 }
 0x810   : > { %v7120_v28 = vpack.c.bf16 %v7098_v8, %v7097_v47 }
 0x811   : > { %v7026_v37 = vpop.permute.xlu1 %7025  ;;  %v7028_v40 = vpop.permute.xlu0 %7027 }
 0x812   : > { %v7100_v43 = vmul.f32 %v7026_v37, %v12730_v61  ;;  %7943 = vmatmul.mubr.msk.bf16.gmra.mxu0 %vm6527_vm6, %v7120_v28  ;;  %v7101_v36 = vmul.f32 %v12720_v22, %v7028_v40 }
 0x814   : > { %v7121_v1 = vpack.c.bf16 %v7100_v43, %v7099_v34 }
 0x815   : > { %v7030_v52 = vpop.permute.xlu1 %7029  ;;  %v7032_v39 = vpop.permute.xlu0 %7031 }
 0x816   : > { %v7102_v12 = vmul.f32 %v12728_v55, %v7030_v52  ;;  %7946 = vmatprep.mubr.msk.bf16.mxu0 %vm6527_vm6, %v7121_v1  ;;  %v7103_v5 = vmul.f32 %v7032_v39, %v12738_v50 }
 0x818   : > { %v7122_v10 = vpack.c.bf16 %v7102_v12, %v7101_v36 }
 0x819   : > { %v7034_v4 = vpop.permute.xlu1 %7033  ;;  %v7036_v58 = vpop.permute.xlu0 %7035 }
 0x81a   : > { %v7104_v0 = vmul.f32 %v7034_v4, %v12746_v17  ;;  %7947 = vmatmul.mubr.msk.bf16.gmra.mxu0 %vm6527_vm6, %v7122_v10  ;;  %v7105_v44 = vmul.f32 %v12736_v13, %v7036_v58 }
 0x81c   : > { %v7123_v61 = vpack.c.bf16 %v7104_v0, %v7103_v5 }
 0x81d   : > { %v7038_v46 = vpop.permute.xlu1 %7037  ;;  %v7040_v31 = vpop.permute.xlu0 %7039 }
 0x81e   : > { %v7106_v22 = vmul.f32 %v12744_v45, %v7038_v46  ;;  %7950 = vmatprep.mubr.msk.bf16.mxu0 %vm6527_vm6, %v7123_v61  ;;  %v7107_v3 = vmul.f32 %v7040_v31, %v12754_v19  ;;  %v12829_v19 = vld [vmem:[%s12993_s6] ss:$0 sm:$0xff] }
 0x820   : > { %v7124_v55 = vpack.c.bf16 %v7106_v22, %v7105_v44 }
 0x821   : > { %v7042_v21 = vpop.permute.xlu1 %7041  ;;  %v7044_v17 = vpop.permute.xlu0 %7043 }
 0x822   : > { %v7108_v50 = vmul.f32 %v7042_v21, %v12762_v53  ;;  %7951 = vmatmul.mubr.msk.bf16.gmra.mxu0 %vm6527_vm6, %v7124_v55  ;;  %v7109_v7 = vmul.f32 %v12752_v57, %v7044_v17  ;;  %v12836_v57 = vld [vmem:[%s12994_s7] ss:$0 sm:$0xff] }
 0x824   : > { %v7125_v23 = vpack.c.bf16 %v7108_v50, %v7107_v3 }
 0x825   : > { %v7046_v49 = vpop.permute.xlu1 %7045 }
 0x826   : > { %v7110_v13 = vmul.f32 %v12760_v54, %v7046_v49  ;;  %7954 = vmatprep.mubr.msk.bf16.mxu0 %vm6527_vm6, %v7125_v23 }
 0x828   : > { %v7126_v45 = vpack.c.bf16 %v7110_v13, %v7109_v7 }
 0x82a   : > { %7955 = vmatmul.mubr.msk.bf16.gmra.mxu0 %vm6527_vm6, %v7126_v45 }
 0x8b2   : > { %v7928_v53 = vpop.f32.mrf.mxu0 }
 0x8b3   : > { %v7377_v54 = vmul.f32 %v7928_v53, %v12829_v19 }
 0x8b4   : > { %v7241_v56 = vpop.f32.mrf.mxu0 }
 0x8b5   : > { %v7416_v63 = vadd.f32 %v12836_v57, %v7377_v54  ;;  %v7375_v9 = vmul.f32 %v12829_v19, %v7241_v56 }
 0x8b6   : > { %v7929_v60 = vpop.f32.mrf.mxu0 }
 0x8b7   : > { %7448 = vst [vmem:[%s12841_s19 + $0x10] sm:$0xff] %v7416_v63  ;;  %v7414_v24 = vadd.f32 %v12836_v57, %v7375_v9  ;;  %v7378_v30 = vmul.f32 %v7929_v60, %v12829_v19 }
 0x8b8   : > { %v7244_v29 = vpop.f32.mrf.mxu0 }
 0x8b9   : > { %7446 = vst [vmem:[%s12841_s19] sm:$0xff] %v7414_v24  ;;  %v7417_v20 = vadd.f32 %v12836_v57, %v7378_v30  ;;  %v7376_v33 = vmul.f32 %v12829_v19, %v7244_v29 }
 0x8ba   : > { %v7932_v62 = vpop.f32.mrf.mxu0 }
 0x8bb   : > { %7449 = vst [vmem:[%s12841_s19 + $0x18] sm:$0xff] %v7417_v20  ;;  %v7415_v59 = vadd.f32 %v12836_v57, %v7376_v33  ;;  %v7381_v14 = vmul.f32 %v7932_v62, %v12829_v19 }
 0x8bc   : > { %v7257_v6 = vpop.f32.mrf.mxu0 }
 0x8bd   : > { %7447 = vst [vmem:[%s12841_s19 + $0x8] sm:$0xff] %v7415_v59  ;;  %v7420_v15 = vadd.f32 %v12836_v57, %v7381_v14  ;;  %v7379_v18 = vmul.f32 %v12829_v19, %v7257_v6 }
 0x8be   : > { %v7933_v27 = vpop.f32.mrf.mxu0 }
 0x8bf   : > { %7452 = vst [vmem:[%s12841_s19 + $0x30] sm:$0xff] %v7420_v15  ;;  %v7418_v38 = vadd.f32 %v12836_v57, %v7379_v18  ;;  %v7382_v11 = vmul.f32 %v7933_v27, %v12829_v19 }
 0x8c0   : > { %v7260_v16 = vpop.f32.mrf.mxu0 }
 0x8c1   : > { %7450 = vst [vmem:[%s12841_s19 + $0x20] sm:$0xff] %v7418_v38  ;;  %v7421_v26 = vadd.f32 %v12836_v57, %v7382_v11  ;;  %v7380_v51 = vmul.f32 %v12829_v19, %v7260_v16 }
 0x8c2   : > { %v7936_v32 = vpop.f32.mrf.mxu0 }
 0x8c3   : > { %7453 = vst [vmem:[%s12841_s19 + $0x38] sm:$0xff] %v7421_v26  ;;  %v7419_v25 = vadd.f32 %v12836_v57, %v7380_v51  ;;  %v7385_v48 = vmul.f32 %v7936_v32, %v12829_v19 }
 0x8c4   : > { %v7273_v42 = vpop.f32.mrf.mxu0 }
 0x8c5   : > { %7451 = vst [vmem:[%s12841_s19 + $0x28] sm:$0xff] %v7419_v25  ;;  %v7424_v2 = vadd.f32 %v12836_v57, %v7385_v48  ;;  %v7383_v41 = vmul.f32 %v12829_v19, %v7273_v42 }
 0x8c6   : > { %v7937_v35 = vpop.f32.mrf.mxu0 }
 0x8c7   : > { %7456 = vst [vmem:[%s12841_s19 + $0x50] sm:$0xff] %v7424_v2  ;;  %v7422_v47 = vadd.f32 %v12836_v57, %v7383_v41  ;;  %v7386_v8 = vmul.f32 %v7937_v35, %v12829_v19 }
 0x8c8   : > { %v7276_v28 = vpop.f32.mrf.mxu0 }
 0x8c9   : > { %7454 = vst [vmem:[%s12841_s19 + $0x40] sm:$0xff] %v7422_v47  ;;  %v7425_v37 = vadd.f32 %v12836_v57, %v7386_v8  ;;  %v7384_v40 = vmul.f32 %v12829_v19, %v7276_v28 }
 0x8ca   : > { %v7940_v34 = vpop.f32.mrf.mxu0 }
 0x8cb   : > { %7457 = vst [vmem:[%s12841_s19 + $0x58] sm:$0xff] %v7425_v37  ;;  %v7423_v43 = vadd.f32 %v12836_v57, %v7384_v40  ;;  %v7389_v1 = vmul.f32 %v7940_v34, %v12829_v19 }
 0x8cc   : > { %v7289_v52 = vpop.f32.mrf.mxu0 }
 0x8cd   : > { %7455 = vst [vmem:[%s12841_s19 + $0x48] sm:$0xff] %v7423_v43  ;;  %v7428_v39 = vadd.f32 %v12836_v57, %v7389_v1  ;;  %v7387_v36 = vmul.f32 %v12829_v19, %v7289_v52 }
 0x8ce   : > { %v7941_v12 = vpop.f32.mrf.mxu0 }
 0x8cf   : > { %7460 = vst [vmem:[%s12841_s19 + $0x70] sm:$0xff] %v7428_v39  ;;  %v7426_v10 = vadd.f32 %v12836_v57, %v7387_v36  ;;  %v7390_v4 = vmul.f32 %v7941_v12, %v12829_v19 }
 0x8d0   : > { %v7292_v58 = vpop.f32.mrf.mxu0 }
 0x8d1   : > { %7458 = vst [vmem:[%s12841_s19 + $0x60] sm:$0xff] %v7426_v10  ;;  %v7429_v5 = vadd.f32 %v12836_v57, %v7390_v4  ;;  %v7388_v0 = vmul.f32 %v12829_v19, %v7292_v58 }
 0x8d2   : > { %v7944_v61 = vpop.f32.mrf.mxu0 }
 0x8d3   : > { %7461 = vst [vmem:[%s12841_s19 + $0x78] sm:$0xff] %v7429_v5  ;;  %v7427_v46 = vadd.f32 %v12836_v57, %v7388_v0  ;;  %v7393_v31 = vmul.f32 %v7944_v61, %v12829_v19 }
 0x8d4   : > { %v7305_v44 = vpop.f32.mrf.mxu0 }
 0x8d5   : > { %7459 = vst [vmem:[%s12841_s19 + $0x68] sm:$0xff] %v7427_v46  ;;  %v7432_v22 = vadd.f32 %v12836_v57, %v7393_v31  ;;  %v7391_v55 = vmul.f32 %v12829_v19, %v7305_v44 }
 0x8d6   : > { %v7945_v21 = vpop.f32.mrf.mxu0 }
 0x8d7   : > { %7464 = vst [vmem:[%s12841_s19 + $0x90] sm:$0xff] %v7432_v22  ;;  %v7430_v3 = vadd.f32 %v12836_v57, %v7391_v55  ;;  %v7394_v50 = vmul.f32 %v7945_v21, %v12829_v19 }
 0x8d8   : > { %v7308_v17 = vpop.f32.mrf.mxu0 }
 0x8d9   : > { %7462 = vst [vmem:[%s12841_s19 + $0x80] sm:$0xff] %v7430_v3  ;;  %v7433_v23 = vadd.f32 %v12836_v57, %v7394_v50  ;;  %v7392_v49 = vmul.f32 %v12829_v19, %v7308_v17 }
 0x8da   : > { %v7948_v7 = vpop.f32.mrf.mxu0 }
 0x8db   : > { %7465 = vst [vmem:[%s12841_s19 + $0x98] sm:$0xff] %v7433_v23  ;;  %v7431_v13 = vadd.f32 %v12836_v57, %v7392_v49  ;;  %v7397_v45 = vmul.f32 %v7948_v7, %v12829_v19 }
 0x8dc   : > { %v7321_v53 = vpop.f32.mrf.mxu0 }
 0x8dd   : > { %7463 = vst [vmem:[%s12841_s19 + $0x88] sm:$0xff] %v7431_v13  ;;  %v7436_v54 = vadd.f32 %v12836_v57, %v7397_v45  ;;  %v7395_v56 = vmul.f32 %v12829_v19, %v7321_v53 }
 0x8de   : > { %v7949_v63 = vpop.f32.mrf.mxu0 }
 0x8df   : > { %7468 = vst [vmem:[%s12841_s19 + $0xb0] sm:$0xff] %v7436_v54  ;;  %v7434_v9 = vadd.f32 %v12836_v57, %v7395_v56  ;;  %v7398_v60 = vmul.f32 %v7949_v63, %v12829_v19 }
 0x8e0   : > { %v7324_v24 = vpop.f32.mrf.mxu0 }
 0x8e1   : > { %7466 = vst [vmem:[%s12841_s19 + $0xa0] sm:$0xff] %v7434_v9  ;;  %v7437_v30 = vadd.f32 %v12836_v57, %v7398_v60  ;;  %v7396_v29 = vmul.f32 %v12829_v19, %v7324_v24 }
 0x8e2   : > { %v7952_v20 = vpop.f32.mrf.mxu0 }
 0x8e3   : > { %7469 = vst [vmem:[%s12841_s19 + $0xb8] sm:$0xff] %v7437_v30  ;;  %v7435_v33 = vadd.f32 %v12836_v57, %v7396_v29  ;;  %v7401_v62 = vmul.f32 %v7952_v20, %v12829_v19 }
 0x8e4   : > { %v7337_v59 = vpop.f32.mrf.mxu0 }
 0x8e5   : > { %7467 = vst [vmem:[%s12841_s19 + $0xa8] sm:$0xff] %v7435_v33  ;;  %v7440_v14 = vadd.f32 %v12836_v57, %v7401_v62  ;;  %v7399_v6 = vmul.f32 %v12829_v19, %v7337_v59 }
 0x8e6   : > { %v7953_v15 = vpop.f32.mrf.mxu0 }
 0x8e7   : > { %7472 = vst [vmem:[%s12841_s19 + $0xd0] sm:$0xff] %v7440_v14  ;;  %v7438_v18 = vadd.f32 %v12836_v57, %v7399_v6  ;;  %v7402_v27 = vmul.f32 %v7953_v15, %v12829_v19 }
 0x8e8   : > { %v7340_v38 = vpop.f32.mrf.mxu0 }
 0x8e9   : > { %7470 = vst [vmem:[%s12841_s19 + $0xc0] sm:$0xff] %v7438_v18  ;;  %v7441_v11 = vadd.f32 %v12836_v57, %v7402_v27  ;;  %v7400_v16 = vmul.f32 %v12829_v19, %v7340_v38 }
 0x8ea   : > { %v7956_v26 = vpop.f32.mrf.mxu0 }
 0x8eb   : > { %7473 = vst [vmem:[%s12841_s19 + $0xd8] sm:$0xff] %v7441_v11  ;;  %v7439_v51 = vadd.f32 %v12836_v57, %v7400_v16  ;;  %v7405_v32 = vmul.f32 %v7956_v26, %v12829_v19 }
 0x8ec   : > { %v7353_v25 = vpop.f32.mrf.mxu0 }
 0x8ed   : > { %7471 = vst [vmem:[%s12841_s19 + $0xc8] sm:$0xff] %v7439_v51  ;;  %v7444_v48 = vadd.f32 %v12836_v57, %v7405_v32  ;;  %v7403_v42 = vmul.f32 %v12829_v19, %v7353_v25 }
 0x8ee   : > { %v7957_v2 = vpop.f32.mrf.mxu0 }
 0x8ef   : > { %7476 = vst [vmem:[%s12841_s19 + $0xf0] sm:$0xff] %v7444_v48  ;;  %v7442_v41 = vadd.f32 %v12836_v57, %v7403_v42  ;;  %v7406_v35 = vmul.f32 %v7957_v2, %v12829_v19 }
 0x8f0   : > { %v7356_v47 = vpop.f32.mrf.mxu0 }
 0x8f1   : > { %7474 = vst [vmem:[%s12841_s19 + $0xe0] sm:$0xff] %v7442_v41  ;;  %v7445_v8 = vadd.f32 %v12836_v57, %v7406_v35  ;;  %v7404_v28 = vmul.f32 %v12829_v19, %v7356_v47 }
 0x8f3   : > { %7477 = vst [vmem:[%s12841_s19 + $0xf8] sm:$0xff] %v7445_v8  ;;  %v7443_v37 = vadd.f32 %v12836_v57, %v7404_v28 }
 0x8f5   : > { %7475 = vst [vmem:[%s12841_s19 + $0xe8] sm:$0xff] %v7443_v37 }
 0x8f6   : > { %8228 = shalt.err (!%p8225_p3)
}
 0x8f7   : > { %s8229_s23 = scalar_lea.hbm %s12938_s26, 4096  ;;  %s8233_s19 = scalar_lea.hbm %s12995_s8, 8192 }
 0x8f8   : > { %p8230_p4 = scmp.ne.s32.totalorder %s12938_s26, %s8229_s23  ;;  %p8234_p9 = scmp.lt.s32.totalorder %s12938_s26, %s12995_s8 }
 0x8f9   : > { %p8235_p10 = scmp.lt.s32.totalorder %s8233_s19, %s8229_s23 }
 0x8fa   : > { %p8231_p7 = pnand %p8230_p4, %p8367_p5 }
 0x8fb   : > { %p8236_p11 = por %p8235_p10, %p8234_p9 }
 0x8fc   : > { %p8232_p8 = pneg %p8231_p7 }
 0x8fe   : > { %p8237_p12 = pnand %p8236_p11, %p8232_p8 }
 0x900   : > { %8240 = shalt.err (!%p8237_p12)
}
 0x901   : > { %s8282_s25 = smov 128   ;;  %s8283_s10 = smov 8  }
 0x902   : > { %7958 = dma.vmem_to_hbm [thread:$0]  (%p8367_p5), %s12940_s21, 4096, %s12938_s26, %s12947_s9, %s8282_s25, %s8282_s25, %s8283_s10  }
 0x903 PF: > { %p7964_p13 = scmp.ge.s32.totalorder %s8275_s30, 2  ;;  %s7507_s24 = sand.u32 1, %s8263_s27  }
 0x904   : > { %s7508_s12 = scalar_lea.sflag [#allocation3], %s7507_s24 }
 0x905   : > { %p7961_p0 = pnand %p7964_p13, %p8371_p6 }
 0x907   : > { %p7962_p1 = pneg %p7961_p0 }
 0x909   : > { %8258 = dma.done.wait (%p7962_p1), %s7508_s12, 4096  }
 0x90a   : > { %8260 = vsyncadd (%p7962_p1), %s7508_s12, 4294963200  ;;  %p18_p2 = scmp.ge.s32.totalorder %s8354_s11, 4   ;;  %s13175_s27 = smov %s8267_s28 }
 0x90b   : > { %s13176_s28 = smov %s8271_s29  ;;  %s13177_s29 = smov %s8365_s14 }
 0x90c   : > { %s13178_s30 = smov %s8354_s11  ;;  %20 = sbr.rel (!%p18_p2) target bundleno = 3 (0x3), region = 87 }
 0x911   :  { %7513 = vsyncpa [#allocation3], 1 }
 0x912   :  { %7515 = vsyncpa [#allocation3 + $0x1], 1 }

</bundles_post_ra>
